<compile_context>
chip_gen: v7x
topology: tpu7x:2x2x1
jax: 0.10.0
libtpu: 0.0.40
codegen_flags: <defaults>
</compile_context>

<pallas_src>
import numpy as np
import jax
import jax.numpy as jnp
from jax.experimental import pallas as pl
from jax.experimental.pallas import tpu as pltpu

LOG2PI = float(np.log(2.0 * np.pi))
_EXP_M2 = float(np.exp(-2.0))


# ----------------------------------------------------------------------------
# helpers
# ----------------------------------------------------------------------------
def _round_up(x, m):
    return ((x + m - 1) // m) * m


_VMEM_LIMIT_CACHE = [None]


def _vmem_limit():
    # Generation-aware scoped-VMEM limit: ~60% of physical VMEM (96 MiB cap),
    # conservative 32 MiB fallback (safe on v7x's 64 MiB).
    if _VMEM_LIMIT_CACHE[0] is None:
        lim = 32 * 1024 * 1024
        try:
            cap = int(getattr(pltpu.get_tpu_info(), "vmem_capacity_bytes", 0) or 0)
            if cap > 0:
                lim = max(lim, min(int(cap * 0.6), 96 * 1024 * 1024))
        except Exception:
            pass
        _VMEM_LIMIT_CACHE[0] = lim
    return _VMEM_LIMIT_CACHE[0]


def _cparams(semantics):
    return pltpu.CompilerParams(dimension_semantics=semantics,
                                vmem_limit_bytes=_vmem_limit())


def _row_tiling(n, max_tile=512):
    tm = min(max_tile, _round_up(n, 8))
    return tm, _round_up(n, tm)


def _k_tiling(k, max_tile=1024):
    if k <= max_tile:
        return k, k
    return max_tile, _round_up(k, max_tile)


def _col_tiling(m, max_tile=256):
    if m <= max_tile:
        return m, m
    return max_tile, _round_up(m, max_tile)


def _pad2d(x, rpad, cpad):
    r, c = x.shape
    if r == rpad and c == cpad:
        return x
    return jnp.pad(x, ((0, rpad - r), (0, cpad - c)))


# ----------------------------------------------------------------------------
# Tiled matmul (bf16 operands, f32 accumulation directly in the output block)
# ----------------------------------------------------------------------------
def matmul_fused(x2d, w, bias=None, colscale=None):
    """f32 y = (x2d @ w [+ bias]) [* colscale]."""
    n, k = x2d.shape
    _, m = w.shape
    tm, npad = _row_tiling(n)
    tk, kpad = _k_tiling(k)
    tn, mpad = _col_tiling(m)
    nt, kt, mt = npad // tm, kpad // tk, mpad // tn

    has_bias = bias is not None
    has_scale = colscale is not None
    ops = [_pad2d(x2d.astype(jnp.bfloat16), npad, kpad),
           _pad2d(w.astype(jnp.bfloat16), kpad, mpad)]
    in_specs = [pl.BlockSpec((tm, tk), lambda i, j, kk: (i, kk)),
                pl.BlockSpec((tk, tn), lambda i, j, kk: (kk, j))]
    if has_bias:
        ops.append(_pad2d(bias.reshape(1, m).astype(jnp.float32), 1, mpad))
        in_specs.append(pl.BlockSpec((1, tn), lambda i, j, kk: (0, j)))
    if has_scale:
        ops.append(_pad2d(colscale.reshape(1, m).astype(jnp.float32), 1, mpad))
        in_specs.append(pl.BlockSpec((1, tn), lambda i, j, kk: (0, j)))

    def kernel(*refs):
        x_ref, w_ref = refs[0], refs[1]
        pos = 2
        b_ref = s_ref = None
        if has_bias:
            b_ref = refs[pos]; pos += 1
        if has_scale:
            s_ref = refs[pos]; pos += 1
        o_ref = refs[pos]
        kk = pl.program_id(2)

        @pl.when(kk == 0)
        def _():
            o_ref[...] = jnp.zeros_like(o_ref)

        o_ref[...] += jnp.dot(x_ref[...], w_ref[...],
                              preferred_element_type=jnp.float32)

        if has_bias or has_scale:
            @pl.when(kk == pl.num_programs(2) - 1)
            def _():
                y = o_ref[...]
                if has_bias:
                    y = y + b_ref[...]
                if has_scale:
                    y = y * s_ref[...]
                o_ref[...] = y

    y = pl.pallas_call(
        kernel,
        grid=(nt, mt, kt),
        in_specs=in_specs,
        out_specs=pl.BlockSpec((tm, tn), lambda i, j, kk: (i, j)),
        out_shape=jax.ShapeDtypeStruct((npad, mpad), jnp.float32),
        compiler_params=_cparams(("parallel", "parallel", "arbitrary")),
    )(*ops)
    return y[:n, :m] if (npad, mpad) != (n, m) else y


# ----------------------------------------------------------------------------
# Exact two-pass data-dependent ActNorm statistics (streaming over rows)
# ----------------------------------------------------------------------------
def channel_stats(h, scale=1.0):
    """Per-channel ActNorm stats of h (N, C): pass 0 = mean, pass 1 = centered
    second moment.  Returns (bias=(1,C) = -mean, exp(logs)=(1,C), sum(logs))."""
    n, c = h.shape
    tm, npad = _row_tiling(n)
    nt = npad // tm
    hp = _pad2d(h, npad, c)
    inv_n = 1.0 / float(n)
    sc = float(scale)

    def kernel(h_ref, bias_ref, esc_ref, sl_ref, sum_ref, mean_ref, m2_ref):
        p = pl.program_id(0)
        i = pl.program_id(1)
        rows = jax.lax.broadcasted_iota(jnp.int32, (tm, 1), 0) + i * tm
        valid = rows < n

        @pl.when(jnp.logical_and(p == 0, i == 0))
        def _():
            sum_ref[...] = jnp.zeros_like(sum_ref)

        @pl.when(p == 0)
        def _():
            hv = jnp.where(valid, h_ref[...], 0.0)
            sum_ref[...] += jnp.sum(hv, axis=0, keepdims=True)

        @pl.when(jnp.logical_and(p == 1, i == 0))
        def _():
            mean_ref[...] = sum_ref[...] * inv_n
            m2_ref[...] = jnp.zeros_like(m2_ref)

        @pl.when(p == 1)
        def _():
            d = jnp.where(valid, h_ref[...] - mean_ref[...], 0.0)
            m2_ref[...] += jnp.sum(d * d, axis=0, keepdims=True)

        @pl.when(jnp.logical_and(p == 1, i == nt - 1))
        def _():
            var = m2_ref[...] * inv_n
            logs = jnp.log(sc / (jnp.sqrt(var) + 1e-6))
            bias_ref[...] = -mean_ref[...]
            esc_ref[...] = jnp.exp(logs)
            sl_ref[...] = jnp.sum(logs).reshape(1, 1)

    bias, esc, sl = pl.pallas_call(
        kernel,
        grid=(2, nt),
        in_specs=[pl.BlockSpec((tm, c), lambda p, i: (i, 0))],
        out_specs=(pl.BlockSpec((1, c), lambda p, i: (0, 0)),
                   pl.BlockSpec((1, c), lambda p, i: (0, 0)),
                   pl.BlockSpec((1, 1), lambda p, i: (0, 0))),
        out_shape=(jax.ShapeDtypeStruct((1, c), jnp.float32),
                   jax.ShapeDtypeStruct((1, c), jnp.float32),
                   jax.ShapeDtypeStruct((1, 1), jnp.float32)),
        scratch_shapes=[pltpu.VMEM((1, c), jnp.float32),
                        pltpu.VMEM((1, c), jnp.float32),
                        pltpu.VMEM((1, c), jnp.float32)],
        compiler_params=_cparams(("arbitrary", "arbitrary")),
    )(hp)
    return bias, esc, sl[0, 0]


# ----------------------------------------------------------------------------
# ActNorm apply (+ReLU) (+fused 1x1 matmul), row-parallel
# ----------------------------------------------------------------------------
def actnorm_apply(h, bias, esc, *, relu=False, w_post=None,
                  post_dtype=jnp.bfloat16, out_dtype=jnp.float32):
    n, c = h.shape
    tm, npad = _row_tiling(n)
    nt = npad // tm
    has_post = w_post is not None
    cout = int(w_post.shape[1]) if has_post else c

    ops = [_pad2d(h, npad, c), bias.astype(jnp.float32), esc.astype(jnp.float32)]
    in_specs = [pl.BlockSpec((tm, c), lambda i: (i, 0)),
                pl.BlockSpec((1, c), lambda i: (0, 0)),
                pl.BlockSpec((1, c), lambda i: (0, 0))]
    if has_post:
        ops.append(w_post.astype(post_dtype))
        in_specs.append(pl.BlockSpec((c, cout), lambda i: (0, 0)))

    def kernel(*refs):
        h_ref, b_ref, e_ref = refs[0], refs[1], refs[2]
        w_ref = refs[3] if has_post else None
        o_ref = refs[4] if has_post else refs[3]
        y = (h_ref[...] + b_ref[...]) * e_ref[...]
        if relu:
            y = jnp.maximum(y, 0.0)
        if has_post:
            y = jnp.dot(y.astype(post_dtype), w_ref[...],
                        preferred_element_type=jnp.float32)
        o_ref[...] = y.astype(out_dtype)

    y = pl.pallas_call(
        kernel,
        grid=(nt,),
        in_specs=in_specs,
        out_specs=pl.BlockSpec((tm, cout), lambda i: (i, 0)),
        out_shape=jax.ShapeDtypeStruct((npad, cout), out_dtype),
        compiler_params=_cparams(("parallel",)),
    )(*ops)
    return y[:n] if npad != n else y


# ----------------------------------------------------------------------------
# Conv2dZeros matmul with fused 'cross' split + coupling / Gaussian-logp epilogue
# ----------------------------------------------------------------------------
def conv_zeros_split_fused(x2d, w_a, w_b, bias_a, bias_b, cs_a, cs_b, z2, mode):
    """Conv2dZeros as a tiled matmul whose two 'cross'-split output halves are
    consumed in-kernel (the conv output never hits HBM):
      mode='coupling': z2' = (z2 + a) * sigmoid(b + 2);  per-row sum(log sigmoid)
      mode='gaussian': per-row sum of diag-Gaussian logp of z2 (mean=a, logs=b)
    Returns (z2' or None, per_row_logdet)."""
    n, k = x2d.shape
    ch = int(w_a.shape[1])
    tm, npad = _row_tiling(n)
    tk, kpad = _k_tiling(k)
    nt, kt = npad // tm, kpad // tk
    coupling = (mode == 'coupling')

    ops = [_pad2d(x2d.astype(jnp.bfloat16), npad, kpad),
           _pad2d(w_a.astype(jnp.bfloat16), kpad, ch),
           _pad2d(w_b.astype(jnp.bfloat16), kpad, ch),
           bias_a.reshape(1, ch).astype(jnp.float32),
           bias_b.reshape(1, ch).astype(jnp.float32),
           cs_a.reshape(1, ch).astype(jnp.float32),
           cs_b.reshape(1, ch).astype(jnp.float32),
           _pad2d(z2.astype(jnp.float32), npad, ch)]
    in_specs = [pl.BlockSpec((tm, tk), lambda i, kk: (i, kk)),
                pl.BlockSpec((tk, ch), lambda i, kk: (kk, 0)),
                pl.BlockSpec((tk, ch), lambda i, kk: (kk, 0)),
                pl.BlockSpec((1, ch), lambda i, kk: (0, 0)),
                pl.BlockSpec((1, ch), lambda i, kk: (0, 0)),
                pl.BlockSpec((1, ch), lambda i, kk: (0, 0)),
                pl.BlockSpec((1, ch), lambda i, kk: (0, 0)),
                pl.BlockSpec((tm, ch), lambda i, kk: (i, 0))]

    def kernel(x_ref, wa_ref, wb_ref, ba_ref, bb_ref, ca_ref, cb_ref, z2_ref,
               *rest):
        if coupling:
            z2n_ref, ld_ref, acc_a, acc_b = rest
        else:
            ld_ref, acc_a, acc_b = rest
        kk = pl.program_id(1)

        @pl.when(kk == 0)
        def _():
            acc_a[...] = jnp.zeros_like(acc_a)
            acc_b[...] = jnp.zeros_like(acc_b)

        xv = x_ref[...]
        acc_a[...] += jnp.dot(xv, wa_ref[...], preferred_element_type=jnp.float32)
        acc_b[...] += jnp.dot(xv, wb_ref[...], preferred_element_type=jnp.float32)

        @pl.when(kk == pl.num_programs(1) - 1)
        def _():
            a = (acc_a[...] + ba_ref[...]) * ca_ref[...]
            b = (acc_b[...] + bb_ref[...]) * cb_ref[...]
            z2v = z2_ref[...]
            if coupling:
                s = jax.nn.sigmoid(b + 2.0)
                z2n_ref[...] = (z2v + a) * s
                ld_ref[...] = jnp.sum(jnp.log(s), axis=1, keepdims=True)
            else:
                d = z2v - a
                ll = -0.5 * (2.0 * b + d * d * jnp.exp(-2.0 * b) + LOG2PI)
                ld_ref[...] = jnp.sum(ll, axis=1, keepdims=True)

    if coupling:
        out_specs = (pl.BlockSpec((tm, ch), lambda i, kk: (i, 0)),
                     pl.BlockSpec((tm, 1), lambda i, kk: (i, 0)))
        out_shape = (jax.ShapeDtypeStruct((npad, ch), jnp.float32),
                     jax.ShapeDtypeStruct((npad, 1), jnp.float32))
    else:
        out_specs = pl.BlockSpec((tm, 1), lambda i, kk: (i, 0))
        out_shape = jax.ShapeDtypeStruct((npad, 1), jnp.float32)

    res = pl.pallas_call(
        kernel,
        grid=(nt, kt),
        in_specs=in_specs,
        out_specs=out_specs,
        out_shape=out_shape,
        scratch_shapes=[pltpu.VMEM((tm, ch), jnp.float32),
                        pltpu.VMEM((tm, ch), jnp.float32)],
        compiler_params=_cparams(("parallel", "arbitrary")),
    )(*ops)
    if coupling:
        z2n, ld = res
        return (z2n[:n] if npad != n else z2n), (ld[:n] if npad != n else ld)
    ld = res
    return None, (ld[:n] if npad != n else ld)


# ----------------------------------------------------------------------------
# Prior log-prob (mean=0, logs=1), lane-dense (B, n), gridded over n
# ----------------------------------------------------------------------------
def prior_logp(z2d):
    bsz, n = z2d.shape
    tn = min(8192, _round_up(n, 128))
    npad = _round_up(n, tn)
    nt = npad // tn
    zp = jnp.pad(z2d, ((0, 0), (0, npad - n))) if npad != n else z2d

    def kernel(z_ref, out_ref):
        i = pl.program_id(0)

        @pl.when(i == 0)
        def _():
            out_ref[...] = jnp.zeros_like(out_ref)

        x = z_ref[...]
        ll = -0.5 * (2.0 + x * x * _EXP_M2 + LOG2PI)
        out_ref[...] += jnp.sum(ll, axis=1, keepdims=True)

    lp = pl.pallas_call(
        kernel,
        grid=(nt,),
        in_specs=[pl.BlockSpec((bsz, tn), lambda i: (0, i))],
        out_specs=pl.BlockSpec((bsz, 1), lambda i: (0, 0)),
        out_shape=jax.ShapeDtypeStruct((bsz, 1), jnp.float32),
        compiler_params=_cparams(("arbitrary",)),
    )(zp)
    corr = (npad - n) * (-0.5) * (2.0 + LOG2PI)   # exact zero-pad correction
    return lp[:, 0] - corr


# ----------------------------------------------------------------------------
# Convolution glue (im2col + weight reshapes)
# ----------------------------------------------------------------------------
def _im2col_3x3(x):
    # TODO(synk): in-kernel halo-window 3x3 conv to avoid the 9x HBM amplification.
    B, H, W, C = x.shape
    xp = jnp.pad(x, ((0, 0), (1, 1), (1, 1), (0, 0)))
    cols = jnp.stack([xp[:, kh:kh + H, kw:kw + W, :]
                      for kh in range(3) for kw in range(3)], axis=-1)
    return cols.reshape(B * H * W, C * 9)          # flat index c*9 + kh*3 + kw


def _conv_w2d(weight):
    # (Cout, Cin, kh, kw) -> (Cin*kh*kw, Cout) matching the im2col layout.
    Cout, Cin, kh, kw = weight.shape
    if kh == 1 and kw == 1:
        return weight.reshape(Cout, Cin).T
    return jnp.transpose(weight, (1, 2, 3, 0)).reshape(Cin * kh * kw, Cout)


# ----------------------------------------------------------------------------
# Glow building blocks (parameters + forward glue around the kernels)
# ----------------------------------------------------------------------------
def _lu_decompose(a):
    n = a.shape[0]
    U = a.astype(np.float64).copy()
    L = np.eye(n)
    Pm = np.eye(n)
    for k in range(n - 1):
        piv = int(np.argmax(np.abs(U[k:, k]))) + k
        if piv != k:
            U[[k, piv], :] = U[[piv, k], :]
            Pm[[k, piv], :] = Pm[[piv, k], :]
            L[[k, piv], :k] = L[[piv, k], :k]
        for i in range(k + 1, n):
            L[i, k] = U[i, k] / U[k, k]
            U[i, k:] -= L[i, k] * U[k, k:]
    return Pm.T, L, U


def make_invconv_params(C, rng):
    w_init = np.linalg.qr(rng.randn(C, C))[0].astype(np.float32)
    p, l, u = _lu_decompose(w_init)
    s = np.diag(u)
    return dict(
        p=jnp.asarray(p, jnp.float32),
        sign_s=jnp.asarray(np.sign(s), jnp.float32),
        l=jnp.asarray(l, jnp.float32),
        log_s=jnp.asarray(np.log(np.abs(s)), jnp.float32),
        u=jnp.asarray(np.triu(u, k=1), jnp.float32),
        l_mask=jnp.asarray(np.tril(np.ones((C, C), np.float32), -1)),
        eye=jnp.eye(C, dtype=jnp.float32),
    )


def invconv_weight(params):
    l = params['l'] * params['l_mask'] + params['eye']
    u = (params['u'] * params['l_mask'].T
         + jnp.diag(params['sign_s'] * jnp.exp(params['log_s'])))
    return params['p'] @ l @ u                     # (C, C)


def flow_step_forward(x, logdet, p):
    B, H, W, C = x.shape
    N = B * H * W
    num_pixels = H * W
    Ch = C // 2

    # ---- ActNorm2d (data-dependent) + InvertibleConv1x1, fused apply ----
    x2d = x.reshape(N, C)
    bias_a, esc_a, sumlogs = channel_stats(x2d, scale=p['actnorm_scale'])
    w_inv = invconv_weight(p['invconv'])           # (C, C)
    z2d = actnorm_apply(x2d, bias_a, esc_a, w_post=w_inv.T,
                        post_dtype=jnp.float32)    # keep the z path in f32
    logdet = logdet + (sumlogs + jnp.sum(p['invconv']['log_s'])) * float(num_pixels)

    z1 = z2d[:, :Ch].reshape(B, H, W, Ch)          # 'split'
    z2_2d = z2d[:, Ch:]

    # ---- coupling net: conv3x3 -> actnorm -> relu -> conv1x1 -> actnorm ->
    #      relu -> Conv2dZeros(3x3) -> affine coupling (fully fused epilogue) ----
    h1 = matmul_fused(_im2col_3x3(z1.astype(jnp.bfloat16)), _conv_w2d(p['conv1_w']))
    b1, e1, _ = channel_stats(h1)                  # ActNormConv2d internal actnorm
    h2 = actnorm_apply(h1, b1, e1, relu=True, w_post=_conv_w2d(p['conv2_w']))
    b2, e2, _ = channel_stats(h2)
    hidden = h2.shape[1]
    a2 = actnorm_apply(h2, b2, e2, relu=True, out_dtype=jnp.bfloat16)
    a2 = a2.reshape(B, H, W, hidden)

    w3 = _conv_w2d(p['conv3_w'])                   # (hidden*9, C)
    cs3 = jnp.exp(p['conv3_logs'].reshape(-1) * 3.0)
    z2n, ld_rows = conv_zeros_split_fused(
        _im2col_3x3(a2), w3[:, 0::2], w3[:, 1::2],
        p['conv3_b'][0::2], p['conv3_b'][1::2], cs3[0::2], cs3[1::2],
        z2_2d, mode='coupling')
    logdet = logdet + jnp.sum(ld_rows.reshape(B, H * W), axis=1)

    z = jnp.concatenate([z1, z2n.reshape(B, H, W, Ch)], axis=-1)
    return z, logdet


def split2d_forward(x, logdet, p):
    B, H, W, C = x.shape
    N = B * H * W
    Ch = C // 2
    x2d = x.reshape(N, C)
    z1 = x[..., :Ch]
    z2_2d = x2d[:, Ch:]
    w = _conv_w2d(p['conv_w'])                     # (Ch*9, C)
    cs = jnp.exp(p['conv_logs'].reshape(-1) * 3.0)
    _, lp_rows = conv_zeros_split_fused(
        _im2col_3x3(z1.astype(jnp.bfloat16)), w[:, 0::2], w[:, 1::2],
        p['conv_b'][0::2], p['conv_b'][1::2], cs[0::2], cs[1::2],
        z2_2d, mode='gaussian')
    logdet = logdet + jnp.sum(lp_rows.reshape(B, H * W), axis=1)
    return z1, logdet


def squeeze2d(x, factor=2):
    B, H, W, C = x.shape
    x = x.reshape(B, H // factor, factor, W // factor, factor, C)
    x = jnp.transpose(x, (0, 1, 3, 5, 2, 4))
    return x.reshape(B, H // factor, W // factor, C * factor * factor)


def build_flownet(image_shape, hidden, K, L, actnorm_scale, rng):
    H, W, C = image_shape
    layers = []
    for i in range(L):
        C = C * 4
        layers.append(('squeeze', None))
        for _ in range(K):
            p = dict(
                actnorm_scale=float(actnorm_scale),
                invconv=make_invconv_params(C, rng),
                conv1_w=jnp.asarray(rng.normal(0.0, 0.05, (hidden, C // 2, 3, 3)),
                                    jnp.float32),
                conv2_w=jnp.asarray(rng.normal(0.0, 0.05, (hidden, hidden, 1, 1)),
                                    jnp.float32),
                conv3_w=jnp.zeros((C, hidden, 3, 3), jnp.float32),
                conv3_b=jnp.zeros((C,), jnp.float32),
                conv3_logs=jnp.zeros((C, 1, 1), jnp.float32),
            )
            layers.append(('flowstep', p))
        if i < L - 1:
            p = dict(conv_w=jnp.zeros((C, C // 2, 3, 3), jnp.float32),
                     conv_b=jnp.zeros((C,), jnp.float32),
                     conv_logs=jnp.zeros((C, 1, 1), jnp.float32))
            layers.append(('split', p))
            C = C // 2
    return layers


def glow_inference(x_nchw, layers, noise_key):
    B, C, H, W = x_nchw.shape
    num_pixels = H * W                             # util.count_pixels(x)
    x = jnp.transpose(x_nchw, (0, 2, 3, 1)).astype(jnp.float32)   # NCHW -> NHWC
    x = x + jax.random.normal(noise_key, x.shape, jnp.float32) / 255.0
    logdet = jnp.full((B,), float(-np.log(256.0) * num_pixels), jnp.float32)

    z = x
    for kind, p in layers:
        if kind == 'squeeze':
            z = squeeze2d(z, 2)
        elif kind == 'flowstep':
            z, logdet = flow_step_forward(z, logdet, p)
        elif kind == 'split':
            z, logdet = split2d_forward(z, logdet, p)

    Bz, Hz, Wz, Cz = z.shape
    objective = logdet + prior_logp(z.reshape(Bz, Hz * Wz * Cz))   # mean=0, logs=1
    nll = -objective / (float(np.log(2.0)) * num_pixels)
    z_nchw = jnp.transpose(z, (0, 3, 1, 2))        # back to NCHW
    return z_nchw, nll


# ----------------------------------------------------------------------------
if __name__ == "__main__":
    glow_params = dict(image_shape=(16, 16, 4),    # (H, W, C)
                       hidden_features=32, K=2, L=2, actnorm_scale=1.0)
    rng = np.random.RandomState(0)                 # deterministic params
    layers = build_flownet(glow_params['image_shape'],
                           glow_params['hidden_features'],
                           glow_params['K'], glow_params['L'],
                           glow_params['actnorm_scale'], rng)

    key = jax.random.PRNGKey(0)
    kx, kn = jax.random.split(key)
    x = jax.random.uniform(kx, (2, 4, 16, 16), jnp.float32)   # NCHW input

    run = jax.jit(lambda xx, kk: glow_inference(xx, layers, kk))
    z, nll = run(x, kn)
    jax.block_until_ready((z, nll))

    assert z.shape == (2, 32, 4, 4), z.shape
    assert nll.shape == (2,), nll.shape
    assert bool(jnp.all(jnp.isfinite(z))) and bool(jnp.all(jnp.isfinite(nll)))
    print("KERNEL_OK")
</pallas_src>

<mosaic_0001>
module attributes {stable_mosaic.version = 11 : i64} {
  func.func @kernel(%arg0: i32, %arg1: i32, %arg2: memref<128x16xf32, #tpu.memory_space<vmem>>, %arg3: memref<1x16xf32, #tpu.memory_space<vmem>>, %arg4: memref<1x16xf32, #tpu.memory_space<vmem>>, %arg5: memref<1x1xf32, #tpu.memory_space<vmem>>, %arg6: memref<1x16xf32, #tpu.memory_space<vmem>>, %arg7: memref<1x16xf32, #tpu.memory_space<vmem>>, %arg8: memref<1x16xf32, #tpu.memory_space<vmem>>) attributes {dimension_semantics = [#tpu.dimension_semantics<arbitrary>, #tpu.dimension_semantics<arbitrary>], iteration_bounds = array<i64: 2, 1>, scalar_prefetch = 0 : i64, scratch_operands = 3 : i64, tpu.core_type = #tpu.core_type<tc>, window_params = [{transform_indices = @transform_0, window_bounds = array<i64: 128, 16>}, {pipeline_mode = #tpu.pipeline_mode<synchronous>, transform_indices = @transform_1, window_bounds = array<i64: 1, 16>}, {pipeline_mode = #tpu.pipeline_mode<synchronous>, transform_indices = @transform_2, window_bounds = array<i64: 1, 16>}, {pipeline_mode = #tpu.pipeline_mode<synchronous>, transform_indices = @transform_3, window_bounds = array<i64: 1, 1>}]} {
    %0 = tpu.iota {dimensions = array<i32: 0>} : vector<128x1xi32>
    %c128_i32 = arith.constant 128 : i32
    %1 = arith.muli %arg1, %c128_i32 : i32
    %2 = vector.broadcast %1 : i32 to vector<128x1xi32>
    %3 = arith.addi %0, %2 : vector<128x1xi32>
    %c128_i32_0 = arith.constant 128 : i32
    %4 = vector.broadcast %c128_i32_0 : i32 to vector<128x1xi32>
    %5 = arith.cmpi slt, %3, %4 : vector<128x1xi32>
    %c0_i32 = arith.constant 0 : i32
    %6 = arith.cmpi eq, %arg0, %c0_i32 : i32
    %c0_i32_1 = arith.constant 0 : i32
    %7 = arith.cmpi eq, %arg1, %c0_i32_1 : i32
    %8 = arith.andi %6, %7 : i1
    %9 = arith.extui %8 : i1 to i32
    %c0_i32_2 = arith.constant 0 : i32
    %10 = arith.cmpi ne, %9, %c0_i32_2 : i32
    scf.if %10 {
      %cst = arith.constant 0.000000e+00 : f32
      %27 = vector.broadcast %cst : f32 to vector<1x16xf32>
      %c0 = arith.constant 0 : index
      %c0_12 = arith.constant 0 : index
      %28 = vector.load %arg6[%c0, %c0_12] : memref<1x16xf32, #tpu.memory_space<vmem>>, vector<1x16xf32>
      tpu.vector_store %arg6[%c0, %c0_12], %27 {strides = array<i32>} : memref<1x16xf32, #tpu.memory_space<vmem>>, vector<1x16xf32>,
    } else {
    }
    %c0_i32_3 = arith.constant 0 : i32
    %11 = arith.cmpi eq, %arg0, %c0_i32_3 : i32
    %12 = arith.extui %11 : i1 to i32
    %c0_i32_4 = arith.constant 0 : i32
    %13 = arith.cmpi ne, %12, %c0_i32_4 : i32
    scf.if %13 {
      %c0 = arith.constant 0 : index
      %c0_12 = arith.constant 0 : index
      %27 = vector.load %arg2[%c0, %c0_12] : memref<128x16xf32, #tpu.memory_space<vmem>>, vector<128x16xf32>
      %cst = arith.constant 0.000000e+00 : f32
      %28 = vector.shape_cast %5 : vector<128x1xi1> to vector<128x1xi1>
      %29 = vector.broadcast %28 : vector<128x1xi1> to vector<128x16xi1>
      %30 = vector.broadcast %cst : f32 to vector<128x16xf32>
      %31 = arith.select %29, %27, %30 : vector<128x16xi1>, vector<128x16xf32>
      %c0_13 = arith.constant 0 : index
      %c0_14 = arith.constant 0 : index
      %32 = vector.load %arg6[%c0_13, %c0_14] : memref<1x16xf32, #tpu.memory_space<vmem>>, vector<1x16xf32>
      %cst_15 = arith.constant dense<0.000000e+00> : vector<16xf32>
      %33 = vector.multi_reduction <add>, %31, %cst_15 [0] : vector<128x16xf32> to vector<16xf32>
      %34 = vector.shape_cast %33 : vector<16xf32> to vector<1x16xf32>
      %35 = arith.addf %32, %34 : vector<1x16xf32>
      %c0_16 = arith.constant 0 : index
      %c0_17 = arith.constant 0 : index
      %36 = vector.load %arg6[%c0_16, %c0_17] : memref<1x16xf32, #tpu.memory_space<vmem>>, vector<1x16xf32>
      tpu.vector_store %arg6[%c0_16, %c0_17], %35 {strides = array<i32>} : memref<1x16xf32, #tpu.memory_space<vmem>>, vector<1x16xf32>,
    } else {
    }
    %c1_i32 = arith.constant 1 : i32
    %14 = arith.cmpi eq, %arg0, %c1_i32 : i32
    %c0_i32_5 = arith.constant 0 : i32
    %15 = arith.cmpi eq, %arg1, %c0_i32_5 : i32
    %16 = arith.andi %14, %15 : i1
    %17 = arith.extui %16 : i1 to i32
    %c0_i32_6 = arith.constant 0 : i32
    %18 = arith.cmpi ne, %17, %c0_i32_6 : i32
    scf.if %18 {
      %c0 = arith.constant 0 : index
      %c0_12 = arith.constant 0 : index
      %27 = vector.load %arg6[%c0, %c0_12] : memref<1x16xf32, #tpu.memory_space<vmem>>, vector<1x16xf32>
      %cst = arith.constant 7.812500e-03 : f32
      %28 = vector.broadcast %cst : f32 to vector<1x16xf32>
      %29 = arith.mulf %27, %28 : vector<1x16xf32>
      %c0_13 = arith.constant 0 : index
      %c0_14 = arith.constant 0 : index
      %30 = vector.load %arg7[%c0_13, %c0_14] : memref<1x16xf32, #tpu.memory_space<vmem>>, vector<1x16xf32>
      tpu.vector_store %arg7[%c0_13, %c0_14], %29 {strides = array<i32>} : memref<1x16xf32, #tpu.memory_space<vmem>>, vector<1x16xf32>,
      %cst_15 = arith.constant 0.000000e+00 : f32
      %31 = vector.broadcast %cst_15 : f32 to vector<1x16xf32>
      %c0_16 = arith.constant 0 : index
      %c0_17 = arith.constant 0 : index
      %32 = vector.load %arg8[%c0_16, %c0_17] : memref<1x16xf32, #tpu.memory_space<vmem>>, vector<1x16xf32>
      tpu.vector_store %arg8[%c0_16, %c0_17], %31 {strides = array<i32>} : memref<1x16xf32, #tpu.memory_space<vmem>>, vector<1x16xf32>,
    } else {
    }
    %c1_i32_7 = arith.constant 1 : i32
    %19 = arith.cmpi eq, %arg0, %c1_i32_7 : i32
    %20 = arith.extui %19 : i1 to i32
    %c0_i32_8 = arith.constant 0 : i32
    %21 = arith.cmpi ne, %20, %c0_i32_8 : i32
    scf.if %21 {
      %c0 = arith.constant 0 : index
      %c0_12 = arith.constant 0 : index
      %27 = vector.load %arg2[%c0, %c0_12] : memref<128x16xf32, #tpu.memory_space<vmem>>, vector<128x16xf32>
      %c0_13 = arith.constant 0 : index
      %c0_14 = arith.constant 0 : index
      %28 = vector.load %arg7[%c0_13, %c0_14] : memref<1x16xf32, #tpu.memory_space<vmem>>, vector<1x16xf32>
      %29 = vector.broadcast %28 : vector<1x16xf32> to vector<128x16xf32>
      %30 = arith.subf %27, %29 : vector<128x16xf32>
      %cst = arith.constant 0.000000e+00 : f32
      %31 = vector.shape_cast %5 : vector<128x1xi1> to vector<128x1xi1>
      %32 = vector.broadcast %31 : vector<128x1xi1> to vector<128x16xi1>
      %33 = vector.broadcast %cst : f32 to vector<128x16xf32>
      %34 = arith.select %32, %30, %33 : vector<128x16xi1>, vector<128x16xf32>
      %c0_15 = arith.constant 0 : index
      %c0_16 = arith.constant 0 : index
      %35 = vector.load %arg8[%c0_15, %c0_16] : memref<1x16xf32, #tpu.memory_space<vmem>>, vector<1x16xf32>
      %36 = arith.mulf %34, %34 : vector<128x16xf32>
      %cst_17 = arith.constant dense<0.000000e+00> : vector<16xf32>
      %37 = vector.multi_reduction <add>, %36, %cst_17 [0] : vector<128x16xf32> to vector<16xf32>
      %38 = vector.shape_cast %37 : vector<16xf32> to vector<1x16xf32>
      %39 = arith.addf %35, %38 : vector<1x16xf32>
      %c0_18 = arith.constant 0 : index
      %c0_19 = arith.constant 0 : index
      %40 = vector.load %arg8[%c0_18, %c0_19] : memref<1x16xf32, #tpu.memory_space<vmem>>, vector<1x16xf32>
      tpu.vector_store %arg8[%c0_18, %c0_19], %39 {strides = array<i32>} : memref<1x16xf32, #tpu.memory_space<vmem>>, vector<1x16xf32>,
    } else {
    }
    %c1_i32_9 = arith.constant 1 : i32
    %22 = arith.cmpi eq, %arg0, %c1_i32_9 : i32
    %c0_i32_10 = arith.constant 0 : i32
    %23 = arith.cmpi eq, %arg1, %c0_i32_10 : i32
    %24 = arith.andi %22, %23 : i1
    %25 = arith.extui %24 : i1 to i32
    %c0_i32_11 = arith.constant 0 : i32
    %26 = arith.cmpi ne, %25, %c0_i32_11 : i32
    scf.if %26 {
      %c0 = arith.constant 0 : index
      %c0_12 = arith.constant 0 : index
      %27 = vector.load %arg8[%c0, %c0_12] : memref<1x16xf32, #tpu.memory_space<vmem>>, vector<1x16xf32>
      %cst = arith.constant 7.812500e-03 : f32
      %28 = vector.broadcast %cst : f32 to vector<1x16xf32>
      %29 = arith.mulf %27, %28 : vector<1x16xf32>
      %30 = math.sqrt %29 : vector<1x16xf32>
      %cst_13 = arith.constant 9.99999997E-7 : f32
      %31 = vector.broadcast %cst_13 : f32 to vector<1x16xf32>
      %32 = arith.addf %30, %31 : vector<1x16xf32>
      %cst_14 = arith.constant 1.000000e+00 : f32
      %33 = vector.broadcast %cst_14 : f32 to vector<1x16xf32>
      %34 = arith.divf %33, %32 : vector<1x16xf32>
      %35 = math.log %34 : vector<1x16xf32>
      %c0_15 = arith.constant 0 : index
      %c0_16 = arith.constant 0 : index
      %36 = vector.load %arg7[%c0_15, %c0_16] : memref<1x16xf32, #tpu.memory_space<vmem>>, vector<1x16xf32>
      %cst_17 = arith.constant 0.000000e+00 : f32
      %37 = vector.broadcast %cst_17 : f32 to vector<1x16xf32>
      %38 = arith.subf %37, %36 : vector<1x16xf32>
      %c0_18 = arith.constant 0 : index
      %c0_19 = arith.constant 0 : index
      %39 = vector.load %arg3[%c0_18, %c0_19] : memref<1x16xf32, #tpu.memory_space<vmem>>, vector<1x16xf32>
      tpu.vector_store %arg3[%c0_18, %c0_19], %38 {strides = array<i32>} : memref<1x16xf32, #tpu.memory_space<vmem>>, vector<1x16xf32>,
      %40 = math.exp %35 : vector<1x16xf32>
      %c0_20 = arith.constant 0 : index
      %c0_21 = arith.constant 0 : index
      %41 = vector.load %arg4[%c0_20, %c0_21] : memref<1x16xf32, #tpu.memory_space<vmem>>, vector<1x16xf32>
      tpu.vector_store %arg4[%c0_20, %c0_21], %40 {strides = array<i32>} : memref<1x16xf32, #tpu.memory_space<vmem>>, vector<1x16xf32>,
      %42 = vector.shape_cast %35 : vector<1x16xf32> to vector<1x1x16xf32>
      %cst_22 = arith.constant dense<0.000000e+00> : vector<1xf32>
      %43 = vector.multi_reduction <add>, %42, %cst_22 [1, 2] : vector<1x1x16xf32> to vector<1xf32>
      %44 = vector.shape_cast %43 : vector<1xf32> to vector<1x1x1xf32>
      %45 = vector.extract %44[0, 0, 0] : f32 from vector<1x1x1xf32>
      %46 = vector.broadcast %45 : f32 to vector<1x1xf32>
      %c0_23 = arith.constant 0 : index
      %c0_24 = arith.constant 0 : index
      %47 = vector.load %arg5[%c0_23, %c0_24] : memref<1x1xf32, #tpu.memory_space<vmem>>, vector<1x1xf32>
      tpu.vector_store %arg5[%c0_23, %c0_24], %46 {strides = array<i32>} : memref<1x1xf32, #tpu.memory_space<vmem>>, vector<1x1xf32>,
    } else {
    }
    return
  }
  func.func @transform_0(%arg0: i32, %arg1: i32) -> (i32, i32) {
    %c0_i32 = arith.constant 0 : i32
    %c0_i32_0 = arith.constant 0 : i32
    return %arg1, %c0_i32 : i32, i32
  }
  func.func @transform_1(%arg0: i32, %arg1: i32) -> (i32, i32) {
    %c0_i32 = arith.constant 0 : i32
    %c0_i32_0 = arith.constant 0 : i32
    %c0_i32_1 = arith.constant 0 : i32
    return %c0_i32, %c0_i32_0 : i32, i32
  }
  func.func @transform_2(%arg0: i32, %arg1: i32) -> (i32, i32) {
    %c0_i32 = arith.constant 0 : i32
    %c0_i32_0 = arith.constant 0 : i32
    %c0_i32_1 = arith.constant 0 : i32
    return %c0_i32, %c0_i32_0 : i32, i32
  }
  func.func @transform_3(%arg0: i32, %arg1: i32) -> (i32, i32) {
    %c0_i32 = arith.constant 0 : i32
    %c0_i32_0 = arith.constant 0 : i32
    %c0_i32_1 = arith.constant 0 : i32
    return %c0_i32, %c0_i32_0 : i32, i32
  }
}

module attributes {stable_mosaic.version = 11 : i64} {
  func.func @kernel(%arg0: i32, %arg1: memref<128x16xf32, #tpu.memory_space<vmem>>, %arg2: memref<1x16xf32, #tpu.memory_space<vmem>>, %arg3: memref<1x16xf32, #tpu.memory_space<vmem>>, %arg4: memref<16x16xf32, #tpu.memory_space<vmem>>, %arg5: memref<128x16xf32, #tpu.memory_space<vmem>>) attributes {dimension_semantics = [#tpu.dimension_semantics<parallel>], iteration_bounds = array<i64: 1>, scalar_prefetch = 0 : i64, scratch_operands = 0 : i64, tpu.core_type = #tpu.core_type<tc>, window_params = [{transform_indices = @transform_0, window_bounds = array<i64: 128, 16>}, {pipeline_mode = #tpu.pipeline_mode<synchronous>, transform_indices = @transform_1, window_bounds = array<i64: 1, 16>}, {pipeline_mode = #tpu.pipeline_mode<synchronous>, transform_indices = @transform_2, window_bounds = array<i64: 1, 16>}, {pipeline_mode = #tpu.pipeline_mode<synchronous>, transform_indices = @transform_3, window_bounds = array<i64: 16, 16>}, {transform_indices = @transform_4, window_bounds = array<i64: 128, 16>}]} {
    %c0 = arith.constant 0 : index
    %c0_0 = arith.constant 0 : index
    %0 = vector.load %arg1[%c0, %c0_0] : memref<128x16xf32, #tpu.memory_space<vmem>>, vector<128x16xf32>
    %c0_1 = arith.constant 0 : index
    %c0_2 = arith.constant 0 : index
    %1 = vector.load %arg2[%c0_1, %c0_2] : memref<1x16xf32, #tpu.memory_space<vmem>>, vector<1x16xf32>
    %2 = vector.broadcast %1 : vector<1x16xf32> to vector<128x16xf32>
    %3 = arith.addf %0, %2 : vector<128x16xf32>
    %c0_3 = arith.constant 0 : index
    %c0_4 = arith.constant 0 : index
    %4 = vector.load %arg3[%c0_3, %c0_4] : memref<1x16xf32, #tpu.memory_space<vmem>>, vector<1x16xf32>
    %5 = vector.broadcast %4 : vector<1x16xf32> to vector<128x16xf32>
    %6 = arith.mulf %3, %5 : vector<128x16xf32>
    %c0_5 = arith.constant 0 : index
    %c0_6 = arith.constant 0 : index
    %7 = vector.load %arg4[%c0_5, %c0_6] : memref<16x16xf32, #tpu.memory_space<vmem>>, vector<16x16xf32>
    %cst = arith.constant dense<0.000000e+00> : vector<128x16xf32>
    %8 = tpu.matmul %6, %7, %cst {dimension_numbers = #tpu.dot_dimension_numbers<[1], [0], [0], [1], [0, 0, 1, 1], [], []>} : vector<128x16xf32>, vector<16x16xf32>, vector<128x16xf32> -> vector<128x16xf32>
    %c0_7 = arith.constant 0 : index
    %c0_8 = arith.constant 0 : index
    %9 = vector.load %arg5[%c0_7, %c0_8] : memref<128x16xf32, #tpu.memory_space<vmem>>, vector<128x16xf32>
    tpu.vector_store %arg5[%c0_7, %c0_8], %8 {strides = array<i32>} : memref<128x16xf32, #tpu.memory_space<vmem>>, vector<128x16xf32>,
    return
  }
  func.func @transform_0(%arg0: i32) -> (i32, i32) {
    %c0_i32 = arith.constant 0 : i32
    %c0_i32_0 = arith.constant 0 : i32
    return %arg0, %c0_i32 : i32, i32
  }
  func.func @transform_1(%arg0: i32) -> (i32, i32) {
    %c0_i32 = arith.constant 0 : i32
    %c0_i32_0 = arith.constant 0 : i32
    %c0_i32_1 = arith.constant 0 : i32
    return %c0_i32, %c0_i32_0 : i32, i32
  }
  func.func @transform_2(%arg0: i32) -> (i32, i32) {
    %c0_i32 = arith.constant 0 : i32
    %c0_i32_0 = arith.constant 0 : i32
    %c0_i32_1 = arith.constant 0 : i32
    return %c0_i32, %c0_i32_0 : i32, i32
  }
  func.func @transform_3(%arg0: i32) -> (i32, i32) {
    %c0_i32 = arith.constant 0 : i32
    %c0_i32_0 = arith.constant 0 : i32
    %c0_i32_1 = arith.constant 0 : i32
    return %c0_i32, %c0_i32_0 : i32, i32
  }
  func.func @transform_4(%arg0: i32) -> (i32, i32) {
    %c0_i32 = arith.constant 0 : i32
    %c0_i32_0 = arith.constant 0 : i32
    return %arg0, %c0_i32 : i32, i32
  }
}

module attributes {stable_mosaic.version = 11 : i64} {
  func.func @kernel(%arg0: i32, %arg1: i32, %arg2: i32, %arg3: memref<128x72xbf16, #tpu.memory_space<vmem>>, %arg4: memref<72x32xbf16, #tpu.memory_space<vmem>>, %arg5: memref<128x32xf32, #tpu.memory_space<vmem>>) attributes {dimension_semantics = [#tpu.dimension_semantics<parallel>, #tpu.dimension_semantics<parallel>, #tpu.dimension_semantics<arbitrary>], iteration_bounds = array<i64: 1, 1, 1>, scalar_prefetch = 0 : i64, scratch_operands = 0 : i64, tpu.core_type = #tpu.core_type<tc>, window_params = [{transform_indices = @transform_0, window_bounds = array<i64: 128, 72>}, {transform_indices = @transform_1, window_bounds = array<i64: 72, 32>}, {transform_indices = @transform_2, window_bounds = array<i64: 128, 32>}]} {
    %c0_i32 = arith.constant 0 : i32
    %0 = arith.cmpi eq, %arg2, %c0_i32 : i32
    %1 = arith.extui %0 : i1 to i32
    %c0_i32_0 = arith.constant 0 : i32
    %2 = arith.cmpi ne, %1, %c0_i32_0 : i32
    scf.if %2 {
      %cst_8 = arith.constant 0.000000e+00 : f32
      %9 = vector.broadcast %cst_8 : f32 to vector<128x32xf32>
      %c0_9 = arith.constant 0 : index
      %c0_10 = arith.constant 0 : index
      %10 = vector.load %arg5[%c0_9, %c0_10] : memref<128x32xf32, #tpu.memory_space<vmem>>, vector<128x32xf32>
      tpu.vector_store %arg5[%c0_9, %c0_10], %9 {strides = array<i32>} : memref<128x32xf32, #tpu.memory_space<vmem>>, vector<128x32xf32>,
    } else {
    }
    %c0 = arith.constant 0 : index
    %c0_1 = arith.constant 0 : index
    %3 = vector.load %arg5[%c0, %c0_1] : memref<128x32xf32, #tpu.memory_space<vmem>>, vector<128x32xf32>
    %c0_2 = arith.constant 0 : index
    %c0_3 = arith.constant 0 : index
    %4 = vector.load %arg3[%c0_2, %c0_3] : memref<128x72xbf16, #tpu.memory_space<vmem>>, vector<128x72xbf16>
    %c0_4 = arith.constant 0 : index
    %c0_5 = arith.constant 0 : index
    %5 = vector.load %arg4[%c0_4, %c0_5] : memref<72x32xbf16, #tpu.memory_space<vmem>>, vector<72x32xbf16>
    %cst = arith.constant dense<0.000000e+00> : vector<128x32xf32>
    %6 = tpu.matmul %4, %5, %cst {dimension_numbers = #tpu.dot_dimension_numbers<[1], [0], [0], [1], [0, 0, 1, 1], [], []>} : vector<128x72xbf16>, vector<72x32xbf16>, vector<128x32xf32> -> vector<128x32xf32>
    %7 = arith.addf %3, %6 : vector<128x32xf32>
    %c0_6 = arith.constant 0 : index
    %c0_7 = arith.constant 0 : index
    %8 = vector.load %arg5[%c0_6, %c0_7] : memref<128x32xf32, #tpu.memory_space<vmem>>, vector<128x32xf32>
    tpu.vector_store %arg5[%c0_6, %c0_7], %7 {strides = array<i32>} : memref<128x32xf32, #tpu.memory_space<vmem>>, vector<128x32xf32>,
    return
  }
  func.func @transform_0(%arg0: i32, %arg1: i32, %arg2: i32) -> (i32, i32) {
    %c0_i32 = arith.constant 0 : i32
    return %arg0, %arg2 : i32, i32
  }
  func.func @transform_1(%arg0: i32, %arg1: i32, %arg2: i32) -> (i32, i32) {
    %c0_i32 = arith.constant 0 : i32
    return %arg2, %arg1 : i32, i32
  }
  func.func @transform_2(%arg0: i32, %arg1: i32, %arg2: i32) -> (i32, i32) {
    %c0_i32 = arith.constant 0 : i32
    return %arg0, %arg1 : i32, i32
  }
}

module attributes {stable_mosaic.version = 11 : i64} {
  func.func @kernel(%arg0: i32, %arg1: i32, %arg2: memref<128x32xf32, #tpu.memory_space<vmem>>, %arg3: memref<1x32xf32, #tpu.memory_space<vmem>>, %arg4: memref<1x32xf32, #tpu.memory_space<vmem>>, %arg5: memref<1x1xf32, #tpu.memory_space<vmem>>, %arg6: memref<1x32xf32, #tpu.memory_space<vmem>>, %arg7: memref<1x32xf32, #tpu.memory_space<vmem>>, %arg8: memref<1x32xf32, #tpu.memory_space<vmem>>) attributes {dimension_semantics = [#tpu.dimension_semantics<arbitrary>, #tpu.dimension_semantics<arbitrary>], iteration_bounds = array<i64: 2, 1>, scalar_prefetch = 0 : i64, scratch_operands = 3 : i64, tpu.core_type = #tpu.core_type<tc>, window_params = [{transform_indices = @transform_0, window_bounds = array<i64: 128, 32>}, {pipeline_mode = #tpu.pipeline_mode<synchronous>, transform_indices = @transform_1, window_bounds = array<i64: 1, 32>}, {pipeline_mode = #tpu.pipeline_mode<synchronous>, transform_indices = @transform_2, window_bounds = array<i64: 1, 32>}, {pipeline_mode = #tpu.pipeline_mode<synchronous>, transform_indices = @transform_3, window_bounds = array<i64: 1, 1>}]} {
    %0 = tpu.iota {dimensions = array<i32: 0>} : vector<128x1xi32>
    %c128_i32 = arith.constant 128 : i32
    %1 = arith.muli %arg1, %c128_i32 : i32
    %2 = vector.broadcast %1 : i32 to vector<128x1xi32>
    %3 = arith.addi %0, %2 : vector<128x1xi32>
    %c128_i32_0 = arith.constant 128 : i32
    %4 = vector.broadcast %c128_i32_0 : i32 to vector<128x1xi32>
    %5 = arith.cmpi slt, %3, %4 : vector<128x1xi32>
    %c0_i32 = arith.constant 0 : i32
    %6 = arith.cmpi eq, %arg0, %c0_i32 : i32
    %c0_i32_1 = arith.constant 0 : i32
    %7 = arith.cmpi eq, %arg1, %c0_i32_1 : i32
    %8 = arith.andi %6, %7 : i1
    %9 = arith.extui %8 : i1 to i32
    %c0_i32_2 = arith.constant 0 : i32
    %10 = arith.cmpi ne, %9, %c0_i32_2 : i32
    scf.if %10 {
      %cst = arith.constant 0.000000e+00 : f32
      %27 = vector.broadcast %cst : f32 to vector<1x32xf32>
      %c0 = arith.constant 0 : index
      %c0_12 = arith.constant 0 : index
      %28 = vector.load %arg6[%c0, %c0_12] : memref<1x32xf32, #tpu.memory_space<vmem>>, vector<1x32xf32>
      tpu.vector_store %arg6[%c0, %c0_12], %27 {strides = array<i32>} : memref<1x32xf32, #tpu.memory_space<vmem>>, vector<1x32xf32>,
    } else {
    }
    %c0_i32_3 = arith.constant 0 : i32
    %11 = arith.cmpi eq, %arg0, %c0_i32_3 : i32
    %12 = arith.extui %11 : i1 to i32
    %c0_i32_4 = arith.constant 0 : i32
    %13 = arith.cmpi ne, %12, %c0_i32_4 : i32
    scf.if %13 {
      %c0 = arith.constant 0 : index
      %c0_12 = arith.constant 0 : index
      %27 = vector.load %arg2[%c0, %c0_12] : memref<128x32xf32, #tpu.memory_space<vmem>>, vector<128x32xf32>
      %cst = arith.constant 0.000000e+00 : f32
      %28 = vector.shape_cast %5 : vector<128x1xi1> to vector<128x1xi1>
      %29 = vector.broadcast %28 : vector<128x1xi1> to vector<128x32xi1>
      %30 = vector.broadcast %cst : f32 to vector<128x32xf32>
      %31 = arith.select %29, %27, %30 : vector<128x32xi1>, vector<128x32xf32>
      %c0_13 = arith.constant 0 : index
      %c0_14 = arith.constant 0 : index
      %32 = vector.load %arg6[%c0_13, %c0_14] : memref<1x32xf32, #tpu.memory_space<vmem>>, vector<1x32xf32>
      %cst_15 = arith.constant dense<0.000000e+00> : vector<32xf32>
      %33 = vector.multi_reduction <add>, %31, %cst_15 [0] : vector<128x32xf32> to vector<32xf32>
      %34 = vector.shape_cast %33 : vector<32xf32> to vector<1x32xf32>
      %35 = arith.addf %32, %34 : vector<1x32xf32>
      %c0_16 = arith.constant 0 : index
      %c0_17 = arith.constant 0 : index
      %36 = vector.load %arg6[%c0_16, %c0_17] : memref<1x32xf32, #tpu.memory_space<vmem>>, vector<1x32xf32>
      tpu.vector_store %arg6[%c0_16, %c0_17], %35 {strides = array<i32>} : memref<1x32xf32, #tpu.memory_space<vmem>>, vector<1x32xf32>,
    } else {
    }
    %c1_i32 = arith.constant 1 : i32
    %14 = arith.cmpi eq, %arg0, %c1_i32 : i32
    %c0_i32_5 = arith.constant 0 : i32
    %15 = arith.cmpi eq, %arg1, %c0_i32_5 : i32
    %16 = arith.andi %14, %15 : i1
    %17 = arith.extui %16 : i1 to i32
    %c0_i32_6 = arith.constant 0 : i32
    %18 = arith.cmpi ne, %17, %c0_i32_6 : i32
    scf.if %18 {
      %c0 = arith.constant 0 : index
      %c0_12 = arith.constant 0 : index
      %27 = vector.load %arg6[%c0, %c0_12] : memref<1x32xf32, #tpu.memory_space<vmem>>, vector<1x32xf32>
      %cst = arith.constant 7.812500e-03 : f32
      %28 = vector.broadcast %cst : f32 to vector<1x32xf32>
      %29 = arith.mulf %27, %28 : vector<1x32xf32>
      %c0_13 = arith.constant 0 : index
      %c0_14 = arith.constant 0 : index
      %30 = vector.load %arg7[%c0_13, %c0_14] : memref<1x32xf32, #tpu.memory_space<vmem>>, vector<1x32xf32>
      tpu.vector_store %arg7[%c0_13, %c0_14], %29 {strides = array<i32>} : memref<1x32xf32, #tpu.memory_space<vmem>>, vector<1x32xf32>,
      %cst_15 = arith.constant 0.000000e+00 : f32
      %31 = vector.broadcast %cst_15 : f32 to vector<1x32xf32>
      %c0_16 = arith.constant 0 : index
      %c0_17 = arith.constant 0 : index
      %32 = vector.load %arg8[%c0_16, %c0_17] : memref<1x32xf32, #tpu.memory_space<vmem>>, vector<1x32xf32>
      tpu.vector_store %arg8[%c0_16, %c0_17], %31 {strides = array<i32>} : memref<1x32xf32, #tpu.memory_space<vmem>>, vector<1x32xf32>,
    } else {
    }
    %c1_i32_7 = arith.constant 1 : i32
    %19 = arith.cmpi eq, %arg0, %c1_i32_7 : i32
    %20 = arith.extui %19 : i1 to i32
    %c0_i32_8 = arith.constant 0 : i32
    %21 = arith.cmpi ne, %20, %c0_i32_8 : i32
    scf.if %21 {
      %c0 = arith.constant 0 : index
      %c0_12 = arith.constant 0 : index
      %27 = vector.load %arg2[%c0, %c0_12] : memref<128x32xf32, #tpu.memory_space<vmem>>, vector<128x32xf32>
      %c0_13 = arith.constant 0 : index
      %c0_14 = arith.constant 0 : index
      %28 = vector.load %arg7[%c0_13, %c0_14] : memref<1x32xf32, #tpu.memory_space<vmem>>, vector<1x32xf32>
      %29 = vector.broadcast %28 : vector<1x32xf32> to vector<128x32xf32>
      %30 = arith.subf %27, %29 : vector<128x32xf32>
      %cst = arith.constant 0.000000e+00 : f32
      %31 = vector.shape_cast %5 : vector<128x1xi1> to vector<128x1xi1>
      %32 = vector.broadcast %31 : vector<128x1xi1> to vector<128x32xi1>
      %33 = vector.broadcast %cst : f32 to vector<128x32xf32>
      %34 = arith.select %32, %30, %33 : vector<128x32xi1>, vector<128x32xf32>
      %c0_15 = arith.constant 0 : index
      %c0_16 = arith.constant 0 : index
      %35 = vector.load %arg8[%c0_15, %c0_16] : memref<1x32xf32, #tpu.memory_space<vmem>>, vector<1x32xf32>
      %36 = arith.mulf %34, %34 : vector<128x32xf32>
      %cst_17 = arith.constant dense<0.000000e+00> : vector<32xf32>
      %37 = vector.multi_reduction <add>, %36, %cst_17 [0] : vector<128x32xf32> to vector<32xf32>
      %38 = vector.shape_cast %37 : vector<32xf32> to vector<1x32xf32>
      %39 = arith.addf %35, %38 : vector<1x32xf32>
      %c0_18 = arith.constant 0 : index
      %c0_19 = arith.constant 0 : index
      %40 = vector.load %arg8[%c0_18, %c0_19] : memref<1x32xf32, #tpu.memory_space<vmem>>, vector<1x32xf32>
      tpu.vector_store %arg8[%c0_18, %c0_19], %39 {strides = array<i32>} : memref<1x32xf32, #tpu.memory_space<vmem>>, vector<1x32xf32>,
    } else {
    }
    %c1_i32_9 = arith.constant 1 : i32
    %22 = arith.cmpi eq, %arg0, %c1_i32_9 : i32
    %c0_i32_10 = arith.constant 0 : i32
    %23 = arith.cmpi eq, %arg1, %c0_i32_10 : i32
    %24 = arith.andi %22, %23 : i1
    %25 = arith.extui %24 : i1 to i32
    %c0_i32_11 = arith.constant 0 : i32
    %26 = arith.cmpi ne, %25, %c0_i32_11 : i32
    scf.if %26 {
      %c0 = arith.constant 0 : index
      %c0_12 = arith.constant 0 : index
      %27 = vector.load %arg8[%c0, %c0_12] : memref<1x32xf32, #tpu.memory_space<vmem>>, vector<1x32xf32>
      %cst = arith.constant 7.812500e-03 : f32
      %28 = vector.broadcast %cst : f32 to vector<1x32xf32>
      %29 = arith.mulf %27, %28 : vector<1x32xf32>
      %30 = math.sqrt %29 : vector<1x32xf32>
      %cst_13 = arith.constant 9.99999997E-7 : f32
      %31 = vector.broadcast %cst_13 : f32 to vector<1x32xf32>
      %32 = arith.addf %30, %31 : vector<1x32xf32>
      %cst_14 = arith.constant 1.000000e+00 : f32
      %33 = vector.broadcast %cst_14 : f32 to vector<1x32xf32>
      %34 = arith.divf %33, %32 : vector<1x32xf32>
      %35 = math.log %34 : vector<1x32xf32>
      %c0_15 = arith.constant 0 : index
      %c0_16 = arith.constant 0 : index
      %36 = vector.load %arg7[%c0_15, %c0_16] : memref<1x32xf32, #tpu.memory_space<vmem>>, vector<1x32xf32>
      %cst_17 = arith.constant 0.000000e+00 : f32
      %37 = vector.broadcast %cst_17 : f32 to vector<1x32xf32>
      %38 = arith.subf %37, %36 : vector<1x32xf32>
      %c0_18 = arith.constant 0 : index
      %c0_19 = arith.constant 0 : index
      %39 = vector.load %arg3[%c0_18, %c0_19] : memref<1x32xf32, #tpu.memory_space<vmem>>, vector<1x32xf32>
      tpu.vector_store %arg3[%c0_18, %c0_19], %38 {strides = array<i32>} : memref<1x32xf32, #tpu.memory_space<vmem>>, vector<1x32xf32>,
      %40 = math.exp %35 : vector<1x32xf32>
      %c0_20 = arith.constant 0 : index
      %c0_21 = arith.constant 0 : index
      %41 = vector.load %arg4[%c0_20, %c0_21] : memref<1x32xf32, #tpu.memory_space<vmem>>, vector<1x32xf32>
      tpu.vector_store %arg4[%c0_20, %c0_21], %40 {strides = array<i32>} : memref<1x32xf32, #tpu.memory_space<vmem>>, vector<1x32xf32>,
      %42 = vector.shape_cast %35 : vector<1x32xf32> to vector<1x1x32xf32>
      %cst_22 = arith.constant dense<0.000000e+00> : vector<1xf32>
      %43 = vector.multi_reduction <add>, %42, %cst_22 [1, 2] : vector<1x1x32xf32> to vector<1xf32>
      %44 = vector.shape_cast %43 : vector<1xf32> to vector<1x1x1xf32>
      %45 = vector.extract %44[0, 0, 0] : f32 from vector<1x1x1xf32>
      %46 = vector.broadcast %45 : f32 to vector<1x1xf32>
      %c0_23 = arith.constant 0 : index
      %c0_24 = arith.constant 0 : index
      %47 = vector.load %arg5[%c0_23, %c0_24] : memref<1x1xf32, #tpu.memory_space<vmem>>, vector<1x1xf32>
      tpu.vector_store %arg5[%c0_23, %c0_24], %46 {strides = array<i32>} : memref<1x1xf32, #tpu.memory_space<vmem>>, vector<1x1xf32>,
    } else {
    }
    return
  }
  func.func @transform_0(%arg0: i32, %arg1: i32) -> (i32, i32) {
    %c0_i32 = arith.constant 0 : i32
    %c0_i32_0 = arith.constant 0 : i32
    return %arg1, %c0_i32 : i32, i32
  }
  func.func @transform_1(%arg0: i32, %arg1: i32) -> (i32, i32) {
    %c0_i32 = arith.constant 0 : i32
    %c0_i32_0 = arith.constant 0 : i32
    %c0_i32_1 = arith.constant 0 : i32
    return %c0_i32, %c0_i32_0 : i32, i32
  }
  func.func @transform_2(%arg0: i32, %arg1: i32) -> (i32, i32) {
    %c0_i32 = arith.constant 0 : i32
    %c0_i32_0 = arith.constant 0 : i32
    %c0_i32_1 = arith.constant 0 : i32
    return %c0_i32, %c0_i32_0 : i32, i32
  }
  func.func @transform_3(%arg0: i32, %arg1: i32) -> (i32, i32) {
    %c0_i32 = arith.constant 0 : i32
    %c0_i32_0 = arith.constant 0 : i32
    %c0_i32_1 = arith.constant 0 : i32
    return %c0_i32, %c0_i32_0 : i32, i32
  }
}

module attributes {stable_mosaic.version = 11 : i64} {
  func.func @kernel(%arg0: i32, %arg1: memref<128x32xf32, #tpu.memory_space<vmem>>, %arg2: memref<1x32xf32, #tpu.memory_space<vmem>>, %arg3: memref<1x32xf32, #tpu.memory_space<vmem>>, %arg4: memref<128x32xbf16, #tpu.memory_space<vmem>>) attributes {dimension_semantics = [#tpu.dimension_semantics<parallel>], iteration_bounds = array<i64: 1>, scalar_prefetch = 0 : i64, scratch_operands = 0 : i64, tpu.core_type = #tpu.core_type<tc>, window_params = [{transform_indices = @transform_0, window_bounds = array<i64: 128, 32>}, {pipeline_mode = #tpu.pipeline_mode<synchronous>, transform_indices = @transform_1, window_bounds = array<i64: 1, 32>}, {pipeline_mode = #tpu.pipeline_mode<synchronous>, transform_indices = @transform_2, window_bounds = array<i64: 1, 32>}, {transform_indices = @transform_3, window_bounds = array<i64: 128, 32>}]} {
    %c0 = arith.constant 0 : index
    %c0_0 = arith.constant 0 : index
    %0 = vector.load %arg1[%c0, %c0_0] : memref<128x32xf32, #tpu.memory_space<vmem>>, vector<128x32xf32>
    %c0_1 = arith.constant 0 : index
    %c0_2 = arith.constant 0 : index
    %1 = vector.load %arg2[%c0_1, %c0_2] : memref<1x32xf32, #tpu.memory_space<vmem>>, vector<1x32xf32>
    %2 = vector.broadcast %1 : vector<1x32xf32> to vector<128x32xf32>
    %3 = arith.addf %0, %2 : vector<128x32xf32>
    %c0_3 = arith.constant 0 : index
    %c0_4 = arith.constant 0 : index
    %4 = vector.load %arg3[%c0_3, %c0_4] : memref<1x32xf32, #tpu.memory_space<vmem>>, vector<1x32xf32>
    %5 = vector.broadcast %4 : vector<1x32xf32> to vector<128x32xf32>
    %6 = arith.mulf %3, %5 : vector<128x32xf32>
    %cst = arith.constant 0.000000e+00 : f32
    %7 = vector.broadcast %cst : f32 to vector<128x32xf32>
    %8 = arith.maximumf %6, %7 : vector<128x32xf32>
    %9 = arith.truncf %8 : vector<128x32xf32> to vector<128x32xbf16>
    %c0_5 = arith.constant 0 : index
    %c0_6 = arith.constant 0 : index
    %10 = vector.load %arg4[%c0_5, %c0_6] : memref<128x32xbf16, #tpu.memory_space<vmem>>, vector<128x32xbf16>
    tpu.vector_store %arg4[%c0_5, %c0_6], %9 {strides = array<i32>} : memref<128x32xbf16, #tpu.memory_space<vmem>>, vector<128x32xbf16>,
    return
  }
  func.func @transform_0(%arg0: i32) -> (i32, i32) {
    %c0_i32 = arith.constant 0 : i32
    %c0_i32_0 = arith.constant 0 : i32
    return %arg0, %c0_i32 : i32, i32
  }
  func.func @transform_1(%arg0: i32) -> (i32, i32) {
    %c0_i32 = arith.constant 0 : i32
    %c0_i32_0 = arith.constant 0 : i32
    %c0_i32_1 = arith.constant 0 : i32
    return %c0_i32, %c0_i32_0 : i32, i32
  }
  func.func @transform_2(%arg0: i32) -> (i32, i32) {
    %c0_i32 = arith.constant 0 : i32
    %c0_i32_0 = arith.constant 0 : i32
    %c0_i32_1 = arith.constant 0 : i32
    return %c0_i32, %c0_i32_0 : i32, i32
  }
  func.func @transform_3(%arg0: i32) -> (i32, i32) {
    %c0_i32 = arith.constant 0 : i32
    %c0_i32_0 = arith.constant 0 : i32
    return %arg0, %c0_i32 : i32, i32
  }
}

module attributes {stable_mosaic.version = 11 : i64} {
  func.func @kernel(%arg0: i32, %arg1: memref<128x32xf32, #tpu.memory_space<vmem>>, %arg2: memref<1x32xf32, #tpu.memory_space<vmem>>, %arg3: memref<1x32xf32, #tpu.memory_space<vmem>>, %arg4: memref<32x32xbf16, #tpu.memory_space<vmem>>, %arg5: memref<128x32xf32, #tpu.memory_space<vmem>>) attributes {dimension_semantics = [#tpu.dimension_semantics<parallel>], iteration_bounds = array<i64: 1>, scalar_prefetch = 0 : i64, scratch_operands = 0 : i64, tpu.core_type = #tpu.core_type<tc>, window_params = [{transform_indices = @transform_0, window_bounds = array<i64: 128, 32>}, {pipeline_mode = #tpu.pipeline_mode<synchronous>, transform_indices = @transform_1, window_bounds = array<i64: 1, 32>}, {pipeline_mode = #tpu.pipeline_mode<synchronous>, transform_indices = @transform_2, window_bounds = array<i64: 1, 32>}, {pipeline_mode = #tpu.pipeline_mode<synchronous>, transform_indices = @transform_3, window_bounds = array<i64: 32, 32>}, {transform_indices = @transform_4, window_bounds = array<i64: 128, 32>}]} {
    %c0 = arith.constant 0 : index
    %c0_0 = arith.constant 0 : index
    %0 = vector.load %arg1[%c0, %c0_0] : memref<128x32xf32, #tpu.memory_space<vmem>>, vector<128x32xf32>
    %c0_1 = arith.constant 0 : index
    %c0_2 = arith.constant 0 : index
    %1 = vector.load %arg2[%c0_1, %c0_2] : memref<1x32xf32, #tpu.memory_space<vmem>>, vector<1x32xf32>
    %2 = vector.broadcast %1 : vector<1x32xf32> to vector<128x32xf32>
    %3 = arith.addf %0, %2 : vector<128x32xf32>
    %c0_3 = arith.constant 0 : index
    %c0_4 = arith.constant 0 : index
    %4 = vector.load %arg3[%c0_3, %c0_4] : memref<1x32xf32, #tpu.memory_space<vmem>>, vector<1x32xf32>
    %5 = vector.broadcast %4 : vector<1x32xf32> to vector<128x32xf32>
    %6 = arith.mulf %3, %5 : vector<128x32xf32>
    %cst = arith.constant 0.000000e+00 : f32
    %7 = vector.broadcast %cst : f32 to vector<128x32xf32>
    %8 = arith.maximumf %6, %7 : vector<128x32xf32>
    %9 = arith.truncf %8 : vector<128x32xf32> to vector<128x32xbf16>
    %c0_5 = arith.constant 0 : index
    %c0_6 = arith.constant 0 : index
    %10 = vector.load %arg4[%c0_5, %c0_6] : memref<32x32xbf16, #tpu.memory_space<vmem>>, vector<32x32xbf16>
    %cst_7 = arith.constant dense<0.000000e+00> : vector<128x32xf32>
    %11 = tpu.matmul %9, %10, %cst_7 {dimension_numbers = #tpu.dot_dimension_numbers<[1], [0], [0], [1], [0, 0, 1, 1], [], []>} : vector<128x32xbf16>, vector<32x32xbf16>, vector<128x32xf32> -> vector<128x32xf32>
    %c0_8 = arith.constant 0 : index
    %c0_9 = arith.constant 0 : index
    %12 = vector.load %arg5[%c0_8, %c0_9] : memref<128x32xf32, #tpu.memory_space<vmem>>, vector<128x32xf32>
    tpu.vector_store %arg5[%c0_8, %c0_9], %11 {strides = array<i32>} : memref<128x32xf32, #tpu.memory_space<vmem>>, vector<128x32xf32>,
    return
  }
  func.func @transform_0(%arg0: i32) -> (i32, i32) {
    %c0_i32 = arith.constant 0 : i32
    %c0_i32_0 = arith.constant 0 : i32
    return %arg0, %c0_i32 : i32, i32
  }
  func.func @transform_1(%arg0: i32) -> (i32, i32) {
    %c0_i32 = arith.constant 0 : i32
    %c0_i32_0 = arith.constant 0 : i32
    %c0_i32_1 = arith.constant 0 : i32
    return %c0_i32, %c0_i32_0 : i32, i32
  }
  func.func @transform_2(%arg0: i32) -> (i32, i32) {
    %c0_i32 = arith.constant 0 : i32
    %c0_i32_0 = arith.constant 0 : i32
    %c0_i32_1 = arith.constant 0 : i32
    return %c0_i32, %c0_i32_0 : i32, i32
  }
  func.func @transform_3(%arg0: i32) -> (i32, i32) {
    %c0_i32 = arith.constant 0 : i32
    %c0_i32_0 = arith.constant 0 : i32
    %c0_i32_1 = arith.constant 0 : i32
    return %c0_i32, %c0_i32_0 : i32, i32
  }
  func.func @transform_4(%arg0: i32) -> (i32, i32) {
    %c0_i32 = arith.constant 0 : i32
    %c0_i32_0 = arith.constant 0 : i32
    return %arg0, %c0_i32 : i32, i32
  }
}

module attributes {stable_mosaic.version = 11 : i64} {
  func.func @kernel(%arg0: i32, %arg1: i32, %arg2: memref<128x288xbf16, #tpu.memory_space<vmem>>, %arg3: memref<288x8xbf16, #tpu.memory_space<vmem>>, %arg4: memref<288x8xbf16, #tpu.memory_space<vmem>>, %arg5: memref<1x8xf32, #tpu.memory_space<vmem>>, %arg6: memref<1x8xf32, #tpu.memory_space<vmem>>, %arg7: memref<1x8xf32, #tpu.memory_space<vmem>>, %arg8: memref<1x8xf32, #tpu.memory_space<vmem>>, %arg9: memref<128x8xf32, #tpu.memory_space<vmem>>, %arg10: memref<128x8xf32, #tpu.memory_space<vmem>>, %arg11: memref<128x1xf32, #tpu.memory_space<vmem>>, %arg12: memref<128x8xf32, #tpu.memory_space<vmem>>, %arg13: memref<128x8xf32, #tpu.memory_space<vmem>>) attributes {dimension_semantics = [#tpu.dimension_semantics<parallel>, #tpu.dimension_semantics<arbitrary>], iteration_bounds = array<i64: 1, 1>, scalar_prefetch = 0 : i64, scratch_operands = 2 : i64, tpu.core_type = #tpu.core_type<tc>, window_params = [{transform_indices = @transform_0, window_bounds = array<i64: 128, 288>}, {transform_indices = @transform_1, window_bounds = array<i64: 288, 8>}, {transform_indices = @transform_2, window_bounds = array<i64: 288, 8>}, {pipeline_mode = #tpu.pipeline_mode<synchronous>, transform_indices = @transform_3, window_bounds = array<i64: 1, 8>}, {pipeline_mode = #tpu.pipeline_mode<synchronous>, transform_indices = @transform_4, window_bounds = array<i64: 1, 8>}, {pipeline_mode = #tpu.pipeline_mode<synchronous>, transform_indices = @transform_5, window_bounds = array<i64: 1, 8>}, {pipeline_mode = #tpu.pipeline_mode<synchronous>, transform_indices = @transform_6, window_bounds = array<i64: 1, 8>}, {transform_indices = @transform_7, window_bounds = array<i64: 128, 8>}, {transform_indices = @transform_8, window_bounds = array<i64: 128, 8>}, {transform_indices = @transform_9, window_bounds = array<i64: 128, 1>}]} {
    %c0_i32 = arith.constant 0 : i32
    %0 = arith.cmpi eq, %arg1, %c0_i32 : i32
    %1 = arith.extui %0 : i1 to i32
    %c0_i32_0 = arith.constant 0 : i32
    %2 = arith.cmpi ne, %1, %c0_i32_0 : i32
    scf.if %2 {
      %cst_17 = arith.constant 0.000000e+00 : f32
      %17 = vector.broadcast %cst_17 : f32 to vector<128x8xf32>
      %c0_18 = arith.constant 0 : index
      %c0_19 = arith.constant 0 : index
      %18 = vector.load %arg12[%c0_18, %c0_19] : memref<128x8xf32, #tpu.memory_space<vmem>>, vector<128x8xf32>
      tpu.vector_store %arg12[%c0_18, %c0_19], %17 {strides = array<i32>} : memref<128x8xf32, #tpu.memory_space<vmem>>, vector<128x8xf32>,
      %cst_20 = arith.constant 0.000000e+00 : f32
      %19 = vector.broadcast %cst_20 : f32 to vector<128x8xf32>
      %c0_21 = arith.constant 0 : index
      %c0_22 = arith.constant 0 : index
      %20 = vector.load %arg13[%c0_21, %c0_22] : memref<128x8xf32, #tpu.memory_space<vmem>>, vector<128x8xf32>
      tpu.vector_store %arg13[%c0_21, %c0_22], %19 {strides = array<i32>} : memref<128x8xf32, #tpu.memory_space<vmem>>, vector<128x8xf32>,
    } else {
    }
    %c0 = arith.constant 0 : index
    %c0_1 = arith.constant 0 : index
    %3 = vector.load %arg2[%c0, %c0_1] : memref<128x288xbf16, #tpu.memory_space<vmem>>, vector<128x288xbf16>
    %c0_2 = arith.constant 0 : index
    %c0_3 = arith.constant 0 : index
    %4 = vector.load %arg12[%c0_2, %c0_3] : memref<128x8xf32, #tpu.memory_space<vmem>>, vector<128x8xf32>
    %c0_4 = arith.constant 0 : index
    %c0_5 = arith.constant 0 : index
    %5 = vector.load %arg3[%c0_4, %c0_5] : memref<288x8xbf16, #tpu.memory_space<vmem>>, vector<288x8xbf16>
    %cst = arith.constant dense<0.000000e+00> : vector<128x8xf32>
    %6 = tpu.matmul %3, %5, %cst {dimension_numbers = #tpu.dot_dimension_numbers<[1], [0], [0], [1], [0, 0, 1, 1], [], []>} : vector<128x288xbf16>, vector<288x8xbf16>, vector<128x8xf32> -> vector<128x8xf32>
    %7 = arith.addf %4, %6 : vector<128x8xf32>
    %c0_6 = arith.constant 0 : index
    %c0_7 = arith.constant 0 : index
    %8 = vector.load %arg12[%c0_6, %c0_7] : memref<128x8xf32, #tpu.memory_space<vmem>>, vector<128x8xf32>
    tpu.vector_store %arg12[%c0_6, %c0_7], %7 {strides = array<i32>} : memref<128x8xf32, #tpu.memory_space<vmem>>, vector<128x8xf32>,
    %c0_8 = arith.constant 0 : index
    %c0_9 = arith.constant 0 : index
    %9 = vector.load %arg13[%c0_8, %c0_9] : memref<128x8xf32, #tpu.memory_space<vmem>>, vector<128x8xf32>
    %c0_10 = arith.constant 0 : index
    %c0_11 = arith.constant 0 : index
    %10 = vector.load %arg4[%c0_10, %c0_11] : memref<288x8xbf16, #tpu.memory_space<vmem>>, vector<288x8xbf16>
    %cst_12 = arith.constant dense<0.000000e+00> : vector<128x8xf32>
    %11 = tpu.matmul %3, %10, %cst_12 {dimension_numbers = #tpu.dot_dimension_numbers<[1], [0], [0], [1], [0, 0, 1, 1], [], []>} : vector<128x288xbf16>, vector<288x8xbf16>, vector<128x8xf32> -> vector<128x8xf32>
    %12 = arith.addf %9, %11 : vector<128x8xf32>
    %c0_13 = arith.constant 0 : index
    %c0_14 = arith.constant 0 : index
    %13 = vector.load %arg13[%c0_13, %c0_14] : memref<128x8xf32, #tpu.memory_space<vmem>>, vector<128x8xf32>
    tpu.vector_store %arg13[%c0_13, %c0_14], %12 {strides = array<i32>} : memref<128x8xf32, #tpu.memory_space<vmem>>, vector<128x8xf32>,
    %c0_i32_15 = arith.constant 0 : i32
    %14 = arith.cmpi eq, %arg1, %c0_i32_15 : i32
    %15 = arith.extui %14 : i1 to i32
    %c0_i32_16 = arith.constant 0 : i32
    %16 = arith.cmpi ne, %15, %c0_i32_16 : i32
    scf.if %16 {
      %c0_17 = arith.constant 0 : index
      %c0_18 = arith.constant 0 : index
      %17 = vector.load %arg12[%c0_17, %c0_18] : memref<128x8xf32, #tpu.memory_space<vmem>>, vector<128x8xf32>
      %c0_19 = arith.constant 0 : index
      %c0_20 = arith.constant 0 : index
      %18 = vector.load %arg5[%c0_19, %c0_20] : memref<1x8xf32, #tpu.memory_space<vmem>>, vector<1x8xf32>
      %19 = vector.broadcast %18 : vector<1x8xf32> to vector<128x8xf32>
      %20 = arith.addf %17, %19 : vector<128x8xf32>
      %c0_21 = arith.constant 0 : index
      %c0_22 = arith.constant 0 : index
      %21 = vector.load %arg7[%c0_21, %c0_22] : memref<1x8xf32, #tpu.memory_space<vmem>>, vector<1x8xf32>
      %22 = vector.broadcast %21 : vector<1x8xf32> to vector<128x8xf32>
      %23 = arith.mulf %20, %22 : vector<128x8xf32>
      %c0_23 = arith.constant 0 : index
      %c0_24 = arith.constant 0 : index
      %24 = vector.load %arg13[%c0_23, %c0_24] : memref<128x8xf32, #tpu.memory_space<vmem>>, vector<128x8xf32>
      %c0_25 = arith.constant 0 : index
      %c0_26 = arith.constant 0 : index
      %25 = vector.load %arg6[%c0_25, %c0_26] : memref<1x8xf32, #tpu.memory_space<vmem>>, vector<1x8xf32>
      %26 = vector.broadcast %25 : vector<1x8xf32> to vector<128x8xf32>
      %27 = arith.addf %24, %26 : vector<128x8xf32>
      %c0_27 = arith.constant 0 : index
      %c0_28 = arith.constant 0 : index
      %28 = vector.load %arg8[%c0_27, %c0_28] : memref<1x8xf32, #tpu.memory_space<vmem>>, vector<1x8xf32>
      %29 = vector.broadcast %28 : vector<1x8xf32> to vector<128x8xf32>
      %30 = arith.mulf %27, %29 : vector<128x8xf32>
      %c0_29 = arith.constant 0 : index
      %c0_30 = arith.constant 0 : index
      %31 = vector.load %arg9[%c0_29, %c0_30] : memref<128x8xf32, #tpu.memory_space<vmem>>, vector<128x8xf32>
      %cst_31 = arith.constant 2.000000e+00 : f32
      %32 = vector.broadcast %cst_31 : f32 to vector<128x8xf32>
      %33 = arith.addf %30, %32 : vector<128x8xf32>
      %34 = arith.negf %33 : vector<128x8xf32>
      %35 = math.exp %34 : vector<128x8xf32>
      %cst_32 = arith.constant 1.000000e+00 : f32
      %36 = vector.broadcast %cst_32 : f32 to vector<128x8xf32>
      %37 = arith.addf %36, %35 : vector<128x8xf32>
      %38 = arith.divf %36, %37 : vector<128x8xf32>
      %39 = arith.addf %31, %23 : vector<128x8xf32>
      %40 = arith.mulf %39, %38 : vector<128x8xf32>
      %c0_33 = arith.constant 0 : index
      %c0_34 = arith.constant 0 : index
      %41 = vector.load %arg10[%c0_33, %c0_34] : memref<128x8xf32, #tpu.memory_space<vmem>>, vector<128x8xf32>
      tpu.vector_store %arg10[%c0_33, %c0_34], %40 {strides = array<i32>} : memref<128x8xf32, #tpu.memory_space<vmem>>, vector<128x8xf32>,
      %42 = math.log %38 : vector<128x8xf32>
      %cst_35 = arith.constant dense<0.000000e+00> : vector<128xf32>
      %43 = vector.multi_reduction <add>, %42, %cst_35 [1] : vector<128x8xf32> to vector<128xf32>
      %44 = vector.shape_cast %43 : vector<128xf32> to vector<128x1xf32>
      %c0_36 = arith.constant 0 : index
      %c0_37 = arith.constant 0 : index
      %45 = vector.load %arg11[%c0_36, %c0_37] : memref<128x1xf32, #tpu.memory_space<vmem>>, vector<128x1xf32>
      tpu.vector_store %arg11[%c0_36, %c0_37], %44 {strides = array<i32>} : memref<128x1xf32, #tpu.memory_space<vmem>>, vector<128x1xf32>,
    } else {
    }
    return
  }
  func.func @transform_0(%arg0: i32, %arg1: i32) -> (i32, i32) {
    %c0_i32 = arith.constant 0 : i32
    return %arg0, %arg1 : i32, i32
  }
  func.func @transform_1(%arg0: i32, %arg1: i32) -> (i32, i32) {
    %c0_i32 = arith.constant 0 : i32
    %c0_i32_0 = arith.constant 0 : i32
    return %arg1, %c0_i32 : i32, i32
  }
  func.func @transform_2(%arg0: i32, %arg1: i32) -> (i32, i32) {
    %c0_i32 = arith.constant 0 : i32
    %c0_i32_0 = arith.constant 0 : i32
    return %arg1, %c0_i32 : i32, i32
  }
  func.func @transform_3(%arg0: i32, %arg1: i32) -> (i32, i32) {
    %c0_i32 = arith.constant 0 : i32
    %c0_i32_0 = arith.constant 0 : i32
    %c0_i32_1 = arith.constant 0 : i32
    return %c0_i32, %c0_i32_0 : i32, i32
  }
  func.func @transform_4(%arg0: i32, %arg1: i32) -> (i32, i32) {
    %c0_i32 = arith.constant 0 : i32
    %c0_i32_0 = arith.constant 0 : i32
    %c0_i32_1 = arith.constant 0 : i32
    return %c0_i32, %c0_i32_0 : i32, i32
  }
  func.func @transform_5(%arg0: i32, %arg1: i32) -> (i32, i32) {
    %c0_i32 = arith.constant 0 : i32
    %c0_i32_0 = arith.constant 0 : i32
    %c0_i32_1 = arith.constant 0 : i32
    return %c0_i32, %c0_i32_0 : i32, i32
  }
  func.func @transform_6(%arg0: i32, %arg1: i32) -> (i32, i32) {
    %c0_i32 = arith.constant 0 : i32
    %c0_i32_0 = arith.constant 0 : i32
    %c0_i32_1 = arith.constant 0 : i32
    return %c0_i32, %c0_i32_0 : i32, i32
  }
  func.func @transform_7(%arg0: i32, %arg1: i32) -> (i32, i32) {
    %c0_i32 = arith.constant 0 : i32
    %c0_i32_0 = arith.constant 0 : i32
    return %arg0, %c0_i32 : i32, i32
  }
  func.func @transform_8(%arg0: i32, %arg1: i32) -> (i32, i32) {
    %c0_i32 = arith.constant 0 : i32
    %c0_i32_0 = arith.constant 0 : i32
    return %arg0, %c0_i32 : i32, i32
  }
  func.func @transform_9(%arg0: i32, %arg1: i32) -> (i32, i32) {
    %c0_i32 = arith.constant 0 : i32
    %c0_i32_0 = arith.constant 0 : i32
    return %arg0, %c0_i32 : i32, i32
  }
}

module attributes {stable_mosaic.version = 11 : i64} {
  func.func @kernel(%arg0: i32, %arg1: i32, %arg2: memref<128x72xbf16, #tpu.memory_space<vmem>>, %arg3: memref<72x8xbf16, #tpu.memory_space<vmem>>, %arg4: memref<72x8xbf16, #tpu.memory_space<vmem>>, %arg5: memref<1x8xf32, #tpu.memory_space<vmem>>, %arg6: memref<1x8xf32, #tpu.memory_space<vmem>>, %arg7: memref<1x8xf32, #tpu.memory_space<vmem>>, %arg8: memref<1x8xf32, #tpu.memory_space<vmem>>, %arg9: memref<128x8xf32, #tpu.memory_space<vmem>>, %arg10: memref<128x1xf32, #tpu.memory_space<vmem>>, %arg11: memref<128x8xf32, #tpu.memory_space<vmem>>, %arg12: memref<128x8xf32, #tpu.memory_space<vmem>>) attributes {dimension_semantics = [#tpu.dimension_semantics<parallel>, #tpu.dimension_semantics<arbitrary>], iteration_bounds = array<i64: 1, 1>, scalar_prefetch = 0 : i64, scratch_operands = 2 : i64, tpu.core_type = #tpu.core_type<tc>, window_params = [{transform_indices = @transform_0, window_bounds = array<i64: 128, 72>}, {transform_indices = @transform_1, window_bounds = array<i64: 72, 8>}, {transform_indices = @transform_2, window_bounds = array<i64: 72, 8>}, {pipeline_mode = #tpu.pipeline_mode<synchronous>, transform_indices = @transform_3, window_bounds = array<i64: 1, 8>}, {pipeline_mode = #tpu.pipeline_mode<synchronous>, transform_indices = @transform_4, window_bounds = array<i64: 1, 8>}, {pipeline_mode = #tpu.pipeline_mode<synchronous>, transform_indices = @transform_5, window_bounds = array<i64: 1, 8>}, {pipeline_mode = #tpu.pipeline_mode<synchronous>, transform_indices = @transform_6, window_bounds = array<i64: 1, 8>}, {transform_indices = @transform_7, window_bounds = array<i64: 128, 8>}, {transform_indices = @transform_8, window_bounds = array<i64: 128, 1>}]} {
    %c0_i32 = arith.constant 0 : i32
    %0 = arith.cmpi eq, %arg1, %c0_i32 : i32
    %1 = arith.extui %0 : i1 to i32
    %c0_i32_0 = arith.constant 0 : i32
    %2 = arith.cmpi ne, %1, %c0_i32_0 : i32
    scf.if %2 {
      %cst_17 = arith.constant 0.000000e+00 : f32
      %17 = vector.broadcast %cst_17 : f32 to vector<128x8xf32>
      %c0_18 = arith.constant 0 : index
      %c0_19 = arith.constant 0 : index
      %18 = vector.load %arg11[%c0_18, %c0_19] : memref<128x8xf32, #tpu.memory_space<vmem>>, vector<128x8xf32>
      tpu.vector_store %arg11[%c0_18, %c0_19], %17 {strides = array<i32>} : memref<128x8xf32, #tpu.memory_space<vmem>>, vector<128x8xf32>,
      %cst_20 = arith.constant 0.000000e+00 : f32
      %19 = vector.broadcast %cst_20 : f32 to vector<128x8xf32>
      %c0_21 = arith.constant 0 : index
      %c0_22 = arith.constant 0 : index
      %20 = vector.load %arg12[%c0_21, %c0_22] : memref<128x8xf32, #tpu.memory_space<vmem>>, vector<128x8xf32>
      tpu.vector_store %arg12[%c0_21, %c0_22], %19 {strides = array<i32>} : memref<128x8xf32, #tpu.memory_space<vmem>>, vector<128x8xf32>,
    } else {
    }
    %c0 = arith.constant 0 : index
    %c0_1 = arith.constant 0 : index
    %3 = vector.load %arg2[%c0, %c0_1] : memref<128x72xbf16, #tpu.memory_space<vmem>>, vector<128x72xbf16>
    %c0_2 = arith.constant 0 : index
    %c0_3 = arith.constant 0 : index
    %4 = vector.load %arg11[%c0_2, %c0_3] : memref<128x8xf32, #tpu.memory_space<vmem>>, vector<128x8xf32>
    %c0_4 = arith.constant 0 : index
    %c0_5 = arith.constant 0 : index
    %5 = vector.load %arg3[%c0_4, %c0_5] : memref<72x8xbf16, #tpu.memory_space<vmem>>, vector<72x8xbf16>
    %cst = arith.constant dense<0.000000e+00> : vector<128x8xf32>
    %6 = tpu.matmul %3, %5, %cst {dimension_numbers = #tpu.dot_dimension_numbers<[1], [0], [0], [1], [0, 0, 1, 1], [], []>} : vector<128x72xbf16>, vector<72x8xbf16>, vector<128x8xf32> -> vector<128x8xf32>
    %7 = arith.addf %4, %6 : vector<128x8xf32>
    %c0_6 = arith.constant 0 : index
    %c0_7 = arith.constant 0 : index
    %8 = vector.load %arg11[%c0_6, %c0_7] : memref<128x8xf32, #tpu.memory_space<vmem>>, vector<128x8xf32>
    tpu.vector_store %arg11[%c0_6, %c0_7], %7 {strides = array<i32>} : memref<128x8xf32, #tpu.memory_space<vmem>>, vector<128x8xf32>,
    %c0_8 = arith.constant 0 : index
    %c0_9 = arith.constant 0 : index
    %9 = vector.load %arg12[%c0_8, %c0_9] : memref<128x8xf32, #tpu.memory_space<vmem>>, vector<128x8xf32>
    %c0_10 = arith.constant 0 : index
    %c0_11 = arith.constant 0 : index
    %10 = vector.load %arg4[%c0_10, %c0_11] : memref<72x8xbf16, #tpu.memory_space<vmem>>, vector<72x8xbf16>
    %cst_12 = arith.constant dense<0.000000e+00> : vector<128x8xf32>
    %11 = tpu.matmul %3, %10, %cst_12 {dimension_numbers = #tpu.dot_dimension_numbers<[1], [0], [0], [1], [0, 0, 1, 1], [], []>} : vector<128x72xbf16>, vector<72x8xbf16>, vector<128x8xf32> -> vector<128x8xf32>
    %12 = arith.addf %9, %11 : vector<128x8xf32>
    %c0_13 = arith.constant 0 : index
    %c0_14 = arith.constant 0 : index
    %13 = vector.load %arg12[%c0_13, %c0_14] : memref<128x8xf32, #tpu.memory_space<vmem>>, vector<128x8xf32>
    tpu.vector_store %arg12[%c0_13, %c0_14], %12 {strides = array<i32>} : memref<128x8xf32, #tpu.memory_space<vmem>>, vector<128x8xf32>,
    %c0_i32_15 = arith.constant 0 : i32
    %14 = arith.cmpi eq, %arg1, %c0_i32_15 : i32
    %15 = arith.extui %14 : i1 to i32
    %c0_i32_16 = arith.constant 0 : i32
    %16 = arith.cmpi ne, %15, %c0_i32_16 : i32
    scf.if %16 {
      %c0_17 = arith.constant 0 : index
      %c0_18 = arith.constant 0 : index
      %17 = vector.load %arg11[%c0_17, %c0_18] : memref<128x8xf32, #tpu.memory_space<vmem>>, vector<128x8xf32>
      %c0_19 = arith.constant 0 : index
      %c0_20 = arith.constant 0 : index
      %18 = vector.load %arg5[%c0_19, %c0_20] : memref<1x8xf32, #tpu.memory_space<vmem>>, vector<1x8xf32>
      %19 = vector.broadcast %18 : vector<1x8xf32> to vector<128x8xf32>
      %20 = arith.addf %17, %19 : vector<128x8xf32>
      %c0_21 = arith.constant 0 : index
      %c0_22 = arith.constant 0 : index
      %21 = vector.load %arg7[%c0_21, %c0_22] : memref<1x8xf32, #tpu.memory_space<vmem>>, vector<1x8xf32>
      %22 = vector.broadcast %21 : vector<1x8xf32> to vector<128x8xf32>
      %23 = arith.mulf %20, %22 : vector<128x8xf32>
      %c0_23 = arith.constant 0 : index
      %c0_24 = arith.constant 0 : index
      %24 = vector.load %arg12[%c0_23, %c0_24] : memref<128x8xf32, #tpu.memory_space<vmem>>, vector<128x8xf32>
      %c0_25 = arith.constant 0 : index
      %c0_26 = arith.constant 0 : index
      %25 = vector.load %arg6[%c0_25, %c0_26] : memref<1x8xf32, #tpu.memory_space<vmem>>, vector<1x8xf32>
      %26 = vector.broadcast %25 : vector<1x8xf32> to vector<128x8xf32>
      %27 = arith.addf %24, %26 : vector<128x8xf32>
      %c0_27 = arith.constant 0 : index
      %c0_28 = arith.constant 0 : index
      %28 = vector.load %arg8[%c0_27, %c0_28] : memref<1x8xf32, #tpu.memory_space<vmem>>, vector<1x8xf32>
      %29 = vector.broadcast %28 : vector<1x8xf32> to vector<128x8xf32>
      %30 = arith.mulf %27, %29 : vector<128x8xf32>
      %c0_29 = arith.constant 0 : index
      %c0_30 = arith.constant 0 : index
      %31 = vector.load %arg9[%c0_29, %c0_30] : memref<128x8xf32, #tpu.memory_space<vmem>>, vector<128x8xf32>
      %32 = arith.subf %31, %23 : vector<128x8xf32>
      %cst_31 = arith.constant 2.000000e+00 : f32
      %33 = vector.broadcast %cst_31 : f32 to vector<128x8xf32>
      %34 = arith.mulf %33, %30 : vector<128x8xf32>
      %35 = arith.mulf %32, %32 : vector<128x8xf32>
      %cst_32 = arith.constant -2.000000e+00 : f32
      %36 = vector.broadcast %cst_32 : f32 to vector<128x8xf32>
      %37 = arith.mulf %36, %30 : vector<128x8xf32>
      %38 = math.exp %37 : vector<128x8xf32>
      %39 = arith.mulf %35, %38 : vector<128x8xf32>
      %40 = arith.addf %34, %39 : vector<128x8xf32>
      %cst_33 = arith.constant 1.83787704 : f32
      %41 = vector.broadcast %cst_33 : f32 to vector<128x8xf32>
      %42 = arith.addf %40, %41 : vector<128x8xf32>
      %cst_34 = arith.constant -5.000000e-01 : f32
      %43 = vector.broadcast %cst_34 : f32 to vector<128x8xf32>
      %44 = arith.mulf %43, %42 : vector<128x8xf32>
      %cst_35 = arith.constant dense<0.000000e+00> : vector<128xf32>
      %45 = vector.multi_reduction <add>, %44, %cst_35 [1] : vector<128x8xf32> to vector<128xf32>
      %46 = vector.shape_cast %45 : vector<128xf32> to vector<128x1xf32>
      %c0_36 = arith.constant 0 : index
      %c0_37 = arith.constant 0 : index
      %47 = vector.load %arg10[%c0_36, %c0_37] : memref<128x1xf32, #tpu.memory_space<vmem>>, vector<128x1xf32>
      tpu.vector_store %arg10[%c0_36, %c0_37], %46 {strides = array<i32>} : memref<128x1xf32, #tpu.memory_space<vmem>>, vector<128x1xf32>,
    } else {
    }
    return
  }
  func.func @transform_0(%arg0: i32, %arg1: i32) -> (i32, i32) {
    %c0_i32 = arith.constant 0 : i32
    return %arg0, %arg1 : i32, i32
  }
  func.func @transform_1(%arg0: i32, %arg1: i32) -> (i32, i32) {
    %c0_i32 = arith.constant 0 : i32
    %c0_i32_0 = arith.constant 0 : i32
    return %arg1, %c0_i32 : i32, i32
  }
  func.func @transform_2(%arg0: i32, %arg1: i32) -> (i32, i32) {
    %c0_i32 = arith.constant 0 : i32
    %c0_i32_0 = arith.constant 0 : i32
    return %arg1, %c0_i32 : i32, i32
  }
  func.func @transform_3(%arg0: i32, %arg1: i32) -> (i32, i32) {
    %c0_i32 = arith.constant 0 : i32
    %c0_i32_0 = arith.constant 0 : i32
    %c0_i32_1 = arith.constant 0 : i32
    return %c0_i32, %c0_i32_0 : i32, i32
  }
  func.func @transform_4(%arg0: i32, %arg1: i32) -> (i32, i32) {
    %c0_i32 = arith.constant 0 : i32
    %c0_i32_0 = arith.constant 0 : i32
    %c0_i32_1 = arith.constant 0 : i32
    return %c0_i32, %c0_i32_0 : i32, i32
  }
  func.func @transform_5(%arg0: i32, %arg1: i32) -> (i32, i32) {
    %c0_i32 = arith.constant 0 : i32
    %c0_i32_0 = arith.constant 0 : i32
    %c0_i32_1 = arith.constant 0 : i32
    return %c0_i32, %c0_i32_0 : i32, i32
  }
  func.func @transform_6(%arg0: i32, %arg1: i32) -> (i32, i32) {
    %c0_i32 = arith.constant 0 : i32
    %c0_i32_0 = arith.constant 0 : i32
    %c0_i32_1 = arith.constant 0 : i32
    return %c0_i32, %c0_i32_0 : i32, i32
  }
  func.func @transform_7(%arg0: i32, %arg1: i32) -> (i32, i32) {
    %c0_i32 = arith.constant 0 : i32
    %c0_i32_0 = arith.constant 0 : i32
    return %arg0, %c0_i32 : i32, i32
  }
  func.func @transform_8(%arg0: i32, %arg1: i32) -> (i32, i32) {
    %c0_i32 = arith.constant 0 : i32
    %c0_i32_0 = arith.constant 0 : i32
    return %arg0, %c0_i32 : i32, i32
  }
}

module attributes {stable_mosaic.version = 11 : i64} {
  func.func @kernel(%arg0: i32, %arg1: memref<32x32xf32, #tpu.memory_space<vmem>>, %arg2: memref<1x32xf32, #tpu.memory_space<vmem>>, %arg3: memref<1x32xf32, #tpu.memory_space<vmem>>, %arg4: memref<32x32xf32, #tpu.memory_space<vmem>>, %arg5: memref<32x32xf32, #tpu.memory_space<vmem>>) attributes {dimension_semantics = [#tpu.dimension_semantics<parallel>], iteration_bounds = array<i64: 1>, scalar_prefetch = 0 : i64, scratch_operands = 0 : i64, tpu.core_type = #tpu.core_type<tc>, window_params = [{transform_indices = @transform_0, window_bounds = array<i64: 32, 32>}, {pipeline_mode = #tpu.pipeline_mode<synchronous>, transform_indices = @transform_1, window_bounds = array<i64: 1, 32>}, {pipeline_mode = #tpu.pipeline_mode<synchronous>, transform_indices = @transform_2, window_bounds = array<i64: 1, 32>}, {pipeline_mode = #tpu.pipeline_mode<synchronous>, transform_indices = @transform_3, window_bounds = array<i64: 32, 32>}, {transform_indices = @transform_4, window_bounds = array<i64: 32, 32>}]} {
    %c0 = arith.constant 0 : index
    %c0_0 = arith.constant 0 : index
    %0 = vector.load %arg1[%c0, %c0_0] : memref<32x32xf32, #tpu.memory_space<vmem>>, vector<32x32xf32>
    %c0_1 = arith.constant 0 : index
    %c0_2 = arith.constant 0 : index
    %1 = vector.load %arg2[%c0_1, %c0_2] : memref<1x32xf32, #tpu.memory_space<vmem>>, vector<1x32xf32>
    %2 = vector.broadcast %1 : vector<1x32xf32> to vector<32x32xf32>
    %3 = arith.addf %0, %2 : vector<32x32xf32>
    %c0_3 = arith.constant 0 : index
    %c0_4 = arith.constant 0 : index
    %4 = vector.load %arg3[%c0_3, %c0_4] : memref<1x32xf32, #tpu.memory_space<vmem>>, vector<1x32xf32>
    %5 = vector.broadcast %4 : vector<1x32xf32> to vector<32x32xf32>
    %6 = arith.mulf %3, %5 : vector<32x32xf32>
    %c0_5 = arith.constant 0 : index
    %c0_6 = arith.constant 0 : index
    %7 = vector.load %arg4[%c0_5, %c0_6] : memref<32x32xf32, #tpu.memory_space<vmem>>, vector<32x32xf32>
    %cst = arith.constant dense<0.000000e+00> : vector<32x32xf32>
    %8 = tpu.matmul %6, %7, %cst {dimension_numbers = #tpu.dot_dimension_numbers<[1], [0], [0], [1], [0, 0, 1, 1], [], []>} : vector<32x32xf32>, vector<32x32xf32>, vector<32x32xf32> -> vector<32x32xf32>
    %c0_7 = arith.constant 0 : index
    %c0_8 = arith.constant 0 : index
    %9 = vector.load %arg5[%c0_7, %c0_8] : memref<32x32xf32, #tpu.memory_space<vmem>>, vector<32x32xf32>
    tpu.vector_store %arg5[%c0_7, %c0_8], %8 {strides = array<i32>} : memref<32x32xf32, #tpu.memory_space<vmem>>, vector<32x32xf32>,
    return
  }
  func.func @transform_0(%arg0: i32) -> (i32, i32) {
    %c0_i32 = arith.constant 0 : i32
    %c0_i32_0 = arith.constant 0 : i32
    return %arg0, %c0_i32 : i32, i32
  }
  func.func @transform_1(%arg0: i32) -> (i32, i32) {
    %c0_i32 = arith.constant 0 : i32
    %c0_i32_0 = arith.constant 0 : i32
    %c0_i32_1 = arith.constant 0 : i32
    return %c0_i32, %c0_i32_0 : i32, i32
  }
  func.func @transform_2(%arg0: i32) -> (i32, i32) {
    %c0_i32 = arith.constant 0 : i32
    %c0_i32_0 = arith.constant 0 : i32
    %c0_i32_1 = arith.constant 0 : i32
    return %c0_i32, %c0_i32_0 : i32, i32
  }
  func.func @transform_3(%arg0: i32) -> (i32, i32) {
    %c0_i32 = arith.constant 0 : i32
    %c0_i32_0 = arith.constant 0 : i32
    %c0_i32_1 = arith.constant 0 : i32
    return %c0_i32, %c0_i32_0 : i32, i32
  }
  func.func @transform_4(%arg0: i32) -> (i32, i32) {
    %c0_i32 = arith.constant 0 : i32
    %c0_i32_0 = arith.constant 0 : i32
    return %arg0, %c0_i32 : i32, i32
  }
}

module attributes {stable_mosaic.version = 11 : i64} {
  func.func @kernel(%arg0: i32, %arg1: i32, %arg2: memref<32x32xf32, #tpu.memory_space<vmem>>, %arg3: memref<1x32xf32, #tpu.memory_space<vmem>>, %arg4: memref<1x32xf32, #tpu.memory_space<vmem>>, %arg5: memref<1x1xf32, #tpu.memory_space<vmem>>, %arg6: memref<1x32xf32, #tpu.memory_space<vmem>>, %arg7: memref<1x32xf32, #tpu.memory_space<vmem>>, %arg8: memref<1x32xf32, #tpu.memory_space<vmem>>) attributes {dimension_semantics = [#tpu.dimension_semantics<arbitrary>, #tpu.dimension_semantics<arbitrary>], iteration_bounds = array<i64: 2, 1>, scalar_prefetch = 0 : i64, scratch_operands = 3 : i64, tpu.core_type = #tpu.core_type<tc>, window_params = [{transform_indices = @transform_0, window_bounds = array<i64: 32, 32>}, {pipeline_mode = #tpu.pipeline_mode<synchronous>, transform_indices = @transform_1, window_bounds = array<i64: 1, 32>}, {pipeline_mode = #tpu.pipeline_mode<synchronous>, transform_indices = @transform_2, window_bounds = array<i64: 1, 32>}, {pipeline_mode = #tpu.pipeline_mode<synchronous>, transform_indices = @transform_3, window_bounds = array<i64: 1, 1>}]} {
    %0 = tpu.iota {dimensions = array<i32: 0>} : vector<32x1xi32>
    %c32_i32 = arith.constant 32 : i32
    %1 = arith.muli %arg1, %c32_i32 : i32
    %2 = vector.broadcast %1 : i32 to vector<32x1xi32>
    %3 = arith.addi %0, %2 : vector<32x1xi32>
    %c32_i32_0 = arith.constant 32 : i32
    %4 = vector.broadcast %c32_i32_0 : i32 to vector<32x1xi32>
    %5 = arith.cmpi slt, %3, %4 : vector<32x1xi32>
    %c0_i32 = arith.constant 0 : i32
    %6 = arith.cmpi eq, %arg0, %c0_i32 : i32
    %c0_i32_1 = arith.constant 0 : i32
    %7 = arith.cmpi eq, %arg1, %c0_i32_1 : i32
    %8 = arith.andi %6, %7 : i1
    %9 = arith.extui %8 : i1 to i32
    %c0_i32_2 = arith.constant 0 : i32
    %10 = arith.cmpi ne, %9, %c0_i32_2 : i32
    scf.if %10 {
      %cst = arith.constant 0.000000e+00 : f32
      %27 = vector.broadcast %cst : f32 to vector<1x32xf32>
      %c0 = arith.constant 0 : index
      %c0_12 = arith.constant 0 : index
      %28 = vector.load %arg6[%c0, %c0_12] : memref<1x32xf32, #tpu.memory_space<vmem>>, vector<1x32xf32>
      tpu.vector_store %arg6[%c0, %c0_12], %27 {strides = array<i32>} : memref<1x32xf32, #tpu.memory_space<vmem>>, vector<1x32xf32>,
    } else {
    }
    %c0_i32_3 = arith.constant 0 : i32
    %11 = arith.cmpi eq, %arg0, %c0_i32_3 : i32
    %12 = arith.extui %11 : i1 to i32
    %c0_i32_4 = arith.constant 0 : i32
    %13 = arith.cmpi ne, %12, %c0_i32_4 : i32
    scf.if %13 {
      %c0 = arith.constant 0 : index
      %c0_12 = arith.constant 0 : index
      %27 = vector.load %arg2[%c0, %c0_12] : memref<32x32xf32, #tpu.memory_space<vmem>>, vector<32x32xf32>
      %cst = arith.constant 0.000000e+00 : f32
      %28 = vector.shape_cast %5 : vector<32x1xi1> to vector<32x1xi1>
      %29 = vector.broadcast %28 : vector<32x1xi1> to vector<32x32xi1>
      %30 = vector.broadcast %cst : f32 to vector<32x32xf32>
      %31 = arith.select %29, %27, %30 : vector<32x32xi1>, vector<32x32xf32>
      %c0_13 = arith.constant 0 : index
      %c0_14 = arith.constant 0 : index
      %32 = vector.load %arg6[%c0_13, %c0_14] : memref<1x32xf32, #tpu.memory_space<vmem>>, vector<1x32xf32>
      %cst_15 = arith.constant dense<0.000000e+00> : vector<32xf32>
      %33 = vector.multi_reduction <add>, %31, %cst_15 [0] : vector<32x32xf32> to vector<32xf32>
      %34 = vector.shape_cast %33 : vector<32xf32> to vector<1x32xf32>
      %35 = arith.addf %32, %34 : vector<1x32xf32>
      %c0_16 = arith.constant 0 : index
      %c0_17 = arith.constant 0 : index
      %36 = vector.load %arg6[%c0_16, %c0_17] : memref<1x32xf32, #tpu.memory_space<vmem>>, vector<1x32xf32>
      tpu.vector_store %arg6[%c0_16, %c0_17], %35 {strides = array<i32>} : memref<1x32xf32, #tpu.memory_space<vmem>>, vector<1x32xf32>,
    } else {
    }
    %c1_i32 = arith.constant 1 : i32
    %14 = arith.cmpi eq, %arg0, %c1_i32 : i32
    %c0_i32_5 = arith.constant 0 : i32
    %15 = arith.cmpi eq, %arg1, %c0_i32_5 : i32
    %16 = arith.andi %14, %15 : i1
    %17 = arith.extui %16 : i1 to i32
    %c0_i32_6 = arith.constant 0 : i32
    %18 = arith.cmpi ne, %17, %c0_i32_6 : i32
    scf.if %18 {
      %c0 = arith.constant 0 : index
      %c0_12 = arith.constant 0 : index
      %27 = vector.load %arg6[%c0, %c0_12] : memref<1x32xf32, #tpu.memory_space<vmem>>, vector<1x32xf32>
      %cst = arith.constant 3.125000e-02 : f32
      %28 = vector.broadcast %cst : f32 to vector<1x32xf32>
      %29 = arith.mulf %27, %28 : vector<1x32xf32>
      %c0_13 = arith.constant 0 : index
      %c0_14 = arith.constant 0 : index
      %30 = vector.load %arg7[%c0_13, %c0_14] : memref<1x32xf32, #tpu.memory_space<vmem>>, vector<1x32xf32>
      tpu.vector_store %arg7[%c0_13, %c0_14], %29 {strides = array<i32>} : memref<1x32xf32, #tpu.memory_space<vmem>>, vector<1x32xf32>,
      %cst_15 = arith.constant 0.000000e+00 : f32
      %31 = vector.broadcast %cst_15 : f32 to vector<1x32xf32>
      %c0_16 = arith.constant 0 : index
      %c0_17 = arith.constant 0 : index
      %32 = vector.load %arg8[%c0_16, %c0_17] : memref<1x32xf32, #tpu.memory_space<vmem>>, vector<1x32xf32>
      tpu.vector_store %arg8[%c0_16, %c0_17], %31 {strides = array<i32>} : memref<1x32xf32, #tpu.memory_space<vmem>>, vector<1x32xf32>,
    } else {
    }
    %c1_i32_7 = arith.constant 1 : i32
    %19 = arith.cmpi eq, %arg0, %c1_i32_7 : i32
    %20 = arith.extui %19 : i1 to i32
    %c0_i32_8 = arith.constant 0 : i32
    %21 = arith.cmpi ne, %20, %c0_i32_8 : i32
    scf.if %21 {
      %c0 = arith.constant 0 : index
      %c0_12 = arith.constant 0 : index
      %27 = vector.load %arg2[%c0, %c0_12] : memref<32x32xf32, #tpu.memory_space<vmem>>, vector<32x32xf32>
      %c0_13 = arith.constant 0 : index
      %c0_14 = arith.constant 0 : index
      %28 = vector.load %arg7[%c0_13, %c0_14] : memref<1x32xf32, #tpu.memory_space<vmem>>, vector<1x32xf32>
      %29 = vector.broadcast %28 : vector<1x32xf32> to vector<32x32xf32>
      %30 = arith.subf %27, %29 : vector<32x32xf32>
      %cst = arith.constant 0.000000e+00 : f32
      %31 = vector.shape_cast %5 : vector<32x1xi1> to vector<32x1xi1>
      %32 = vector.broadcast %31 : vector<32x1xi1> to vector<32x32xi1>
      %33 = vector.broadcast %cst : f32 to vector<32x32xf32>
      %34 = arith.select %32, %30, %33 : vector<32x32xi1>, vector<32x32xf32>
      %c0_15 = arith.constant 0 : index
      %c0_16 = arith.constant 0 : index
      %35 = vector.load %arg8[%c0_15, %c0_16] : memref<1x32xf32, #tpu.memory_space<vmem>>, vector<1x32xf32>
      %36 = arith.mulf %34, %34 : vector<32x32xf32>
      %cst_17 = arith.constant dense<0.000000e+00> : vector<32xf32>
      %37 = vector.multi_reduction <add>, %36, %cst_17 [0] : vector<32x32xf32> to vector<32xf32>
      %38 = vector.shape_cast %37 : vector<32xf32> to vector<1x32xf32>
      %39 = arith.addf %35, %38 : vector<1x32xf32>
      %c0_18 = arith.constant 0 : index
      %c0_19 = arith.constant 0 : index
      %40 = vector.load %arg8[%c0_18, %c0_19] : memref<1x32xf32, #tpu.memory_space<vmem>>, vector<1x32xf32>
      tpu.vector_store %arg8[%c0_18, %c0_19], %39 {strides = array<i32>} : memref<1x32xf32, #tpu.memory_space<vmem>>, vector<1x32xf32>,
    } else {
    }
    %c1_i32_9 = arith.constant 1 : i32
    %22 = arith.cmpi eq, %arg0, %c1_i32_9 : i32
    %c0_i32_10 = arith.constant 0 : i32
    %23 = arith.cmpi eq, %arg1, %c0_i32_10 : i32
    %24 = arith.andi %22, %23 : i1
    %25 = arith.extui %24 : i1 to i32
    %c0_i32_11 = arith.constant 0 : i32
    %26 = arith.cmpi ne, %25, %c0_i32_11 : i32
    scf.if %26 {
      %c0 = arith.constant 0 : index
      %c0_12 = arith.constant 0 : index
      %27 = vector.load %arg8[%c0, %c0_12] : memref<1x32xf32, #tpu.memory_space<vmem>>, vector<1x32xf32>
      %cst = arith.constant 3.125000e-02 : f32
      %28 = vector.broadcast %cst : f32 to vector<1x32xf32>
      %29 = arith.mulf %27, %28 : vector<1x32xf32>
      %30 = math.sqrt %29 : vector<1x32xf32>
      %cst_13 = arith.constant 9.99999997E-7 : f32
      %31 = vector.broadcast %cst_13 : f32 to vector<1x32xf32>
      %32 = arith.addf %30, %31 : vector<1x32xf32>
      %cst_14 = arith.constant 1.000000e+00 : f32
      %33 = vector.broadcast %cst_14 : f32 to vector<1x32xf32>
      %34 = arith.divf %33, %32 : vector<1x32xf32>
      %35 = math.log %34 : vector<1x32xf32>
      %c0_15 = arith.constant 0 : index
      %c0_16 = arith.constant 0 : index
      %36 = vector.load %arg7[%c0_15, %c0_16] : memref<1x32xf32, #tpu.memory_space<vmem>>, vector<1x32xf32>
      %cst_17 = arith.constant 0.000000e+00 : f32
      %37 = vector.broadcast %cst_17 : f32 to vector<1x32xf32>
      %38 = arith.subf %37, %36 : vector<1x32xf32>
      %c0_18 = arith.constant 0 : index
      %c0_19 = arith.constant 0 : index
      %39 = vector.load %arg3[%c0_18, %c0_19] : memref<1x32xf32, #tpu.memory_space<vmem>>, vector<1x32xf32>
      tpu.vector_store %arg3[%c0_18, %c0_19], %38 {strides = array<i32>} : memref<1x32xf32, #tpu.memory_space<vmem>>, vector<1x32xf32>,
      %40 = math.exp %35 : vector<1x32xf32>
      %c0_20 = arith.constant 0 : index
      %c0_21 = arith.constant 0 : index
      %41 = vector.load %arg4[%c0_20, %c0_21] : memref<1x32xf32, #tpu.memory_space<vmem>>, vector<1x32xf32>
      tpu.vector_store %arg4[%c0_20, %c0_21], %40 {strides = array<i32>} : memref<1x32xf32, #tpu.memory_space<vmem>>, vector<1x32xf32>,
      %42 = vector.shape_cast %35 : vector<1x32xf32> to vector<1x1x32xf32>
      %cst_22 = arith.constant dense<0.000000e+00> : vector<1xf32>
      %43 = vector.multi_reduction <add>, %42, %cst_22 [1, 2] : vector<1x1x32xf32> to vector<1xf32>
      %44 = vector.shape_cast %43 : vector<1xf32> to vector<1x1x1xf32>
      %45 = vector.extract %44[0, 0, 0] : f32 from vector<1x1x1xf32>
      %46 = vector.broadcast %45 : f32 to vector<1x1xf32>
      %c0_23 = arith.constant 0 : index
      %c0_24 = arith.constant 0 : index
      %47 = vector.load %arg5[%c0_23, %c0_24] : memref<1x1xf32, #tpu.memory_space<vmem>>, vector<1x1xf32>
      tpu.vector_store %arg5[%c0_23, %c0_24], %46 {strides = array<i32>} : memref<1x1xf32, #tpu.memory_space<vmem>>, vector<1x1xf32>,
    } else {
    }
    return
  }
  func.func @transform_0(%arg0: i32, %arg1: i32) -> (i32, i32) {
    %c0_i32 = arith.constant 0 : i32
    %c0_i32_0 = arith.constant 0 : i32
    return %arg1, %c0_i32 : i32, i32
  }
  func.func @transform_1(%arg0: i32, %arg1: i32) -> (i32, i32) {
    %c0_i32 = arith.constant 0 : i32
    %c0_i32_0 = arith.constant 0 : i32
    %c0_i32_1 = arith.constant 0 : i32
    return %c0_i32, %c0_i32_0 : i32, i32
  }
  func.func @transform_2(%arg0: i32, %arg1: i32) -> (i32, i32) {
    %c0_i32 = arith.constant 0 : i32
    %c0_i32_0 = arith.constant 0 : i32
    %c0_i32_1 = arith.constant 0 : i32
    return %c0_i32, %c0_i32_0 : i32, i32
  }
  func.func @transform_3(%arg0: i32, %arg1: i32) -> (i32, i32) {
    %c0_i32 = arith.constant 0 : i32
    %c0_i32_0 = arith.constant 0 : i32
    %c0_i32_1 = arith.constant 0 : i32
    return %c0_i32, %c0_i32_0 : i32, i32
  }
}

module attributes {stable_mosaic.version = 11 : i64} {
  func.func @kernel(%arg0: i32, %arg1: i32, %arg2: i32, %arg3: memref<32x144xbf16, #tpu.memory_space<vmem>>, %arg4: memref<144x32xbf16, #tpu.memory_space<vmem>>, %arg5: memref<32x32xf32, #tpu.memory_space<vmem>>) attributes {dimension_semantics = [#tpu.dimension_semantics<parallel>, #tpu.dimension_semantics<parallel>, #tpu.dimension_semantics<arbitrary>], iteration_bounds = array<i64: 1, 1, 1>, scalar_prefetch = 0 : i64, scratch_operands = 0 : i64, tpu.core_type = #tpu.core_type<tc>, window_params = [{transform_indices = @transform_0, window_bounds = array<i64: 32, 144>}, {transform_indices = @transform_1, window_bounds = array<i64: 144, 32>}, {transform_indices = @transform_2, window_bounds = array<i64: 32, 32>}]} {
    %c0_i32 = arith.constant 0 : i32
    %0 = arith.cmpi eq, %arg2, %c0_i32 : i32
    %1 = arith.extui %0 : i1 to i32
    %c0_i32_0 = arith.constant 0 : i32
    %2 = arith.cmpi ne, %1, %c0_i32_0 : i32
    scf.if %2 {
      %cst_8 = arith.constant 0.000000e+00 : f32
      %9 = vector.broadcast %cst_8 : f32 to vector<32x32xf32>
      %c0_9 = arith.constant 0 : index
      %c0_10 = arith.constant 0 : index
      %10 = vector.load %arg5[%c0_9, %c0_10] : memref<32x32xf32, #tpu.memory_space<vmem>>, vector<32x32xf32>
      tpu.vector_store %arg5[%c0_9, %c0_10], %9 {strides = array<i32>} : memref<32x32xf32, #tpu.memory_space<vmem>>, vector<32x32xf32>,
    } else {
    }
    %c0 = arith.constant 0 : index
    %c0_1 = arith.constant 0 : index
    %3 = vector.load %arg5[%c0, %c0_1] : memref<32x32xf32, #tpu.memory_space<vmem>>, vector<32x32xf32>
    %c0_2 = arith.constant 0 : index
    %c0_3 = arith.constant 0 : index
    %4 = vector.load %arg3[%c0_2, %c0_3] : memref<32x144xbf16, #tpu.memory_space<vmem>>, vector<32x144xbf16>
    %c0_4 = arith.constant 0 : index
    %c0_5 = arith.constant 0 : index
    %5 = vector.load %arg4[%c0_4, %c0_5] : memref<144x32xbf16, #tpu.memory_space<vmem>>, vector<144x32xbf16>
    %cst = arith.constant dense<0.000000e+00> : vector<32x32xf32>
    %6 = tpu.matmul %4, %5, %cst {dimension_numbers = #tpu.dot_dimension_numbers<[1], [0], [0], [1], [0, 0, 1, 1], [], []>} : vector<32x144xbf16>, vector<144x32xbf16>, vector<32x32xf32> -> vector<32x32xf32>
    %7 = arith.addf %3, %6 : vector<32x32xf32>
    %c0_6 = arith.constant 0 : index
    %c0_7 = arith.constant 0 : index
    %8 = vector.load %arg5[%c0_6, %c0_7] : memref<32x32xf32, #tpu.memory_space<vmem>>, vector<32x32xf32>
    tpu.vector_store %arg5[%c0_6, %c0_7], %7 {strides = array<i32>} : memref<32x32xf32, #tpu.memory_space<vmem>>, vector<32x32xf32>,
    return
  }
  func.func @transform_0(%arg0: i32, %arg1: i32, %arg2: i32) -> (i32, i32) {
    %c0_i32 = arith.constant 0 : i32
    return %arg0, %arg2 : i32, i32
  }
  func.func @transform_1(%arg0: i32, %arg1: i32, %arg2: i32) -> (i32, i32) {
    %c0_i32 = arith.constant 0 : i32
    return %arg2, %arg1 : i32, i32
  }
  func.func @transform_2(%arg0: i32, %arg1: i32, %arg2: i32) -> (i32, i32) {
    %c0_i32 = arith.constant 0 : i32
    return %arg0, %arg1 : i32, i32
  }
}

module attributes {stable_mosaic.version = 11 : i64} {
  func.func @kernel(%arg0: i32, %arg1: memref<32x32xf32, #tpu.memory_space<vmem>>, %arg2: memref<1x32xf32, #tpu.memory_space<vmem>>, %arg3: memref<1x32xf32, #tpu.memory_space<vmem>>, %arg4: memref<32x32xbf16, #tpu.memory_space<vmem>>, %arg5: memref<32x32xf32, #tpu.memory_space<vmem>>) attributes {dimension_semantics = [#tpu.dimension_semantics<parallel>], iteration_bounds = array<i64: 1>, scalar_prefetch = 0 : i64, scratch_operands = 0 : i64, tpu.core_type = #tpu.core_type<tc>, window_params = [{transform_indices = @transform_0, window_bounds = array<i64: 32, 32>}, {pipeline_mode = #tpu.pipeline_mode<synchronous>, transform_indices = @transform_1, window_bounds = array<i64: 1, 32>}, {pipeline_mode = #tpu.pipeline_mode<synchronous>, transform_indices = @transform_2, window_bounds = array<i64: 1, 32>}, {pipeline_mode = #tpu.pipeline_mode<synchronous>, transform_indices = @transform_3, window_bounds = array<i64: 32, 32>}, {transform_indices = @transform_4, window_bounds = array<i64: 32, 32>}]} {
    %c0 = arith.constant 0 : index
    %c0_0 = arith.constant 0 : index
    %0 = vector.load %arg1[%c0, %c0_0] : memref<32x32xf32, #tpu.memory_space<vmem>>, vector<32x32xf32>
    %c0_1 = arith.constant 0 : index
    %c0_2 = arith.constant 0 : index
    %1 = vector.load %arg2[%c0_1, %c0_2] : memref<1x32xf32, #tpu.memory_space<vmem>>, vector<1x32xf32>
    %2 = vector.broadcast %1 : vector<1x32xf32> to vector<32x32xf32>
    %3 = arith.addf %0, %2 : vector<32x32xf32>
    %c0_3 = arith.constant 0 : index
    %c0_4 = arith.constant 0 : index
    %4 = vector.load %arg3[%c0_3, %c0_4] : memref<1x32xf32, #tpu.memory_space<vmem>>, vector<1x32xf32>
    %5 = vector.broadcast %4 : vector<1x32xf32> to vector<32x32xf32>
    %6 = arith.mulf %3, %5 : vector<32x32xf32>
    %cst = arith.constant 0.000000e+00 : f32
    %7 = vector.broadcast %cst : f32 to vector<32x32xf32>
    %8 = arith.maximumf %6, %7 : vector<32x32xf32>
    %9 = arith.truncf %8 : vector<32x32xf32> to vector<32x32xbf16>
    %c0_5 = arith.constant 0 : index
    %c0_6 = arith.constant 0 : index
    %10 = vector.load %arg4[%c0_5, %c0_6] : memref<32x32xbf16, #tpu.memory_space<vmem>>, vector<32x32xbf16>
    %cst_7 = arith.constant dense<0.000000e+00> : vector<32x32xf32>
    %11 = tpu.matmul %9, %10, %cst_7 {dimension_numbers = #tpu.dot_dimension_numbers<[1], [0], [0], [1], [0, 0, 1, 1], [], []>} : vector<32x32xbf16>, vector<32x32xbf16>, vector<32x32xf32> -> vector<32x32xf32>
    %c0_8 = arith.constant 0 : index
    %c0_9 = arith.constant 0 : index
    %12 = vector.load %arg5[%c0_8, %c0_9] : memref<32x32xf32, #tpu.memory_space<vmem>>, vector<32x32xf32>
    tpu.vector_store %arg5[%c0_8, %c0_9], %11 {strides = array<i32>} : memref<32x32xf32, #tpu.memory_space<vmem>>, vector<32x32xf32>,
    return
  }
  func.func @transform_0(%arg0: i32) -> (i32, i32) {
    %c0_i32 = arith.constant 0 : i32
    %c0_i32_0 = arith.constant 0 : i32
    return %arg0, %c0_i32 : i32, i32
  }
  func.func @transform_1(%arg0: i32) -> (i32, i32) {
    %c0_i32 = arith.constant 0 : i32
    %c0_i32_0 = arith.constant 0 : i32
    %c0_i32_1 = arith.constant 0 : i32
    return %c0_i32, %c0_i32_0 : i32, i32
  }
  func.func @transform_2(%arg0: i32) -> (i32, i32) {
    %c0_i32 = arith.constant 0 : i32
    %c0_i32_0 = arith.constant 0 : i32
    %c0_i32_1 = arith.constant 0 : i32
    return %c0_i32, %c0_i32_0 : i32, i32
  }
  func.func @transform_3(%arg0: i32) -> (i32, i32) {
    %c0_i32 = arith.constant 0 : i32
    %c0_i32_0 = arith.constant 0 : i32
    %c0_i32_1 = arith.constant 0 : i32
    return %c0_i32, %c0_i32_0 : i32, i32
  }
  func.func @transform_4(%arg0: i32) -> (i32, i32) {
    %c0_i32 = arith.constant 0 : i32
    %c0_i32_0 = arith.constant 0 : i32
    return %arg0, %c0_i32 : i32, i32
  }
}

module attributes {stable_mosaic.version = 11 : i64} {
  func.func @kernel(%arg0: i32, %arg1: memref<32x32xf32, #tpu.memory_space<vmem>>, %arg2: memref<1x32xf32, #tpu.memory_space<vmem>>, %arg3: memref<1x32xf32, #tpu.memory_space<vmem>>, %arg4: memref<32x32xbf16, #tpu.memory_space<vmem>>) attributes {dimension_semantics = [#tpu.dimension_semantics<parallel>], iteration_bounds = array<i64: 1>, scalar_prefetch = 0 : i64, scratch_operands = 0 : i64, tpu.core_type = #tpu.core_type<tc>, window_params = [{transform_indices = @transform_0, window_bounds = array<i64: 32, 32>}, {pipeline_mode = #tpu.pipeline_mode<synchronous>, transform_indices = @transform_1, window_bounds = array<i64: 1, 32>}, {pipeline_mode = #tpu.pipeline_mode<synchronous>, transform_indices = @transform_2, window_bounds = array<i64: 1, 32>}, {transform_indices = @transform_3, window_bounds = array<i64: 32, 32>}]} {
    %c0 = arith.constant 0 : index
    %c0_0 = arith.constant 0 : index
    %0 = vector.load %arg1[%c0, %c0_0] : memref<32x32xf32, #tpu.memory_space<vmem>>, vector<32x32xf32>
    %c0_1 = arith.constant 0 : index
    %c0_2 = arith.constant 0 : index
    %1 = vector.load %arg2[%c0_1, %c0_2] : memref<1x32xf32, #tpu.memory_space<vmem>>, vector<1x32xf32>
    %2 = vector.broadcast %1 : vector<1x32xf32> to vector<32x32xf32>
    %3 = arith.addf %0, %2 : vector<32x32xf32>
    %c0_3 = arith.constant 0 : index
    %c0_4 = arith.constant 0 : index
    %4 = vector.load %arg3[%c0_3, %c0_4] : memref<1x32xf32, #tpu.memory_space<vmem>>, vector<1x32xf32>
    %5 = vector.broadcast %4 : vector<1x32xf32> to vector<32x32xf32>
    %6 = arith.mulf %3, %5 : vector<32x32xf32>
    %cst = arith.constant 0.000000e+00 : f32
    %7 = vector.broadcast %cst : f32 to vector<32x32xf32>
    %8 = arith.maximumf %6, %7 : vector<32x32xf32>
    %9 = arith.truncf %8 : vector<32x32xf32> to vector<32x32xbf16>
    %c0_5 = arith.constant 0 : index
    %c0_6 = arith.constant 0 : index
    %10 = vector.load %arg4[%c0_5, %c0_6] : memref<32x32xbf16, #tpu.memory_space<vmem>>, vector<32x32xbf16>
    tpu.vector_store %arg4[%c0_5, %c0_6], %9 {strides = array<i32>} : memref<32x32xbf16, #tpu.memory_space<vmem>>, vector<32x32xbf16>,
    return
  }
  func.func @transform_0(%arg0: i32) -> (i32, i32) {
    %c0_i32 = arith.constant 0 : i32
    %c0_i32_0 = arith.constant 0 : i32
    return %arg0, %c0_i32 : i32, i32
  }
  func.func @transform_1(%arg0: i32) -> (i32, i32) {
    %c0_i32 = arith.constant 0 : i32
    %c0_i32_0 = arith.constant 0 : i32
    %c0_i32_1 = arith.constant 0 : i32
    return %c0_i32, %c0_i32_0 : i32, i32
  }
  func.func @transform_2(%arg0: i32) -> (i32, i32) {
    %c0_i32 = arith.constant 0 : i32
    %c0_i32_0 = arith.constant 0 : i32
    %c0_i32_1 = arith.constant 0 : i32
    return %c0_i32, %c0_i32_0 : i32, i32
  }
  func.func @transform_3(%arg0: i32) -> (i32, i32) {
    %c0_i32 = arith.constant 0 : i32
    %c0_i32_0 = arith.constant 0 : i32
    return %arg0, %c0_i32 : i32, i32
  }
}

module attributes {stable_mosaic.version = 11 : i64} {
  func.func @kernel(%arg0: i32, %arg1: i32, %arg2: memref<32x288xbf16, #tpu.memory_space<vmem>>, %arg3: memref<288x16xbf16, #tpu.memory_space<vmem>>, %arg4: memref<288x16xbf16, #tpu.memory_space<vmem>>, %arg5: memref<1x16xf32, #tpu.memory_space<vmem>>, %arg6: memref<1x16xf32, #tpu.memory_space<vmem>>, %arg7: memref<1x16xf32, #tpu.memory_space<vmem>>, %arg8: memref<1x16xf32, #tpu.memory_space<vmem>>, %arg9: memref<32x16xf32, #tpu.memory_space<vmem>>, %arg10: memref<32x16xf32, #tpu.memory_space<vmem>>, %arg11: memref<32x1xf32, #tpu.memory_space<vmem>>, %arg12: memref<32x16xf32, #tpu.memory_space<vmem>>, %arg13: memref<32x16xf32, #tpu.memory_space<vmem>>) attributes {dimension_semantics = [#tpu.dimension_semantics<parallel>, #tpu.dimension_semantics<arbitrary>], iteration_bounds = array<i64: 1, 1>, scalar_prefetch = 0 : i64, scratch_operands = 2 : i64, tpu.core_type = #tpu.core_type<tc>, window_params = [{transform_indices = @transform_0, window_bounds = array<i64: 32, 288>}, {transform_indices = @transform_1, window_bounds = array<i64: 288, 16>}, {transform_indices = @transform_2, window_bounds = array<i64: 288, 16>}, {pipeline_mode = #tpu.pipeline_mode<synchronous>, transform_indices = @transform_3, window_bounds = array<i64: 1, 16>}, {pipeline_mode = #tpu.pipeline_mode<synchronous>, transform_indices = @transform_4, window_bounds = array<i64: 1, 16>}, {pipeline_mode = #tpu.pipeline_mode<synchronous>, transform_indices = @transform_5, window_bounds = array<i64: 1, 16>}, {pipeline_mode = #tpu.pipeline_mode<synchronous>, transform_indices = @transform_6, window_bounds = array<i64: 1, 16>}, {transform_indices = @transform_7, window_bounds = array<i64: 32, 16>}, {transform_indices = @transform_8, window_bounds = array<i64: 32, 16>}, {transform_indices = @transform_9, window_bounds = array<i64: 32, 1>}]} {
    %c0_i32 = arith.constant 0 : i32
    %0 = arith.cmpi eq, %arg1, %c0_i32 : i32
    %1 = arith.extui %0 : i1 to i32
    %c0_i32_0 = arith.constant 0 : i32
    %2 = arith.cmpi ne, %1, %c0_i32_0 : i32
    scf.if %2 {
      %cst_17 = arith.constant 0.000000e+00 : f32
      %17 = vector.broadcast %cst_17 : f32 to vector<32x16xf32>
      %c0_18 = arith.constant 0 : index
      %c0_19 = arith.constant 0 : index
      %18 = vector.load %arg12[%c0_18, %c0_19] : memref<32x16xf32, #tpu.memory_space<vmem>>, vector<32x16xf32>
      tpu.vector_store %arg12[%c0_18, %c0_19], %17 {strides = array<i32>} : memref<32x16xf32, #tpu.memory_space<vmem>>, vector<32x16xf32>,
      %cst_20 = arith.constant 0.000000e+00 : f32
      %19 = vector.broadcast %cst_20 : f32 to vector<32x16xf32>
      %c0_21 = arith.constant 0 : index
      %c0_22 = arith.constant 0 : index
      %20 = vector.load %arg13[%c0_21, %c0_22] : memref<32x16xf32, #tpu.memory_space<vmem>>, vector<32x16xf32>
      tpu.vector_store %arg13[%c0_21, %c0_22], %19 {strides = array<i32>} : memref<32x16xf32, #tpu.memory_space<vmem>>, vector<32x16xf32>,
    } else {
    }
    %c0 = arith.constant 0 : index
    %c0_1 = arith.constant 0 : index
    %3 = vector.load %arg2[%c0, %c0_1] : memref<32x288xbf16, #tpu.memory_space<vmem>>, vector<32x288xbf16>
    %c0_2 = arith.constant 0 : index
    %c0_3 = arith.constant 0 : index
    %4 = vector.load %arg12[%c0_2, %c0_3] : memref<32x16xf32, #tpu.memory_space<vmem>>, vector<32x16xf32>
    %c0_4 = arith.constant 0 : index
    %c0_5 = arith.constant 0 : index
    %5 = vector.load %arg3[%c0_4, %c0_5] : memref<288x16xbf16, #tpu.memory_space<vmem>>, vector<288x16xbf16>
    %cst = arith.constant dense<0.000000e+00> : vector<32x16xf32>
    %6 = tpu.matmul %3, %5, %cst {dimension_numbers = #tpu.dot_dimension_numbers<[1], [0], [0], [1], [0, 0, 1, 1], [], []>} : vector<32x288xbf16>, vector<288x16xbf16>, vector<32x16xf32> -> vector<32x16xf32>
    %7 = arith.addf %4, %6 : vector<32x16xf32>
    %c0_6 = arith.constant 0 : index
    %c0_7 = arith.constant 0 : index
    %8 = vector.load %arg12[%c0_6, %c0_7] : memref<32x16xf32, #tpu.memory_space<vmem>>, vector<32x16xf32>
    tpu.vector_store %arg12[%c0_6, %c0_7], %7 {strides = array<i32>} : memref<32x16xf32, #tpu.memory_space<vmem>>, vector<32x16xf32>,
    %c0_8 = arith.constant 0 : index
    %c0_9 = arith.constant 0 : index
    %9 = vector.load %arg13[%c0_8, %c0_9] : memref<32x16xf32, #tpu.memory_space<vmem>>, vector<32x16xf32>
    %c0_10 = arith.constant 0 : index
    %c0_11 = arith.constant 0 : index
    %10 = vector.load %arg4[%c0_10, %c0_11] : memref<288x16xbf16, #tpu.memory_space<vmem>>, vector<288x16xbf16>
    %cst_12 = arith.constant dense<0.000000e+00> : vector<32x16xf32>
    %11 = tpu.matmul %3, %10, %cst_12 {dimension_numbers = #tpu.dot_dimension_numbers<[1], [0], [0], [1], [0, 0, 1, 1], [], []>} : vector<32x288xbf16>, vector<288x16xbf16>, vector<32x16xf32> -> vector<32x16xf32>
    %12 = arith.addf %9, %11 : vector<32x16xf32>
    %c0_13 = arith.constant 0 : index
    %c0_14 = arith.constant 0 : index
    %13 = vector.load %arg13[%c0_13, %c0_14] : memref<32x16xf32, #tpu.memory_space<vmem>>, vector<32x16xf32>
    tpu.vector_store %arg13[%c0_13, %c0_14], %12 {strides = array<i32>} : memref<32x16xf32, #tpu.memory_space<vmem>>, vector<32x16xf32>,
    %c0_i32_15 = arith.constant 0 : i32
    %14 = arith.cmpi eq, %arg1, %c0_i32_15 : i32
    %15 = arith.extui %14 : i1 to i32
    %c0_i32_16 = arith.constant 0 : i32
    %16 = arith.cmpi ne, %15, %c0_i32_16 : i32
    scf.if %16 {
      %c0_17 = arith.constant 0 : index
      %c0_18 = arith.constant 0 : index
      %17 = vector.load %arg12[%c0_17, %c0_18] : memref<32x16xf32, #tpu.memory_space<vmem>>, vector<32x16xf32>
      %c0_19 = arith.constant 0 : index
      %c0_20 = arith.constant 0 : index
      %18 = vector.load %arg5[%c0_19, %c0_20] : memref<1x16xf32, #tpu.memory_space<vmem>>, vector<1x16xf32>
      %19 = vector.broadcast %18 : vector<1x16xf32> to vector<32x16xf32>
      %20 = arith.addf %17, %19 : vector<32x16xf32>
      %c0_21 = arith.constant 0 : index
      %c0_22 = arith.constant 0 : index
      %21 = vector.load %arg7[%c0_21, %c0_22] : memref<1x16xf32, #tpu.memory_space<vmem>>, vector<1x16xf32>
      %22 = vector.broadcast %21 : vector<1x16xf32> to vector<32x16xf32>
      %23 = arith.mulf %20, %22 : vector<32x16xf32>
      %c0_23 = arith.constant 0 : index
      %c0_24 = arith.constant 0 : index
      %24 = vector.load %arg13[%c0_23, %c0_24] : memref<32x16xf32, #tpu.memory_space<vmem>>, vector<32x16xf32>
      %c0_25 = arith.constant 0 : index
      %c0_26 = arith.constant 0 : index
      %25 = vector.load %arg6[%c0_25, %c0_26] : memref<1x16xf32, #tpu.memory_space<vmem>>, vector<1x16xf32>
      %26 = vector.broadcast %25 : vector<1x16xf32> to vector<32x16xf32>
      %27 = arith.addf %24, %26 : vector<32x16xf32>
      %c0_27 = arith.constant 0 : index
      %c0_28 = arith.constant 0 : index
      %28 = vector.load %arg8[%c0_27, %c0_28] : memref<1x16xf32, #tpu.memory_space<vmem>>, vector<1x16xf32>
      %29 = vector.broadcast %28 : vector<1x16xf32> to vector<32x16xf32>
      %30 = arith.mulf %27, %29 : vector<32x16xf32>
      %c0_29 = arith.constant 0 : index
      %c0_30 = arith.constant 0 : index
      %31 = vector.load %arg9[%c0_29, %c0_30] : memref<32x16xf32, #tpu.memory_space<vmem>>, vector<32x16xf32>
      %cst_31 = arith.constant 2.000000e+00 : f32
      %32 = vector.broadcast %cst_31 : f32 to vector<32x16xf32>
      %33 = arith.addf %30, %32 : vector<32x16xf32>
      %34 = arith.negf %33 : vector<32x16xf32>
      %35 = math.exp %34 : vector<32x16xf32>
      %cst_32 = arith.constant 1.000000e+00 : f32
      %36 = vector.broadcast %cst_32 : f32 to vector<32x16xf32>
      %37 = arith.addf %36, %35 : vector<32x16xf32>
      %38 = arith.divf %36, %37 : vector<32x16xf32>
      %39 = arith.addf %31, %23 : vector<32x16xf32>
      %40 = arith.mulf %39, %38 : vector<32x16xf32>
      %c0_33 = arith.constant 0 : index
      %c0_34 = arith.constant 0 : index
      %41 = vector.load %arg10[%c0_33, %c0_34] : memref<32x16xf32, #tpu.memory_space<vmem>>, vector<32x16xf32>
      tpu.vector_store %arg10[%c0_33, %c0_34], %40 {strides = array<i32>} : memref<32x16xf32, #tpu.memory_space<vmem>>, vector<32x16xf32>,
      %42 = math.log %38 : vector<32x16xf32>
      %cst_35 = arith.constant dense<0.000000e+00> : vector<32xf32>
      %43 = vector.multi_reduction <add>, %42, %cst_35 [1] : vector<32x16xf32> to vector<32xf32>
      %44 = vector.shape_cast %43 : vector<32xf32> to vector<32x1xf32>
      %c0_36 = arith.constant 0 : index
      %c0_37 = arith.constant 0 : index
      %45 = vector.load %arg11[%c0_36, %c0_37] : memref<32x1xf32, #tpu.memory_space<vmem>>, vector<32x1xf32>
      tpu.vector_store %arg11[%c0_36, %c0_37], %44 {strides = array<i32>} : memref<32x1xf32, #tpu.memory_space<vmem>>, vector<32x1xf32>,
    } else {
    }
    return
  }
  func.func @transform_0(%arg0: i32, %arg1: i32) -> (i32, i32) {
    %c0_i32 = arith.constant 0 : i32
    return %arg0, %arg1 : i32, i32
  }
  func.func @transform_1(%arg0: i32, %arg1: i32) -> (i32, i32) {
    %c0_i32 = arith.constant 0 : i32
    %c0_i32_0 = arith.constant 0 : i32
    return %arg1, %c0_i32 : i32, i32
  }
  func.func @transform_2(%arg0: i32, %arg1: i32) -> (i32, i32) {
    %c0_i32 = arith.constant 0 : i32
    %c0_i32_0 = arith.constant 0 : i32
    return %arg1, %c0_i32 : i32, i32
  }
  func.func @transform_3(%arg0: i32, %arg1: i32) -> (i32, i32) {
    %c0_i32 = arith.constant 0 : i32
    %c0_i32_0 = arith.constant 0 : i32
    %c0_i32_1 = arith.constant 0 : i32
    return %c0_i32, %c0_i32_0 : i32, i32
  }
  func.func @transform_4(%arg0: i32, %arg1: i32) -> (i32, i32) {
    %c0_i32 = arith.constant 0 : i32
    %c0_i32_0 = arith.constant 0 : i32
    %c0_i32_1 = arith.constant 0 : i32
    return %c0_i32, %c0_i32_0 : i32, i32
  }
  func.func @transform_5(%arg0: i32, %arg1: i32) -> (i32, i32) {
    %c0_i32 = arith.constant 0 : i32
    %c0_i32_0 = arith.constant 0 : i32
    %c0_i32_1 = arith.constant 0 : i32
    return %c0_i32, %c0_i32_0 : i32, i32
  }
  func.func @transform_6(%arg0: i32, %arg1: i32) -> (i32, i32) {
    %c0_i32 = arith.constant 0 : i32
    %c0_i32_0 = arith.constant 0 : i32
    %c0_i32_1 = arith.constant 0 : i32
    return %c0_i32, %c0_i32_0 : i32, i32
  }
  func.func @transform_7(%arg0: i32, %arg1: i32) -> (i32, i32) {
    %c0_i32 = arith.constant 0 : i32
    %c0_i32_0 = arith.constant 0 : i32
    return %arg0, %c0_i32 : i32, i32
  }
  func.func @transform_8(%arg0: i32, %arg1: i32) -> (i32, i32) {
    %c0_i32 = arith.constant 0 : i32
    %c0_i32_0 = arith.constant 0 : i32
    return %arg0, %c0_i32 : i32, i32
  }
  func.func @transform_9(%arg0: i32, %arg1: i32) -> (i32, i32) {
    %c0_i32 = arith.constant 0 : i32
    %c0_i32_0 = arith.constant 0 : i32
    return %arg0, %c0_i32 : i32, i32
  }
}

module attributes {stable_mosaic.version = 11 : i64} {
  func.func @kernel(%arg0: i32, %arg1: memref<2x512xf32, #tpu.memory_space<vmem>>, %arg2: memref<2x1xf32, #tpu.memory_space<vmem>>) attributes {dimension_semantics = [#tpu.dimension_semantics<arbitrary>], iteration_bounds = array<i64: 1>, scalar_prefetch = 0 : i64, scratch_operands = 0 : i64, tpu.core_type = #tpu.core_type<tc>, window_params = [{transform_indices = @transform_0, window_bounds = array<i64: 2, 512>}, {pipeline_mode = #tpu.pipeline_mode<synchronous>, transform_indices = @transform_1, window_bounds = array<i64: 2, 1>}]} {
    %c0_i32 = arith.constant 0 : i32
    %0 = arith.cmpi eq, %arg0, %c0_i32 : i32
    %1 = arith.extui %0 : i1 to i32
    %c0_i32_0 = arith.constant 0 : i32
    %2 = arith.cmpi ne, %1, %c0_i32_0 : i32
    scf.if %2 {
      %cst_10 = arith.constant 0.000000e+00 : f32
      %18 = vector.broadcast %cst_10 : f32 to vector<2x1xf32>
      %c0_11 = arith.constant 0 : index
      %c0_12 = arith.constant 0 : index
      %19 = vector.load %arg2[%c0_11, %c0_12] : memref<2x1xf32, #tpu.memory_space<vmem>>, vector<2x1xf32>
      tpu.vector_store %arg2[%c0_11, %c0_12], %18 {strides = array<i32>} : memref<2x1xf32, #tpu.memory_space<vmem>>, vector<2x1xf32>,
    } else {
    }
    %c0 = arith.constant 0 : index
    %c0_1 = arith.constant 0 : index
    %3 = vector.load %arg1[%c0, %c0_1] : memref<2x512xf32, #tpu.memory_space<vmem>>, vector<2x512xf32>
    %4 = arith.mulf %3, %3 : vector<2x512xf32>
    %cst = arith.constant 0.135335281 : f32
    %5 = vector.broadcast %cst : f32 to vector<2x512xf32>
    %6 = arith.mulf %4, %5 : vector<2x512xf32>
    %cst_2 = arith.constant 2.000000e+00 : f32
    %7 = vector.broadcast %cst_2 : f32 to vector<2x512xf32>
    %8 = arith.addf %7, %6 : vector<2x512xf32>
    %cst_3 = arith.constant 1.83787704 : f32
    %9 = vector.broadcast %cst_3 : f32 to vector<2x512xf32>
    %10 = arith.addf %8, %9 : vector<2x512xf32>
    %cst_4 = arith.constant -5.000000e-01 : f32
    %11 = vector.broadcast %cst_4 : f32 to vector<2x512xf32>
    %12 = arith.mulf %11, %10 : vector<2x512xf32>
    %c0_5 = arith.constant 0 : index
    %c0_6 = arith.constant 0 : index
    %13 = vector.load %arg2[%c0_5, %c0_6] : memref<2x1xf32, #tpu.memory_space<vmem>>, vector<2x1xf32>
    %cst_7 = arith.constant dense<0.000000e+00> : vector<2xf32>
    %14 = vector.multi_reduction <add>, %12, %cst_7 [1] : vector<2x512xf32> to vector<2xf32>
    %15 = vector.shape_cast %14 : vector<2xf32> to vector<2x1xf32>
    %16 = arith.addf %13, %15 : vector<2x1xf32>
    %c0_8 = arith.constant 0 : index
    %c0_9 = arith.constant 0 : index
    %17 = vector.load %arg2[%c0_8, %c0_9] : memref<2x1xf32, #tpu.memory_space<vmem>>, vector<2x1xf32>
    tpu.vector_store %arg2[%c0_8, %c0_9], %16 {strides = array<i32>} : memref<2x1xf32, #tpu.memory_space<vmem>>, vector<2x1xf32>,
    return
  }
  func.func @transform_0(%arg0: i32) -> (i32, i32) {
    %c0_i32 = arith.constant 0 : i32
    %c0_i32_0 = arith.constant 0 : i32
    return %c0_i32, %arg0 : i32, i32
  }
  func.func @transform_1(%arg0: i32) -> (i32, i32) {
    %c0_i32 = arith.constant 0 : i32
    %c0_i32_0 = arith.constant 0 : i32
    %c0_i32_1 = arith.constant 0 : i32
    return %c0_i32, %c0_i32_0 : i32, i32
  }
}

</mosaic_0001>

<bundles_post_ra>
// kernel: _lambda_.35
= control target key start
LH: loop header
LB: loop body
LE: loop exit
PB: predicated region body
PF: predicated region fallthrough
CT: control target
= control target key end

     0   :  { %vm81_vm0 = vcmask 130048   ;;  %s548_s3 = inlined_call_operand.vmem [shape: f32[16,16], index: 3, kind: input, shape index: {}]   ;;  %s549_s0 = inlined_call_operand.vmem [shape: f32[128,16], index: 0, kind: input, shape index: {}]   ;;  %s550_s1 = inlined_call_operand.vmem [shape: f32[1,16], index: 1, kind: input, shape index: {}]   ;;  %s551_s2 = inlined_call_operand.vmem [shape: f32[1,16], index: 2, kind: input, shape index: {}]   ;;  %s552_s4 = inlined_call_operand.vmem [shape: f32[128,16], index: 4, kind: output, shape index: {}]  }
   0x1   :  { %v79_v0 = vld [vmem:[%s548_s3] sm:$0xff]  ;;  %v80_v1 = vld [vmem:[%s548_s3 + $0x8] sm:$0xff]  ;;  %v19_v11 = vld [vmem:[%s549_s0 + $0x10] sm:$0xff] }
   0x2   :  { %v17_v2 = vld [vmem:[%s549_s0] sm:$0xff]  ;;  %v359_v3 = vpack.c.bf16 %v80_v1, %v79_v0  ;;  %v18_v9 = vld [vmem:[%s549_s0 + $0x8] sm:$0xff]  ;;  %v27_v15 = vld [vmem:[%s549_s0 + $0x50] sm:$0xff] }
   0x3   :  { %v295_v4 = vld [vmem:[%s550_s1] ss:$0 sm:$0xff]  ;;  %v26_v10 = vld [vmem:[%s549_s0 + $0x48] sm:$0xff]  ;;  %v20_v16 = vld [vmem:[%s549_s0 + $0x18] sm:$0xff] }
   0x4   :  { %v405_v5 = vld [vmem:[%s551_s2] ss:$0 sm:$0xff]  ;;  %v40_v7 = vadd.f32 %v295_v4, %v17_v2  ;;  %360 = vmatprep.subr.bf16.mxu0 %v359_v3  ;;  %363 = vmatprep.subr.bf16.mxu1 %v359_v3  ;;  %v41_v12 = vadd.f32 %v295_v4, %v18_v9  ;;  %v49_v13 = vadd.f32 %v295_v4, %v26_v10  ;;  %v28_v17 = vld [vmem:[%s549_s0 + $0x58] sm:$0xff]  ;;  %v22_v23 = vld [vmem:[%s549_s0 + $0x28] sm:$0xff] }
   0x5   :  { %v25_v6 = vld [vmem:[%s549_s0 + $0x40] sm:$0xff]  ;;  %v42_v14 = vadd.f32 %v295_v4, %v19_v11  ;;  %362 = vmatpush3.bf16.msra.mxu0 %v359_v3  ;;  %364 = vmatpush3.bf16.msra.mxu1 %v359_v3  ;;  %v50_v20 = vadd.f32 %v295_v4, %v27_v15  ;;  %v43_v27 = vadd.f32 %v295_v4, %v20_v16  ;;  %v30_v28 = vld [vmem:[%s549_s0 + $0x68] sm:$0xff]  ;;  %v23_v32 = vld [vmem:[%s549_s0 + $0x30] sm:$0xff] }
   0x6   :  { %v48_v8 = vadd.f32 %v295_v4, %v25_v6  ;;  %v63_v18 = vmul.f32 %v405_v5, %v40_v7  ;;  %v21_v21 = vld [vmem:[%s549_s0 + $0x20] sm:$0xff]  ;;  %v64_v24 = vmul.f32 %v405_v5, %v41_v12  ;;  %v72_v25 = vmul.f32 %v405_v5, %v49_v13  ;;  %v31_v33 = vld [vmem:[%s549_s0 + $0x70] sm:$0xff]  ;;  %v24_v40 = vld [vmem:[%s549_s0 + $0x38] sm:$0xff] }
   0x7   :  { %v29_v22 = vld [vmem:[%s549_s0 + $0x60] sm:$0xff]  ;;  %v65_v26 = vmul.f32 %v405_v5, %v42_v14  ;;  %v73_v29 = vmul.f32 %v405_v5, %v50_v20  ;;  %v51_v30 = vadd.f32 %v295_v4, %v28_v17  ;;  %v44_v31 = vadd.f32 %v295_v4, %v21_v21  ;;  %v32_v41 = vld [vmem:[%s549_s0 + $0x78] sm:$0xff] }
   0x8   :  { %v71_v19 = vmul.f32 %v405_v5, %v48_v8  ;;  %335 = vmatprep.mubr.msk.f32.mxu0 %vm81_vm0, %v63_v18  ;;  %v66_v34 = vmul.f32 %v405_v5, %v43_v27  ;;  %v52_v35 = vadd.f32 %v295_v4, %v29_v22  ;;  %v45_v36 = vadd.f32 %v295_v4, %v22_v23 }
   0x9   :  { %336 = vmatmul.mubr.msk.f32.vlgmr.msra.gmra.mrb[0].mxu0 %vm81_vm0, %v64_v24  ;;  %v74_v37 = vmul.f32 %v405_v5, %v51_v30  ;;  %v67_v38 = vmul.f32 %v405_v5, %v44_v31  ;;  %v53_v39 = vadd.f32 %v295_v4, %v30_v28  ;;  %v46_v43 = vadd.f32 %v295_v4, %v23_v32 }
   0xa   :  { %347 = vmatprep.mubr.msk.f32.mxu1 %vm81_vm0, %v71_v19  ;;  %338 = vmatprep.mubr.msk.f32.mxu0 %vm81_vm0, %v65_v26  ;;  %v75_v42 = vmul.f32 %v405_v5, %v52_v35  ;;  %v54_v44 = vadd.f32 %v295_v4, %v31_v33  ;;  %v68_v45 = vmul.f32 %v405_v5, %v45_v36 }
   0xb   :  { %348 = vmatmul.mubr.msk.f32.vlgmr.msra.gmra.mrb[0].mxu1 %vm81_vm0, %v72_v25  ;;  %v76_v46 = vmul.f32 %v405_v5, %v53_v39  ;;  %v47_v47 = vadd.f32 %v295_v4, %v24_v40  ;;  %v55_v48 = vadd.f32 %v295_v4, %v32_v41  ;;  %v69_v49 = vmul.f32 %v405_v5, %v46_v43 }
   0xc   :  { %350 = vmatprep.mubr.msk.f32.mxu1 %vm81_vm0, %v73_v29  ;;  %v77_v50 = vmul.f32 %v405_v5, %v54_v44 }
   0xd   :  { %339 = vmatmul.mubr.msk.f32.gmra.mrb[2].mxu0 %vm81_vm0, %v66_v34  ;;  %v70_v51 = vmul.f32 %v405_v5, %v47_v47  ;;  %v78_v52 = vmul.f32 %v405_v5, %v55_v48 }
   0xe   :  { %341 = vmatprep.mubr.msk.f32.mxu0 %vm81_vm0, %v67_v38 }
   0xf   :  { %351 = vmatmul.mubr.msk.f32.gmra.mrb[2].mxu1 %vm81_vm0, %v74_v37 }
  0x10   :  { %353 = vmatprep.mubr.msk.f32.mxu1 %vm81_vm0, %v75_v42 }
  0x11   :  { %342 = vmatmul.mubr.msk.f32.gmra.mrb[4].mxu0 %vm81_vm0, %v68_v45 }
  0x12   :  { %344 = vmatprep.mubr.msk.f32.mxu0 %vm81_vm0, %v69_v49 }
  0x13   :  { %354 = vmatmul.mubr.msk.f32.gmra.mrb[4].mxu1 %vm81_vm0, %v76_v46 }
  0x14   :  { %356 = vmatprep.mubr.msk.f32.mxu1 %vm81_vm0, %v77_v50 }
  0x15   :  { %345 = vmatmul.mubr.msk.f32.gmra.mrb[6].mxu0 %vm81_vm0, %v70_v51 }
  0x17   :  { %357 = vmatmul.mubr.msk.f32.gmra.mrb[6].mxu1 %vm81_vm0, %v78_v52 }
  0xdc   :  { %v337_v53 = vpop.f32.mrb[0].mxu0 }
  0xdd   :  { %276 = vst.msk [vmem:[%s552_s4 + $0x8] sm:$0xff] %vm81_vm0, %v337_v53  ;;  %v196_v55 = vpop.f32.mrb[1].mxu0 }
  0xde   :  { %v349_v54 = vpop.f32.mrb[0].mxu1  ;;  %275 = vst.msk [vmem:[%s552_s4] sm:$0xff] %vm81_vm0, %v196_v55 }
  0xdf   :  { %284 = vst.msk [vmem:[%s552_s4 + $0x48] sm:$0xff] %vm81_vm0, %v349_v54  ;;  %v236_v56 = vpop.f32.mrb[1].mxu1 }
  0xe0   :  { %283 = vst.msk [vmem:[%s552_s4 + $0x40] sm:$0xff] %vm81_vm0, %v236_v56  ;;  %v340_v57 = vpop.f32.mrb[2].mxu0 }
  0xe1   :  { %278 = vst.msk [vmem:[%s552_s4 + $0x18] sm:$0xff] %vm81_vm0, %v340_v57  ;;  %v206_v59 = vpop.f32.mrb[3].mxu0 }
  0xe2   :  { %v352_v58 = vpop.f32.mrb[2].mxu1  ;;  %277 = vst.msk [vmem:[%s552_s4 + $0x10] sm:$0xff] %vm81_vm0, %v206_v59 }
  0xe3   :  { %286 = vst.msk [vmem:[%s552_s4 + $0x58] sm:$0xff] %vm81_vm0, %v352_v58  ;;  %v246_v60 = vpop.f32.mrb[3].mxu1 }
  0xe4   :  { %285 = vst.msk [vmem:[%s552_s4 + $0x50] sm:$0xff] %vm81_vm0, %v246_v60  ;;  %v343_v61 = vpop.f32.mrb[4].mxu0 }
  0xe5   :  { %280 = vst.msk [vmem:[%s552_s4 + $0x28] sm:$0xff] %vm81_vm0, %v343_v61  ;;  %v216_v63 = vpop.f32.mrb[5].mxu0 }
  0xe6   :  { %v355_v62 = vpop.f32.mrb[4].mxu1  ;;  %279 = vst.msk [vmem:[%s552_s4 + $0x20] sm:$0xff] %vm81_vm0, %v216_v63 }
  0xe7   :  { %288 = vst.msk [vmem:[%s552_s4 + $0x68] sm:$0xff] %vm81_vm0, %v355_v62  ;;  %v256_v0 = vpop.f32.mrb[5].mxu1 }
  0xe8   :  { %287 = vst.msk [vmem:[%s552_s4 + $0x60] sm:$0xff] %vm81_vm0, %v256_v0  ;;  %v346_v1 = vpop.f32.mrb[6].mxu0 }
  0xe9   :  { %282 = vst.msk [vmem:[%s552_s4 + $0x38] sm:$0xff] %vm81_vm0, %v346_v1  ;;  %v226_v3 = vpop.f32.mrb[7].mxu0 }
  0xea   :  { %v358_v2 = vpop.f32.mrb[6].mxu1  ;;  %281 = vst.msk [vmem:[%s552_s4 + $0x30] sm:$0xff] %vm81_vm0, %v226_v3 }
  0xeb   :  { %290 = vst.msk [vmem:[%s552_s4 + $0x78] sm:$0xff] %vm81_vm0, %v358_v2  ;;  %v266_v4 = vpop.f32.mrb[7].mxu1 }
  0xec   :  { %289 = vst.msk [vmem:[%s552_s4 + $0x70] sm:$0xff] %vm81_vm0, %v266_v4 }

// kernel: _lambda_.34
= control target key start
LH: loop header
LB: loop body
LE: loop exit
PB: predicated region body
PF: predicated region fallthrough
CT: control target
= control target key end

     0   :  { %9 = vsyncpa [#allocation6], 0  ;;  %s733_s12 = smov 0   ;;  %s735_s13 = smov 0   ;;  %s936_s0 = inlined_call_operand.vmem [shape: f32[128,16], index: 0, kind: input, shape index: {}]   ;;  %s937_s1 = inlined_call_operand.vmem [shape: f32[1,16], index: 1, kind: output, shape index: {0}]   ;;  %s938_s2 = inlined_call_operand.vmem [shape: f32[1,16], index: 2, kind: output, shape index: {1}]   ;;  %s939_s3 = inlined_call_operand.hbm [shape: f32[1,1], index: 3, kind: output, shape index: {2}]  }
   0x1   :  { %s737_s14 = smov 0  }
   0x2 LB: > { %s598_s15 = sadd.s32 4294967295, %s708_s14   ;;  %s27_s16 = sadd.s32 1, %s704_s13  ;;  %s708_s14 = sphi %s737_s14, %s15_s14   ;;  %s704_s13 = sphi %s735_s13, %s942_s13   ;;  %s700_s12 = sphi %s733_s12, %s941_s12  }
   0x3   : > { %p29_p0 = scmp.ge.s32.totalorder %s27_s16, 2  ;;  %p601_p1 = scmp.ge.s32.totalorder %s708_s14, 1 }
   0x4   : > { %p141_p2 = scmp.lt.s32.totalorder %s708_s14, 3 }
   0x5   : > { %s944_s16 = smov (%p29_p0, %s27_s16), 0 }
   0x6   : > { %p142_p3 = pnand %p601_p1, %p141_p2 }
   0x7   : > { %p217_p4 = scmp.eq.s32.totalorder (!%p142_p3), %s700_s12, 0 }
   0x8   : > { %145 = sbr.rel (%p142_p3) target bundleno = 419 (0x1a3), region = 24 }
   0xf   : > { %222 = sbr.rel (!%p217_p4) target bundleno = 22 (0x16), region = 28  ;;  %vm223_vm0 = vcmask (%p217_p4), 122880   ;;  %v710_v0 = vmov (%p217_p4), 0.0  }
  0x10   : > { %224 = vst.msk [vmem:[#allocation2] sm:$0x1] (%p217_p4), %vm223_vm0, %v710_v0 }
  0x16 PF: > { %p603_p5 = scmp.ne.s32.totalorder %s700_s12, 0 }
  0x17   : > { %v228_v1 = vld [vmem:[%s936_s0] sm:$0xff] (!%p603_p5)  ;;  %v229_v2 = vld [vmem:[%s936_s0 + $0x8] sm:$0xff] (!%p603_p5)  ;;  %v230_v3 = vld [vmem:[%s936_s0 + $0x10] sm:$0xff] (!%p603_p5)  ;;  %vm293_vm1 = vcmask (!%p603_p5), 130048   ;;  %vm332_vm2 = vcmask (!%p603_p5), 122880  }
  0x18   : > { %227 = sbr.rel (%p603_p5) target bundleno = 70 (0x46), region = 32  ;;  %v231_v4 = vld [vmem:[%s936_s0 + $0x18] sm:$0xff] (!%p603_p5)  ;;  %v294_v5 = vsel (!%p603_p5), %vm293_vm1, %v228_v1, 0.0  ;;  %v295_v6 = vsel (!%p603_p5), %vm293_vm1, %v229_v2, 0.0  ;;  %v297_v7 = vsel (!%p603_p5), %vm293_vm1, %v230_v3, 0.0  ;;  %v232_v8 = vld [vmem:[%s936_s0 + $0x20] sm:$0xff] (!%p603_p5) }
  0x19   : > { %v296_v9 = vadd.f32 (!%p603_p5), %v295_v6, %v294_v5  ;;  %v299_v10 = vsel (!%p603_p5), %vm293_vm1, %v231_v4, 0.0  ;;  %v233_v11 = vld [vmem:[%s936_s0 + $0x28] sm:$0xff] (!%p603_p5)  ;;  %v301_v13 = vsel (!%p603_p5), %vm293_vm1, %v232_v8, 0.0  ;;  %v234_v14 = vld [vmem:[%s936_s0 + $0x30] sm:$0xff] (!%p603_p5)  ;;  %v235_v17 = vld [vmem:[%s936_s0 + $0x38] sm:$0xff] (!%p603_p5) }
  0x1a   : > { %v303_v16 = vsel (!%p603_p5), %vm293_vm1, %v233_v11, 0.0  ;;  %v305_v19 = vsel (!%p603_p5), %vm293_vm1, %v234_v14, 0.0  ;;  %v236_v20 = vld [vmem:[%s936_s0 + $0x40] sm:$0xff] (!%p603_p5)  ;;  %v307_v22 = vsel (!%p603_p5), %vm293_vm1, %v235_v17, 0.0  ;;  %v237_v23 = vld [vmem:[%s936_s0 + $0x48] sm:$0xff] (!%p603_p5)  ;;  %v238_v26 = vld [vmem:[%s936_s0 + $0x50] sm:$0xff] (!%p603_p5) }
  0x1b   : > { %v298_v12 = vadd.f32 (!%p603_p5), %v297_v7, %v296_v9  ;;  %v309_v25 = vsel (!%p603_p5), %vm293_vm1, %v236_v20, 0.0  ;;  %v311_v28 = vsel (!%p603_p5), %vm293_vm1, %v237_v23, 0.0  ;;  %v239_v29 = vld [vmem:[%s936_s0 + $0x58] sm:$0xff] (!%p603_p5)  ;;  %v313_v31 = vsel (!%p603_p5), %vm293_vm1, %v238_v26, 0.0  ;;  %v240_v32 = vld [vmem:[%s936_s0 + $0x60] sm:$0xff] (!%p603_p5)  ;;  %v241_v35 = vld [vmem:[%s936_s0 + $0x68] sm:$0xff] (!%p603_p5) }
  0x1c   : > { %v315_v34 = vsel (!%p603_p5), %vm293_vm1, %v239_v29, 0.0  ;;  %v317_v37 = vsel (!%p603_p5), %vm293_vm1, %v240_v32, 0.0  ;;  %v242_v38 = vld [vmem:[%s936_s0 + $0x70] sm:$0xff] (!%p603_p5)  ;;  %v319_v40 = vsel (!%p603_p5), %vm293_vm1, %v241_v35, 0.0  ;;  %v243_v41 = vld [vmem:[%s936_s0 + $0x78] sm:$0xff] (!%p603_p5) }
  0x1d   : > { %v300_v15 = vadd.f32 (!%p603_p5), %v299_v10, %v298_v12  ;;  %v321_v43 = vsel (!%p603_p5), %vm293_vm1, %v242_v38, 0.0  ;;  %v323_v45 = vsel (!%p603_p5), %vm293_vm1, %v243_v41, 0.0  ;;  %v292_v53 = vld [vmem:[#allocation2] sm:$0x1] (!%p603_p5) }
  0x1f   : > { %v302_v18 = vadd.f32 %v301_v13, %v300_v15 }
  0x21   : > { %v304_v21 = vadd.f32 %v303_v16, %v302_v18 }
  0x23   : > { %v306_v24 = vadd.f32 %v305_v19, %v304_v21 }
  0x25   : > { %v308_v27 = vadd.f32 %v307_v22, %v306_v24 }
  0x27   : > { %v310_v30 = vadd.f32 %v309_v25, %v308_v27 }
  0x29   : > { %v312_v33 = vadd.f32 %v311_v28, %v310_v30 }
  0x2b   : > { %v314_v36 = vadd.f32 %v313_v31, %v312_v33 }
  0x2d   : > { %v316_v39 = vadd.f32 %v315_v34, %v314_v36 }
  0x2f   : > { %v318_v42 = vadd.f32 %v317_v37, %v316_v39 }
  0x31   : > { %v320_v44 = vadd.f32 %v319_v40, %v318_v42 }
  0x33   : > { %v322_v46 = vadd.f32 %v321_v43, %v320_v44 }
  0x35   : > { %v324_v47 = vadd.f32 %v323_v45, %v322_v46 }
  0x37   : > { %v325_v48 = vrot.slane %v324_v47, 4 }
  0x39   : > { %v326_v49 = vadd.f32 %v325_v48, %v324_v47 }
  0x3b   : > { %v327_v50 = vrot.slane %v326_v49, 2 }
  0x3d   : > { %v328_v51 = vadd.f32 %v327_v50, %v326_v49 }
  0x3f   : > { %v329_v52 = vrot.slane %v328_v51, 1 }
  0x41   : > { %v330_v54 = vadd.f32 %v329_v52, %v328_v51 }
  0x43   : > { %v331_v55 = vadd.f32 %v330_v54, %v292_v53 }
  0x45   : > { %333 = vst.msk [vmem:[#allocation2] sm:$0x1] %vm332_vm2, %v331_v55 }
  0x46 PF: > { %p334_p6 = scmp.eq.s32.totalorder %s700_s12, 1 }
  0x47   : > { %vm341_vm3 = vcmask (%p334_p6), 122880   ;;  %v711_v58 = vmov (%p334_p6), 0.0  }
  0x48   : > { %338 = sbr.rel (!%p334_p6) target bundleno = 80 (0x50), region = 36  ;;  %343 = vst.msk [vmem:[#allocation4] sm:$0x1] (%p334_p6), %vm341_vm3, %v711_v58 }
  0x4c   : > { %v339_v56 = vld [vmem:[#allocation2] sm:$0x1] (%p334_p6) }
  0x4d   : > { %v340_v57 = vmul.f32 (%p334_p6), 0.0078125, %v339_v56 }
  0x4f   : > { %342 = vst.msk [vmem:[#allocation3] sm:$0x1] %vm341_vm3, %v340_v57 }
  0x50 PF: > { %p605_p7 = scmp.ne.s32.totalorder %s700_s12, 1 }
  0x51   : > { %v347_v59 = vld [vmem:[%s936_s0] sm:$0xff] (!%p605_p7)  ;;  %v348_v60 = vld [vmem:[%s936_s0 + $0x8] sm:$0xff] (!%p605_p7)  ;;  %v349_v61 = vld [vmem:[%s936_s0 + $0x10] sm:$0xff] (!%p605_p7)  ;;  %vm451_vm4 = vcmask (!%p605_p7), 130048   ;;  %vm490_vm5 = vcmask (!%p605_p7), 122880  }
  0x52   : > { %346 = sbr.rel (%p605_p7) target bundleno = 137 (0x89), region = 40  ;;  %v350_v62 = vld [vmem:[%s936_s0 + $0x18] sm:$0xff] (!%p605_p7)  ;;  %v351_v3 = vld [vmem:[%s936_s0 + $0x20] sm:$0xff] (!%p605_p7)  ;;  %v352_v5 = vld [vmem:[%s936_s0 + $0x28] sm:$0xff] (!%p605_p7) }
  0x53   : > { %v353_v6 = vld [vmem:[%s936_s0 + $0x30] sm:$0xff] (!%p605_p7)  ;;  %v354_v13 = vld [vmem:[%s936_s0 + $0x38] sm:$0xff] (!%p605_p7)  ;;  %v355_v19 = vld [vmem:[%s936_s0 + $0x40] sm:$0xff] (!%p605_p7) }
  0x54   : > { %v356_v24 = vld [vmem:[%s936_s0 + $0x48] sm:$0xff] (!%p605_p7)  ;;  %v357_v29 = vld [vmem:[%s936_s0 + $0x50] sm:$0xff] (!%p605_p7)  ;;  %v358_v34 = vld [vmem:[%s936_s0 + $0x58] sm:$0xff] (!%p605_p7) }
  0x55   : > { %v359_v39 = vld [vmem:[%s936_s0 + $0x60] sm:$0xff] (!%p605_p7)  ;;  %v360_v44 = vld [vmem:[%s936_s0 + $0x68] sm:$0xff] (!%p605_p7)  ;;  %v361_v49 = vld [vmem:[%s936_s0 + $0x70] sm:$0xff] (!%p605_p7) }
  0x56   : > { %v606_v63 = vld [vmem:[#allocation3] ss:$0 sm:$0xff] (!%p605_p7)  ;;  %v362_v54 = vld [vmem:[%s936_s0 + $0x78] sm:$0xff] (!%p605_p7) }
  0x57   : > { %v370_v0 = vsub.f32 (!%p605_p7), %v347_v59, %v606_v63  ;;  %v371_v1 = vsub.f32 (!%p605_p7), %v348_v60, %v606_v63  ;;  %v372_v2 = vsub.f32 (!%p605_p7), %v349_v61, %v606_v63  ;;  %v373_v4 = vsub.f32 (!%p605_p7), %v350_v62, %v606_v63 }
  0x58   : > { %v374_v7 = vsub.f32 (!%p605_p7), %v351_v3, %v606_v63  ;;  %v375_v11 = vsub.f32 (!%p605_p7), %v352_v5, %v606_v63  ;;  %v376_v14 = vsub.f32 (!%p605_p7), %v353_v6, %v606_v63  ;;  %v377_v21 = vsub.f32 (!%p605_p7), %v354_v13, %v606_v63 }
  0x59   : > { %v435_v8 = vmul.f32 %v370_v0, %v370_v0  ;;  %v436_v9 = vmul.f32 %v371_v1, %v371_v1  ;;  %v437_v10 = vmul.f32 %v372_v2, %v372_v2  ;;  %v438_v12 = vmul.f32 %v373_v4, %v373_v4 }
  0x5a   : > { %v439_v15 = vmul.f32 %v374_v7, %v374_v7  ;;  %v440_v22 = vmul.f32 %v375_v11, %v375_v11  ;;  %v378_v26 = vsub.f32 %v355_v19, %v606_v63  ;;  %v441_v27 = vmul.f32 %v376_v14, %v376_v14 }
  0x5b   : > { %v452_v16 = vsel %vm451_vm4, %v435_v8, 0.0  ;;  %v453_v17 = vsel %vm451_vm4, %v436_v9, 0.0  ;;  %v455_v18 = vsel %vm451_vm4, %v437_v10, 0.0  ;;  %v457_v23 = vsel %vm451_vm4, %v438_v12, 0.0 }
  0x5c   : > { %v454_v20 = vadd.f32 %v453_v17, %v452_v16  ;;  %v459_v28 = vsel %vm451_vm4, %v439_v15, 0.0  ;;  %v379_v31 = vsub.f32 %v356_v24, %v606_v63  ;;  %v442_v32 = vmul.f32 %v377_v21, %v377_v21  ;;  %v434_v16 = vld [vmem:[#allocation4] sm:$0x1] }
  0x5d   : > { %v461_v33 = vsel %vm451_vm4, %v440_v22, 0.0  ;;  %v380_v36 = vsub.f32 %v357_v29, %v606_v63  ;;  %v443_v37 = vmul.f32 %v378_v26, %v378_v26  ;;  %v463_v38 = vsel %vm451_vm4, %v441_v27, 0.0 }
  0x5e   : > { %v456_v25 = vadd.f32 %v455_v18, %v454_v20  ;;  %v381_v41 = vsub.f32 %v358_v34, %v606_v63  ;;  %v444_v42 = vmul.f32 %v379_v31, %v379_v31  ;;  %v465_v43 = vsel %vm451_vm4, %v442_v32, 0.0 }
  0x5f   : > { %v382_v46 = vsub.f32 %v359_v39, %v606_v63  ;;  %v445_v47 = vmul.f32 %v380_v36, %v380_v36  ;;  %v467_v48 = vsel %vm451_vm4, %v443_v37, 0.0  ;;  %v383_v51 = vsub.f32 %v360_v44, %v606_v63 }
  0x60   : > { %v458_v30 = vadd.f32 %v457_v23, %v456_v25  ;;  %v446_v52 = vmul.f32 %v381_v41, %v381_v41  ;;  %v469_v53 = vsel %vm451_vm4, %v444_v42, 0.0  ;;  %v384_v56 = vsub.f32 %v361_v49, %v606_v63 }
  0x61   : > { %v447_v57 = vmul.f32 %v382_v46, %v382_v46  ;;  %v471_v58 = vsel %vm451_vm4, %v445_v47, 0.0  ;;  %v385_v60 = vsub.f32 %v362_v54, %v606_v63  ;;  %v448_v61 = vmul.f32 %v383_v51, %v383_v51 }
  0x62   : > { %v460_v35 = vadd.f32 %v459_v28, %v458_v30  ;;  %v473_v62 = vsel %vm451_vm4, %v446_v52, 0.0  ;;  %v449_v1 = vmul.f32 %v384_v56, %v384_v56 }
  0x63   : > { %v475_v2 = vsel %vm451_vm4, %v447_v57, 0.0  ;;  %v450_v4 = vmul.f32 %v385_v60, %v385_v60  ;;  %v477_v5 = vsel %vm451_vm4, %v448_v61, 0.0 }
  0x64   : > { %v462_v40 = vadd.f32 %v461_v33, %v460_v35  ;;  %v479_v7 = vsel %vm451_vm4, %v449_v1, 0.0 }
  0x65   : > { %v481_v9 = vsel %vm451_vm4, %v450_v4, 0.0 }
  0x66   : > { %v464_v45 = vadd.f32 %v463_v38, %v462_v40 }
  0x68   : > { %v466_v50 = vadd.f32 %v465_v43, %v464_v45 }
  0x6a   : > { %v468_v55 = vadd.f32 %v467_v48, %v466_v50 }
  0x6c   : > { %v470_v59 = vadd.f32 %v469_v53, %v468_v55 }
  0x6e   : > { %v472_v0 = vadd.f32 %v471_v58, %v470_v59 }
  0x70   : > { %v474_v3 = vadd.f32 %v473_v62, %v472_v0 }
  0x72   : > { %v476_v6 = vadd.f32 %v475_v2, %v474_v3 }
  0x74   : > { %v478_v8 = vadd.f32 %v477_v5, %v476_v6 }
  0x76   : > { %v480_v10 = vadd.f32 %v479_v7, %v478_v8 }
  0x78   : > { %v482_v11 = vadd.f32 %v481_v9, %v480_v10 }
  0x7a   : > { %v483_v63 = vrot.slane %v482_v11, 4 }
  0x7c   : > { %v484_v12 = vadd.f32 %v483_v63, %v482_v11 }
  0x7e   : > { %v485_v13 = vrot.slane %v484_v12, 2 }
  0x80   : > { %v486_v14 = vadd.f32 %v485_v13, %v484_v12 }
  0x82   : > { %v487_v15 = vrot.slane %v486_v14, 1 }
  0x84   : > { %v488_v17 = vadd.f32 %v487_v15, %v486_v14 }
  0x86   : > { %v489_v18 = vadd.f32 %v488_v17, %v434_v16 }
  0x88   : > { %491 = vst.msk [vmem:[#allocation4] sm:$0x1] %vm490_vm5, %v489_v18 }
  0x89 PF: > { %493 = sbr.rel (!%p334_p6) target bundleno = 394 (0x18a), region = 44  ;;  %v508_v20 = vld [vmem:[#allocation3] sm:$0x1] (%p334_p6)  ;;  %vm510_vm6 = vcmask (%p334_p6), 122880   ;;  %vm526_vm9 = vcmask (%p334_p6), 0  }
  0x8a   : > { %v509_v22 = vsub.f32 (%p334_p6), 0.0, %v508_v20 }
  0x8c   : > { %511 = vst.msk [vmem:[%s937_s1] sm:$0x1] (%p334_p6), %vm510_vm6, %v509_v22 }
  0x8f   : > { %v494_v19 = vld [vmem:[#allocation4] sm:$0x1] (%p334_p6) }
  0x90   : > { %v495_v21 = vmul.f32 0.0078125, %v494_v19 }
  0x92   : > { %648 = vrsqrt.f32 %v495_v21  ;;  %vm498_vm7 = vcmp.eq.f32.partialorder %v495_v21, inf  ;;  %v501_v24 = vand.u32 2147483648, %v495_v21  ;;  %vm500_vm8 = vcmp.eq.f32.partialorder %v495_v21, 0.0 }
  0x9c   : > { %v649_v23 = vpop.eup %648 }
  0x9d   : > { %v497_v25 = vmul.f32 %v649_v23, %v495_v21 }
  0x9f   : > { %v499_v26 = vsel %vm498_vm7, %v495_v21, %v497_v25 }
  0xa0   : > { %v502_v27 = vsel %vm500_vm8, %v501_v24, %v499_v26 }
  0xa1   : > { %v503_v28 = vadd.f32 1e-06, %v502_v27 }
  0xa3   : > { %650 = vrcp.f32 %v503_v28 }
  0xad   : > { %v651_v29 = vpop.eup %650 }
  0xae   : > { %652 = vlog2.f32 %v651_v29 }
  0xb8   : > { %v653_v30 = vpop.eup %652 }
  0xb9   : > { %v507_v31 = vmul.f32 0.6931472, %v653_v30 }
  0xbb   : > { %v512_v32 = vmul.f32 1.442695, %v507_v31  ;;  %v515_v33 = vsel %vm510_vm6, %v507_v31, 0.0 }
  0xbc   : > { %516 = vadd.xlane.f32.xlu0 %v515_v33 }
  0xbd   : > { %654 = vpow2.f32 %v512_v32 }
  0xc7   : > { %v655_v34 = vpop.eup %654 }
  0xc8   : > { %514 = vst.msk [vmem:[%s938_s2] sm:$0x1] %vm510_vm6, %v655_v34 }
 0x149   : > { %v517_v35 = vpop.xlane.xlu0 %516 }
 0x14a   : > { %v518_v36 = vrot.slane %v517_v35, 4 }
 0x14c   : > { %v519_v37 = vadd.f32 %v518_v36, %v517_v35 }
 0x14e   : > { %v520_v38 = vrot.slane %v519_v37, 2 }
 0x150   : > { %v521_v39 = vadd.f32 %v520_v38, %v519_v37 }
 0x152   : > { %v522_v40 = vrot.slane %v521_v39, 1 }
 0x154   : > { %v523_v41 = vadd.f32 %v522_v40, %v521_v39 }
 0x156   : > { %613 = vpush %v523_v41 }
 0x187   : > { %s614_s18 = spop %613 }
 0x188   : > { %v525_v42 = vstv %s614_s18 }
 0x189   : > { %527 = vst.msk [vmem:[#allocation5] sm:$0x1] %vm526_vm9, %v525_v42 }
 0x18a PF: > { %p901_p8 = scmp.eq.s32.totalorder %s598_s15, 1  ;;  %s712_s20 = smov [#allocation5]  }
 0x18b   : > { %s541_s21 = sshll.u32 %s712_s20, 4  ;;  %s542_s21 = int_to_ptr.vmem [resolvable:$true] %s541_s21 }
 0x18c   : > { %s656_s22 = scalar_lea.vmem %s542_s21, 16  ;;  %s662_s23 = scalar_lea.vmem %s542_s21, 32 }
 0x18d   : > { %p657_p9 = scmp.ne.s32.totalorder %s542_s21, %s656_s22  ;;  %p663_p12 = scmp.lt.s32.totalorder %s542_s21, %s542_s21 }
 0x18e   : > { %p664_p13 = scmp.lt.s32.totalorder %s662_s23, %s656_s22 }
 0x18f   : > { %p658_p10 = pnand %p657_p9, %p901_p8 }
 0x190   : > { %p665_p0 = por %p664_p13, %p663_p12 }
 0x191   : > { %p659_p11 = pneg %p658_p10 }
 0x193   : > { %p666_p1 = pnand %p665_p0, %p659_p11 }
 0x195   : > { %669 = shalt.err (!%p666_p1)
}
 0x196   : > { %s670_s25 = scalar_lea.hbm %s939_s3, 16 }
 0x197   : > { %p671_p2 = scmp.ne.s32.totalorder %s939_s3, %s670_s25  ;;  %p676_p5 = scmp.lt.u32.totalorder %s670_s25, %s939_s3 }
 0x199   : > { %p672_p3 = pnand %p671_p2, %p901_p8 }
 0x19b   : > { %p673_p4 = pneg %p672_p3 }
 0x19d   : > { %p678_p6 = pnand %p676_p5, %p673_p4 }
 0x19f   : > { %681 = shalt.err (!%p678_p6)
}
 0x1a0   : > { %616 = dma.vmem_to_hbm [thread:$0]  (%p901_p8), %s542_s21, 16, %s939_s3, [#allocation6]  }
 0x1a1   : > { %695 = dma.done.wait (%p901_p8), [#allocation6], 16  }
 0x1a2   : > { %697 = vsyncadd (%p901_p8), [#allocation6], 4294967280 }
 0x1a3 PF: > { %s15_s14 = sadd.s32 1, %s708_s14   ;;  %s941_s12 = smov %s704_s13 }
 0x1a4   : > { %p12_p7 = scmp.ge.s32.totalorder %s15_s14, 4   ;;  %s942_s13 = smov %s944_s16 }
 0x1a6   :  { %14 = sbr.rel (!%p12_p7) target bundleno = 2 (0x2), region = 87 }
 0x1ad   :  { %560 = vsyncpa [#allocation6], 1 }
 0x1ae   :  { %562 = vsyncpa [#allocation6 + $0x1], 1 }

// kernel: _lambda_.36
= control target key start
LH: loop header
LB: loop body
LE: loop exit
PB: predicated region body
PF: predicated region fallthrough
CT: control target
= control target key end

     0   :  { %vm16_vm0 = vcmask 261120   ;;  %v390_v1 = vmov 0.0   ;;  %vm141_vm1 = vcmask 588800   ;;  %vm166_vm2 = vcmask 1043456   ;;  %s629_s1 = inlined_call_operand.vmem [shape: bf16[72,32], index: 1, kind: input, shape index: {}]   ;;  %s630_s2 = inlined_call_operand.vmem [shape: f32[128,32], index: 2, kind: output, shape index: {}]   ;;  %s631_s0 = inlined_call_operand.vmem [shape: bf16[128,72], index: 0, kind: input, shape index: {}]  }
   0x1   :  { %v377_v0 = vld [vmem:[%s629_s1] sm:$0xff]   ;;  %19 = vst.msk [vmem:[%s630_s2 + $0x10] sm:$0xff] %vm16_vm0, %v390_v1  ;;  %17 = vst.msk [vmem:[%s630_s2] sm:$0xff] %vm16_vm0, %v390_v1  ;;  %v378_v2 = vld [vmem:[%s629_s1 + $0x8] sm:$0xff]  }
   0x2   :  { %18 = vst.msk [vmem:[%s630_s2 + $0x8] sm:$0xff] %vm16_vm0, %v390_v1  ;;  %20 = vst.msk [vmem:[%s630_s2 + $0x18] sm:$0xff] %vm16_vm0, %v390_v1  ;;  %338 = vmatprep.subr.bf16.mxu0 %v377_v0  ;;  %364 = vmatprep.subr.bf16.mxu1 %v377_v0  ;;  %v379_v3 = vld [vmem:[%s629_s1 + $0x10] sm:$0xff]   ;;  %v382_v4 = vld [vmem:[%s631_s0] sm:$0xff]  }
   0x3   :  { %21 = vst.msk [vmem:[%s630_s2 + $0x20] sm:$0xff] %vm16_vm0, %v390_v1  ;;  %22 = vst.msk [vmem:[%s630_s2 + $0x28] sm:$0xff] %vm16_vm0, %v390_v1  ;;  %339 = vmatpush3.bf16.msra.mxu0 %v377_v0  ;;  %369 = vmatpush3.bf16.msra.mxu1 %v377_v0  ;;  %v383_v5 = vld [vmem:[%s631_s0 + $0x20] sm:$0xff]   ;;  %v380_v6 = vld [vmem:[%s629_s1 + $0x18] sm:$0xff]  }
   0x4   :  { %23 = vst.msk [vmem:[%s630_s2 + $0x30] sm:$0xff] %vm16_vm0, %v390_v1  ;;  %24 = vst.msk [vmem:[%s630_s2 + $0x38] sm:$0xff] %vm16_vm0, %v390_v1  ;;  %340 = vmatprep.subr.bf16.mxu0 %v378_v2  ;;  %365 = vmatprep.subr.bf16.mxu1 %v378_v2  ;;  %v381_v7 = vld [vmem:[%s629_s1 + $0x20] ss:$0 sps:$4 sm:$0xff]   ;;  %v384_v9 = vld [vmem:[%s631_s0 + $0x8] sm:$0xff]  }
   0x5   :  { %25 = vst.msk [vmem:[%s630_s2 + $0x40] sm:$0xff] %vm16_vm0, %v390_v1  ;;  %26 = vst.msk [vmem:[%s630_s2 + $0x48] sm:$0xff] %vm16_vm0, %v390_v1  ;;  %348 = vmatprep.mubr.msk.bf16.mxu0 %vm141_vm1, %v382_v4  ;;  %356 = vmatprep.mubr.msk.bf16.mxu1 %vm141_vm1, %v383_v5  ;;  %v168_v8 = vsel %vm166_vm2, %v381_v7, 0  ;;  %v385_v10 = vld [vmem:[%s631_s0 + $0x28] sm:$0xff]   ;;  %v386_v11 = vld [vmem:[%s631_s0 + $0x10] sm:$0xff]  }
   0x6   :  { %27 = vst.msk [vmem:[%s630_s2 + $0x50] sm:$0xff] %vm16_vm0, %v390_v1  ;;  %28 = vst.msk [vmem:[%s630_s2 + $0x58] sm:$0xff] %vm16_vm0, %v390_v1  ;;  %v387_v12 = vld [vmem:[%s631_s0 + $0x30] sm:$0xff]   ;;  %v388_v13 = vld [vmem:[%s631_s0 + $0x18] sm:$0xff]  }
   0x7   :  { %29 = vst.msk [vmem:[%s630_s2 + $0x60] sm:$0xff] %vm16_vm0, %v390_v1  ;;  %30 = vst.msk [vmem:[%s630_s2 + $0x68] sm:$0xff] %vm16_vm0, %v390_v1  ;;  %341 = vmatpush3.bf16.msra.mxu0 %v378_v2  ;;  %370 = vmatpush3.bf16.msra.mxu1 %v378_v2  ;;  %v389_v14 = vld [vmem:[%s631_s0 + $0x38] sm:$0xff]  }
   0x8   :  { %31 = vst.msk [vmem:[%s630_s2 + $0x70] sm:$0xff] %vm16_vm0, %v390_v1  ;;  %32 = vst.msk [vmem:[%s630_s2 + $0x78] sm:$0xff] %vm16_vm0, %v390_v1  ;;  %342 = vmatprep.subr.bf16.mxu0 %v379_v3  ;;  %366 = vmatprep.subr.bf16.mxu1 %v379_v3  ;;  %v35_v15 = vld [vmem:[%s630_s2 + $0x10] sm:$0xff]  ;;  %v33_v17 = vld [vmem:[%s630_s2] sm:$0xff] }
   0x9   :  { %v36_v21 = vld [vmem:[%s630_s2 + $0x18] sm:$0xff]  ;;  %v34_v27 = vld [vmem:[%s630_s2 + $0x8] sm:$0xff] }
   0xa   :  { %v37_v41 = vld [vmem:[%s630_s2 + $0x20] sm:$0xff]  ;;  %v38_v51 = vld [vmem:[%s630_s2 + $0x28] sm:$0xff] }
   0xb   :  { %343 = vmatpush3.bf16.msra.mxu0 %v379_v3  ;;  %371 = vmatpush3.bf16.msra.mxu1 %v379_v3  ;;  %v39_v39 = vld [vmem:[%s630_s2 + $0x30] sm:$0xff]  ;;  %v40_v45 = vld [vmem:[%s630_s2 + $0x38] sm:$0xff] }
   0xc   :  { %344 = vmatprep.subr.bf16.mxu0 %v380_v6  ;;  %367 = vmatprep.subr.bf16.mxu1 %v380_v6  ;;  %v41_v18 = vld [vmem:[%s630_s2 + $0x40] sm:$0xff]  ;;  %v42_v28 = vld [vmem:[%s630_s2 + $0x48] sm:$0xff] }
   0xd   :  { %v43_v16 = vld [vmem:[%s630_s2 + $0x50] sm:$0xff]  ;;  %v44_v22 = vld [vmem:[%s630_s2 + $0x58] sm:$0xff] }
   0xe   :  { %v45_v42 = vld [vmem:[%s630_s2 + $0x60] sm:$0xff]  ;;  %v46_v52 = vld [vmem:[%s630_s2 + $0x68] sm:$0xff] }
   0xf   :  { %345 = vmatpush3.bf16.msra.mxu0 %v380_v6  ;;  %372 = vmatpush3.bf16.msra.mxu1 %v380_v6  ;;  %v47_v40 = vld [vmem:[%s630_s2 + $0x70] sm:$0xff]  ;;  %v48_v46 = vld [vmem:[%s630_s2 + $0x78] sm:$0xff] }
  0x10   :  { %374 = vmatprep.subr.msk.bf16.mxu0 %vm166_vm2, %v381_v7  ;;  %375 = vmatprep.subr.msk.bf16.mxu1 %vm166_vm2, %v381_v7 }
  0x13   :  { %347 = vmatpush3.bf16.msra.mxu0 %v168_v8  ;;  %373 = vmatpush3.bf16.msra.mxu1 %v168_v8 }
  0x16   :  { %349 = vmatmul.mubr.msk.bf16.vlgmr.msra.gmra.mrb[0].mxu0 %vm141_vm1, %v384_v9  ;;  %357 = vmatmul.mubr.msk.bf16.vlgmr.msra.gmra.mrb[0].mxu1 %vm141_vm1, %v385_v10 }
  0x17   :  { %352 = vmatprep.mubr.msk.bf16.mxu0 %vm141_vm1, %v386_v11  ;;  %360 = vmatprep.mubr.msk.bf16.mxu1 %vm141_vm1, %v387_v12 }
  0x1e   :  { %353 = vmatmul.mubr.msk.bf16.gmra.mrb[4].mxu0 %vm141_vm1, %v388_v13  ;;  %361 = vmatmul.mubr.msk.bf16.gmra.mrb[4].mxu1 %vm141_vm1, %v389_v14 }
  0xe9   :  { %v350_v19 = vpop.f32.mrb[0].mxu0  ;;  %v358_v20 = vpop.f32.mrb[0].mxu1 }
  0xea   :  { %v269_v23 = vadd.f32 %v350_v19, %v35_v15  ;;  %v277_v24 = vadd.f32 %v358_v20, %v43_v16  ;;  %v204_v25 = vpop.f32.mrb[1].mxu0  ;;  %v236_v26 = vpop.f32.mrb[1].mxu1 }
  0xeb   :  { %v267_v29 = vadd.f32 %v204_v25, %v33_v17  ;;  %v275_v30 = vadd.f32 %v236_v26, %v41_v18  ;;  %v351_v31 = vpop.f32.mrb[2].mxu0  ;;  %v359_v32 = vpop.f32.mrb[2].mxu1 }
  0xec   :  { %286 = vst.msk [vmem:[%s630_s2 + $0x10] sm:$0xff] %vm16_vm0, %v269_v23  ;;  %294 = vst.msk [vmem:[%s630_s2 + $0x50] sm:$0xff] %vm16_vm0, %v277_v24  ;;  %v270_v33 = vadd.f32 %v351_v31, %v36_v21  ;;  %v278_v34 = vadd.f32 %v359_v32, %v44_v22  ;;  %v207_v35 = vpop.f32.mrb[3].mxu0  ;;  %v239_v36 = vpop.f32.mrb[3].mxu1 }
  0xed   :  { %284 = vst.msk [vmem:[%s630_s2] sm:$0xff] %vm16_vm0, %v267_v29  ;;  %292 = vst.msk [vmem:[%s630_s2 + $0x40] sm:$0xff] %vm16_vm0, %v275_v30  ;;  %v268_v37 = vadd.f32 %v207_v35, %v34_v27  ;;  %v276_v38 = vadd.f32 %v239_v36, %v42_v28 }
  0xee   :  { %287 = vst.msk [vmem:[%s630_s2 + $0x18] sm:$0xff] %vm16_vm0, %v270_v33  ;;  %295 = vst.msk [vmem:[%s630_s2 + $0x58] sm:$0xff] %vm16_vm0, %v278_v34 }
  0xef   :  { %285 = vst.msk [vmem:[%s630_s2 + $0x8] sm:$0xff] %vm16_vm0, %v268_v37  ;;  %293 = vst.msk [vmem:[%s630_s2 + $0x48] sm:$0xff] %vm16_vm0, %v276_v38 }
  0xf1   :  { %v354_v43 = vpop.f32.mrb[4].mxu0  ;;  %v362_v44 = vpop.f32.mrb[4].mxu1 }
  0xf2   :  { %v273_v47 = vadd.f32 %v354_v43, %v39_v39  ;;  %v281_v48 = vadd.f32 %v362_v44, %v47_v40  ;;  %v220_v49 = vpop.f32.mrb[5].mxu0  ;;  %v252_v50 = vpop.f32.mrb[5].mxu1 }
  0xf3   :  { %v271_v53 = vadd.f32 %v220_v49, %v37_v41  ;;  %v279_v54 = vadd.f32 %v252_v50, %v45_v42  ;;  %v355_v55 = vpop.f32.mrb[6].mxu0  ;;  %v363_v56 = vpop.f32.mrb[6].mxu1 }
  0xf4   :  { %290 = vst.msk [vmem:[%s630_s2 + $0x30] sm:$0xff] %vm16_vm0, %v273_v47  ;;  %298 = vst.msk [vmem:[%s630_s2 + $0x70] sm:$0xff] %vm16_vm0, %v281_v48  ;;  %v274_v57 = vadd.f32 %v355_v55, %v40_v45  ;;  %v282_v58 = vadd.f32 %v363_v56, %v48_v46  ;;  %v223_v59 = vpop.f32.mrb[7].mxu0  ;;  %v255_v60 = vpop.f32.mrb[7].mxu1 }
  0xf5   :  { %288 = vst.msk [vmem:[%s630_s2 + $0x20] sm:$0xff] %vm16_vm0, %v271_v53  ;;  %296 = vst.msk [vmem:[%s630_s2 + $0x60] sm:$0xff] %vm16_vm0, %v279_v54  ;;  %v272_v61 = vadd.f32 %v223_v59, %v38_v51  ;;  %v280_v62 = vadd.f32 %v255_v60, %v46_v52 }
  0xf6   :  { %291 = vst.msk [vmem:[%s630_s2 + $0x38] sm:$0xff] %vm16_vm0, %v274_v57  ;;  %299 = vst.msk [vmem:[%s630_s2 + $0x78] sm:$0xff] %vm16_vm0, %v282_v58 }
  0xf7   :  { %289 = vst.msk [vmem:[%s630_s2 + $0x28] sm:$0xff] %vm16_vm0, %v272_v61  ;;  %297 = vst.msk [vmem:[%s630_s2 + $0x68] sm:$0xff] %vm16_vm0, %v280_v62 }

// kernel: _lambda_.37
= control target key start
LH: loop header
LB: loop body
LE: loop exit
PB: predicated region body
PF: predicated region fallthrough
CT: control target
= control target key end

     0   :  { %9 = vsyncpa [#allocation6], 0  ;;  %s733_s12 = smov 0   ;;  %s735_s13 = smov 0   ;;  %s936_s0 = inlined_call_operand.vmem [shape: f32[128,32], index: 0, kind: input, shape index: {}]   ;;  %s937_s1 = inlined_call_operand.vmem [shape: f32[1,32], index: 1, kind: output, shape index: {0}]   ;;  %s938_s2 = inlined_call_operand.vmem [shape: f32[1,32], index: 2, kind: output, shape index: {1}]   ;;  %s939_s3 = inlined_call_operand.hbm [shape: f32[1,1], index: 3, kind: output, shape index: {2}]  }
   0x1   :  { %s737_s14 = smov 0  }
   0x2 LB: > { %s598_s15 = sadd.s32 4294967295, %s708_s14   ;;  %s27_s16 = sadd.s32 1, %s704_s13  ;;  %s708_s14 = sphi %s737_s14, %s15_s14   ;;  %s704_s13 = sphi %s735_s13, %s942_s13   ;;  %s700_s12 = sphi %s733_s12, %s941_s12  }
   0x3   : > { %p29_p0 = scmp.ge.s32.totalorder %s27_s16, 2  ;;  %p601_p1 = scmp.ge.s32.totalorder %s708_s14, 1 }
   0x4   : > { %p141_p2 = scmp.lt.s32.totalorder %s708_s14, 3 }
   0x5   : > { %s944_s16 = smov (%p29_p0, %s27_s16), 0 }
   0x6   : > { %p142_p3 = pnand %p601_p1, %p141_p2 }
   0x7   : > { %p217_p4 = scmp.eq.s32.totalorder (!%p142_p3), %s700_s12, 0 }
   0x8   : > { %145 = sbr.rel (%p142_p3) target bundleno = 419 (0x1a3), region = 24 }
   0xf   : > { %222 = sbr.rel (!%p217_p4) target bundleno = 22 (0x16), region = 28  ;;  %vm223_vm0 = vcmask (%p217_p4), 253952   ;;  %v710_v0 = vmov (%p217_p4), 0.0  }
  0x10   : > { %224 = vst.msk [vmem:[#allocation2] sm:$0x1] (%p217_p4), %vm223_vm0, %v710_v0 }
  0x16 PF: > { %p603_p5 = scmp.ne.s32.totalorder %s700_s12, 0 }
  0x17   : > { %v228_v1 = vld [vmem:[%s936_s0] sm:$0xff] (!%p603_p5)  ;;  %v229_v2 = vld [vmem:[%s936_s0 + $0x8] sm:$0xff] (!%p603_p5)  ;;  %v230_v3 = vld [vmem:[%s936_s0 + $0x10] sm:$0xff] (!%p603_p5)  ;;  %vm293_vm1 = vcmask (!%p603_p5), 261120   ;;  %vm332_vm2 = vcmask (!%p603_p5), 253952  }
  0x18   : > { %227 = sbr.rel (%p603_p5) target bundleno = 70 (0x46), region = 32  ;;  %v231_v4 = vld [vmem:[%s936_s0 + $0x18] sm:$0xff] (!%p603_p5)  ;;  %v294_v5 = vsel (!%p603_p5), %vm293_vm1, %v228_v1, 0.0  ;;  %v295_v6 = vsel (!%p603_p5), %vm293_vm1, %v229_v2, 0.0  ;;  %v297_v7 = vsel (!%p603_p5), %vm293_vm1, %v230_v3, 0.0  ;;  %v232_v8 = vld [vmem:[%s936_s0 + $0x20] sm:$0xff] (!%p603_p5) }
  0x19   : > { %v296_v9 = vadd.f32 (!%p603_p5), %v295_v6, %v294_v5  ;;  %v299_v10 = vsel (!%p603_p5), %vm293_vm1, %v231_v4, 0.0  ;;  %v233_v11 = vld [vmem:[%s936_s0 + $0x28] sm:$0xff] (!%p603_p5)  ;;  %v301_v13 = vsel (!%p603_p5), %vm293_vm1, %v232_v8, 0.0  ;;  %v234_v14 = vld [vmem:[%s936_s0 + $0x30] sm:$0xff] (!%p603_p5)  ;;  %v235_v17 = vld [vmem:[%s936_s0 + $0x38] sm:$0xff] (!%p603_p5) }
  0x1a   : > { %v303_v16 = vsel (!%p603_p5), %vm293_vm1, %v233_v11, 0.0  ;;  %v305_v19 = vsel (!%p603_p5), %vm293_vm1, %v234_v14, 0.0  ;;  %v236_v20 = vld [vmem:[%s936_s0 + $0x40] sm:$0xff] (!%p603_p5)  ;;  %v307_v22 = vsel (!%p603_p5), %vm293_vm1, %v235_v17, 0.0  ;;  %v237_v23 = vld [vmem:[%s936_s0 + $0x48] sm:$0xff] (!%p603_p5)  ;;  %v238_v26 = vld [vmem:[%s936_s0 + $0x50] sm:$0xff] (!%p603_p5) }
  0x1b   : > { %v298_v12 = vadd.f32 (!%p603_p5), %v297_v7, %v296_v9  ;;  %v309_v25 = vsel (!%p603_p5), %vm293_vm1, %v236_v20, 0.0  ;;  %v311_v28 = vsel (!%p603_p5), %vm293_vm1, %v237_v23, 0.0  ;;  %v239_v29 = vld [vmem:[%s936_s0 + $0x58] sm:$0xff] (!%p603_p5)  ;;  %v313_v31 = vsel (!%p603_p5), %vm293_vm1, %v238_v26, 0.0  ;;  %v240_v32 = vld [vmem:[%s936_s0 + $0x60] sm:$0xff] (!%p603_p5)  ;;  %v241_v35 = vld [vmem:[%s936_s0 + $0x68] sm:$0xff] (!%p603_p5) }
  0x1c   : > { %v315_v34 = vsel (!%p603_p5), %vm293_vm1, %v239_v29, 0.0  ;;  %v317_v37 = vsel (!%p603_p5), %vm293_vm1, %v240_v32, 0.0  ;;  %v242_v38 = vld [vmem:[%s936_s0 + $0x70] sm:$0xff] (!%p603_p5)  ;;  %v319_v40 = vsel (!%p603_p5), %vm293_vm1, %v241_v35, 0.0  ;;  %v243_v41 = vld [vmem:[%s936_s0 + $0x78] sm:$0xff] (!%p603_p5) }
  0x1d   : > { %v300_v15 = vadd.f32 (!%p603_p5), %v299_v10, %v298_v12  ;;  %v321_v43 = vsel (!%p603_p5), %vm293_vm1, %v242_v38, 0.0  ;;  %v323_v45 = vsel (!%p603_p5), %vm293_vm1, %v243_v41, 0.0  ;;  %v292_v53 = vld [vmem:[#allocation2] sm:$0x1] (!%p603_p5) }
  0x1f   : > { %v302_v18 = vadd.f32 %v301_v13, %v300_v15 }
  0x21   : > { %v304_v21 = vadd.f32 %v303_v16, %v302_v18 }
  0x23   : > { %v306_v24 = vadd.f32 %v305_v19, %v304_v21 }
  0x25   : > { %v308_v27 = vadd.f32 %v307_v22, %v306_v24 }
  0x27   : > { %v310_v30 = vadd.f32 %v309_v25, %v308_v27 }
  0x29   : > { %v312_v33 = vadd.f32 %v311_v28, %v310_v30 }
  0x2b   : > { %v314_v36 = vadd.f32 %v313_v31, %v312_v33 }
  0x2d   : > { %v316_v39 = vadd.f32 %v315_v34, %v314_v36 }
  0x2f   : > { %v318_v42 = vadd.f32 %v317_v37, %v316_v39 }
  0x31   : > { %v320_v44 = vadd.f32 %v319_v40, %v318_v42 }
  0x33   : > { %v322_v46 = vadd.f32 %v321_v43, %v320_v44 }
  0x35   : > { %v324_v47 = vadd.f32 %v323_v45, %v322_v46 }
  0x37   : > { %v325_v48 = vrot.slane %v324_v47, 4 }
  0x39   : > { %v326_v49 = vadd.f32 %v325_v48, %v324_v47 }
  0x3b   : > { %v327_v50 = vrot.slane %v326_v49, 2 }
  0x3d   : > { %v328_v51 = vadd.f32 %v327_v50, %v326_v49 }
  0x3f   : > { %v329_v52 = vrot.slane %v328_v51, 1 }
  0x41   : > { %v330_v54 = vadd.f32 %v329_v52, %v328_v51 }
  0x43   : > { %v331_v55 = vadd.f32 %v330_v54, %v292_v53 }
  0x45   : > { %333 = vst.msk [vmem:[#allocation2] sm:$0x1] %vm332_vm2, %v331_v55 }
  0x46 PF: > { %p334_p6 = scmp.eq.s32.totalorder %s700_s12, 1 }
  0x47   : > { %vm341_vm3 = vcmask (%p334_p6), 253952   ;;  %v711_v58 = vmov (%p334_p6), 0.0  }
  0x48   : > { %338 = sbr.rel (!%p334_p6) target bundleno = 80 (0x50), region = 36  ;;  %343 = vst.msk [vmem:[#allocation4] sm:$0x1] (%p334_p6), %vm341_vm3, %v711_v58 }
  0x4c   : > { %v339_v56 = vld [vmem:[#allocation2] sm:$0x1] (%p334_p6) }
  0x4d   : > { %v340_v57 = vmul.f32 (%p334_p6), 0.0078125, %v339_v56 }
  0x4f   : > { %342 = vst.msk [vmem:[#allocation3] sm:$0x1] %vm341_vm3, %v340_v57 }
  0x50 PF: > { %p605_p7 = scmp.ne.s32.totalorder %s700_s12, 1 }
  0x51   : > { %v347_v59 = vld [vmem:[%s936_s0] sm:$0xff] (!%p605_p7)  ;;  %v348_v60 = vld [vmem:[%s936_s0 + $0x8] sm:$0xff] (!%p605_p7)  ;;  %v349_v61 = vld [vmem:[%s936_s0 + $0x10] sm:$0xff] (!%p605_p7)  ;;  %vm451_vm4 = vcmask (!%p605_p7), 261120   ;;  %vm490_vm5 = vcmask (!%p605_p7), 253952  }
  0x52   : > { %346 = sbr.rel (%p605_p7) target bundleno = 137 (0x89), region = 40  ;;  %v350_v62 = vld [vmem:[%s936_s0 + $0x18] sm:$0xff] (!%p605_p7)  ;;  %v351_v3 = vld [vmem:[%s936_s0 + $0x20] sm:$0xff] (!%p605_p7)  ;;  %v352_v5 = vld [vmem:[%s936_s0 + $0x28] sm:$0xff] (!%p605_p7) }
  0x53   : > { %v353_v6 = vld [vmem:[%s936_s0 + $0x30] sm:$0xff] (!%p605_p7)  ;;  %v354_v13 = vld [vmem:[%s936_s0 + $0x38] sm:$0xff] (!%p605_p7)  ;;  %v355_v19 = vld [vmem:[%s936_s0 + $0x40] sm:$0xff] (!%p605_p7) }
  0x54   : > { %v356_v24 = vld [vmem:[%s936_s0 + $0x48] sm:$0xff] (!%p605_p7)  ;;  %v357_v29 = vld [vmem:[%s936_s0 + $0x50] sm:$0xff] (!%p605_p7)  ;;  %v358_v34 = vld [vmem:[%s936_s0 + $0x58] sm:$0xff] (!%p605_p7) }
  0x55   : > { %v359_v39 = vld [vmem:[%s936_s0 + $0x60] sm:$0xff] (!%p605_p7)  ;;  %v360_v44 = vld [vmem:[%s936_s0 + $0x68] sm:$0xff] (!%p605_p7)  ;;  %v361_v49 = vld [vmem:[%s936_s0 + $0x70] sm:$0xff] (!%p605_p7) }
  0x56   : > { %v606_v63 = vld [vmem:[#allocation3] ss:$0 sm:$0xff] (!%p605_p7)  ;;  %v362_v54 = vld [vmem:[%s936_s0 + $0x78] sm:$0xff] (!%p605_p7) }
  0x57   : > { %v370_v0 = vsub.f32 (!%p605_p7), %v347_v59, %v606_v63  ;;  %v371_v1 = vsub.f32 (!%p605_p7), %v348_v60, %v606_v63  ;;  %v372_v2 = vsub.f32 (!%p605_p7), %v349_v61, %v606_v63  ;;  %v373_v4 = vsub.f32 (!%p605_p7), %v350_v62, %v606_v63 }
  0x58   : > { %v374_v7 = vsub.f32 (!%p605_p7), %v351_v3, %v606_v63  ;;  %v375_v11 = vsub.f32 (!%p605_p7), %v352_v5, %v606_v63  ;;  %v376_v14 = vsub.f32 (!%p605_p7), %v353_v6, %v606_v63  ;;  %v377_v21 = vsub.f32 (!%p605_p7), %v354_v13, %v606_v63 }
  0x59   : > { %v435_v8 = vmul.f32 %v370_v0, %v370_v0  ;;  %v436_v9 = vmul.f32 %v371_v1, %v371_v1  ;;  %v437_v10 = vmul.f32 %v372_v2, %v372_v2  ;;  %v438_v12 = vmul.f32 %v373_v4, %v373_v4 }
  0x5a   : > { %v439_v15 = vmul.f32 %v374_v7, %v374_v7  ;;  %v440_v22 = vmul.f32 %v375_v11, %v375_v11  ;;  %v378_v26 = vsub.f32 %v355_v19, %v606_v63  ;;  %v441_v27 = vmul.f32 %v376_v14, %v376_v14 }
  0x5b   : > { %v452_v16 = vsel %vm451_vm4, %v435_v8, 0.0  ;;  %v453_v17 = vsel %vm451_vm4, %v436_v9, 0.0  ;;  %v455_v18 = vsel %vm451_vm4, %v437_v10, 0.0  ;;  %v457_v23 = vsel %vm451_vm4, %v438_v12, 0.0 }
  0x5c   : > { %v454_v20 = vadd.f32 %v453_v17, %v452_v16  ;;  %v459_v28 = vsel %vm451_vm4, %v439_v15, 0.0  ;;  %v379_v31 = vsub.f32 %v356_v24, %v606_v63  ;;  %v442_v32 = vmul.f32 %v377_v21, %v377_v21  ;;  %v434_v16 = vld [vmem:[#allocation4] sm:$0x1] }
  0x5d   : > { %v461_v33 = vsel %vm451_vm4, %v440_v22, 0.0  ;;  %v380_v36 = vsub.f32 %v357_v29, %v606_v63  ;;  %v443_v37 = vmul.f32 %v378_v26, %v378_v26  ;;  %v463_v38 = vsel %vm451_vm4, %v441_v27, 0.0 }
  0x5e   : > { %v456_v25 = vadd.f32 %v455_v18, %v454_v20  ;;  %v381_v41 = vsub.f32 %v358_v34, %v606_v63  ;;  %v444_v42 = vmul.f32 %v379_v31, %v379_v31  ;;  %v465_v43 = vsel %vm451_vm4, %v442_v32, 0.0 }
  0x5f   : > { %v382_v46 = vsub.f32 %v359_v39, %v606_v63  ;;  %v445_v47 = vmul.f32 %v380_v36, %v380_v36  ;;  %v467_v48 = vsel %vm451_vm4, %v443_v37, 0.0  ;;  %v383_v51 = vsub.f32 %v360_v44, %v606_v63 }
  0x60   : > { %v458_v30 = vadd.f32 %v457_v23, %v456_v25  ;;  %v446_v52 = vmul.f32 %v381_v41, %v381_v41  ;;  %v469_v53 = vsel %vm451_vm4, %v444_v42, 0.0  ;;  %v384_v56 = vsub.f32 %v361_v49, %v606_v63 }
  0x61   : > { %v447_v57 = vmul.f32 %v382_v46, %v382_v46  ;;  %v471_v58 = vsel %vm451_vm4, %v445_v47, 0.0  ;;  %v385_v60 = vsub.f32 %v362_v54, %v606_v63  ;;  %v448_v61 = vmul.f32 %v383_v51, %v383_v51 }
  0x62   : > { %v460_v35 = vadd.f32 %v459_v28, %v458_v30  ;;  %v473_v62 = vsel %vm451_vm4, %v446_v52, 0.0  ;;  %v449_v1 = vmul.f32 %v384_v56, %v384_v56 }
  0x63   : > { %v475_v2 = vsel %vm451_vm4, %v447_v57, 0.0  ;;  %v450_v4 = vmul.f32 %v385_v60, %v385_v60  ;;  %v477_v5 = vsel %vm451_vm4, %v448_v61, 0.0 }
  0x64   : > { %v462_v40 = vadd.f32 %v461_v33, %v460_v35  ;;  %v479_v7 = vsel %vm451_vm4, %v449_v1, 0.0 }
  0x65   : > { %v481_v9 = vsel %vm451_vm4, %v450_v4, 0.0 }
  0x66   : > { %v464_v45 = vadd.f32 %v463_v38, %v462_v40 }
  0x68   : > { %v466_v50 = vadd.f32 %v465_v43, %v464_v45 }
  0x6a   : > { %v468_v55 = vadd.f32 %v467_v48, %v466_v50 }
  0x6c   : > { %v470_v59 = vadd.f32 %v469_v53, %v468_v55 }
  0x6e   : > { %v472_v0 = vadd.f32 %v471_v58, %v470_v59 }
  0x70   : > { %v474_v3 = vadd.f32 %v473_v62, %v472_v0 }
  0x72   : > { %v476_v6 = vadd.f32 %v475_v2, %v474_v3 }
  0x74   : > { %v478_v8 = vadd.f32 %v477_v5, %v476_v6 }
  0x76   : > { %v480_v10 = vadd.f32 %v479_v7, %v478_v8 }
  0x78   : > { %v482_v11 = vadd.f32 %v481_v9, %v480_v10 }
  0x7a   : > { %v483_v63 = vrot.slane %v482_v11, 4 }
  0x7c   : > { %v484_v12 = vadd.f32 %v483_v63, %v482_v11 }
  0x7e   : > { %v485_v13 = vrot.slane %v484_v12, 2 }
  0x80   : > { %v486_v14 = vadd.f32 %v485_v13, %v484_v12 }
  0x82   : > { %v487_v15 = vrot.slane %v486_v14, 1 }
  0x84   : > { %v488_v17 = vadd.f32 %v487_v15, %v486_v14 }
  0x86   : > { %v489_v18 = vadd.f32 %v488_v17, %v434_v16 }
  0x88   : > { %491 = vst.msk [vmem:[#allocation4] sm:$0x1] %vm490_vm5, %v489_v18 }
  0x89 PF: > { %493 = sbr.rel (!%p334_p6) target bundleno = 394 (0x18a), region = 44  ;;  %v508_v20 = vld [vmem:[#allocation3] sm:$0x1] (%p334_p6)  ;;  %vm510_vm6 = vcmask (%p334_p6), 253952   ;;  %vm526_vm9 = vcmask (%p334_p6), 0  }
  0x8a   : > { %v509_v22 = vsub.f32 (%p334_p6), 0.0, %v508_v20 }
  0x8c   : > { %511 = vst.msk [vmem:[%s937_s1] sm:$0x1] (%p334_p6), %vm510_vm6, %v509_v22 }
  0x8f   : > { %v494_v19 = vld [vmem:[#allocation4] sm:$0x1] (%p334_p6) }
  0x90   : > { %v495_v21 = vmul.f32 0.0078125, %v494_v19 }
  0x92   : > { %648 = vrsqrt.f32 %v495_v21  ;;  %vm498_vm7 = vcmp.eq.f32.partialorder %v495_v21, inf  ;;  %v501_v24 = vand.u32 2147483648, %v495_v21  ;;  %vm500_vm8 = vcmp.eq.f32.partialorder %v495_v21, 0.0 }
  0x9c   : > { %v649_v23 = vpop.eup %648 }
  0x9d   : > { %v497_v25 = vmul.f32 %v649_v23, %v495_v21 }
  0x9f   : > { %v499_v26 = vsel %vm498_vm7, %v495_v21, %v497_v25 }
  0xa0   : > { %v502_v27 = vsel %vm500_vm8, %v501_v24, %v499_v26 }
  0xa1   : > { %v503_v28 = vadd.f32 1e-06, %v502_v27 }
  0xa3   : > { %650 = vrcp.f32 %v503_v28 }
  0xad   : > { %v651_v29 = vpop.eup %650 }
  0xae   : > { %652 = vlog2.f32 %v651_v29 }
  0xb8   : > { %v653_v30 = vpop.eup %652 }
  0xb9   : > { %v507_v31 = vmul.f32 0.6931472, %v653_v30 }
  0xbb   : > { %v512_v32 = vmul.f32 1.442695, %v507_v31  ;;  %v515_v33 = vsel %vm510_vm6, %v507_v31, 0.0 }
  0xbc   : > { %516 = vadd.xlane.f32.xlu0 %v515_v33 }
  0xbd   : > { %654 = vpow2.f32 %v512_v32 }
  0xc7   : > { %v655_v34 = vpop.eup %654 }
  0xc8   : > { %514 = vst.msk [vmem:[%s938_s2] sm:$0x1] %vm510_vm6, %v655_v34 }
 0x149   : > { %v517_v35 = vpop.xlane.xlu0 %516 }
 0x14a   : > { %v518_v36 = vrot.slane %v517_v35, 4 }
 0x14c   : > { %v519_v37 = vadd.f32 %v518_v36, %v517_v35 }
 0x14e   : > { %v520_v38 = vrot.slane %v519_v37, 2 }
 0x150   : > { %v521_v39 = vadd.f32 %v520_v38, %v519_v37 }
 0x152   : > { %v522_v40 = vrot.slane %v521_v39, 1 }
 0x154   : > { %v523_v41 = vadd.f32 %v522_v40, %v521_v39 }
 0x156   : > { %613 = vpush %v523_v41 }
 0x187   : > { %s614_s18 = spop %613 }
 0x188   : > { %v525_v42 = vstv %s614_s18 }
 0x189   : > { %527 = vst.msk [vmem:[#allocation5] sm:$0x1] %vm526_vm9, %v525_v42 }
 0x18a PF: > { %p901_p8 = scmp.eq.s32.totalorder %s598_s15, 1  ;;  %s712_s20 = smov [#allocation5]  }
 0x18b   : > { %s541_s21 = sshll.u32 %s712_s20, 4  ;;  %s542_s21 = int_to_ptr.vmem [resolvable:$true] %s541_s21 }
 0x18c   : > { %s656_s22 = scalar_lea.vmem %s542_s21, 16  ;;  %s662_s23 = scalar_lea.vmem %s542_s21, 32 }
 0x18d   : > { %p657_p9 = scmp.ne.s32.totalorder %s542_s21, %s656_s22  ;;  %p663_p12 = scmp.lt.s32.totalorder %s542_s21, %s542_s21 }
 0x18e   : > { %p664_p13 = scmp.lt.s32.totalorder %s662_s23, %s656_s22 }
 0x18f   : > { %p658_p10 = pnand %p657_p9, %p901_p8 }
 0x190   : > { %p665_p0 = por %p664_p13, %p663_p12 }
 0x191   : > { %p659_p11 = pneg %p658_p10 }
 0x193   : > { %p666_p1 = pnand %p665_p0, %p659_p11 }
 0x195   : > { %669 = shalt.err (!%p666_p1)
}
 0x196   : > { %s670_s25 = scalar_lea.hbm %s939_s3, 16 }
 0x197   : > { %p671_p2 = scmp.ne.s32.totalorder %s939_s3, %s670_s25  ;;  %p676_p5 = scmp.lt.u32.totalorder %s670_s25, %s939_s3 }
 0x199   : > { %p672_p3 = pnand %p671_p2, %p901_p8 }
 0x19b   : > { %p673_p4 = pneg %p672_p3 }
 0x19d   : > { %p678_p6 = pnand %p676_p5, %p673_p4 }
 0x19f   : > { %681 = shalt.err (!%p678_p6)
}
 0x1a0   : > { %616 = dma.vmem_to_hbm [thread:$0]  (%p901_p8), %s542_s21, 16, %s939_s3, [#allocation6]  }
 0x1a1   : > { %695 = dma.done.wait (%p901_p8), [#allocation6], 16  }
 0x1a2   : > { %697 = vsyncadd (%p901_p8), [#allocation6], 4294967280 }
 0x1a3 PF: > { %s15_s14 = sadd.s32 1, %s708_s14   ;;  %s941_s12 = smov %s704_s13 }
 0x1a4   : > { %p12_p7 = scmp.ge.s32.totalorder %s15_s14, 4   ;;  %s942_s13 = smov %s944_s16 }
 0x1a6   :  { %14 = sbr.rel (!%p12_p7) target bundleno = 2 (0x2), region = 87 }
 0x1ad   :  { %560 = vsyncpa [#allocation6], 1 }
 0x1ae   :  { %562 = vsyncpa [#allocation6 + $0x1], 1 }

// kernel: _lambda_.40
= control target key start
LH: loop header
LB: loop body
LE: loop exit
PB: predicated region body
PF: predicated region fallthrough
CT: control target
= control target key end

     0   :  { %vm156_vm0 = vcmask 257024   ;;  %s385_s0 = inlined_call_operand.vmem [shape: f32[128,32], index: 0, kind: input, shape index: {}]   ;;  %s386_s1 = inlined_call_operand.vmem [shape: f32[1,32], index: 1, kind: input, shape index: {}]   ;;  %s387_s2 = inlined_call_operand.vmem [shape: f32[1,32], index: 2, kind: input, shape index: {}]   ;;  %s388_s3 = inlined_call_operand.vmem [shape: bf16[128,32], index: 3, kind: output, shape index: {}]  }
   0x1   :  { %v14_v0 = vld [vmem:[%s385_s0] sm:$0xff]  ;;  %v15_v4 = vld [vmem:[%s385_s0 + $0x8] sm:$0xff]  ;;  %v16_v5 = vld [vmem:[%s385_s0 + $0x10] sm:$0xff] }
   0x2   :  { %v237_v1 = vld [vmem:[%s386_s1] ss:$0 sm:$0xff]  ;;  %v17_v6 = vld [vmem:[%s385_s0 + $0x18] sm:$0xff]  ;;  %v19_v11 = vld [vmem:[%s385_s0 + $0x28] sm:$0xff] }
   0x3   :  { %v242_v2 = vld [vmem:[%s387_s2] ss:$0 sm:$0xff]  ;;  %v37_v3 = vadd.f32 %v237_v1, %v14_v0  ;;  %v38_v7 = vadd.f32 %v237_v1, %v15_v4  ;;  %v39_v8 = vadd.f32 %v237_v1, %v16_v5  ;;  %v40_v9 = vadd.f32 %v237_v1, %v17_v6  ;;  %v20_v12 = vld [vmem:[%s385_s0 + $0x30] sm:$0xff]  ;;  %v21_v17 = vld [vmem:[%s385_s0 + $0x38] sm:$0xff] }
   0x4   :  { %v18_v10 = vld [vmem:[%s385_s0 + $0x20] sm:$0xff]  ;;  %v42_v15 = vadd.f32 %v237_v1, %v19_v11  ;;  %v43_v16 = vadd.f32 %v237_v1, %v20_v12  ;;  %v44_v21 = vadd.f32 %v237_v1, %v21_v17  ;;  %v23_v35 = vld [vmem:[%s385_s0 + $0x48] sm:$0xff]  ;;  %v24_v36 = vld [vmem:[%s385_s0 + $0x50] sm:$0xff] }
   0x5   :  { %v60_v13 = vmul.f32 %v242_v2, %v37_v3  ;;  %v41_v14 = vadd.f32 %v237_v1, %v18_v10  ;;  %v61_v18 = vmul.f32 %v242_v2, %v38_v7  ;;  %v62_v19 = vmul.f32 %v242_v2, %v39_v8  ;;  %v22_v30 = vld [vmem:[%s385_s0 + $0x40] sm:$0xff]  ;;  %v25_v37 = vld [vmem:[%s385_s0 + $0x58] sm:$0xff]  ;;  %v27_v43 = vld [vmem:[%s385_s0 + $0x68] sm:$0xff] }
   0x6   :  { %v63_v20 = vmul.f32 %v242_v2, %v40_v9  ;;  %v65_v24 = vmul.f32 %v242_v2, %v42_v15  ;;  %v66_v25 = vmul.f32 %v242_v2, %v43_v16  ;;  %v67_v29 = vmul.f32 %v242_v2, %v44_v21  ;;  %v26_v42 = vld [vmem:[%s385_s0 + $0x60] sm:$0xff]  ;;  %v28_v44 = vld [vmem:[%s385_s0 + $0x70] sm:$0xff]  ;;  %v29_v49 = vld [vmem:[%s385_s0 + $0x78] sm:$0xff] }
   0x7   :  { %v76_v22 = vmax.f32 %v60_v13, 0.0  ;;  %v64_v23 = vmul.f32 %v242_v2, %v41_v14  ;;  %v77_v26 = vmax.f32 %v61_v18, 0.0  ;;  %v78_v27 = vmax.f32 %v62_v19, 0.0 }
   0x8   :  { %v79_v28 = vmax.f32 %v63_v20, 0.0  ;;  %v81_v33 = vmax.f32 %v65_v24, 0.0  ;;  %v82_v34 = vmax.f32 %v66_v25, 0.0  ;;  %v83_v41 = vmax.f32 %v67_v29, 0.0 }
   0x9   :  { %v195_v31 = vpack.c.bf16 %v76_v22, %v76_v22  ;;  %v80_v32 = vmax.f32 %v64_v23, 0.0  ;;  %v196_v38 = vpack.c.bf16 %v77_v26, %v77_v26  ;;  %v197_v39 = vpack.c.bf16 %v78_v27, %v78_v27 }
   0xa   :  { %v198_v40 = vpack.c.bf16 %v79_v28, %v79_v28  ;;  %v200_v46 = vpack.c.bf16 %v81_v33, %v81_v33  ;;  %v201_v47 = vpack.c.bf16 %v82_v34, %v82_v34  ;;  %v45_v48 = vadd.f32 %v237_v1, %v22_v30 }
   0xb   :  { %157 = vst.msk [vmem:[%s388_s3] sm:$0xf] %vm156_vm0, %v195_v31  ;;  %v199_v45 = vpack.c.bf16 %v80_v32, %v80_v32  ;;  %158 = vst.msk [vmem:[%s388_s3 + $0x4] sm:$0xf] %vm156_vm0, %v196_v38  ;;  %v202_v50 = vpack.c.bf16 %v83_v41, %v83_v41  ;;  %v46_v51 = vadd.f32 %v237_v1, %v23_v35 }
   0xc   :  { %159 = vst.msk [vmem:[%s388_s3 + $0x8] sm:$0xf] %vm156_vm0, %v197_v39  ;;  %160 = vst.msk [vmem:[%s388_s3 + $0xc] sm:$0xf] %vm156_vm0, %v198_v40  ;;  %v47_v52 = vadd.f32 %v237_v1, %v24_v36  ;;  %v48_v53 = vadd.f32 %v237_v1, %v25_v37  ;;  %v68_v54 = vmul.f32 %v242_v2, %v45_v48 }
   0xd   :  { %161 = vst.msk [vmem:[%s388_s3 + $0x10] sm:$0xf] %vm156_vm0, %v199_v45  ;;  %162 = vst.msk [vmem:[%s388_s3 + $0x14] sm:$0xf] %vm156_vm0, %v200_v46  ;;  %v49_v55 = vadd.f32 %v237_v1, %v26_v42  ;;  %v50_v56 = vadd.f32 %v237_v1, %v27_v43  ;;  %v51_v57 = vadd.f32 %v237_v1, %v28_v44 }
   0xe   :  { %163 = vst.msk [vmem:[%s388_s3 + $0x18] sm:$0xf] %vm156_vm0, %v201_v47  ;;  %164 = vst.msk [vmem:[%s388_s3 + $0x1c] sm:$0xf] %vm156_vm0, %v202_v50  ;;  %v69_v58 = vmul.f32 %v242_v2, %v46_v51  ;;  %v70_v59 = vmul.f32 %v242_v2, %v47_v52  ;;  %v71_v60 = vmul.f32 %v242_v2, %v48_v53  ;;  %v84_v62 = vmax.f32 %v68_v54, 0.0 }
   0xf   :  { %v52_v61 = vadd.f32 %v237_v1, %v29_v49  ;;  %v72_v63 = vmul.f32 %v242_v2, %v49_v55  ;;  %v73_v0 = vmul.f32 %v242_v2, %v50_v56  ;;  %v74_v3 = vmul.f32 %v242_v2, %v51_v57 }
  0x10   :  { %v85_v4 = vmax.f32 %v69_v58, 0.0  ;;  %v86_v5 = vmax.f32 %v70_v59, 0.0  ;;  %v87_v6 = vmax.f32 %v71_v60, 0.0  ;;  %v203_v8 = vpack.c.bf16 %v84_v62, %v84_v62 }
  0x11   :  { %v75_v7 = vmul.f32 %v242_v2, %v52_v61  ;;  %v88_v9 = vmax.f32 %v72_v63, 0.0  ;;  %v89_v10 = vmax.f32 %v73_v0, 0.0  ;;  %v90_v11 = vmax.f32 %v74_v3, 0.0 }
  0x12   :  { %v204_v12 = vpack.c.bf16 %v85_v4, %v85_v4  ;;  %v205_v13 = vpack.c.bf16 %v86_v5, %v86_v5  ;;  %v206_v14 = vpack.c.bf16 %v87_v6, %v87_v6  ;;  %165 = vst.msk [vmem:[%s388_s3 + $0x20] sm:$0xf] %vm156_vm0, %v203_v8 }
  0x13   :  { %v91_v1 = vmax.f32 %v75_v7, 0.0  ;;  %v207_v15 = vpack.c.bf16 %v88_v9, %v88_v9  ;;  %v208_v16 = vpack.c.bf16 %v89_v10, %v89_v10  ;;  %v209_v17 = vpack.c.bf16 %v90_v11, %v90_v11 }
  0x14   :  { %166 = vst.msk [vmem:[%s388_s3 + $0x24] sm:$0xf] %vm156_vm0, %v204_v12  ;;  %167 = vst.msk [vmem:[%s388_s3 + $0x28] sm:$0xf] %vm156_vm0, %v205_v13 }
  0x15   :  { %168 = vst.msk [vmem:[%s388_s3 + $0x2c] sm:$0xf] %vm156_vm0, %v206_v14  ;;  %v210_v2 = vpack.c.bf16 %v91_v1, %v91_v1  ;;  %169 = vst.msk [vmem:[%s388_s3 + $0x30] sm:$0xf] %vm156_vm0, %v207_v15 }
  0x16   :  { %170 = vst.msk [vmem:[%s388_s3 + $0x34] sm:$0xf] %vm156_vm0, %v208_v16  ;;  %171 = vst.msk [vmem:[%s388_s3 + $0x38] sm:$0xf] %vm156_vm0, %v209_v17 }
  0x17   :  { %172 = vst.msk [vmem:[%s388_s3 + $0x3c] sm:$0xf] %vm156_vm0, %v210_v2 }

// kernel: _lambda_.38
= control target key start
LH: loop header
LB: loop body
LE: loop exit
PB: predicated region body
PF: predicated region fallthrough
CT: control target
= control target key end

     0   :  { %vm120_vm0 = vcmask 261120   ;;  %s503_s3 = inlined_call_operand.vmem [shape: bf16[32,32], index: 3, kind: input, shape index: {}]   ;;  %s504_s0 = inlined_call_operand.vmem [shape: f32[128,32], index: 0, kind: input, shape index: {}]   ;;  %s505_s1 = inlined_call_operand.vmem [shape: f32[1,32], index: 1, kind: input, shape index: {}]   ;;  %s506_s2 = inlined_call_operand.vmem [shape: f32[1,32], index: 2, kind: input, shape index: {}]   ;;  %s507_s4 = inlined_call_operand.vmem [shape: f32[128,32], index: 4, kind: output, shape index: {}]  }
   0x1   :  { %v308_v0 = vld [vmem:[%s503_s3] sm:$0xff]   ;;  %v309_v1 = vld [vmem:[%s503_s3 + $0x8] sm:$0xff]   ;;  %v20_v12 = vld [vmem:[%s504_s0 + $0x10] sm:$0xff] }
   0x2   :  { %284 = vmatprep.subr.bf16.mxu0 %v308_v0  ;;  %304 = vmatprep.subr.bf16.mxu1 %v308_v0  ;;  %v18_v2 = vld [vmem:[%s504_s0] sm:$0xff]  ;;  %v19_v3 = vld [vmem:[%s504_s0 + $0x8] sm:$0xff]  ;;  %v21_v13 = vld [vmem:[%s504_s0 + $0x18] sm:$0xff] }
   0x3   :  { %v350_v4 = vld [vmem:[%s505_s1] ss:$0 sm:$0xff]  ;;  %285 = vmatpush3.bf16.msra.mxu0 %v308_v0  ;;  %306 = vmatpush3.bf16.msra.mxu1 %v308_v0  ;;  %v27_v9 = vld [vmem:[%s504_s0 + $0x48] sm:$0xff]  ;;  %v28_v14 = vld [vmem:[%s504_s0 + $0x50] sm:$0xff] }
   0x4   :  { %v41_v5 = vadd.f32 %v350_v4, %v18_v2  ;;  %v42_v6 = vadd.f32 %v350_v4, %v19_v3  ;;  %v357_v7 = vld [vmem:[%s506_s2] ss:$0 sm:$0xff]  ;;  %286 = vmatprep.subr.bf16.mxu0 %v309_v1  ;;  %305 = vmatprep.subr.bf16.mxu1 %v309_v1  ;;  %v50_v11 = vadd.f32 %v350_v4, %v27_v9  ;;  %v29_v19 = vld [vmem:[%s504_s0 + $0x58] sm:$0xff]  ;;  %v23_v29 = vld [vmem:[%s504_s0 + $0x28] sm:$0xff] }
   0x5   :  { %v26_v8 = vld [vmem:[%s504_s0 + $0x40] sm:$0xff]  ;;  %v43_v17 = vadd.f32 %v350_v4, %v20_v12  ;;  %v44_v18 = vadd.f32 %v350_v4, %v21_v13  ;;  %v51_v22 = vadd.f32 %v350_v4, %v28_v14  ;;  %v52_v23 = vadd.f32 %v350_v4, %v29_v19  ;;  %v31_v35 = vld [vmem:[%s504_s0 + $0x68] sm:$0xff]  ;;  %v24_v40 = vld [vmem:[%s504_s0 + $0x30] sm:$0xff] }
   0x6   :  { %v49_v10 = vadd.f32 %v350_v4, %v26_v8  ;;  %v64_v15 = vmul.f32 %v357_v7, %v41_v5  ;;  %v65_v16 = vmul.f32 %v357_v7, %v42_v6  ;;  %v73_v21 = vmul.f32 %v357_v7, %v50_v11  ;;  %v22_v24 = vld [vmem:[%s504_s0 + $0x20] sm:$0xff]  ;;  %v25_v41 = vld [vmem:[%s504_s0 + $0x38] sm:$0xff]  ;;  %v32_v46 = vld [vmem:[%s504_s0 + $0x70] sm:$0xff] }
   0x7   :  { %287 = vmatpush3.bf16.msra.mxu0 %v309_v1  ;;  %307 = vmatpush3.bf16.msra.mxu1 %v309_v1  ;;  %v66_v27 = vmul.f32 %v357_v7, %v43_v17  ;;  %v67_v28 = vmul.f32 %v357_v7, %v44_v18  ;;  %v74_v32 = vmul.f32 %v357_v7, %v51_v22  ;;  %v30_v34 = vld [vmem:[%s504_s0 + $0x60] sm:$0xff]  ;;  %v33_v51 = vld [vmem:[%s504_s0 + $0x78] sm:$0xff] }
   0x8   :  { %v72_v20 = vmul.f32 %v357_v7, %v49_v10  ;;  %v80_v25 = vmax.f32 %v64_v15, 0.0  ;;  %v81_v26 = vmax.f32 %v65_v16, 0.0  ;;  %v89_v31 = vmax.f32 %v73_v21, 0.0 }
   0x9   :  { %v75_v33 = vmul.f32 %v357_v7, %v52_v23  ;;  %v82_v37 = vmax.f32 %v66_v27, 0.0  ;;  %v83_v38 = vmax.f32 %v67_v28, 0.0  ;;  %v45_v39 = vadd.f32 %v350_v4, %v22_v24 }
   0xa   :  { %v88_v30 = vmax.f32 %v72_v20, 0.0  ;;  %v96_v36 = vpack.c.bf16 %v81_v26, %v80_v25  ;;  %v90_v43 = vmax.f32 %v74_v32, 0.0  ;;  %v46_v45 = vadd.f32 %v350_v4, %v23_v29 }
   0xb   :  { %v91_v44 = vmax.f32 %v75_v33, 0.0  ;;  %v97_v47 = vpack.c.bf16 %v83_v38, %v82_v37  ;;  %v68_v48 = vmul.f32 %v357_v7, %v45_v39  ;;  %v53_v49 = vadd.f32 %v350_v4, %v30_v34 }
   0xc   :  { %v100_v42 = vpack.c.bf16 %v89_v31, %v88_v30  ;;  %288 = vmatprep.mubr.msk.bf16.mxu0 %vm120_vm0, %v96_v36  ;;  %v54_v50 = vadd.f32 %v350_v4, %v31_v35  ;;  %v69_v53 = vmul.f32 %v357_v7, %v46_v45  ;;  %v47_v54 = vadd.f32 %v350_v4, %v24_v40 }
   0xd   :  { %v101_v52 = vpack.c.bf16 %v91_v44, %v90_v43  ;;  %v48_v55 = vadd.f32 %v350_v4, %v25_v41  ;;  %289 = vmatmul.mubr.msk.bf16.vlgmr.msra.gmra.mrb[0].mxu0 %vm120_vm0, %v97_v47  ;;  %v84_v56 = vmax.f32 %v68_v48, 0.0  ;;  %v76_v57 = vmul.f32 %v357_v7, %v53_v49 }
   0xe   :  { %296 = vmatprep.mubr.msk.bf16.mxu1 %vm120_vm0, %v100_v42  ;;  %v77_v58 = vmul.f32 %v357_v7, %v54_v50  ;;  %v55_v59 = vadd.f32 %v350_v4, %v32_v46  ;;  %v85_v60 = vmax.f32 %v69_v53, 0.0  ;;  %v70_v61 = vmul.f32 %v357_v7, %v47_v54 }
   0xf   :  { %297 = vmatmul.mubr.msk.bf16.vlgmr.msra.gmra.mrb[0].mxu1 %vm120_vm0, %v101_v52  ;;  %v71_v62 = vmul.f32 %v357_v7, %v48_v55  ;;  %v56_v63 = vadd.f32 %v350_v4, %v33_v51  ;;  %v92_v0 = vmax.f32 %v76_v57, 0.0 }
  0x10   :  { %v93_v1 = vmax.f32 %v77_v58, 0.0  ;;  %v78_v2 = vmul.f32 %v357_v7, %v55_v59  ;;  %v98_v3 = vpack.c.bf16 %v85_v60, %v84_v56  ;;  %v86_v5 = vmax.f32 %v70_v61, 0.0 }
  0x11   :  { %v87_v6 = vmax.f32 %v71_v62, 0.0  ;;  %v79_v8 = vmul.f32 %v357_v7, %v56_v63 }
  0x12   :  { %v102_v9 = vpack.c.bf16 %v93_v1, %v92_v0  ;;  %v94_v10 = vmax.f32 %v78_v2, 0.0  ;;  %292 = vmatprep.mubr.msk.bf16.mxu0 %vm120_vm0, %v98_v3 }
  0x13   :  { %v99_v11 = vpack.c.bf16 %v87_v6, %v86_v5  ;;  %v95_v12 = vmax.f32 %v79_v8, 0.0 }
  0x14   :  { %300 = vmatprep.mubr.msk.bf16.mxu1 %vm120_vm0, %v102_v9 }
  0x15   :  { %v103_v13 = vpack.c.bf16 %v95_v12, %v94_v10  ;;  %293 = vmatmul.mubr.msk.bf16.gmra.mrb[4].mxu0 %vm120_vm0, %v99_v11 }
  0x17   :  { %301 = vmatmul.mubr.msk.bf16.gmra.mrb[4].mxu1 %vm120_vm0, %v103_v13 }
  0xe0   :  { %v290_v4 = vpop.f32.mrb[0].mxu0 }
  0xe1   :  { %244 = vst.msk [vmem:[%s507_s4 + $0x10] sm:$0xff] %vm120_vm0, %v290_v4  ;;  %v179_v14 = vpop.f32.mrb[1].mxu0 }
  0xe2   :  { %v298_v7 = vpop.f32.mrb[0].mxu1  ;;  %242 = vst.msk [vmem:[%s507_s4] sm:$0xff] %vm120_vm0, %v179_v14  ;;  %v291_v16 = vpop.f32.mrb[2].mxu0 }
  0xe3   :  { %252 = vst.msk [vmem:[%s507_s4 + $0x50] sm:$0xff] %vm120_vm0, %v298_v7  ;;  %v211_v15 = vpop.f32.mrb[1].mxu1  ;;  %245 = vst.msk [vmem:[%s507_s4 + $0x18] sm:$0xff] %vm120_vm0, %v291_v16  ;;  %v182_v18 = vpop.f32.mrb[3].mxu0 }
  0xe4   :  { %250 = vst.msk [vmem:[%s507_s4 + $0x40] sm:$0xff] %vm120_vm0, %v211_v15  ;;  %v299_v17 = vpop.f32.mrb[2].mxu1  ;;  %243 = vst.msk [vmem:[%s507_s4 + $0x8] sm:$0xff] %vm120_vm0, %v182_v18 }
  0xe5   :  { %253 = vst.msk [vmem:[%s507_s4 + $0x58] sm:$0xff] %vm120_vm0, %v299_v17  ;;  %v214_v19 = vpop.f32.mrb[3].mxu1 }
  0xe6   :  { %251 = vst.msk [vmem:[%s507_s4 + $0x48] sm:$0xff] %vm120_vm0, %v214_v19 }
  0xe8   :  { %v294_v20 = vpop.f32.mrb[4].mxu0 }
  0xe9   :  { %248 = vst.msk [vmem:[%s507_s4 + $0x30] sm:$0xff] %vm120_vm0, %v294_v20  ;;  %v195_v22 = vpop.f32.mrb[5].mxu0 }
  0xea   :  { %v302_v21 = vpop.f32.mrb[4].mxu1  ;;  %246 = vst.msk [vmem:[%s507_s4 + $0x20] sm:$0xff] %vm120_vm0, %v195_v22  ;;  %v295_v24 = vpop.f32.mrb[6].mxu0 }
  0xeb   :  { %256 = vst.msk [vmem:[%s507_s4 + $0x70] sm:$0xff] %vm120_vm0, %v302_v21  ;;  %v227_v23 = vpop.f32.mrb[5].mxu1  ;;  %249 = vst.msk [vmem:[%s507_s4 + $0x38] sm:$0xff] %vm120_vm0, %v295_v24  ;;  %v198_v26 = vpop.f32.mrb[7].mxu0 }
  0xec   :  { %254 = vst.msk [vmem:[%s507_s4 + $0x60] sm:$0xff] %vm120_vm0, %v227_v23  ;;  %v303_v25 = vpop.f32.mrb[6].mxu1  ;;  %247 = vst.msk [vmem:[%s507_s4 + $0x28] sm:$0xff] %vm120_vm0, %v198_v26 }
  0xed   :  { %257 = vst.msk [vmem:[%s507_s4 + $0x78] sm:$0xff] %vm120_vm0, %v303_v25  ;;  %v230_v27 = vpop.f32.mrb[7].mxu1 }
  0xee   :  { %255 = vst.msk [vmem:[%s507_s4 + $0x68] sm:$0xff] %vm120_vm0, %v230_v27 }

// kernel: _lambda_.41
= control target key start
LH: loop header
LB: loop body
LE: loop exit
PB: predicated region body
PF: predicated region fallthrough
CT: control target
= control target key end

     0   :  { %vm381_vm0 = vcmask 261120   ;;  %vm36_vm1 = vcmask 64512   ;;  %v1880_v60 = vmov 0.0   ;;  %vm1402_vm2 = vcmask 7168   ;;  %s2568_s1 = inlined_call_operand.vmem [shape: bf16[288,8], index: 1, kind: input, shape index: {}, may-alias: {1,2}]   ;;  %s2569_s0 = inlined_call_operand.vmem [shape: bf16[128,288], index: 0, kind: input, shape index: {}]   ;;  %s2570_s2 = inlined_call_operand.vmem [shape: bf16[288,8], index: 2, kind: input, shape index: {}, may-alias: {1,2}]   ;;  %s2571_s4 = inlined_call_operand.vmem [shape: f32[1,8], index: 4, kind: input, shape index: {}, may-alias: {3,4}]   ;;  %s2572_s6 = inlined_call_operand.vmem [shape: f32[1,8], index: 6, kind: input, shape index: {}, may-alias: {5,6}]   ;;  %s2573_s3 = inlined_call_operand.vmem [shape: f32[1,8], index: 3, kind: input, shape index: {}, may-alias: {3,4}]   ;;  %s2574_s5 = inlined_call_operand.vmem [shape: f32[1,8], index: 5, kind: input, shape index: {}, may-alias: {5,6}]   ;;  %s2575_s7 = inlined_call_operand.vmem [shape: f32[128,8], index: 7, kind: input, shape index: {}]   ;;  %s2576_s8 = inlined_call_operand.vmem [shape: f32[128,8], index: 8, kind: output, shape index: {0}]   ;;  %s2577_s9 = inlined_call_operand.vmem [shape: f32[128,1], index: 9, kind: output, shape index: {1}]  }
   0x1   :  { %v1716_v0 = vld [vmem:[%s2568_s1 + $0x40] sm:$0xff]   ;;  %v1719_v3 = vld [vmem:[%s2568_s1 + $0x48] sm:$0xff]   ;;  %v1723_v7 = vld [vmem:[%s2568_s1 + $0x50] sm:$0xff]   ;;  %37 = vst.msk [vmem:[#allocation2] sm:$0xff] %vm36_vm1, %v1880_v60 }
   0x2   :  { %v1717_v1 = vld [vmem:[%s2568_s1 + $0x80] sm:$0xff]   ;;  %1523 = vmatprep.subr.bf16.mxu0 %v1716_v0  ;;  %v1720_v4 = vld [vmem:[%s2568_s1 + $0x88] sm:$0xff]   ;;  %v1726_v10 = vld [vmem:[%s2568_s1 + $0x10] sm:$0xff]   ;;  %38 = vst.msk [vmem:[#allocation2 + $0x8] sm:$0xff] %vm36_vm1, %v1880_v60 }
   0x3   :  { %v1718_v2 = vld [vmem:[%s2568_s1] sm:$0xff]   ;;  %1671 = vmatprep.subr.bf16.mxu1 %v1717_v1  ;;  %v1721_v5 = vld [vmem:[%s2568_s1 + $0x8] sm:$0xff]   ;;  %v1728_v12 = vld [vmem:[%s2568_s1 + $0x58] sm:$0xff]   ;;  %39 = vst.msk [vmem:[#allocation2 + $0x10] sm:$0xff] %vm36_vm1, %v1880_v60 }
   0x4   :  { %1524 = vmatpush3.bf16.msra.mxu0 %v1718_v2  ;;  %1672 = vmatpush3.bf16.msra.mxu1 %v1717_v1  ;;  %v1952_v6 = vld [vmem:[%s2569_s0 + $0x8] ss:$12 sps:$4 sm:$0xff]   ;;  %v1960_v8 = vld [vmem:[%s2569_s0 + $0x20] ss:$12 sps:$4 sm:$0xff]   ;;  %v1730_v14 = vld [vmem:[%s2568_s1 + $0x18] sm:$0xff]   ;;  %40 = vst.msk [vmem:[#allocation2 + $0x18] sm:$0xff] %vm36_vm1, %v1880_v60 }
   0x5   :  { %1525 = vmatprep.subr.bf16.mxu0 %v1719_v3  ;;  %1673 = vmatprep.subr.bf16.mxu1 %v1720_v4  ;;  %v1725_v9 = vld [vmem:[%s2570_s2 + $0x40] sm:$0xff]   ;;  %v1729_v13 = vld [vmem:[%s2570_s2 + $0x48] sm:$0xff]   ;;  %v2000_v18 = vld [vmem:[%s2569_s0 + $0x50] ss:$12 sps:$4 sm:$0xff]   ;;  %41 = vst.msk [vmem:[#allocation2 + $0x20] sm:$0xff] %vm36_vm1, %v1880_v60 }
   0x6   :  { %1675 = vmatprep.mubr.msk.bf16.mxu1 %vm381_vm0, %v1952_v6  ;;  %v1727_v11 = vld [vmem:[%s2570_s2] sm:$0xff]   ;;  %v1731_v15 = vld [vmem:[%s2570_s2 + $0x8] sm:$0xff]   ;;  %v1735_v19 = vld [vmem:[%s2570_s2 + $0x50] sm:$0xff]   ;;  %42 = vst.msk [vmem:[#allocation2 + $0x28] sm:$0xff] %vm36_vm1, %v1880_v60 }
   0x7   :  { %v1990_v16 = vld [vmem:[%s2569_s0 + $0x38] ss:$12 sps:$4 sm:$0xff]   ;;  %v1737_v21 = vld [vmem:[%s2570_s2 + $0x10] sm:$0xff]   ;;  %v1738_v22 = vld [vmem:[%s2568_s1 + $0x68] sm:$0xff]   ;;  %43 = vst.msk [vmem:[#allocation2 + $0x30] sm:$0xff] %vm36_vm1, %v1880_v60 }
   0x8   :  { %1526 = vmatpush3.bf16.msra.mxu0 %v1721_v5  ;;  %1674 = vmatpush3.bf16.msra.mxu1 %v1720_v4  ;;  %v1733_v17 = vld [vmem:[%s2568_s1 + $0x60] sm:$0xff]   ;;  %v1739_v23 = vld [vmem:[%s2570_s2 + $0x58] sm:$0xff]   ;;  %v1740_v24 = vld [vmem:[%s2568_s1 + $0x28] sm:$0xff]   ;;  %44 = vst.msk [vmem:[#allocation2 + $0x38] sm:$0xff] %vm36_vm1, %v1880_v60 }
   0x9   :  { %1527 = vmatprep.subr.bf16.mxu0 %v1723_v7  ;;  %1597 = vmatprep.subr.bf16.mxu1 %v1725_v9  ;;  %v1736_v20 = vld [vmem:[%s2568_s1 + $0x20] sm:$0xff]   ;;  %v1741_v25 = vld [vmem:[%s2570_s2 + $0x18] sm:$0xff]   ;;  %v2028_v26 = vld [vmem:[%s2569_s0 + $0x68] ss:$12 sps:$4 sm:$0xff]   ;;  %45 = vst.msk [vmem:[#allocation2 + $0x40] sm:$0xff] %vm36_vm1, %v1880_v60 }
   0xa   :  { %v1743_v27 = vld [vmem:[%s2568_s1 + $0x70] sm:$0xff]   ;;  %v2038_v28 = vld [vmem:[%s2569_s0 + $0x80] ss:$12 sps:$4 sm:$0xff]   ;;  %v1748_v32 = vld [vmem:[%s2568_s1 + $0x78] sm:$0xff]   ;;  %46 = vst.msk [vmem:[#allocation2 + $0x48] sm:$0xff] %vm36_vm1, %v1880_v60 }
   0xb   :  { %1676 = vmatmul.mubr.msk.bf16.vlgmr.msra.gmra.mrb[0].mxu1 %vm381_vm0, %v1960_v8  ;;  %v1745_v29 = vld [vmem:[%s2570_s2 + $0x60] sm:$0xff]   ;;  %v1746_v30 = vld [vmem:[%s2568_s1 + $0x30] sm:$0xff]   ;;  %v1749_v33 = vld [vmem:[%s2570_s2 + $0x68] sm:$0xff]   ;;  %47 = vst.msk [vmem:[#allocation2 + $0x50] sm:$0xff] %vm36_vm1, %v1880_v60 }
   0xc   :  { %1528 = vmatpush3.bf16.msra.mxu0 %v1726_v10  ;;  %1598 = vmatpush3.bf16.msra.mxu1 %v1727_v11  ;;  %v1747_v31 = vld [vmem:[%s2570_s2 + $0x20] sm:$0xff]   ;;  %v1750_v34 = vld [vmem:[%s2568_s1 + $0x38] sm:$0xff]   ;;  %v1751_v35 = vld [vmem:[%s2570_s2 + $0x28] sm:$0xff]   ;;  %48 = vst.msk [vmem:[#allocation2 + $0x58] sm:$0xff] %vm36_vm1, %v1880_v60 }
   0xd   :  { %1529 = vmatprep.subr.bf16.mxu0 %v1728_v12  ;;  %1599 = vmatprep.subr.bf16.mxu1 %v1729_v13  ;;  %v1752_v36 = vld [vmem:[%s2569_s0] ss:$12 sps:$4 sm:$0xff]   ;;  %v1754_v37 = vld [vmem:[%s2569_s0 + $0x4] ss:$12 sps:$4 sm:$0xff]   ;;  %v1760_v43 = vld [vmem:[%s2570_s2 + $0x78] sm:$0xff]   ;;  %49 = vst.msk [vmem:[#allocation2 + $0x60] sm:$0xff] %vm36_vm1, %v1880_v60 }
   0xe   :  { %1679 = vmatprep.mubr.msk.bf16.mxu1 %vm381_vm0, %v1990_v16  ;;  %v2072_v38 = vld [vmem:[%s2569_s0 + $0x98] ss:$12 sps:$4 sm:$0xff]   ;;  %438 = vmatprep.mubr.bf16.mxu0 %v1754_v37  ;;  %v2077_v39 = vld [vmem:[%s2569_s0 + $0xb0] ss:$12 sps:$4 sm:$0xff]   ;;  %v1765_v47 = vld [vmem:[%s2569_s0 + $0x34] ss:$12 sps:$4 sm:$0xff]  }
   0xf   :  { %v1757_v40 = vld [vmem:[%s2570_s2 + $0x70] sm:$0xff]   ;;  %v1758_v41 = vld [vmem:[%s2570_s2 + $0x80] sm:$0xff]   ;;  %v1761_v44 = vld [vmem:[%s2570_s2 + $0x38] sm:$0xff]   ;;  %50 = vst.msk [vmem:[#allocation2 + $0x68] sm:$0xff] %vm36_vm1, %v1880_v60 }
  0x10   :  { %1530 = vmatpush3.bf16.msra.mxu0 %v1730_v14  ;;  %1600 = vmatpush3.bf16.msra.mxu1 %v1731_v15  ;;  %v1759_v42 = vld [vmem:[%s2570_s2 + $0x30] sm:$0xff]   ;;  %v1762_v45 = vld [vmem:[%s2569_s0 + $0x1c] ss:$12 sps:$4 sm:$0xff]   ;;  %v1764_v46 = vld [vmem:[%s2569_s0 + $0x18] ss:$12 sps:$4 sm:$0xff]   ;;  %51 = vst.msk [vmem:[#allocation2 + $0x70] sm:$0xff] %vm36_vm1, %v1880_v60 }
  0x11   :  { %1531 = vmatprep.subr.bf16.mxu0 %v1733_v17  ;;  %1601 = vmatprep.subr.bf16.mxu1 %v1735_v19  ;;  %v1774_v48 = vld [vmem:[%s2570_s2 + $0x88] sm:$0xff]   ;;  %v1767_v49 = vld [vmem:[%s2569_s0 + $0x30] ss:$12 sps:$4 sm:$0xff]   ;;  %v1777_v55 = vld [vmem:[%s2569_s0 + $0x78] ss:$12 sps:$4 sm:$0xff]   ;;  %52 = vst.msk [vmem:[#allocation2 + $0x78] sm:$0xff] %vm36_vm1, %v1880_v60 }
  0x12   :  { %v1768_v50 = vld [vmem:[%s2569_s0 + $0x4c] ss:$12 sps:$4 sm:$0xff]   ;;  %v1770_v51 = vld [vmem:[%s2569_s0 + $0x48] ss:$12 sps:$4 sm:$0xff]   ;;  %v1771_v52 = vld [vmem:[%s2569_s0 + $0x64] ss:$12 sps:$4 sm:$0xff]  }
  0x13   :  { %1680 = vmatmul.mubr.msk.bf16.gmra.mrb[4].mxu1 %vm381_vm0, %v2000_v18  ;;  %v1773_v53 = vld [vmem:[%s2569_s0 + $0x60] ss:$12 sps:$4 sm:$0xff]   ;;  %v1775_v54 = vld [vmem:[%s2569_s0 + $0x7c] ss:$12 sps:$4 sm:$0xff]   ;;  %53 = vst.msk [vmem:[#allocation3] sm:$0xff] %vm36_vm1, %v1880_v60  ;;  %54 = vst.msk [vmem:[#allocation3 + $0x8] sm:$0xff] %vm36_vm1, %v1880_v60 }
  0x14   :  { %1532 = vmatpush3.bf16.msra.mxu0 %v1736_v20  ;;  %1602 = vmatpush3.bf16.msra.mxu1 %v1737_v21  ;;  %v1778_v56 = vld [vmem:[%s2569_s0 + $0x94] ss:$12 sps:$4 sm:$0xff]   ;;  %v1780_v57 = vld [vmem:[%s2569_s0 + $0x90] ss:$12 sps:$4 sm:$0xff]   ;;  %v1781_v58 = vld [vmem:[%s2569_s0 + $0xac] ss:$12 sps:$4 sm:$0xff]  }
  0x15   :  { %1533 = vmatprep.subr.bf16.mxu0 %v1738_v22  ;;  %1603 = vmatprep.subr.bf16.mxu1 %v1739_v23  ;;  %v1783_v59 = vld [vmem:[%s2569_s0 + $0xa8] ss:$12 sps:$4 sm:$0xff]   ;;  %55 = vst.msk [vmem:[#allocation3 + $0x10] sm:$0xff] %vm36_vm1, %v1880_v60  ;;  %56 = vst.msk [vmem:[#allocation3 + $0x18] sm:$0xff] %vm36_vm1, %v1880_v60  ;;  %v101_v15 = vld [vmem:[#allocation2] sm:$0xff] }
  0x16   :  { %1683 = vmatprep.mubr.msk.bf16.mxu1 %vm381_vm0, %v2028_v26  ;;  %57 = vst.msk [vmem:[#allocation3 + $0x20] sm:$0xff] %vm36_vm1, %v1880_v60  ;;  %58 = vst.msk [vmem:[#allocation3 + $0x28] sm:$0xff] %vm36_vm1, %v1880_v60  ;;  %v102_v21 = vld [vmem:[#allocation2 + $0x8] sm:$0xff] }
  0x17   :  { %59 = vst.msk [vmem:[#allocation3 + $0x30] sm:$0xff] %vm36_vm1, %v1880_v60  ;;  %60 = vst.msk [vmem:[#allocation3 + $0x38] sm:$0xff] %vm36_vm1, %v1880_v60 }
  0x18   :  { %1534 = vmatpush3.bf16.msra.mxu0 %v1740_v24  ;;  %1604 = vmatpush3.bf16.msra.mxu1 %v1741_v25  ;;  %61 = vst.msk [vmem:[#allocation3 + $0x40] sm:$0xff] %vm36_vm1, %v1880_v60  ;;  %62 = vst.msk [vmem:[#allocation3 + $0x48] sm:$0xff] %vm36_vm1, %v1880_v60 }
  0x19   :  { %1535 = vmatprep.subr.bf16.mxu0 %v1743_v27  ;;  %1605 = vmatprep.subr.bf16.mxu1 %v1745_v29  ;;  %63 = vst.msk [vmem:[#allocation3 + $0x50] sm:$0xff] %vm36_vm1, %v1880_v60  ;;  %64 = vst.msk [vmem:[#allocation3 + $0x58] sm:$0xff] %vm36_vm1, %v1880_v60  ;;  %v103_v29 = vld [vmem:[#allocation2 + $0x10] sm:$0xff] }
  0x1a   :  { %65 = vst.msk [vmem:[#allocation3 + $0x60] sm:$0xff] %vm36_vm1, %v1880_v60  ;;  %66 = vst.msk [vmem:[#allocation3 + $0x68] sm:$0xff] %vm36_vm1, %v1880_v60 }
  0x1b   :  { %1684 = vmatmul.mubr.msk.bf16.gmra.mrb[8].mxu1 %vm381_vm0, %v2038_v28  ;;  %67 = vst.msk [vmem:[#allocation3 + $0x70] sm:$0xff] %vm36_vm1, %v1880_v60  ;;  %68 = vst.msk [vmem:[#allocation3 + $0x78] sm:$0xff] %vm36_vm1, %v1880_v60 }
  0x1c   :  { %1536 = vmatpush3.bf16.msra.mxu0 %v1746_v30  ;;  %1606 = vmatpush3.bf16.msra.mxu1 %v1747_v31 }
  0x1d   :  { %1537 = vmatprep.subr.bf16.mxu0 %v1748_v32  ;;  %1607 = vmatprep.subr.bf16.mxu1 %v1749_v33 }
  0x1e   :  { %1687 = vmatprep.mubr.msk.bf16.mxu1 %vm381_vm0, %v2072_v38 }
  0x20   :  { %1538 = vmatpush3.bf16.msra.mxu0 %v1750_v34  ;;  %1608 = vmatpush3.bf16.msra.mxu1 %v1751_v35  ;;  %v104_v35 = vld [vmem:[#allocation2 + $0x18] sm:$0xff] }
  0x21   :  { %1609 = vmatprep.subr.bf16.mxu1 %v1757_v40  ;;  %1691 = vmatprep.subr.bf16.mxu0 %v1758_v41 }
  0x23   :  { %439 = vmatmul.mubr.bf16.vlgmr.msra.gmra.mrb[0].mxu0 %v1752_v36  ;;  %1688 = vmatmul.mubr.msk.bf16.gmra.mrb[12].mxu1 %vm381_vm0, %v2077_v39 }
  0x24   :  { %825 = vmatprep.mubr.bf16.mxu1 %v1754_v37  ;;  %1610 = vmatpush3.bf16.msra.mxu1 %v1759_v42 }
  0x25   :  { %1692 = vmatpush3.bf16.msra.mxu0 %v1758_v41  ;;  %1611 = vmatprep.subr.bf16.mxu1 %v1760_v43 }
  0x26   :  { %446 = vmatprep.mubr.bf16.mxu0 %v1762_v45  ;;  %1693 = vmatprep.subr.bf16.mxu0 %v1774_v48 }
  0x28   :  { %1612 = vmatpush3.bf16.msra.mxu1 %v1761_v44 }
  0x29   :  { %1711 = vmatprep.subr.bf16.mxu1 %v1758_v41  ;;  %1694 = vmatpush3.bf16.msra.mxu0 %v1774_v48 }
  0x2b   :  { %447 = vmatmul.mubr.bf16.gmra.mrb[4].mxu0 %v1764_v46  ;;  %826 = vmatmul.mubr.bf16.vlgmr.msra.gmra.mrb[16].mxu1 %v1752_v36 }
  0x2c   :  { %454 = vmatprep.mubr.bf16.mxu0 %v1765_v47  ;;  %833 = vmatprep.mubr.bf16.mxu1 %v1762_v45 }
  0x2d   :  { %1713 = vmatpush3.bf16.msra.mxu1 %v1758_v41 }
  0x2e   :  { %1712 = vmatprep.subr.bf16.mxu1 %v1774_v48 }
  0x31   :  { %1714 = vmatpush3.bf16.msra.mxu1 %v1774_v48 }
  0x33   :  { %455 = vmatmul.mubr.bf16.gmra.mrb[8].mxu0 %v1767_v49  ;;  %834 = vmatmul.mubr.bf16.gmra.mrb[20].mxu1 %v1764_v46 }
  0x34   :  { %462 = vmatprep.mubr.bf16.mxu0 %v1768_v50  ;;  %841 = vmatprep.mubr.bf16.mxu1 %v1765_v47  ;;  %v105_v47 = vld [vmem:[#allocation2 + $0x20] sm:$0xff] }
  0x3b   :  { %463 = vmatmul.mubr.bf16.gmra.mrb[12].mxu0 %v1770_v51  ;;  %842 = vmatmul.mubr.bf16.gmra.mrb[24].mxu1 %v1767_v49 }
  0x3c   :  { %470 = vmatprep.mubr.bf16.mxu0 %v1771_v52  ;;  %849 = vmatprep.mubr.bf16.mxu1 %v1768_v50 }
  0x43   :  { %471 = vmatmul.mubr.bf16.gmra.mrb[16].mxu0 %v1773_v53  ;;  %850 = vmatmul.mubr.bf16.gmra.mrb[28].mxu1 %v1770_v51 }
  0x44   :  { %478 = vmatprep.mubr.bf16.mxu0 %v1775_v54  ;;  %857 = vmatprep.mubr.bf16.mxu1 %v1771_v52 }
  0x4b   :  { %479 = vmatmul.mubr.bf16.gmra.mrb[20].mxu0 %v1777_v55  ;;  %858 = vmatmul.mubr.bf16.gmra.mrb[32].mxu1 %v1773_v53  ;;  %v106_v53 = vld [vmem:[#allocation2 + $0x28] sm:$0xff] }
  0x4c   :  { %486 = vmatprep.mubr.bf16.mxu0 %v1778_v56  ;;  %865 = vmatprep.mubr.bf16.mxu1 %v1775_v54 }
  0x53   :  { %487 = vmatmul.mubr.bf16.gmra.mrb[24].mxu0 %v1780_v57  ;;  %866 = vmatmul.mubr.bf16.gmra.mrb[36].mxu1 %v1777_v55 }
  0x54   :  { %494 = vmatprep.mubr.bf16.mxu0 %v1781_v58  ;;  %873 = vmatprep.mubr.bf16.mxu1 %v1778_v56 }
  0x5b   :  { %495 = vmatmul.mubr.bf16.gmra.mrb[28].mxu0 %v1783_v59  ;;  %874 = vmatmul.mubr.bf16.gmra.mrb[40].mxu1 %v1780_v57 }
  0x5c   :  { %1695 = vmatprep.mubr.msk.bf16.mxu0 %vm381_vm0, %v1952_v6  ;;  %881 = vmatprep.mubr.bf16.mxu1 %v1781_v58 }
  0x63   :  { %1696 = vmatmul.mubr.msk.bf16.vlgmr.msra.gmra.mrb[32].mxu0 %vm381_vm0, %v1960_v8  ;;  %882 = vmatmul.mubr.bf16.gmra.mrb[44].mxu1 %v1783_v59 }
  0x64   :  { %1699 = vmatprep.mubr.msk.bf16.mxu0 %vm381_vm0, %v1990_v16  ;;  %1707 = vmatprep.mubr.msk.bf16.mxu1 %vm381_vm0, %v2072_v38 }
  0x6b   :  { %1700 = vmatmul.mubr.msk.bf16.gmra.mrb[36].mxu0 %vm381_vm0, %v2000_v18  ;;  %1708 = vmatmul.mubr.msk.bf16.vlgmr.msra.gmra.mrb[48].mxu1 %vm381_vm0, %v2077_v39 }
  0x6c   :  { %1703 = vmatprep.mubr.msk.bf16.mxu0 %vm381_vm0, %v2028_v26 }
  0x73   :  { %1704 = vmatmul.mubr.msk.bf16.gmra.mrb[40].mxu0 %vm381_vm0, %v2038_v28 }
  0xde   :  { %v1677_v61 = vpop.f32.mrb[0].mxu1 }
  0xdf   :  { %v537_v62 = vpop.f32.mrb[1].mxu1 }
  0xe0   :  { %v1678_v63 = vpop.f32.mrb[2].mxu1 }
  0xe1   :  { %v540_v0 = vpop.f32.mrb[3].mxu1 }
  0xe6   :  { %v2191_v1 = vpop.f32.mrb[4].mxu1 }
  0xe7   :  { %v553_v2 = vpop.f32.mrb[5].mxu1 }
  0xe8   :  { %v2193_v3 = vpop.f32.mrb[6].mxu1 }
  0xe9   :  { %v556_v4 = vpop.f32.mrb[7].mxu1 }
  0xee   :  { %v2195_v5 = vpop.f32.mrb[8].mxu1 }
  0xef   :  { %v2197_v6 = vpop.f32.mrb[9].mxu1 }
  0xf0   :  { %v2199_v7 = vpop.f32.mrb[10].mxu1 }
  0xf1   :  { %v2201_v8 = vpop.f32.mrb[11].mxu1 }
  0xf6   :  { %v1539_v9 = vpop.f32.mrb[0].mxu0  ;;  %v2203_v11 = vpop.f32.mrb[12].mxu1 }
  0xf7   :  { %v1540_v10 = vpop.f32.mrb[1].mxu0  ;;  %v2205_v14 = vpop.f32.mrb[13].mxu1 }
  0xf8   :  { %v1541_v12 = vadd.f32 %v1540_v10, %v1539_v9  ;;  %v1542_v13 = vpop.f32.mrb[2].mxu0  ;;  %v2207_v17 = vpop.f32.mrb[14].mxu1 }
  0xf9   :  { %v1543_v16 = vpop.f32.mrb[3].mxu0  ;;  %v2209_v20 = vpop.f32.mrb[15].mxu1 }
  0xfa   :  { %v538_v18 = vadd.f32 %v1541_v12, %v537_v62  ;;  %v1544_v19 = vadd.f32 %v1543_v16, %v1542_v13 }
  0xfc   :  { %v600_v22 = vadd.f32 %v538_v18, %v101_v15  ;;  %v541_v23 = vadd.f32 %v1544_v19, %v540_v0 }
  0xfe   :  { %617 = vst.msk [vmem:[#allocation2] sm:$0xff] %vm36_vm1, %v600_v22  ;;  %v601_v24 = vadd.f32 %v541_v23, %v102_v21  ;;  %v1545_v25 = vpop.f32.mrb[4].mxu0  ;;  %v1613_v31 = vpop.f32.mrb[16].mxu1 }
  0xff   :  { %v1546_v26 = vpop.f32.mrb[5].mxu0  ;;  %v1614_v34 = vpop.f32.mrb[17].mxu1 }
 0x100   :  { %618 = vst.msk [vmem:[#allocation2 + $0x8] sm:$0xff] %vm36_vm1, %v601_v24  ;;  %v1547_v27 = vadd.f32 %v1546_v26, %v1545_v25  ;;  %v1548_v28 = vpop.f32.mrb[6].mxu0  ;;  %v2213_v36 = vadd.f32 %v1614_v34, %v1613_v31  ;;  %v1616_v37 = vpop.f32.mrb[18].mxu1 }
 0x101   :  { %v1549_v30 = vpop.f32.mrb[7].mxu0  ;;  %v1617_v40 = vpop.f32.mrb[19].mxu1 }
 0x102   :  { %v546_v32 = vadd.f32 %v1677_v61, %v1547_v27  ;;  %v1550_v33 = vadd.f32 %v1549_v30, %v1548_v28  ;;  %v2215_v41 = vadd.f32 %v1617_v40, %v1616_v37  ;;  %v109_v28 = vld [vmem:[#allocation2 + $0x40] sm:$0xff] }
 0x104   :  { %v602_v38 = vadd.f32 %v546_v32, %v103_v29  ;;  %v549_v39 = vadd.f32 %v1678_v63, %v1550_v33 }
 0x106   :  { %619 = vst.msk [vmem:[#allocation2 + $0x10] sm:$0xff] %vm36_vm1, %v602_v38  ;;  %v603_v42 = vadd.f32 %v549_v39, %v104_v35  ;;  %v1551_v43 = vpop.f32.mrb[8].mxu0  ;;  %v1619_v49 = vpop.f32.mrb[20].mxu1 }
 0x107   :  { %v1552_v44 = vpop.f32.mrb[9].mxu0  ;;  %v1620_v52 = vpop.f32.mrb[21].mxu1 }
 0x108   :  { %620 = vst.msk [vmem:[#allocation2 + $0x18] sm:$0xff] %vm36_vm1, %v603_v42  ;;  %v1553_v45 = vadd.f32 %v1552_v44, %v1551_v43  ;;  %v1554_v46 = vpop.f32.mrb[10].mxu0  ;;  %v2219_v54 = vadd.f32 %v1620_v52, %v1619_v49  ;;  %v1622_v55 = vpop.f32.mrb[22].mxu1 }
 0x109   :  { %v1555_v48 = vpop.f32.mrb[11].mxu0  ;;  %v1623_v58 = vpop.f32.mrb[23].mxu1 }
 0x10a   :  { %v554_v50 = vadd.f32 %v1553_v45, %v553_v2  ;;  %v1556_v51 = vadd.f32 %v1555_v48, %v1554_v46  ;;  %v2221_v59 = vadd.f32 %v1623_v58, %v1622_v55  ;;  %v107_v2 = vld [vmem:[#allocation2 + $0x30] sm:$0xff] }
 0x10b   :  { %v111_v46 = vld [vmem:[#allocation2 + $0x50] sm:$0xff] }
 0x10c   :  { %v604_v56 = vadd.f32 %v554_v50, %v105_v47  ;;  %v557_v57 = vadd.f32 %v1556_v51, %v556_v4  ;;  %v108_v4 = vld [vmem:[#allocation2 + $0x38] sm:$0xff] }
 0x10e   :  { %621 = vst.msk [vmem:[#allocation2 + $0x20] sm:$0xff] %vm36_vm1, %v604_v56  ;;  %v605_v60 = vadd.f32 %v557_v57, %v106_v53  ;;  %v1557_v61 = vpop.f32.mrb[12].mxu0  ;;  %v1625_v10 = vpop.f32.mrb[24].mxu1 }
 0x10f   :  { %v1558_v62 = vpop.f32.mrb[13].mxu0  ;;  %v1626_v15 = vpop.f32.mrb[25].mxu1 }
 0x110   :  { %622 = vst.msk [vmem:[#allocation2 + $0x28] sm:$0xff] %vm36_vm1, %v605_v60  ;;  %v1559_v63 = vadd.f32 %v1558_v62, %v1557_v61  ;;  %v1560_v0 = vpop.f32.mrb[14].mxu0  ;;  %v2226_v16 = vadd.f32 %v1626_v15, %v1625_v10  ;;  %v1628_v18 = vpop.f32.mrb[26].mxu1 }
 0x111   :  { %v1561_v9 = vpop.f32.mrb[15].mxu0  ;;  %v1629_v22 = vpop.f32.mrb[27].mxu1 }
 0x112   :  { %v562_v12 = vadd.f32 %v2191_v1, %v1559_v63  ;;  %v1562_v13 = vadd.f32 %v1561_v9, %v1560_v0  ;;  %v2229_v23 = vadd.f32 %v1629_v22, %v1628_v18  ;;  %v113_v0 = vld [vmem:[#allocation2 + $0x60] sm:$0xff] }
 0x114   :  { %v606_v19 = vadd.f32 %v562_v12, %v107_v2  ;;  %v565_v21 = vadd.f32 %v2193_v3, %v1562_v13  ;;  %v110_v3 = vld [vmem:[#allocation2 + $0x48] sm:$0xff] }
 0x116   :  { %623 = vst.msk [vmem:[#allocation2 + $0x30] sm:$0xff] %vm36_vm1, %v606_v19  ;;  %v607_v24 = vadd.f32 %v565_v21, %v108_v4  ;;  %v1563_v25 = vpop.f32.mrb[16].mxu0  ;;  %v1631_v30 = vpop.f32.mrb[28].mxu1 }
 0x117   :  { %v1564_v26 = vpop.f32.mrb[17].mxu0  ;;  %v1632_v33 = vpop.f32.mrb[29].mxu1 }
 0x118   :  { %624 = vst.msk [vmem:[#allocation2 + $0x38] sm:$0xff] %vm36_vm1, %v607_v24  ;;  %v1565_v1 = vadd.f32 %v1564_v26, %v1563_v25  ;;  %v1566_v27 = vpop.f32.mrb[18].mxu0  ;;  %v2234_v34 = vadd.f32 %v1632_v33, %v1631_v30  ;;  %v1634_v35 = vpop.f32.mrb[30].mxu1 }
 0x119   :  { %v1567_v29 = vpop.f32.mrb[19].mxu0  ;;  %v1635_v39 = vpop.f32.mrb[31].mxu1 }
 0x11a   :  { %v570_v31 = vadd.f32 %v1565_v1, %v2197_v6  ;;  %v1568_v32 = vadd.f32 %v1567_v29, %v1566_v27  ;;  %v2237_v40 = vadd.f32 %v1635_v39, %v1634_v35  ;;  %v115_v27 = vld [vmem:[#allocation2 + $0x70] sm:$0xff] }
 0x11c   :  { %v608_v37 = vadd.f32 %v570_v31, %v109_v28  ;;  %v573_v38 = vadd.f32 %v1568_v32, %v2201_v8  ;;  %v112_v8 = vld [vmem:[#allocation2 + $0x58] sm:$0xff] }
 0x11e   :  { %625 = vst.msk [vmem:[#allocation2 + $0x40] sm:$0xff] %vm36_vm1, %v608_v37  ;;  %v609_v42 = vadd.f32 %v573_v38, %v110_v3  ;;  %v1569_v43 = vpop.f32.mrb[20].mxu0  ;;  %v1637_v48 = vpop.f32.mrb[32].mxu1 }
 0x11f   :  { %v1570_v44 = vpop.f32.mrb[21].mxu0  ;;  %v1638_v51 = vpop.f32.mrb[33].mxu1 }
 0x120   :  { %626 = vst.msk [vmem:[#allocation2 + $0x48] sm:$0xff] %vm36_vm1, %v609_v42  ;;  %v1571_v6 = vadd.f32 %v1570_v44, %v1569_v43  ;;  %v1572_v45 = vpop.f32.mrb[22].mxu0  ;;  %v2242_v52 = vadd.f32 %v1638_v51, %v1637_v48  ;;  %v1640_v53 = vpop.f32.mrb[34].mxu1  ;;  %v635_v43 = vld [vmem:[#allocation3 + $0x10] sm:$0xff] }
 0x121   :  { %v1573_v47 = vpop.f32.mrb[23].mxu0  ;;  %v1641_v57 = vpop.f32.mrb[35].mxu1 }
 0x122   :  { %v578_v49 = vadd.f32 %v2195_v5, %v1571_v6  ;;  %v1574_v50 = vadd.f32 %v1573_v47, %v1572_v45  ;;  %v2245_v58 = vadd.f32 %v1641_v57, %v1640_v53  ;;  %v633_v45 = vld [vmem:[#allocation3] sm:$0xff]  ;;  %v636_v47 = vld [vmem:[#allocation3 + $0x18] sm:$0xff] }
 0x124   :  { %v610_v55 = vadd.f32 %v578_v49, %v111_v46  ;;  %v581_v56 = vadd.f32 %v2199_v7, %v1574_v50  ;;  %v114_v7 = vld [vmem:[#allocation2 + $0x68] sm:$0xff] }
 0x125   :  { %v634_v50 = vld [vmem:[#allocation3 + $0x8] sm:$0xff] }
 0x126   :  { %627 = vst.msk [vmem:[#allocation2 + $0x50] sm:$0xff] %vm36_vm1, %v610_v55  ;;  %v611_v60 = vadd.f32 %v581_v56, %v112_v8  ;;  %v1575_v61 = vpop.f32.mrb[24].mxu0  ;;  %v1643_v9 = vpop.f32.mrb[36].mxu1 }
 0x127   :  { %v1576_v62 = vpop.f32.mrb[25].mxu0  ;;  %v1644_v13 = vpop.f32.mrb[37].mxu1 }
 0x128   :  { %628 = vst.msk [vmem:[#allocation2 + $0x58] sm:$0xff] %vm36_vm1, %v611_v60  ;;  %v1577_v5 = vadd.f32 %v1576_v62, %v1575_v61  ;;  %v1578_v63 = vpop.f32.mrb[26].mxu0  ;;  %v2250_v15 = vadd.f32 %v1644_v13, %v1643_v9  ;;  %v1646_v4 = vpop.f32.mrb[38].mxu1  ;;  %v640_v9 = vld [vmem:[#allocation3 + $0x38] sm:$0xff] }
 0x129   :  { %v1579_v2 = vpop.f32.mrb[27].mxu0  ;;  %v1647_v21 = vpop.f32.mrb[39].mxu1 }
 0x12a   :  { %v586_v10 = vadd.f32 %v1577_v5, %v2205_v14  ;;  %v1580_v12 = vadd.f32 %v1579_v2, %v1578_v63  ;;  %v2253_v22 = vadd.f32 %v1647_v21, %v1646_v4 }
 0x12c   :  { %v612_v18 = vadd.f32 %v586_v10, %v113_v0  ;;  %v589_v19 = vadd.f32 %v1580_v12, %v2209_v20  ;;  %v116_v20 = vld [vmem:[#allocation2 + $0x78] sm:$0xff]  ;;  %v2276_v12 = vld [vmem:[%s2571_s4] ss:$0 sm:$0xff] }
 0x12e   :  { %629 = vst.msk [vmem:[#allocation2 + $0x60] sm:$0xff] %vm36_vm1, %v612_v18  ;;  %v613_v24 = vadd.f32 %v589_v19, %v114_v7  ;;  %v1581_v25 = vpop.f32.mrb[28].mxu0  ;;  %v1649_v29 = vpop.f32.mrb[40].mxu1  ;;  %v647_v7 = vld [vmem:[#allocation3 + $0x70] sm:$0xff]  ;;  %v638_v19 = vld [vmem:[#allocation3 + $0x28] sm:$0xff] }
 0x12f   :  { %v1582_v26 = vpop.f32.mrb[29].mxu0  ;;  %v1650_v32 = vpop.f32.mrb[41].mxu1 }
 0x130   :  { %630 = vst.msk [vmem:[#allocation2 + $0x68] sm:$0xff] %vm36_vm1, %v613_v24  ;;  %v1583_v14 = vadd.f32 %v1582_v26, %v1581_v25  ;;  %v1584_v1 = vpop.f32.mrb[30].mxu0  ;;  %v1651_v33 = vadd.f32 %v1650_v32, %v1649_v29  ;;  %v1652_v3 = vpop.f32.mrb[42].mxu1  ;;  %v645_v25 = vld [vmem:[#allocation3 + $0x60] sm:$0xff]  ;;  %v648_v29 = vld [vmem:[#allocation3 + $0x78] sm:$0xff] }
 0x131   :  { %v1585_v28 = vpop.f32.mrb[31].mxu0  ;;  %v1653_v38 = vpop.f32.mrb[43].mxu1 }
 0x132   :  { %v594_v30 = vadd.f32 %v2203_v11, %v1583_v14  ;;  %v1586_v31 = vadd.f32 %v1585_v28, %v1584_v1  ;;  %v2259_v39 = vadd.f32 %v1653_v38, %v1652_v3  ;;  %v2283_v1 = vld [vmem:[%s2572_s6] ss:$0 sm:$0xff]  ;;  %v646_v3 = vld [vmem:[#allocation3 + $0x68] sm:$0xff] }
 0x134   :  { %v614_v35 = vadd.f32 %v594_v30, %v115_v27  ;;  %v597_v37 = vadd.f32 %v2207_v17, %v1586_v31 }
 0x136   :  { %631 = vst.msk [vmem:[#allocation2 + $0x70] sm:$0xff] %vm36_vm1, %v614_v35  ;;  %v615_v42 = vadd.f32 %v597_v37, %v116_v20  ;;  %v1697_v44 = vpop.f32.mrb[32].mxu0  ;;  %v1655_v8 = vpop.f32.mrb[44].mxu1 }
 0x137   :  { %v933_v6 = vadd.f32 %v1697_v44, %v2219_v54  ;;  %v924_v11 = vpop.f32.mrb[33].mxu0  ;;  %v1656_v56 = vpop.f32.mrb[45].mxu1 }
 0x138   :  { %632 = vst.msk [vmem:[#allocation2 + $0x78] sm:$0xff] %vm36_vm1, %v615_v42  ;;  %v925_v46 = vadd.f32 %v2213_v36, %v924_v11  ;;  %v1698_v48 = vpop.f32.mrb[34].mxu0  ;;  %v1657_v57 = vadd.f32 %v1656_v56, %v1655_v8  ;;  %v1658_v60 = vpop.f32.mrb[46].mxu1  ;;  %v643_v11 = vld [vmem:[#allocation3 + $0x50] sm:$0xff] }
 0x139   :  { %v989_v49 = vadd.f32 %v933_v6, %v635_v43  ;;  %v936_v17 = vadd.f32 %v1698_v48, %v2221_v59  ;;  %v927_v51 = vpop.f32.mrb[35].mxu0  ;;  %v1659_v61 = vpop.f32.mrb[47].mxu1  ;;  %v639_v59 = vld [vmem:[#allocation3 + $0x30] sm:$0xff] }
 0x13a   :  { %v987_v53 = vadd.f32 %v925_v46, %v633_v45  ;;  %v928_v55 = vadd.f32 %v2215_v41, %v927_v51  ;;  %v1660_v62 = vadd.f32 %v1659_v61, %v1658_v60  ;;  %v637_v41 = vld [vmem:[#allocation3 + $0x20] sm:$0xff] }
 0x13b   :  { %1005 = vst.msk [vmem:[#allocation3 + $0x10] sm:$0xff] %vm36_vm1, %v989_v49  ;;  %v990_v54 = vadd.f32 %v936_v17, %v636_v47  ;;  %v641_v17 = vld [vmem:[#allocation3 + $0x40] sm:$0xff] }
 0x13c   :  { %1003 = vst.msk [vmem:[#allocation3] sm:$0xff] %vm36_vm1, %v987_v53  ;;  %v988_v36 = vadd.f32 %v928_v55, %v634_v50  ;;  %v644_v55 = vld [vmem:[#allocation3 + $0x58] sm:$0xff] }
 0x13d   :  { %1006 = vst.msk [vmem:[#allocation3 + $0x18] sm:$0xff] %vm36_vm1, %v990_v54 }
 0x13e   :  { %1004 = vst.msk [vmem:[#allocation3 + $0x8] sm:$0xff] %vm36_vm1, %v988_v36  ;;  %v1701_v5 = vpop.f32.mrb[36].mxu0  ;;  %v1709_v4 = vpop.f32.mrb[48].mxu1 }
 0x13f   :  { %v949_v63 = vadd.f32 %v1701_v5, %v2234_v34  ;;  %v940_v0 = vpop.f32.mrb[37].mxu0  ;;  %v981_v24 = vadd.f32 %v1709_v4, %v1657_v57  ;;  %v972_v26 = vpop.f32.mrb[49].mxu1 }
 0x140   :  { %v941_v2 = vadd.f32 %v2226_v16, %v940_v0  ;;  %v1702_v10 = vpop.f32.mrb[38].mxu0  ;;  %v973_v27 = vadd.f32 %v1651_v33, %v972_v26  ;;  %v2319_v26 = vld [vmem:[%s2573_s3] ss:$0 sm:$0xff] }
 0x141   :  { %v993_v13 = vadd.f32 %v949_v63, %v639_v59  ;;  %v952_v18 = vadd.f32 %v1702_v10, %v2237_v40  ;;  %v943_v21 = vpop.f32.mrb[39].mxu0  ;;  %v1710_v40 = vpop.f32.mrb[50].mxu1  ;;  %v1001_v32 = vadd.f32 %v981_v24, %v647_v7 }
 0x142   :  { %v991_v34 = vadd.f32 %v941_v2, %v637_v41  ;;  %v944_v16 = vadd.f32 %v2229_v23, %v943_v21  ;;  %v1086_v14 = vld [vmem:[#allocation3 + $0x10] sm:$0xff]  ;;  %v984_v20 = vadd.f32 %v1710_v40, %v1660_v62  ;;  %v975_v35 = vpop.f32.mrb[51].mxu1  ;;  %v999_v42 = vadd.f32 %v973_v27, %v645_v25 }
 0x143   :  { %1009 = vst.msk [vmem:[#allocation3 + $0x30] sm:$0xff] %vm36_vm1, %v993_v13  ;;  %v994_v28 = vadd.f32 %v952_v18, %v640_v9  ;;  %v1109_v30 = vadd.f32 %v2276_v12, %v1086_v14  ;;  %v1084_v31 = vld [vmem:[#allocation3] sm:$0xff]  ;;  %v976_v33 = vadd.f32 %v2259_v39, %v975_v35  ;;  %1017 = vst.msk [vmem:[#allocation3 + $0x70] sm:$0xff] %vm36_vm1, %v1001_v32  ;;  %v1023_v14 = vld [vmem:[#allocation2 + $0x8] sm:$0xff] }
 0x144   :  { %1007 = vst.msk [vmem:[#allocation3 + $0x20] sm:$0xff] %vm36_vm1, %v991_v34  ;;  %v992_v23 = vadd.f32 %v944_v16, %v638_v19  ;;  %v1107_v37 = vadd.f32 %v2276_v12, %v1084_v31  ;;  %v1087_v38 = vld [vmem:[#allocation3 + $0x18] sm:$0xff]  ;;  %v1002_v45 = vadd.f32 %v984_v20, %v648_v29  ;;  %1015 = vst.msk [vmem:[#allocation3 + $0x60] sm:$0xff] %vm36_vm1, %v999_v42  ;;  %v1022_v16 = vld [vmem:[#allocation2] sm:$0xff] }
 0x145   :  { %1010 = vst.msk [vmem:[#allocation3 + $0x38] sm:$0xff] %vm36_vm1, %v994_v28  ;;  %v1132_v43 = vmul.f32 %v2283_v1, %v1109_v30  ;;  %v1110_v44 = vadd.f32 %v2276_v12, %v1087_v38  ;;  %v1085_v6 = vld [vmem:[#allocation3 + $0x8] sm:$0xff]  ;;  %v1000_v49 = vadd.f32 %v976_v33, %v646_v3  ;;  %v1045_v35 = vadd.f32 %v2319_v26, %v1022_v16  ;;  %v1148_v16 = vld [vmem:[%s2575_s7 + $0x10] sm:$0xff] }
 0x146   :  { %1008 = vst.msk [vmem:[#allocation3 + $0x28] sm:$0xff] %vm36_vm1, %v992_v23  ;;  %v1705_v46 = vpop.f32.mrb[40].mxu0  ;;  %v1130_v47 = vmul.f32 %v2283_v1, %v1107_v37  ;;  %v1108_v48 = vadd.f32 %v2276_v12, %v1085_v6  ;;  %1018 = vst.msk [vmem:[#allocation3 + $0x78] sm:$0xff] %vm36_vm1, %v1002_v45  ;;  %v1046_v37 = vadd.f32 %v2319_v26, %v1023_v14 }
 0x147   :  { %v965_v39 = vadd.f32 %v1705_v46, %v2250_v15  ;;  %v956_v50 = vpop.f32.mrb[41].mxu0  ;;  %v1164_v51 = vadd.f32 2.0, %v1132_v43  ;;  %v1133_v8 = vmul.f32 %v2283_v1, %v1110_v44  ;;  %1016 = vst.msk [vmem:[#allocation3 + $0x68] sm:$0xff] %vm36_vm1, %v1000_v49  ;;  %v642_v15 = vld [vmem:[#allocation3 + $0x48] sm:$0xff] }
 0x148   :  { %v957_v53 = vadd.f32 %v2242_v52, %v956_v50  ;;  %v1706_v56 = vpop.f32.mrb[42].mxu0  ;;  %v1162_v54 = vadd.f32 2.0, %v1130_v47  ;;  %v1131_v57 = vmul.f32 %v2283_v1, %v1108_v48 }
 0x149   :  { %v997_v60 = vadd.f32 %v965_v39, %v643_v11  ;;  %v968_v36 = vadd.f32 %v1706_v56, %v2253_v22  ;;  %v959_v61 = vpop.f32.mrb[43].mxu0  ;;  %v1509_v62 = vmul.f32 -1.442695, %v1164_v51  ;;  %v1165_v59 = vadd.f32 2.0, %v1133_v8 }
 0x14a   :  { %v995_v5 = vadd.f32 %v957_v53, %v641_v17  ;;  %v960_v63 = vadd.f32 %v2245_v58, %v959_v61  ;;  %v1507_v41 = vmul.f32 -1.442695, %v1162_v54  ;;  %v1163_v0 = vadd.f32 2.0, %v1131_v57  ;;  %v1090_v52 = vld [vmem:[#allocation3 + $0x30] sm:$0xff] }
 0x14b   :  { %1013 = vst.msk [vmem:[#allocation3 + $0x50] sm:$0xff] %vm36_vm1, %v997_v60  ;;  %v998_v2 = vadd.f32 %v968_v36, %v644_v55  ;;  %1784 = vpow2.f32 %v1509_v62  ;;  %v1510_v9 = vmul.f32 -1.442695, %v1165_v59  ;;  %v1113_v10 = vadd.f32 %v2276_v12, %v1090_v52  ;;  %v1088_v13 = vld [vmem:[#allocation3 + $0x20] sm:$0xff]  ;;  %v1024_v53 = vld [vmem:[#allocation2 + $0x10] sm:$0xff]  ;;  %v1025_v60 = vld [vmem:[#allocation2 + $0x18] sm:$0xff] }
 0x14c   :  { %1011 = vst.msk [vmem:[#allocation3 + $0x40] sm:$0xff] %vm36_vm1, %v995_v5  ;;  %v996_v22 = vadd.f32 %v960_v63, %v642_v15  ;;  %1786 = vpow2.f32 %v1507_v41  ;;  %v1508_v7 = vmul.f32 -1.442695, %v1163_v0  ;;  %v1091_v4 = vld [vmem:[#allocation3 + $0x38] sm:$0xff]  ;;  %v1111_v18 = vadd.f32 %v2276_v12, %v1088_v13  ;;  %v1096_v25 = vld [vmem:[#allocation3 + $0x60] sm:$0xff] }
 0x14d   :  { %1014 = vst.msk [vmem:[#allocation3 + $0x58] sm:$0xff] %vm36_vm1, %v998_v2  ;;  %1788 = vpow2.f32 %v1510_v9  ;;  %v1136_v58 = vmul.f32 %v2283_v1, %v1113_v10  ;;  %v1114_v19 = vadd.f32 %v2276_v12, %v1091_v4  ;;  %v1089_v21 = vld [vmem:[#allocation3 + $0x28] sm:$0xff]  ;;  %v1119_v29 = vadd.f32 %v2276_v12, %v1096_v25  ;;  %v2338_v62 = vld [vmem:[%s2574_s5] ss:$0 sm:$0xff] }
 0x14e   :  { %1012 = vst.msk [vmem:[#allocation3 + $0x48] sm:$0xff] %vm36_vm1, %v996_v22  ;;  %1790 = vpow2.f32 %v1508_v7  ;;  %v1134_v24 = vmul.f32 %v2283_v1, %v1111_v18  ;;  %v1112_v34 = vadd.f32 %v2276_v12, %v1089_v21  ;;  %v1097_v31 = vld [vmem:[#allocation3 + $0x68] sm:$0xff]  ;;  %v1047_v41 = vadd.f32 %v2319_v26, %v1024_v53  ;;  %v1026_v13 = vld [vmem:[#allocation2 + $0x20] sm:$0xff] }
 0x14f   :  { %v1168_v27 = vadd.f32 2.0, %v1136_v58  ;;  %v1137_v28 = vmul.f32 %v2283_v1, %v1114_v19  ;;  %v1142_v23 = vmul.f32 %v2283_v1, %v1119_v29  ;;  %v1120_v3 = vadd.f32 %v2276_v12, %v1097_v31  ;;  %v1146_v4 = vld [vmem:[%s2575_s7] sm:$0xff]  ;;  %v1028_v58 = vld [vmem:[#allocation2 + $0x30] sm:$0xff] }
 0x150   :  { %v1166_v40 = vadd.f32 2.0, %v1134_v24  ;;  %v1135_v30 = vmul.f32 %v2283_v1, %v1112_v34  ;;  %v1048_v2 = vadd.f32 %v2319_v26, %v1025_v60  ;;  %v1068_v10 = vmul.f32 %v2338_v62, %v1045_v35  ;;  %v1147_v24 = vld [vmem:[%s2575_s7 + $0x8] sm:$0xff]  ;;  %v1150_v53 = vld [vmem:[%s2575_s7 + $0x20] sm:$0xff]  ;;  %v1152_v60 = vld [vmem:[%s2575_s7 + $0x30] sm:$0xff] }
 0x151   :  { %v1513_v32 = vmul.f32 -1.442695, %v1168_v27  ;;  %v1169_v20 = vadd.f32 2.0, %v1137_v28  ;;  %v1174_v44 = vadd.f32 2.0, %v1142_v23  ;;  %v1143_v6 = vmul.f32 %v2283_v1, %v1120_v3  ;;  %v1029_v28 = vld [vmem:[#allocation2 + $0x38] sm:$0xff]  ;;  %v1027_v3 = vld [vmem:[#allocation2 + $0x28] sm:$0xff] }
 0x152   :  { %v1511_v38 = vmul.f32 -1.442695, %v1166_v40  ;;  %v1167_v42 = vadd.f32 2.0, %v1135_v30  ;;  %v1094_v33 = vld [vmem:[#allocation3 + $0x50] sm:$0xff]  ;;  %v1069_v18 = vmul.f32 %v2338_v62, %v1046_v37  ;;  %v1070_v21 = vmul.f32 %v2338_v62, %v1047_v41 }
 0x153   :  { %1792 = vpow2.f32 %v1513_v32  ;;  %v1514_v43 = vmul.f32 -1.442695, %v1169_v20  ;;  %v1092_v45 = vld [vmem:[#allocation3 + $0x40] sm:$0xff]  ;;  %v1117_v46 = vadd.f32 %v2276_v12, %v1094_v33  ;;  %v1519_v39 = vmul.f32 -1.442695, %v1174_v44  ;;  %v1098_v40 = vld [vmem:[#allocation3 + $0x70] sm:$0xff] }
 0x154   :  { %1794 = vpow2.f32 %v1511_v38  ;;  %v1512_v11 = vmul.f32 -1.442695, %v1167_v42  ;;  %v1095_v47 = vld [vmem:[#allocation3 + $0x58] sm:$0xff]  ;;  %v1115_v48 = vadd.f32 %v2276_v12, %v1092_v45  ;;  %v1175_v17 = vadd.f32 2.0, %v1143_v6 }
 0x155   :  { %v1785_v49 = vpop.eup %1784  ;;  %1796 = vpow2.f32 %v1514_v43  ;;  %v1118_v50 = vadd.f32 %v2276_v12, %v1095_v47  ;;  %v1140_v55 = vmul.f32 %v2283_v1, %v1117_v46  ;;  %v1093_v34 = vld [vmem:[#allocation3 + $0x48] sm:$0xff]  ;;  %v1071_v14 = vmul.f32 %v2338_v62, %v1048_v2  ;;  %v1149_v32 = vld [vmem:[%s2575_s7 + $0x18] sm:$0xff] }
 0x156   :  { %v1787_v51 = vpop.eup %1786  ;;  %v1228_v8 = vadd.f32 1.0, %v1785_v49  ;;  %1798 = vpow2.f32 %v1512_v11  ;;  %v1138_v56 = vmul.f32 %v2283_v1, %v1115_v48  ;;  %v1520_v36 = vmul.f32 -1.442695, %v1175_v17 }
 0x157   :  { %v1789_v54 = vpop.eup %1788  ;;  %v1226_v57 = vadd.f32 1.0, %v1787_v51  ;;  %1800 = vpow2.f32 %v1519_v39  ;;  %v1141_v15 = vmul.f32 %v2283_v1, %v1118_v50  ;;  %v1172_v5 = vadd.f32 2.0, %v1140_v55  ;;  %v1099_v50 = vld [vmem:[#allocation3 + $0x78] sm:$0xff] }
 0x158   :  { %v1791_v61 = vpop.eup %1790  ;;  %1802 = vrcp.f32 %v1228_v8  ;;  %v1229_v59 = vadd.f32 1.0, %v1789_v54  ;;  %v1170_v63 = vadd.f32 2.0, %v1138_v56  ;;  %v1049_v29 = vadd.f32 %v2319_v26, %v1026_v13 }
 0x159   :  { %1804 = vrcp.f32 %v1226_v57  ;;  %v1227_v0 = vadd.f32 1.0, %v1791_v61  ;;  %v1173_v52 = vadd.f32 2.0, %v1141_v15  ;;  %v1517_v9 = vmul.f32 -1.442695, %v1172_v5  ;;  %v1153_v5 = vld [vmem:[%s2575_s7 + $0x38] sm:$0xff] }
 0x15a   :  { %1806 = vrcp.f32 %v1229_v59  ;;  %v1515_v7 = vmul.f32 -1.442695, %v1170_v63  ;;  %v1274_v31 = vadd.f32 %v1146_v4, %v1068_v10  ;;  %v1051_v20 = vadd.f32 %v2319_v26, %v1028_v58  ;;  %v1034_v63 = vld [vmem:[#allocation2 + $0x60] sm:$0xff]  ;;  %v1035_v10 = vld [vmem:[#allocation2 + $0x68] sm:$0xff] }
 0x15b   :  { %1808 = vrcp.f32 %v1227_v0  ;;  %v1518_v22 = vmul.f32 -1.442695, %v1173_v52  ;;  %v1275_v37 = vadd.f32 %v1147_v24, %v1069_v18  ;;  %v1116_v42 = vadd.f32 %v2276_v12, %v1093_v34 }
 0x15c   :  { %1810 = vpow2.f32 %v1520_v36  ;;  %v1276_v43 = vadd.f32 %v1148_v16, %v1070_v21  ;;  %v1052_v44 = vadd.f32 %v2319_v26, %v1029_v28  ;;  %v1121_v6 = vadd.f32 %v2276_v12, %v1098_v40 }
 0x15d   :  { %v1793_v19 = vpop.eup %1792  ;;  %1812 = vpow2.f32 %v1517_v9  ;;  %v1277_v11 = vadd.f32 %v1149_v32, %v1071_v14  ;;  %v1072_v46 = vmul.f32 %v2338_v62, %v1049_v29  ;;  %v1050_v47 = vadd.f32 %v2319_v26, %v1027_v3 }
 0x15e   :  { %v1795_v25 = vpop.eup %1794  ;;  %v1232_v27 = vadd.f32 1.0, %v1793_v19  ;;  %1814 = vpow2.f32 %v1518_v22  ;;  %v1074_v39 = vmul.f32 %v2338_v62, %v1051_v20  ;;  %v1139_v56 = vmul.f32 %v2283_v1, %v1116_v42  ;;  %v1151_v19 = vld [vmem:[%s2575_s7 + $0x28] sm:$0xff]  ;;  %v1033_v20 = vld [vmem:[#allocation2 + $0x58] sm:$0xff] }
 0x15f   :  { %v1797_v30 = vpop.eup %1796  ;;  %v1230_v23 = vadd.f32 1.0, %v1795_v25  ;;  %1816 = vpow2.f32 %v1515_v7  ;;  %v1075_v36 = vmul.f32 %v2338_v62, %v1052_v44  ;;  %v1144_v15 = vmul.f32 %v2283_v1, %v1121_v6  ;;  %v1032_v7 = vld [vmem:[#allocation2 + $0x50] sm:$0xff] }
 0x160   :  { %v1799_v35 = vpop.eup %1798  ;;  %1818 = vrcp.f32 %v1232_v27  ;;  %v1233_v38 = vadd.f32 1.0, %v1797_v30  ;;  %v1122_v41 = vadd.f32 %v2276_v12, %v1099_v50  ;;  %v1278_v52 = vadd.f32 %v1150_v53, %v1072_v46  ;;  %v1159_v46 = vld [vmem:[%s2575_s7 + $0x68] sm:$0xff]  ;;  %v1156_v50 = vld [vmem:[%s2575_s7 + $0x50] sm:$0xff] }
 0x161   :  { %v1801_v33 = vpop.eup %1800  ;;  %1820 = vrcp.f32 %v1230_v23  ;;  %v1231_v17 = vadd.f32 1.0, %v1799_v35  ;;  %v1073_v2 = vmul.f32 %v2338_v62, %v1050_v47  ;;  %v1280_v22 = vadd.f32 %v1152_v60, %v1074_v39 }
 0x162   :  { %v1803_v45 = vpop.eup %1802  ;;  %1822 = vrcp.f32 %v1233_v38  ;;  %v1238_v55 = vadd.f32 1.0, %v1801_v33  ;;  %v1171_v4 = vadd.f32 2.0, %v1139_v56  ;;  %v1281_v58 = vadd.f32 %v1153_v5, %v1075_v36 }
 0x163   :  { %v1805_v48 = vpop.eup %1804  ;;  %1824 = vlog2.f32 %v1803_v45  ;;  %v1292_v49 = vmul.f32 %v1803_v45, %v1276_v43  ;;  %v1057_v21 = vadd.f32 %v2319_v26, %v1034_v63  ;;  %v1176_v24 = vadd.f32 2.0, %v1144_v15  ;;  %v1158_v43 = vld [vmem:[%s2575_s7 + $0x60] sm:$0xff] }
 0x164   :  { %v1807_v51 = vpop.eup %1806  ;;  %1826 = vlog2.f32 %v1805_v48  ;;  %v1290_v8 = vmul.f32 %v1805_v48, %v1274_v31  ;;  %v1058_v25 = vadd.f32 %v2319_v26, %v1035_v10  ;;  %v1145_v14 = vmul.f32 %v2283_v1, %v1122_v41 }
 0x165   :  { %v1809_v54 = vpop.eup %1808  ;;  %1308 = vst.msk [vmem:[%s2576_s8 + $0x10] sm:$0xff] %vm36_vm1, %v1292_v49  ;;  %1828 = vlog2.f32 %v1807_v51  ;;  %v1293_v57 = vmul.f32 %v1807_v51, %v1277_v11  ;;  %v1055_v29 = vadd.f32 %v2319_v26, %v1032_v7  ;;  %v1279_v32 = vadd.f32 %v1151_v19, %v1073_v2 }
 0x166   :  { %v1811_v61 = vpop.eup %1810  ;;  %1306 = vst.msk [vmem:[%s2576_s8] sm:$0xff] %vm36_vm1, %v1290_v8  ;;  %1830 = vlog2.f32 %v1809_v54  ;;  %v1291_v59 = vmul.f32 %v1809_v54, %v1275_v37  ;;  %v1516_v23 = vmul.f32 -1.442695, %v1171_v4  ;;  %v1080_v35 = vmul.f32 %v2338_v62, %v1057_v21  ;;  %v1030_v37 = vld [vmem:[#allocation2 + $0x40] sm:$0xff] }
 0x167   :  { %v1813_v0 = vpop.eup %1812  ;;  %1309 = vst.msk [vmem:[%s2576_s8 + $0x18] sm:$0xff] %vm36_vm1, %v1293_v57  ;;  %1832 = vrcp.f32 %v1231_v17  ;;  %v1239_v9 = vadd.f32 1.0, %v1811_v61  ;;  %v1521_v38 = vmul.f32 -1.442695, %v1176_v24  ;;  %v1081_v44 = vmul.f32 %v2338_v62, %v1058_v25 }
 0x168   :  { %v1815_v13 = vpop.eup %1814  ;;  %1307 = vst.msk [vmem:[%s2576_s8 + $0x8] sm:$0xff] %vm36_vm1, %v1291_v59  ;;  %1834 = vrcp.f32 %v1238_v55  ;;  %v1236_v12 = vadd.f32 1.0, %v1813_v0  ;;  %v1177_v6 = vadd.f32 2.0, %v1145_v14  ;;  %v1078_v47 = vmul.f32 %v2338_v62, %v1055_v29 }
 0x169   :  { %v1817_v18 = vpop.eup %1816  ;;  %1836 = vrcp.f32 %v1239_v9  ;;  %v1237_v16 = vadd.f32 1.0, %v1815_v13  ;;  %v1056_v48 = vadd.f32 %v2319_v26, %v1033_v20  ;;  %v1053_v51 = vadd.f32 %v2319_v26, %v1030_v37  ;;  %v1036_v20 = vld [vmem:[#allocation2 + $0x70] sm:$0xff] }
 0x16a   :  { %v1819_v34 = vpop.eup %1818  ;;  %1838 = vrcp.f32 %v1236_v12  ;;  %v1234_v40 = vadd.f32 1.0, %v1817_v18  ;;  %v1286_v56 = vadd.f32 %v1158_v43, %v1080_v35  ;;  %v1287_v60 = vadd.f32 %v1159_v46, %v1081_v44 }
 0x16b   :  { %v1821_v27 = vpop.eup %1820  ;;  %1840 = vlog2.f32 %v1819_v34  ;;  %v1296_v28 = vmul.f32 %v1819_v34, %v1280_v22  ;;  %v1522_v36 = vmul.f32 -1.442695, %v1177_v6  ;;  %v1284_v59 = vadd.f32 %v1156_v50, %v1078_v47  ;;  %v1154_v22 = vld [vmem:[%s2575_s7 + $0x40] sm:$0xff]  ;;  %v1037_v47 = vld [vmem:[#allocation2 + $0x78] sm:$0xff] }
 0x16c   :  { %v1823_v30 = vpop.eup %1822  ;;  %1842 = vlog2.f32 %v1821_v27  ;;  %v1294_v31 = vmul.f32 %v1821_v27, %v1278_v52  ;;  %v1079_v5 = vmul.f32 %v2338_v62, %v1056_v48  ;;  %v1157_v52 = vld [vmem:[%s2575_s7 + $0x58] sm:$0xff]  ;;  %v1076_v2 = vmul.f32 %v2338_v62, %v1053_v51 }
 0x16d   :  { %v1825_v3 = vpop.eup %1824  ;;  %1312 = vst.msk [vmem:[%s2576_s8 + $0x30] sm:$0xff] %vm36_vm1, %v1296_v28  ;;  %1844 = vlog2.f32 %v1823_v30  ;;  %v1297_v1 = vmul.f32 %v1823_v30, %v1281_v58  ;;  %v1031_v30 = vld [vmem:[#allocation2 + $0x48] sm:$0xff]  ;;  %v1059_v44 = vadd.f32 %v2319_v26, %v1036_v20 }
 0x16e   :  { %v1827_v42 = vpop.eup %1826  ;;  %v1327_v33 = vmul.f32 0.6931472, %v1825_v3  ;;  %1310 = vst.msk [vmem:[%s2576_s8 + $0x20] sm:$0xff] %vm36_vm1, %v1294_v31  ;;  %1846 = vrcp.f32 %v1237_v16  ;;  %v1285_v18 = vadd.f32 %v1157_v52, %v1079_v5  ;;  %v1282_v24 = vadd.f32 %v1154_v22, %v1076_v2 }
 0x16f   :  { %v1829_v45 = vpop.eup %1828  ;;  %v1323_v11 = vmul.f32 0.6931472, %v1827_v42  ;;  %1313 = vst.msk [vmem:[%s2576_s8 + $0x38] sm:$0xff] %vm36_vm1, %v1297_v1  ;;  %1848 = vrcp.f32 %v1234_v40  ;;  %v1082_v50 = vmul.f32 %v2338_v62, %v1059_v44 }
 0x170   :  { %v1831_v49 = vpop.eup %1830  ;;  %v1360_v39 = vsel %vm36_vm1, %v1327_v33, 0.0  ;;  %v1329_v17 = vmul.f32 0.6931472, %v1829_v45  ;;  %1850 = vpow2.f32 %v1516_v23 }
 0x171   :  { %v1833_v8 = vpop.eup %1832  ;;  %1361 = vadd.xlane.f32.xlu1 %v1360_v39  ;;  %v1354_v53 = vsel %vm36_vm1, %v1323_v11, 0.0  ;;  %v1325_v55 = vmul.f32 0.6931472, %v1831_v49  ;;  %1852 = vpow2.f32 %v1521_v38  ;;  %v1054_v38 = vadd.f32 %v2319_v26, %v1031_v30 }
 0x172   :  { %v1835_v54 = vpop.eup %1834  ;;  %1355 = vadd.xlane.f32.xlu0 %v1354_v53  ;;  %1854 = vlog2.f32 %v1833_v8  ;;  %v1295_v57 = vmul.f32 %v1833_v8, %v1279_v32  ;;  %v1363_v41 = vsel %vm36_vm1, %v1329_v17, 0.0  ;;  %v1155_v17 = vld [vmem:[%s2575_s7 + $0x48] sm:$0xff]  ;;  %v1160_v53 = vld [vmem:[%s2575_s7 + $0x70] sm:$0xff] }
 0x173   :  { %v1837_v15 = vpop.eup %1836  ;;  %1856 = vlog2.f32 %v1835_v54  ;;  %v1302_v61 = vmul.f32 %v1835_v54, %v1286_v56  ;;  %v1357_v10 = vsel %vm36_vm1, %v1325_v55, 0.0  ;;  %v1077_v48 = vmul.f32 %v2338_v62, %v1054_v38 }
 0x174   :  { %v1839_v63 = vpop.eup %1838  ;;  %1311 = vst.msk [vmem:[%s2576_s8 + $0x28] sm:$0xff] %vm36_vm1, %v1295_v57  ;;  %1858 = vlog2.f32 %v1837_v15  ;;  %v1303_v0 = vmul.f32 %v1837_v15, %v1287_v60  ;;  %v1060_v55 = vadd.f32 %v2319_v26, %v1037_v47  ;;  %v1288_v15 = vadd.f32 %v1160_v53, %v1082_v50  ;;  %v1161_v26 = vld [vmem:[%s2575_s7 + $0x78] sm:$0xff] }
 0x175   :  { %v1841_v9 = vpop.eup %1840  ;;  %1364 = vadd.xlane.f32.xlu1 %v1363_v41  ;;  %1318 = vst.msk [vmem:[%s2576_s8 + $0x60] sm:$0xff] %vm36_vm1, %v1302_v61  ;;  %1860 = vlog2.f32 %v1839_v63  ;;  %v1300_v13 = vmul.f32 %v1839_v63, %v1284_v59  ;;  %v1283_v57 = vadd.f32 %v1155_v17, %v1077_v48 }
 0x176   :  { %v1843_v12 = vpop.eup %1842  ;;  %1358 = vadd.xlane.f32.xlu0 %v1357_v10  ;;  %v1335_v7 = vmul.f32 0.6931472, %v1841_v9  ;;  %1319 = vst.msk [vmem:[%s2576_s8 + $0x68] sm:$0xff] %vm36_vm1, %v1303_v0  ;;  %1862 = vpow2.f32 %v1522_v36  ;;  %v1083_v5 = vmul.f32 %v2338_v62, %v1060_v55 }
 0x177   :  { %v1845_v4 = vpop.eup %1844  ;;  %1316 = vst.msk [vmem:[%s2576_s8 + $0x50] sm:$0xff] %vm36_vm1, %v1300_v13  ;;  %v1331_v25 = vmul.f32 0.6931472, %v1843_v12 }
 0x178   :  { %v1847_v58 = vpop.eup %1846  ;;  %v1372_v19 = vsel %vm36_vm1, %v1335_v7, 0.0  ;;  %v1337_v21 = vmul.f32 0.6931472, %v1845_v4  ;;  %v1289_v62 = vadd.f32 %v1161_v26, %v1083_v5 }
 0x179   :  { %v1849_v34 = vpop.eup %1848  ;;  %1864 = vlog2.f32 %v1847_v58  ;;  %v1301_v16 = vmul.f32 %v1847_v58, %v1285_v18  ;;  %v1366_v3 = vsel %vm36_vm1, %v1331_v25, 0.0 }
 0x17a   :  { %v1851_v14 = vpop.eup %1850  ;;  %1373 = vadd.xlane.f32.xlu0 %v1372_v19  ;;  %v1375_v27 = vsel %vm36_vm1, %v1337_v21, 0.0  ;;  %1866 = vlog2.f32 %v1849_v34  ;;  %v1298_v28 = vmul.f32 %v1849_v34, %v1282_v24 }
 0x17b   :  { %v1853_v29 = vpop.eup %1852  ;;  %1376 = vadd.xlane.f32.xlu1 %v1375_v27  ;;  %1317 = vst.msk [vmem:[%s2576_s8 + $0x58] sm:$0xff] %vm36_vm1, %v1301_v16  ;;  %v1235_v40 = vadd.f32 1.0, %v1851_v14 }
 0x17c   :  { %v1855_v31 = vpop.eup %1854  ;;  %1314 = vst.msk [vmem:[%s2576_s8 + $0x40] sm:$0xff] %vm36_vm1, %v1298_v28  ;;  %v1240_v32 = vadd.f32 1.0, %v1853_v29 }
 0x17d   :  { %v1857_v23 = vpop.eup %1856  ;;  %v1333_v1 = vmul.f32 0.6931472, %v1855_v31  ;;  %1868 = vrcp.f32 %v1235_v40 }
 0x17e   :  { %v1859_v35 = vpop.eup %1858  ;;  %1367 = vadd.xlane.f32.xlu0 %v1366_v3  ;;  %v1347_v37 = vmul.f32 0.6931472, %v1857_v23  ;;  %1870 = vrcp.f32 %v1240_v32 }
 0x17f   :  { %v1861_v42 = vpop.eup %1860  ;;  %v1369_v33 = vsel %vm36_vm1, %v1333_v1, 0.0  ;;  %v1349_v43 = vmul.f32 0.6931472, %v1859_v35 }
 0x180   :  { %v1863_v6 = vpop.eup %1862  ;;  %1370 = vadd.xlane.f32.xlu1 %v1369_v33  ;;  %v1390_v45 = vsel %vm36_vm1, %v1347_v37, 0.0  ;;  %v1343_v11 = vmul.f32 0.6931472, %v1861_v42 }
 0x181   :  { %v1241_v46 = vadd.f32 1.0, %v1863_v6  ;;  %v1393_v39 = vsel %vm36_vm1, %v1349_v43, 0.0 }
 0x182   :  { %1391 = vadd.xlane.f32.xlu0 %v1390_v45  ;;  %v1384_v56 = vsel %vm36_vm1, %v1343_v11, 0.0 }
 0x183   :  { %v1865_v49 = vpop.eup %1864  ;;  %1872 = vrcp.f32 %v1241_v46 }
 0x184   :  { %v1867_v51 = vpop.eup %1866  ;;  %1394 = vadd.xlane.f32.xlu1 %v1393_v39  ;;  %v1345_v8 = vmul.f32 0.6931472, %v1865_v49 }
 0x185   :  { %v1339_v54 = vmul.f32 0.6931472, %v1867_v51 }
 0x186   :  { %1385 = vadd.xlane.f32.xlu0 %v1384_v56  ;;  %v1387_v36 = vsel %vm36_vm1, %v1345_v8, 0.0 }
 0x187   :  { %v1869_v60 = vpop.eup %1868  ;;  %v1378_v63 = vsel %vm36_vm1, %v1339_v54, 0.0 }
 0x188   :  { %v1871_v61 = vpop.eup %1870  ;;  %1388 = vadd.xlane.f32.xlu1 %v1387_v36  ;;  %1874 = vlog2.f32 %v1869_v60  ;;  %v1299_v59 = vmul.f32 %v1869_v60, %v1283_v57 }
 0x189   :  { %1876 = vlog2.f32 %v1871_v61  ;;  %v1304_v41 = vmul.f32 %v1871_v61, %v1288_v15 }
 0x18a   :  { %1379 = vadd.xlane.f32.xlu0 %v1378_v63  ;;  %1315 = vst.msk [vmem:[%s2576_s8 + $0x48] sm:$0xff] %vm36_vm1, %v1299_v59 }
 0x18b   :  { %1320 = vst.msk [vmem:[%s2576_s8 + $0x70] sm:$0xff] %vm36_vm1, %v1304_v41 }
 0x18d   :  { %v1873_v0 = vpop.eup %1872 }
 0x18e   :  { %1878 = vlog2.f32 %v1873_v0  ;;  %v1305_v52 = vmul.f32 %v1873_v0, %v1289_v62 }
 0x190   :  { %1321 = vst.msk [vmem:[%s2576_s8 + $0x78] sm:$0xff] %vm36_vm1, %v1305_v52 }
 0x192   :  { %v1875_v2 = vpop.eup %1874 }
 0x193   :  { %v1877_v9 = vpop.eup %1876  ;;  %v1341_v10 = vmul.f32 0.6931472, %v1875_v2 }
 0x194   :  { %v1351_v13 = vmul.f32 0.6931472, %v1877_v9 }
 0x195   :  { %v1381_v22 = vsel %vm36_vm1, %v1341_v10, 0.0 }
 0x196   :  { %1382 = vadd.xlane.f32.xlu1 %v1381_v22  ;;  %v1396_v12 = vsel %vm36_vm1, %v1351_v13, 0.0 }
 0x197   :  { %1397 = vadd.xlane.f32.xlu0 %v1396_v12 }
 0x198   :  { %v1879_v7 = vpop.eup %1878 }
 0x199   :  { %v1353_v4 = vmul.f32 0.6931472, %v1879_v7 }
 0x19b   :  { %v1399_v18 = vsel %vm36_vm1, %v1353_v4, 0.0 }
 0x19c   :  { %1400 = vadd.xlane.f32.xlu1 %v1399_v18 }
 0x1fe   :  { %v1362_v58 = vpop.xlane.xlu1 %1361 }
 0x1ff   :  { %1405 = vst.msk [vmem:[%s2577_s9 + $0x10] sm:$0xff] %vm1402_vm2, %v1362_v58  ;;  %v1356_v19 = vpop.xlane.xlu0 %1355 }
 0x200   :  { %1403 = vst.msk [vmem:[%s2577_s9] sm:$0xff] %vm1402_vm2, %v1356_v19 }
 0x202   :  { %v1365_v21 = vpop.xlane.xlu1 %1364 }
 0x203   :  { %1406 = vst.msk [vmem:[%s2577_s9 + $0x18] sm:$0xff] %vm1402_vm2, %v1365_v21  ;;  %v1359_v24 = vpop.xlane.xlu0 %1358 }
 0x204   :  { %1404 = vst.msk [vmem:[%s2577_s9 + $0x8] sm:$0xff] %vm1402_vm2, %v1359_v24 }
 0x207   :  { %v1374_v34 = vpop.xlane.xlu0 %1373 }
 0x208   :  { %1409 = vst.msk [vmem:[%s2577_s9 + $0x30] sm:$0xff] %vm1402_vm2, %v1374_v34  ;;  %v1377_v25 = vpop.xlane.xlu1 %1376 }
 0x209   :  { %1410 = vst.msk [vmem:[%s2577_s9 + $0x38] sm:$0xff] %vm1402_vm2, %v1377_v25 }
 0x20b   :  { %v1368_v16 = vpop.xlane.xlu0 %1367 }
 0x20c   :  { %1407 = vst.msk [vmem:[%s2577_s9 + $0x20] sm:$0xff] %vm1402_vm2, %v1368_v16 }
 0x20d   :  { %v1371_v14 = vpop.xlane.xlu1 %1370 }
 0x20e   :  { %1408 = vst.msk [vmem:[%s2577_s9 + $0x28] sm:$0xff] %vm1402_vm2, %v1371_v14 }
 0x20f   :  { %v1392_v27 = vpop.xlane.xlu0 %1391 }
 0x210   :  { %1415 = vst.msk [vmem:[%s2577_s9 + $0x60] sm:$0xff] %vm1402_vm2, %v1392_v27 }
 0x211   :  { %v1395_v28 = vpop.xlane.xlu1 %1394 }
 0x212   :  { %1416 = vst.msk [vmem:[%s2577_s9 + $0x68] sm:$0xff] %vm1402_vm2, %v1395_v28 }
 0x213   :  { %v1386_v29 = vpop.xlane.xlu0 %1385 }
 0x214   :  { %1413 = vst.msk [vmem:[%s2577_s9 + $0x50] sm:$0xff] %vm1402_vm2, %v1386_v29 }
 0x215   :  { %v1389_v40 = vpop.xlane.xlu1 %1388 }
 0x216   :  { %1414 = vst.msk [vmem:[%s2577_s9 + $0x58] sm:$0xff] %vm1402_vm2, %v1389_v40 }
 0x217   :  { %v1380_v30 = vpop.xlane.xlu0 %1379 }
 0x218   :  { %1411 = vst.msk [vmem:[%s2577_s9 + $0x40] sm:$0xff] %vm1402_vm2, %v1380_v30 }
 0x223   :  { %v1383_v31 = vpop.xlane.xlu1 %1382 }
 0x224   :  { %1412 = vst.msk [vmem:[%s2577_s9 + $0x48] sm:$0xff] %vm1402_vm2, %v1383_v31  ;;  %v1398_v32 = vpop.xlane.xlu0 %1397 }
 0x225   :  { %1417 = vst.msk [vmem:[%s2577_s9 + $0x70] sm:$0xff] %vm1402_vm2, %v1398_v32 }
 0x229   :  { %v1401_v20 = vpop.xlane.xlu1 %1400 }
 0x22a   :  { %1418 = vst.msk [vmem:[%s2577_s9 + $0x78] sm:$0xff] %vm1402_vm2, %v1401_v20 }

// kernel: _lambda_.66
= control target key start
LH: loop header
LB: loop body
LE: loop exit
PB: predicated region body
PF: predicated region fallthrough
CT: control target
= control target key end

     0   :  { %vm34_vm0 = vcmask 64512   ;;  %v1059_v1 = vmov 0.0   ;;  %vm175_vm1 = vcmask 588800   ;;  %vm200_vm2 = vcmask 1043456   ;;  %s1512_s2 = inlined_call_operand.vmem [shape: bf16[72,8], index: 2, kind: input, shape index: {}, may-alias: {1,2}]   ;;  %s1513_s1 = inlined_call_operand.vmem [shape: bf16[72,8], index: 1, kind: input, shape index: {}, may-alias: {1,2}]   ;;  %s1514_s0 = inlined_call_operand.vmem [shape: bf16[128,72], index: 0, kind: input, shape index: {}]   ;;  %s1515_s4 = inlined_call_operand.vmem [shape: f32[1,8], index: 4, kind: input, shape index: {}, may-alias: {3,4}]   ;;  %s1516_s6 = inlined_call_operand.vmem [shape: f32[1,8], index: 6, kind: input, shape index: {}, may-alias: {5,6}]   ;;  %s1517_s3 = inlined_call_operand.vmem [shape: f32[1,8], index: 3, kind: input, shape index: {}, may-alias: {3,4}]   ;;  %s1518_s5 = inlined_call_operand.vmem [shape: f32[1,8], index: 5, kind: input, shape index: {}, may-alias: {5,6}]   ;;  %s1519_s7 = inlined_call_operand.vmem [shape: f32[128,8], index: 7, kind: input, shape index: {}]   ;;  %s1520_s8 = inlined_call_operand.vmem [shape: f32[128,1], index: 8, kind: output, shape index: {}]  }
   0x1   :  { %v1009_v0 = vld [vmem:[%s1512_s2] sm:$0xff]   ;;  %53 = vst.msk [vmem:[#allocation3 + $0x10] sm:$0xff] %vm34_vm0, %v1059_v1  ;;  %35 = vst.msk [vmem:[#allocation2] sm:$0xff] %vm34_vm0, %v1059_v1  ;;  %v1010_v2 = vld [vmem:[%s1512_s2 + $0x8] sm:$0xff]   ;;  %vm869_vm3 = vcmask 7168  }
   0x2   :  { %36 = vst.msk [vmem:[#allocation2 + $0x8] sm:$0xff] %vm34_vm0, %v1059_v1  ;;  %37 = vst.msk [vmem:[#allocation2 + $0x10] sm:$0xff] %vm34_vm0, %v1059_v1  ;;  %980 = vmatprep.subr.bf16.mxu1 %v1009_v0  ;;  %v1011_v3 = vld [vmem:[%s1513_s1] sm:$0xff]   ;;  %v1012_v4 = vld [vmem:[%s1512_s2 + $0x10] sm:$0xff]  }
   0x3   :  { %38 = vst.msk [vmem:[#allocation2 + $0x18] sm:$0xff] %vm34_vm0, %v1059_v1  ;;  %39 = vst.msk [vmem:[#allocation2 + $0x20] sm:$0xff] %vm34_vm0, %v1059_v1  ;;  %981 = vmatpush3.bf16.msra.mxu1 %v1009_v0  ;;  %954 = vmatprep.subr.bf16.mxu0 %v1011_v3  ;;  %v1013_v5 = vld [vmem:[%s1513_s1 + $0x8] sm:$0xff]   ;;  %v1015_v6 = vld [vmem:[%s1513_s1 + $0x10] sm:$0xff]  }
   0x4   :  { %40 = vst.msk [vmem:[#allocation2 + $0x28] sm:$0xff] %vm34_vm0, %v1059_v1  ;;  %41 = vst.msk [vmem:[#allocation2 + $0x30] sm:$0xff] %vm34_vm0, %v1059_v1  ;;  %982 = vmatprep.subr.bf16.mxu1 %v1010_v2  ;;  %955 = vmatpush3.bf16.msra.mxu0 %v1011_v3  ;;  %v1014_v7 = vld [vmem:[%s1512_s2 + $0x18] sm:$0xff]   ;;  %v1017_v8 = vld [vmem:[%s1514_s0] sm:$0xff]  }
   0x5   :  { %42 = vst.msk [vmem:[#allocation2 + $0x38] sm:$0xff] %vm34_vm0, %v1059_v1  ;;  %43 = vst.msk [vmem:[#allocation2 + $0x40] sm:$0xff] %vm34_vm0, %v1059_v1  ;;  %956 = vmatprep.subr.bf16.mxu0 %v1013_v5  ;;  %990 = vmatprep.mubr.msk.bf16.mxu1 %vm175_vm1, %v1017_v8  ;;  %v1018_v9 = vld [vmem:[%s1513_s1 + $0x18] sm:$0xff]   ;;  %v1016_v10 = vld [vmem:[%s1512_s2 + $0x20] ss:$0 sps:$4 sm:$0xff]  }
   0x6   :  { %44 = vst.msk [vmem:[#allocation2 + $0x48] sm:$0xff] %vm34_vm0, %v1059_v1  ;;  %45 = vst.msk [vmem:[#allocation2 + $0x50] sm:$0xff] %vm34_vm0, %v1059_v1  ;;  %964 = vmatprep.mubr.msk.bf16.mxu0 %vm175_vm1, %v1017_v8  ;;  %v1020_v11 = vld [vmem:[%s1513_s1 + $0x20] ss:$0 sps:$4 sm:$0xff]   ;;  %v387_v12 = vsel %vm200_vm2, %v1016_v10, 0  ;;  %v1019_v13 = vld [vmem:[%s1514_s0 + $0x8] sm:$0xff]  }
   0x7   :  { %46 = vst.msk [vmem:[#allocation2 + $0x58] sm:$0xff] %vm34_vm0, %v1059_v1  ;;  %47 = vst.msk [vmem:[#allocation2 + $0x60] sm:$0xff] %vm34_vm0, %v1059_v1  ;;  %983 = vmatpush3.bf16.msra.mxu1 %v1010_v2  ;;  %v202_v14 = vsel %vm200_vm2, %v1020_v11, 0  ;;  %v1021_v15 = vld [vmem:[%s1514_s0 + $0x10] sm:$0xff]   ;;  %v1022_v16 = vld [vmem:[%s1514_s0 + $0x18] sm:$0xff]  }
   0x8   :  { %48 = vst.msk [vmem:[#allocation2 + $0x68] sm:$0xff] %vm34_vm0, %v1059_v1  ;;  %49 = vst.msk [vmem:[#allocation2 + $0x70] sm:$0xff] %vm34_vm0, %v1059_v1  ;;  %984 = vmatprep.subr.bf16.mxu1 %v1012_v4  ;;  %957 = vmatpush3.bf16.msra.mxu0 %v1013_v5  ;;  %v1023_v17 = vld [vmem:[%s1514_s0 + $0x20] sm:$0xff]   ;;  %v1024_v18 = vld [vmem:[%s1514_s0 + $0x28] sm:$0xff]  }
   0x9   :  { %50 = vst.msk [vmem:[#allocation2 + $0x78] sm:$0xff] %vm34_vm0, %v1059_v1  ;;  %51 = vst.msk [vmem:[#allocation3] sm:$0xff] %vm34_vm0, %v1059_v1  ;;  %958 = vmatprep.subr.bf16.mxu0 %v1015_v6  ;;  %v1025_v19 = vld [vmem:[%s1514_s0 + $0x30] sm:$0xff]   ;;  %v1026_v20 = vld [vmem:[%s1514_s0 + $0x38] sm:$0xff]  }
   0xa   :  { %52 = vst.msk [vmem:[#allocation3 + $0x8] sm:$0xff] %vm34_vm0, %v1059_v1  ;;  %54 = vst.msk [vmem:[#allocation3 + $0x18] sm:$0xff] %vm34_vm0, %v1059_v1  ;;  %v336_v21 = vld [vmem:[#allocation3 + $0x10] sm:$0xff]  ;;  %v83_v29 = vld [vmem:[#allocation2] sm:$0xff] }
   0xb   :  { %55 = vst.msk [vmem:[#allocation3 + $0x20] sm:$0xff] %vm34_vm0, %v1059_v1  ;;  %56 = vst.msk [vmem:[#allocation3 + $0x28] sm:$0xff] %vm34_vm0, %v1059_v1  ;;  %985 = vmatpush3.bf16.msra.mxu1 %v1012_v4  ;;  %v85_v25 = vld [vmem:[#allocation2 + $0x10] sm:$0xff]  ;;  %v86_v33 = vld [vmem:[#allocation2 + $0x18] sm:$0xff] }
   0xc   :  { %57 = vst.msk [vmem:[#allocation3 + $0x30] sm:$0xff] %vm34_vm0, %v1059_v1  ;;  %58 = vst.msk [vmem:[#allocation3 + $0x38] sm:$0xff] %vm34_vm0, %v1059_v1  ;;  %986 = vmatprep.subr.bf16.mxu1 %v1014_v7  ;;  %959 = vmatpush3.bf16.msra.mxu0 %v1015_v6  ;;  %v84_v38 = vld [vmem:[#allocation2 + $0x8] sm:$0xff]  ;;  %v89_v49 = vld [vmem:[#allocation2 + $0x30] sm:$0xff] }
   0xd   :  { %59 = vst.msk [vmem:[#allocation3 + $0x40] sm:$0xff] %vm34_vm0, %v1059_v1  ;;  %60 = vst.msk [vmem:[#allocation3 + $0x48] sm:$0xff] %vm34_vm0, %v1059_v1  ;;  %960 = vmatprep.subr.bf16.mxu0 %v1018_v9  ;;  %v1218_v50 = vld [vmem:[%s1515_s4] ss:$0 sm:$0xff]  ;;  %v90_v59 = vld [vmem:[#allocation2 + $0x38] sm:$0xff] }
   0xe   :  { %61 = vst.msk [vmem:[#allocation3 + $0x50] sm:$0xff] %vm34_vm0, %v1059_v1  ;;  %62 = vst.msk [vmem:[#allocation3 + $0x58] sm:$0xff] %vm34_vm0, %v1059_v1  ;;  %v87_v54 = vld [vmem:[#allocation2 + $0x20] sm:$0xff]  ;;  %v88_v2 = vld [vmem:[#allocation2 + $0x28] sm:$0xff] }
   0xf   :  { %63 = vst.msk [vmem:[#allocation3 + $0x60] sm:$0xff] %vm34_vm0, %v1059_v1  ;;  %64 = vst.msk [vmem:[#allocation3 + $0x68] sm:$0xff] %vm34_vm0, %v1059_v1  ;;  %987 = vmatpush3.bf16.msra.mxu1 %v1014_v7  ;;  %v1223_v55 = vld [vmem:[%s1516_s6] ss:$0 sm:$0xff] }
  0x10   :  { %65 = vst.msk [vmem:[#allocation3 + $0x70] sm:$0xff] %vm34_vm0, %v1059_v1  ;;  %66 = vst.msk [vmem:[#allocation3 + $0x78] sm:$0xff] %vm34_vm0, %v1059_v1  ;;  %1007 = vmatprep.subr.msk.bf16.mxu1 %vm200_vm2, %v1016_v10  ;;  %961 = vmatpush3.bf16.msra.mxu0 %v1018_v9  ;;  %v334_v22 = vld [vmem:[#allocation3] sm:$0xff] }
  0x11   :  { %1006 = vmatprep.subr.msk.bf16.mxu0 %vm200_vm2, %v1020_v11  ;;  %v337_v24 = vld [vmem:[#allocation3 + $0x18] sm:$0xff]  ;;  %v335_v28 = vld [vmem:[#allocation3 + $0x8] sm:$0xff]  ;;  %v1228_v60 = vld [vmem:[%s1517_s3] ss:$0 sm:$0xff] }
  0x12   :  { %v338_v46 = vld [vmem:[#allocation3 + $0x20] sm:$0xff]  ;;  %v339_v53 = vld [vmem:[#allocation3 + $0x28] sm:$0xff] }
  0x13   :  { %989 = vmatpush3.bf16.msra.mxu1 %v387_v12  ;;  %v340_v44 = vld [vmem:[#allocation3 + $0x30] sm:$0xff]  ;;  %v341_v48 = vld [vmem:[#allocation3 + $0x38] sm:$0xff] }
  0x14   :  { %963 = vmatpush3.bf16.msra.mxu0 %v202_v14 }
  0x16   :  { %991 = vmatmul.mubr.msk.bf16.vlgmr.msra.gmra.mrb[0].mxu1 %vm175_vm1, %v1019_v13 }
  0x17   :  { %994 = vmatprep.mubr.msk.bf16.mxu1 %vm175_vm1, %v1021_v15  ;;  %965 = vmatmul.mubr.msk.bf16.vlgmr.msra.gmra.mrb[0].mxu0 %vm175_vm1, %v1019_v13 }
  0x18   :  { %968 = vmatprep.mubr.msk.bf16.mxu0 %vm175_vm1, %v1021_v15 }
  0x1e   :  { %995 = vmatmul.mubr.msk.bf16.gmra.mrb[4].mxu1 %vm175_vm1, %v1022_v16 }
  0x1f   :  { %998 = vmatprep.mubr.msk.bf16.mxu1 %vm175_vm1, %v1023_v17  ;;  %969 = vmatmul.mubr.msk.bf16.gmra.mrb[4].mxu0 %vm175_vm1, %v1022_v16 }
  0x20   :  { %972 = vmatprep.mubr.msk.bf16.mxu0 %vm175_vm1, %v1023_v17  ;;  %v344_v17 = vld [vmem:[#allocation3 + $0x50] sm:$0xff] }
  0x26   :  { %999 = vmatmul.mubr.msk.bf16.gmra.mrb[8].mxu1 %vm175_vm1, %v1024_v18 }
  0x27   :  { %1002 = vmatprep.mubr.msk.bf16.mxu1 %vm175_vm1, %v1025_v19  ;;  %973 = vmatmul.mubr.msk.bf16.gmra.mrb[8].mxu0 %vm175_vm1, %v1024_v18 }
  0x28   :  { %976 = vmatprep.mubr.msk.bf16.mxu0 %vm175_vm1, %v1025_v19  ;;  %v1246_v19 = vld [vmem:[%s1518_s5] ss:$0 sm:$0xff] }
  0x2e   :  { %1003 = vmatmul.mubr.msk.bf16.gmra.mrb[12].mxu1 %vm175_vm1, %v1026_v20 }
  0x2f   :  { %977 = vmatmul.mubr.msk.bf16.gmra.mrb[12].mxu0 %vm175_vm1, %v1026_v20 }
  0xe9   :  { %v992_v23 = vpop.f32.mrb[0].mxu1 }
  0xea   :  { %v488_v26 = vadd.f32 %v992_v23, %v336_v21  ;;  %v423_v27 = vpop.f32.mrb[1].mxu1  ;;  %v966_v32 = vpop.f32.mrb[0].mxu0 }
  0xeb   :  { %v486_v30 = vadd.f32 %v423_v27, %v334_v22  ;;  %v993_v31 = vpop.f32.mrb[2].mxu1  ;;  %v303_v36 = vadd.f32 %v966_v32, %v85_v25  ;;  %v238_v37 = vpop.f32.mrb[1].mxu0  ;;  %v342_v22 = vld [vmem:[#allocation3 + $0x40] sm:$0xff]  ;;  %v93_v27 = vld [vmem:[#allocation2 + $0x50] sm:$0xff] }
  0xec   :  { %504 = vst.msk [vmem:[#allocation3 + $0x10] sm:$0xff] %vm34_vm0, %v488_v26  ;;  %v489_v34 = vadd.f32 %v993_v31, %v337_v24  ;;  %v426_v35 = vpop.f32.mrb[3].mxu1  ;;  %v301_v40 = vadd.f32 %v238_v37, %v83_v29  ;;  %v967_v41 = vpop.f32.mrb[2].mxu0  ;;  %v345_v26 = vld [vmem:[#allocation3 + $0x58] sm:$0xff]  ;;  %v343_v31 = vld [vmem:[#allocation3 + $0x48] sm:$0xff]  ;;  %v91_v32 = vld [vmem:[#allocation2 + $0x40] sm:$0xff] }
  0xed   :  { %502 = vst.msk [vmem:[#allocation3] sm:$0xff] %vm34_vm0, %v486_v30  ;;  %v487_v39 = vadd.f32 %v426_v35, %v335_v28  ;;  %320 = vst.msk [vmem:[#allocation2 + $0x10] sm:$0xff] %vm34_vm0, %v303_v36  ;;  %v304_v42 = vadd.f32 %v967_v41, %v86_v33  ;;  %v241_v43 = vpop.f32.mrb[3].mxu0  ;;  %v647_v41 = vld [vmem:[%s1519_s7 + $0x10] sm:$0xff] }
  0xee   :  { %505 = vst.msk [vmem:[#allocation3 + $0x18] sm:$0xff] %vm34_vm0, %v489_v34  ;;  %318 = vst.msk [vmem:[#allocation2] sm:$0xff] %vm34_vm0, %v301_v40  ;;  %v302_v45 = vadd.f32 %v241_v43, %v84_v38  ;;  %v94_v40 = vld [vmem:[#allocation2 + $0x58] sm:$0xff] }
  0xef   :  { %503 = vst.msk [vmem:[#allocation3 + $0x8] sm:$0xff] %vm34_vm0, %v487_v39  ;;  %321 = vst.msk [vmem:[#allocation2 + $0x18] sm:$0xff] %vm34_vm0, %v304_v42 }
  0xf0   :  { %319 = vst.msk [vmem:[#allocation2 + $0x8] sm:$0xff] %vm34_vm0, %v302_v45 }
  0xf1   :  { %v996_v47 = vpop.f32.mrb[4].mxu1 }
  0xf2   :  { %v492_v51 = vadd.f32 %v996_v47, %v340_v44  ;;  %v439_v52 = vpop.f32.mrb[5].mxu1  ;;  %v970_v58 = vpop.f32.mrb[4].mxu0 }
  0xf3   :  { %v490_v56 = vadd.f32 %v439_v52, %v338_v46  ;;  %v997_v57 = vpop.f32.mrb[6].mxu1  ;;  %v585_v61 = vld [vmem:[#allocation3 + $0x10] sm:$0xff]  ;;  %v307_v0 = vadd.f32 %v970_v58, %v89_v49  ;;  %v254_v1 = vpop.f32.mrb[5].mxu0  ;;  %v92_v49 = vld [vmem:[#allocation2 + $0x48] sm:$0xff] }
  0xf4   :  { %508 = vst.msk [vmem:[#allocation3 + $0x30] sm:$0xff] %vm34_vm0, %v492_v51  ;;  %v493_v62 = vadd.f32 %v997_v57, %v341_v48  ;;  %v442_v63 = vpop.f32.mrb[7].mxu1  ;;  %v608_v3 = vadd.f32 %v1218_v50, %v585_v61  ;;  %v583_v4 = vld [vmem:[#allocation3] sm:$0xff]  ;;  %v305_v6 = vadd.f32 %v254_v1, %v87_v54  ;;  %v971_v7 = vpop.f32.mrb[6].mxu0  ;;  %v523_v8 = vld [vmem:[#allocation2 + $0x10] sm:$0xff] }
  0xf5   :  { %506 = vst.msk [vmem:[#allocation3 + $0x20] sm:$0xff] %vm34_vm0, %v490_v56  ;;  %v491_v5 = vadd.f32 %v442_v63, %v339_v53  ;;  %v606_v9 = vadd.f32 %v1218_v50, %v583_v4  ;;  %v586_v10 = vld [vmem:[#allocation3 + $0x18] sm:$0xff]  ;;  %324 = vst.msk [vmem:[#allocation2 + $0x30] sm:$0xff] %vm34_vm0, %v307_v0  ;;  %v308_v11 = vadd.f32 %v971_v7, %v90_v59  ;;  %v257_v12 = vpop.f32.mrb[7].mxu0  ;;  %v521_v15 = vld [vmem:[#allocation2] sm:$0xff] }
  0xf6   :  { %509 = vst.msk [vmem:[#allocation3 + $0x38] sm:$0xff] %vm34_vm0, %v493_v62  ;;  %v546_v13 = vadd.f32 %v1228_v60, %v523_v8  ;;  %v1238_v14 = vmul.f32 %v1223_v55, %v608_v3  ;;  %v609_v16 = vadd.f32 %v1218_v50, %v586_v10  ;;  %322 = vst.msk [vmem:[#allocation2 + $0x20] sm:$0xff] %vm34_vm0, %v305_v6  ;;  %v584_v24 = vld [vmem:[#allocation3 + $0x8] sm:$0xff]  ;;  %v524_v35 = vld [vmem:[#allocation2 + $0x18] sm:$0xff] }
  0xf7   :  { %507 = vst.msk [vmem:[#allocation3 + $0x28] sm:$0xff] %vm34_vm0, %v491_v5  ;;  %v306_v18 = vadd.f32 %v257_v12, %v88_v2  ;;  %v544_v20 = vadd.f32 %v1228_v60, %v521_v15  ;;  %v1250_v21 = vmul.f32 %v1223_v55, %v606_v9  ;;  %325 = vst.msk [vmem:[#allocation2 + $0x38] sm:$0xff] %vm34_vm0, %v308_v11  ;;  %v645_v51 = vld [vmem:[%s1519_s7] sm:$0xff]  ;;  %v522_v58 = vld [vmem:[#allocation2 + $0x8] sm:$0xff] }
  0xf8   :  { %v711_v23 = vmul.f32 -2.0, %v1238_v14  ;;  %v569_v33 = vmul.f32 %v1246_v19, %v546_v13  ;;  %v632_v36 = vmul.f32 %v1223_v55, %v609_v16  ;;  %v607_v44 = vadd.f32 %v1218_v50, %v584_v24  ;;  %v348_v0 = vld [vmem:[#allocation3 + $0x70] sm:$0xff]  ;;  %v346_v6 = vld [vmem:[#allocation3 + $0x60] sm:$0xff]  ;;  %v349_v11 = vld [vmem:[#allocation3 + $0x78] sm:$0xff] }
  0xf9   :  { %v1000_v25 = vpop.f32.mrb[8].mxu1  ;;  %323 = vst.msk [vmem:[#allocation2 + $0x28] sm:$0xff] %vm34_vm0, %v306_v18  ;;  %v709_v28 = vmul.f32 -2.0, %v1250_v21  ;;  %v567_v42 = vmul.f32 %v1246_v19, %v544_v20  ;;  %v547_v57 = vadd.f32 %v1228_v60, %v524_v35  ;;  %v1279_v7 = vmul.f32 2.0, %v1238_v14  ;;  %v97_v12 = vld [vmem:[#allocation2 + $0x70] sm:$0xff]  ;;  %v347_v20 = vld [vmem:[#allocation3 + $0x68] sm:$0xff] }
  0xfa   :  { %v496_v29 = vadd.f32 %v1000_v25, %v344_v17  ;;  %v455_v30 = vpop.f32.mrb[9].mxu1  ;;  %v729_v34 = vmul.f32 1.442695, %v711_v23  ;;  %v974_v39 = vpop.f32.mrb[8].mxu0  ;;  %v663_v62 = vsub.f32 %v647_v41, %v569_v33  ;;  %v712_v63 = vmul.f32 -2.0, %v632_v36  ;;  %v648_v23 = vld [vmem:[%s1519_s7 + $0x18] sm:$0xff] }
  0xfb   :  { %v494_v37 = vadd.f32 %v455_v30, %v342_v22  ;;  %v1001_v38 = vpop.f32.mrb[10].mxu1  ;;  %v725_v43 = vmul.f32 1.442695, %v709_v28  ;;  %v311_v47 = vadd.f32 %v974_v39, %v93_v27  ;;  %v270_v48 = vpop.f32.mrb[9].mxu0  ;;  %v589_v52 = vld [vmem:[#allocation3 + $0x30] sm:$0xff]  ;;  %v661_v2 = vsub.f32 %v645_v51, %v567_v42  ;;  %v95_v22 = vld [vmem:[#allocation2 + $0x60] sm:$0xff] }
  0xfc   :  { %512 = vst.msk [vmem:[#allocation3 + $0x50] sm:$0xff] %vm34_vm0, %v496_v29  ;;  %v497_v45 = vadd.f32 %v1001_v38, %v345_v26  ;;  %v458_v46 = vpop.f32.mrb[11].mxu1  ;;  %1027 = vpow2.f32 %v729_v34  ;;  %v309_v54 = vadd.f32 %v270_v48, %v91_v32  ;;  %v975_v56 = vpop.f32.mrb[10].mxu0  ;;  %v1274_v3 = vmul.f32 %v1223_v55, %v607_v44  ;;  %v527_v4 = vld [vmem:[#allocation2 + $0x30] sm:$0xff]  ;;  %v98_v28 = vld [vmem:[#allocation2 + $0x78] sm:$0xff]  ;;  %v96_v38 = vld [vmem:[#allocation2 + $0x68] sm:$0xff] }
  0xfd   :  { %510 = vst.msk [vmem:[#allocation3 + $0x40] sm:$0xff] %vm34_vm0, %v494_v37  ;;  %v495_v53 = vadd.f32 %v458_v46, %v343_v31  ;;  %1029 = vpow2.f32 %v725_v43  ;;  %328 = vst.msk [vmem:[#allocation2 + $0x50] sm:$0xff] %vm34_vm0, %v311_v47  ;;  %v312_v59 = vadd.f32 %v975_v56, %v94_v40  ;;  %v273_v61 = vpop.f32.mrb[11].mxu0  ;;  %v612_v5 = vadd.f32 %v1218_v50, %v589_v52  ;;  %v590_v32 = vld [vmem:[#allocation3 + $0x38] sm:$0xff]  ;;  %v587_v41 = vld [vmem:[#allocation3 + $0x20] sm:$0xff] }
  0xfe   :  { %513 = vst.msk [vmem:[#allocation3 + $0x58] sm:$0xff] %vm34_vm0, %v497_v45  ;;  %326 = vst.msk [vmem:[#allocation2 + $0x40] sm:$0xff] %vm34_vm0, %v309_v54  ;;  %v310_v1 = vadd.f32 %v273_v61, %v92_v49  ;;  %v731_v8 = vmul.f32 1.442695, %v712_v63  ;;  %v545_v9 = vadd.f32 %v1228_v60, %v522_v58  ;;  %v1284_v13 = vmul.f32 2.0, %v1250_v21  ;;  %v528_v40 = vld [vmem:[#allocation2 + $0x38] sm:$0xff] }
  0xff   :  { %511 = vst.msk [vmem:[#allocation3 + $0x48] sm:$0xff] %vm34_vm0, %v495_v53  ;;  %329 = vst.msk [vmem:[#allocation2 + $0x58] sm:$0xff] %vm34_vm0, %v312_v59  ;;  %v570_v15 = vmul.f32 %v1246_v19, %v547_v57  ;;  %v710_v16 = vmul.f32 -2.0, %v1274_v3  ;;  %v1289_v17 = vmul.f32 %v1223_v55, %v612_v5  ;;  %v1294_v24 = vmul.f32 2.0, %v632_v36  ;;  %v646_v46 = vld [vmem:[%s1519_s7 + $0x8] sm:$0xff]  ;;  %v525_v54 = vld [vmem:[#allocation2 + $0x20] sm:$0xff] }
 0x100   :  { %327 = vst.msk [vmem:[#allocation2 + $0x48] sm:$0xff] %vm34_vm0, %v310_v1  ;;  %1031 = vpow2.f32 %v731_v8  ;;  %v550_v21 = vadd.f32 %v1228_v60, %v527_v4  ;;  %v695_v29 = vmul.f32 %v663_v62, %v663_v62  ;;  %v693_v30 = vmul.f32 %v661_v2, %v661_v2  ;;  %v651_v59 = vld [vmem:[%s1519_s7 + $0x30] sm:$0xff]  ;;  %v588_v63 = vld [vmem:[#allocation3 + $0x28] sm:$0xff] }
 0x101   :  { %v1004_v10 = vpop.f32.mrb[12].mxu1  ;;  %v727_v31 = vmul.f32 1.442695, %v710_v16  ;;  %v568_v36 = vmul.f32 %v1246_v19, %v545_v9  ;;  %v715_v39 = vmul.f32 -2.0, %v1289_v17  ;;  %v664_v45 = vsub.f32 %v648_v23, %v570_v15 }
 0x102   :  { %v500_v14 = vadd.f32 %v1004_v10, %v348_v0  ;;  %v471_v18 = vpop.f32.mrb[13].mxu1  ;;  %v978_v27 = vpop.f32.mrb[12].mxu0  ;;  %v573_v51 = vmul.f32 %v1246_v19, %v550_v21  ;;  %v613_v53 = vadd.f32 %v1218_v50, %v590_v32  ;;  %v551_v61 = vadd.f32 %v1228_v60, %v528_v40 }
 0x103   :  { %v498_v25 = vadd.f32 %v471_v18, %v346_v6  ;;  %v1005_v26 = vpop.f32.mrb[14].mxu1  ;;  %v315_v35 = vadd.f32 %v978_v27, %v97_v12  ;;  %v286_v37 = vpop.f32.mrb[13].mxu0  ;;  %1033 = vpow2.f32 %v727_v31  ;;  %v737_v52 = vmul.f32 1.442695, %v715_v39  ;;  %v526_v18 = vld [vmem:[#allocation2 + $0x28] sm:$0xff]  ;;  %v652_v27 = vld [vmem:[%s1519_s7 + $0x38] sm:$0xff] }
 0x104   :  { %516 = vst.msk [vmem:[#allocation3 + $0x70] sm:$0xff] %vm34_vm0, %v500_v14  ;;  %v501_v33 = vadd.f32 %v1005_v26, %v349_v11  ;;  %v474_v34 = vpop.f32.mrb[15].mxu1  ;;  %v313_v43 = vadd.f32 %v286_v37, %v95_v22  ;;  %v979_v44 = vpop.f32.mrb[14].mxu0  ;;  %v610_v62 = vadd.f32 %v1218_v50, %v587_v41  ;;  %v662_v1 = vsub.f32 %v646_v46, %v568_v36  ;;  %v649_v31 = vld [vmem:[%s1519_s7 + $0x20] sm:$0xff]  ;;  %v531_v36 = vld [vmem:[#allocation2 + $0x50] sm:$0xff] }
 0x105   :  { %514 = vst.msk [vmem:[#allocation3 + $0x60] sm:$0xff] %vm34_vm0, %v498_v25  ;;  %v499_v42 = vadd.f32 %v474_v34, %v347_v20  ;;  %332 = vst.msk [vmem:[#allocation2 + $0x70] sm:$0xff] %vm34_vm0, %v315_v35  ;;  %v316_v48 = vadd.f32 %v979_v44, %v98_v28  ;;  %v289_v49 = vpop.f32.mrb[15].mxu0  ;;  %1035 = vpow2.f32 %v737_v52  ;;  %v1317_v2 = vmul.f32 %v1223_v55, %v613_v53  ;;  %v594_v39 = vld [vmem:[#allocation3 + $0x58] sm:$0xff] }
 0x106   :  { %v1028_v47 = vpop.eup %1027  ;;  %517 = vst.msk [vmem:[#allocation3 + $0x78] sm:$0xff] %vm34_vm0, %v501_v33  ;;  %330 = vst.msk [vmem:[#allocation2 + $0x60] sm:$0xff] %vm34_vm0, %v313_v43  ;;  %v314_v57 = vadd.f32 %v289_v49, %v96_v38  ;;  %v696_v5 = vmul.f32 %v664_v45, %v664_v45  ;;  %v548_v6 = vadd.f32 %v1228_v60, %v525_v54  ;;  %v678_v16 = vmul.f32 2.0, %v1274_v3  ;;  %v593_v33 = vld [vmem:[#allocation3 + $0x50] sm:$0xff] }
 0x107   :  { %v1030_v56 = vpop.eup %1029  ;;  %515 = vst.msk [vmem:[#allocation3 + $0x68] sm:$0xff] %vm34_vm0, %v499_v42  ;;  %v759_v58 = vmul.f32 %v1028_v47, %v695_v29  ;;  %333 = vst.msk [vmem:[#allocation2 + $0x78] sm:$0xff] %vm34_vm0, %v316_v48  ;;  %v1323_v8 = vmul.f32 %v1223_v55, %v610_v62  ;;  %v667_v10 = vsub.f32 %v651_v59, %v573_v51  ;;  %v716_v11 = vmul.f32 -2.0, %v1317_v2 }
 0x108   :  { %v757_v0 = vmul.f32 %v1030_v56, %v693_v30  ;;  %331 = vst.msk [vmem:[#allocation2 + $0x68] sm:$0xff] %vm34_vm0, %v314_v57  ;;  %v611_v12 = vadd.f32 %v1218_v50, %v588_v63  ;;  %v574_v14 = vmul.f32 %v1246_v19, %v551_v61  ;;  %v694_v23 = vmul.f32 %v662_v1, %v662_v1  ;;  %v650_v57 = vld [vmem:[%s1519_s7 + $0x28] sm:$0xff]  ;;  %v529_v1 = vld [vmem:[#allocation2 + $0x40] sm:$0xff] }
 0x109   :  { %v775_v4 = vadd.f32 %v759_v58, %v1279_v7  ;;  %v713_v7 = vmul.f32 -2.0, %v1323_v8  ;;  %v739_v21 = vmul.f32 1.442695, %v716_v11  ;;  %v571_v3 = vmul.f32 %v1246_v19, %v548_v6 }
 0x10a   :  { %v773_v9 = vadd.f32 %v757_v0, %v1284_v13  ;;  %v1032_v20 = vpop.eup %1031  ;;  %v1332_v25 = vmul.f32 %v1223_v55, %v611_v12  ;;  %v699_v30 = vmul.f32 %v667_v10, %v667_v10  ;;  %v549_v32 = vadd.f32 %v1228_v60, %v526_v18  ;;  %v532_v0 = vld [vmem:[#allocation2 + $0x58] sm:$0xff] }
 0x10b   :  { %v791_v15 = vadd.f32 1.837877, %v775_v4  ;;  %v760_v26 = vmul.f32 %v1032_v20, %v696_v5  ;;  %v733_v28 = vmul.f32 1.442695, %v713_v7  ;;  %1037 = vpow2.f32 %v739_v21  ;;  %v591_v4 = vld [vmem:[#allocation3 + $0x40] sm:$0xff] }
 0x10c   :  { %v789_v22 = vadd.f32 1.837877, %v773_v9  ;;  %v714_v38 = vmul.f32 -2.0, %v1332_v25  ;;  %v683_v42 = vmul.f32 2.0, %v1289_v17  ;;  %v668_v43 = vsub.f32 %v652_v27, %v574_v14 }
 0x10d   :  { %v807_v13 = vmul.f32 -0.5, %v791_v15  ;;  %v1034_v34 = vpop.eup %1033  ;;  %v776_v37 = vadd.f32 %v760_v26, %v1294_v24  ;;  %1039 = vpow2.f32 %v733_v28  ;;  %v665_v45 = vsub.f32 %v649_v31, %v571_v3  ;;  %v655_v15 = vld [vmem:[%s1519_s7 + $0x50] sm:$0xff] }
 0x10e   :  { %v805_v29 = vmul.f32 -0.5, %v789_v22  ;;  %v758_v41 = vmul.f32 %v1034_v34, %v694_v23  ;;  %v735_v46 = vmul.f32 1.442695, %v714_v38  ;;  %v616_v47 = vadd.f32 %v1218_v50, %v593_v33  ;;  %v592_v23 = vld [vmem:[#allocation3 + $0x48] sm:$0xff]  ;;  %v595_v34 = vld [vmem:[#allocation3 + $0x60] sm:$0xff] }
 0x10f   :  { %v827_v35 = vsel %vm34_vm0, %v807_v13, 0.0  ;;  %v792_v44 = vadd.f32 1.837877, %v776_v37  ;;  %v1036_v48 = vpop.eup %1035  ;;  %v572_v49 = vmul.f32 %v1246_v19, %v549_v32  ;;  %v554_v51 = vadd.f32 %v1228_v60, %v531_v36 }
 0x110   :  { %828 = vadd.xlane.f32.xlu1 %v827_v35  ;;  %v821_v40 = vsel %vm34_vm0, %v805_v29, 0.0  ;;  %v774_v24 = vadd.f32 %v758_v41, %v678_v16  ;;  %v617_v52 = vadd.f32 %v1218_v50, %v594_v39  ;;  %v763_v54 = vmul.f32 %v1036_v48, %v699_v30  ;;  %v530_v39 = vld [vmem:[#allocation2 + $0x48] sm:$0xff] }
 0x111   :  { %822 = vadd.xlane.f32.xlu0 %v821_v40  ;;  %v808_v53 = vmul.f32 -0.5, %v792_v44  ;;  %1041 = vpow2.f32 %v735_v46  ;;  %v1352_v17 = vmul.f32 %v1223_v55, %v616_v47  ;;  %v700_v62 = vmul.f32 %v668_v43, %v668_v43  ;;  %v653_v47 = vld [vmem:[%s1519_s7 + $0x40] sm:$0xff] }
 0x112   :  { %v790_v56 = vadd.f32 1.837877, %v774_v24  ;;  %v1358_v58 = vmul.f32 %v1223_v55, %v617_v52  ;;  %v779_v61 = vadd.f32 %v763_v54, %v683_v42  ;;  %v684_v6 = vmul.f32 2.0, %v1317_v2  ;;  %v656_v42 = vld [vmem:[%s1519_s7 + $0x58] sm:$0xff]  ;;  %v596_v54 = vld [vmem:[#allocation3 + $0x68] sm:$0xff] }
 0x113   :  { %v830_v59 = vsel %vm34_vm0, %v808_v53, 0.0  ;;  %v719_v63 = vmul.f32 -2.0, %v1352_v17  ;;  %v697_v9 = vmul.f32 %v665_v45, %v665_v45  ;;  %v577_v10 = vmul.f32 %v1246_v19, %v554_v51  ;;  %v533_v53 = vld [vmem:[#allocation2 + $0x60] sm:$0xff] }
 0x114   :  { %831 = vadd.xlane.f32.xlu1 %v830_v59  ;;  %v806_v5 = vmul.f32 -0.5, %v790_v56  ;;  %v795_v11 = vadd.f32 1.837877, %v779_v61  ;;  %v666_v12 = vsub.f32 %v650_v57, %v572_v49  ;;  %v720_v14 = vmul.f32 -2.0, %v1358_v58 }
 0x115   :  { %v745_v16 = vmul.f32 1.442695, %v719_v63  ;;  %v1038_v7 = vpop.eup %1037  ;;  %v555_v20 = vadd.f32 %v1228_v60, %v532_v0  ;;  %v552_v22 = vadd.f32 %v1228_v60, %v529_v1  ;;  %v614_v2 = vadd.f32 %v1218_v50, %v591_v4 }
 0x116   :  { %v824_v18 = vsel %vm34_vm0, %v806_v5, 0.0  ;;  %v811_v13 = vmul.f32 -0.5, %v795_v11  ;;  %v764_v26 = vmul.f32 %v1038_v7, %v700_v62  ;;  %v747_v27 = vmul.f32 1.442695, %v720_v14 }
 0x117   :  { %v1040_v21 = vpop.eup %1039  ;;  %825 = vadd.xlane.f32.xlu0 %v824_v18  ;;  %1043 = vpow2.f32 %v745_v16  ;;  %v681_v3 = vmul.f32 2.0, %v1323_v8  ;;  %v671_v29 = vsub.f32 %v655_v15, %v577_v10  ;;  %v1374_v30 = vmul.f32 %v1223_v55, %v614_v2  ;;  %v654_v18 = vld [vmem:[%s1519_s7 + $0x48] sm:$0xff] }
 0x118   :  { %v761_v28 = vmul.f32 %v1040_v21, %v697_v9  ;;  %v839_v31 = vsel %vm34_vm0, %v811_v13, 0.0  ;;  %v780_v32 = vadd.f32 %v764_v26, %v684_v6  ;;  %1045 = vpow2.f32 %v747_v27  ;;  %v597_v9 = vld [vmem:[#allocation3 + $0x70] sm:$0xff] }
 0x119   :  { %v615_v33 = vadd.f32 %v1218_v50, %v592_v23  ;;  %v698_v37 = vmul.f32 %v666_v12, %v666_v12  ;;  %v578_v38 = vmul.f32 %v1246_v19, %v555_v20  ;;  %v717_v36 = vmul.f32 -2.0, %v1374_v30  ;;  %v534_v20 = vld [vmem:[#allocation2 + $0x68] sm:$0xff] }
 0x11a   :  { %v777_v35 = vadd.f32 %v761_v28, %v681_v3  ;;  %v796_v40 = vadd.f32 1.837877, %v780_v32  ;;  %v682_v41 = vmul.f32 2.0, %v1332_v25  ;;  %v575_v43 = vmul.f32 %v1246_v19, %v552_v22 }
 0x11b   :  { %v1042_v8 = vpop.eup %1041  ;;  %840 = vadd.xlane.f32.xlu0 %v839_v31  ;;  %v1386_v44 = vmul.f32 %v1223_v55, %v615_v33  ;;  %v741_v48 = vmul.f32 1.442695, %v717_v36  ;;  %v618_v24 = vadd.f32 %v1218_v50, %v595_v34  ;;  %v703_v25 = vmul.f32 %v671_v29, %v671_v29  ;;  %v535_v29 = vld [vmem:[#allocation2 + $0x70] sm:$0xff]  ;;  %v598_v31 = vld [vmem:[#allocation3 + $0x78] sm:$0xff]  ;;  %v657_v33 = vld [vmem:[%s1519_s7 + $0x60] sm:$0xff] }
 0x11c   :  { %v793_v45 = vadd.f32 1.837877, %v777_v35  ;;  %v762_v46 = vmul.f32 %v1042_v8, %v698_v37  ;;  %v812_v49 = vmul.f32 -0.5, %v796_v40  ;;  %v553_v51 = vadd.f32 %v1228_v60, %v530_v39 }
 0x11d   :  { %v718_v52 = vmul.f32 -2.0, %v1386_v44  ;;  %v672_v59 = vsub.f32 %v656_v42, %v578_v38  ;;  %1047 = vpow2.f32 %v741_v48  ;;  %v669_v62 = vsub.f32 %v653_v47, %v575_v43 }
 0x11e   :  { %v809_v56 = vmul.f32 -0.5, %v793_v45  ;;  %v778_v57 = vadd.f32 %v762_v46, %v682_v41  ;;  %v842_v61 = vsel %vm34_vm0, %v812_v49, 0.0  ;;  %v1396_v0 = vmul.f32 %v1223_v55, %v618_v24 }
 0x11f   :  { %v743_v63 = vmul.f32 1.442695, %v718_v52  ;;  %843 = vadd.xlane.f32.xlu1 %v842_v61  ;;  %v556_v5 = vadd.f32 %v1228_v60, %v533_v53  ;;  %v619_v6 = vadd.f32 %v1218_v50, %v596_v54  ;;  %v687_v11 = vmul.f32 2.0, %v1352_v17  ;;  %v658_v54 = vld [vmem:[%s1519_s7 + $0x68] sm:$0xff] }
 0x120   :  { %v833_v1 = vsel %vm34_vm0, %v809_v56, 0.0  ;;  %v794_v4 = vadd.f32 1.837877, %v778_v57  ;;  %v576_v12 = vmul.f32 %v1246_v19, %v553_v51  ;;  %v721_v15 = vmul.f32 -2.0, %v1396_v0  ;;  %v536_v57 = vld [vmem:[#allocation2 + $0x78] sm:$0xff] }
 0x121   :  { %v1044_v10 = vpop.eup %1043  ;;  %834 = vadd.xlane.f32.xlu0 %v833_v1  ;;  %1049 = vpow2.f32 %v743_v63  ;;  %v704_v7 = vmul.f32 %v672_v59, %v672_v59  ;;  %v1408_v22 = vmul.f32 %v1223_v55, %v619_v6  ;;  %v688_v23 = vmul.f32 2.0, %v1358_v58 }
 0x122   :  { %v810_v16 = vmul.f32 -0.5, %v794_v4  ;;  %v767_v14 = vmul.f32 %v1044_v10, %v703_v25  ;;  %v1046_v2 = vpop.eup %1045  ;;  %v701_v17 = vmul.f32 %v669_v62, %v669_v62  ;;  %v749_v21 = vmul.f32 1.442695, %v721_v15 }
 0x123   :  { %v620_v13 = vadd.f32 %v1218_v50, %v597_v9  ;;  %v768_v3 = vmul.f32 %v1046_v2, %v704_v7  ;;  %v579_v28 = vmul.f32 %v1246_v19, %v556_v5  ;;  %v670_v32 = vsub.f32 %v654_v18, %v576_v12 }
 0x124   :  { %v836_v26 = vsel %vm34_vm0, %v810_v16, 0.0  ;;  %v783_v27 = vadd.f32 %v767_v14, %v687_v11  ;;  %1051 = vpow2.f32 %v749_v21  ;;  %v557_v58 = vadd.f32 %v1228_v60, %v534_v20 }
 0x125   :  { %837 = vadd.xlane.f32.xlu1 %v836_v26  ;;  %v722_v34 = vmul.f32 -2.0, %v1408_v22  ;;  %v784_v37 = vadd.f32 %v768_v3, %v688_v23  ;;  %v643_v38 = vmul.f32 %v1223_v55, %v620_v13  ;;  %v685_v36 = vmul.f32 2.0, %v1374_v30 }
 0x126   :  { %v799_v35 = vadd.f32 1.837877, %v783_v27  ;;  %v558_v8 = vadd.f32 %v1228_v60, %v535_v29  ;;  %v621_v40 = vadd.f32 %v1218_v50, %v598_v31  ;;  %v673_v45 = vsub.f32 %v657_v33, %v579_v28 }
 0x127   :  { %v751_v39 = vmul.f32 1.442695, %v722_v34  ;;  %v1048_v41 = vpop.eup %1047  ;;  %v800_v43 = vadd.f32 1.837877, %v784_v37  ;;  %v723_v46 = vmul.f32 -2.0, %v643_v38  ;;  %v702_v48 = vmul.f32 %v670_v32, %v670_v32 }
 0x128   :  { %v815_v42 = vmul.f32 -0.5, %v799_v35  ;;  %v765_v47 = vmul.f32 %v1048_v41, %v701_v17  ;;  %v580_v24 = vmul.f32 %v1246_v19, %v557_v58  ;;  %v644_v30 = vmul.f32 %v1223_v55, %v621_v40  ;;  %v659_v55 = vld [vmem:[%s1519_s7 + $0x70] sm:$0xff] }
 0x129   :  { %1053 = vpow2.f32 %v751_v39  ;;  %v816_v25 = vmul.f32 -0.5, %v800_v43  ;;  %v753_v51 = vmul.f32 1.442695, %v723_v46  ;;  %v686_v50 = vmul.f32 2.0, %v1386_v44 }
 0x12a   :  { %v851_v49 = vsel %vm34_vm0, %v815_v42, 0.0  ;;  %v781_v53 = vadd.f32 %v765_v47, %v685_v36  ;;  %v581_v56 = vmul.f32 %v1246_v19, %v558_v8  ;;  %v705_v62 = vmul.f32 %v673_v45, %v673_v45 }
 0x12b   :  { %v1050_v52 = vpop.eup %1049  ;;  %852 = vadd.xlane.f32.xlu0 %v851_v49  ;;  %v854_v59 = vsel %vm34_vm0, %v816_v25, 0.0  ;;  %1055 = vpow2.f32 %v753_v51  ;;  %v724_v1 = vmul.f32 -2.0, %v644_v30  ;;  %v674_v4 = vsub.f32 %v658_v54, %v580_v24 }
 0x12c   :  { %v766_v61 = vmul.f32 %v1050_v52, %v702_v48  ;;  %855 = vadd.xlane.f32.xlu1 %v854_v59  ;;  %v797_v63 = vadd.f32 1.837877, %v781_v53  ;;  %v559_v5 = vadd.f32 %v1228_v60, %v536_v57  ;;  %v675_v10 = vsub.f32 %v659_v55, %v581_v56  ;;  %v660_v60 = vld [vmem:[%s1519_s7 + $0x78] sm:$0xff] }
 0x12d   :  { %v755_v11 = vmul.f32 1.442695, %v724_v1  ;;  %v689_v15 = vmul.f32 2.0, %v1396_v0  ;;  %v706_v20 = vmul.f32 %v674_v4, %v674_v4  ;;  %v690_v0 = vmul.f32 2.0, %v1408_v22 }
 0x12e   :  { %v782_v44 = vadd.f32 %v766_v61, %v686_v50  ;;  %v1052_v6 = vpop.eup %1051  ;;  %v813_v9 = vmul.f32 -0.5, %v797_v63  ;;  %v582_v2 = vmul.f32 %v1246_v19, %v559_v5  ;;  %v707_v17 = vmul.f32 %v675_v10, %v675_v10 }
 0x12f   :  { %v769_v16 = vmul.f32 %v1052_v6, %v705_v62  ;;  %1057 = vpow2.f32 %v755_v11  ;;  %v691_v31 = vmul.f32 2.0, %v643_v38  ;;  %v692_v22 = vmul.f32 2.0, %v644_v30 }
 0x130   :  { %v798_v12 = vadd.f32 1.837877, %v782_v44  ;;  %v845_v14 = vsel %vm34_vm0, %v813_v9, 0.0  ;;  %v676_v29 = vsub.f32 %v660_v60, %v582_v2 }
 0x131   :  { %846 = vadd.xlane.f32.xlu0 %v845_v14  ;;  %v785_v18 = vadd.f32 %v769_v16, %v689_v15 }
 0x132   :  { %v814_v7 = vmul.f32 -0.5, %v798_v12  ;;  %v708_v35 = vmul.f32 %v676_v29, %v676_v29 }
 0x133   :  { %v1054_v23 = vpop.eup %1053  ;;  %v801_v13 = vadd.f32 1.837877, %v785_v18 }
 0x134   :  { %v848_v21 = vsel %vm34_vm0, %v814_v7, 0.0  ;;  %v770_v26 = vmul.f32 %v1054_v23, %v706_v20 }
 0x135   :  { %849 = vadd.xlane.f32.xlu1 %v848_v21  ;;  %v1056_v27 = vpop.eup %1055  ;;  %v817_v3 = vmul.f32 -0.5, %v801_v13 }
 0x136   :  { %v786_v28 = vadd.f32 %v770_v26, %v690_v0  ;;  %v771_v32 = vmul.f32 %v1056_v27, %v707_v17 }
 0x137   :  { %v857_v19 = vsel %vm34_vm0, %v817_v3, 0.0 }
 0x138   :  { %v802_v33 = vadd.f32 1.837877, %v786_v28  ;;  %858 = vadd.xlane.f32.xlu0 %v857_v19  ;;  %v787_v58 = vadd.f32 %v771_v32, %v691_v31 }
 0x139   :  { %v1058_v37 = vpop.eup %1057 }
 0x13a   :  { %v818_v34 = vmul.f32 -0.5, %v802_v33  ;;  %v803_v36 = vadd.f32 1.837877, %v787_v58  ;;  %v772_v8 = vmul.f32 %v1058_v37, %v708_v35 }
 0x13c   :  { %v860_v39 = vsel %vm34_vm0, %v818_v34, 0.0  ;;  %v819_v40 = vmul.f32 -0.5, %v803_v36  ;;  %v788_v41 = vadd.f32 %v772_v8, %v692_v22 }
 0x13d   :  { %861 = vadd.xlane.f32.xlu1 %v860_v39 }
 0x13e   :  { %v863_v42 = vsel %vm34_vm0, %v819_v40, 0.0  ;;  %v804_v38 = vadd.f32 1.837877, %v788_v41 }
 0x13f   :  { %864 = vadd.xlane.f32.xlu0 %v863_v42 }
 0x140   :  { %v820_v43 = vmul.f32 -0.5, %v804_v38 }
 0x142   :  { %v866_v45 = vsel %vm34_vm0, %v820_v43, 0.0 }
 0x143   :  { %867 = vadd.xlane.f32.xlu1 %v866_v45 }
 0x19d   :  { %v829_v46 = vpop.xlane.xlu1 %828 }
 0x19e   :  { %872 = vst.msk [vmem:[%s1520_s8 + $0x10] sm:$0xff] %vm869_vm3, %v829_v46  ;;  %v823_v47 = vpop.xlane.xlu0 %822 }
 0x19f   :  { %870 = vst.msk [vmem:[%s1520_s8] sm:$0xff] %vm869_vm3, %v823_v47 }
 0x1a1   :  { %v832_v48 = vpop.xlane.xlu1 %831 }
 0x1a2   :  { %873 = vst.msk [vmem:[%s1520_s8 + $0x18] sm:$0xff] %vm869_vm3, %v832_v48 }
 0x1a4   :  { %v826_v24 = vpop.xlane.xlu0 %825 }
 0x1a5   :  { %871 = vst.msk [vmem:[%s1520_s8 + $0x8] sm:$0xff] %vm869_vm3, %v826_v24 }
 0x1a8   :  { %v841_v49 = vpop.xlane.xlu0 %840 }
 0x1a9   :  { %876 = vst.msk [vmem:[%s1520_s8 + $0x30] sm:$0xff] %vm869_vm3, %v841_v49 }
 0x1ac   :  { %v844_v25 = vpop.xlane.xlu1 %843 }
 0x1ad   :  { %877 = vst.msk [vmem:[%s1520_s8 + $0x38] sm:$0xff] %vm869_vm3, %v844_v25 }
 0x1ae   :  { %v835_v51 = vpop.xlane.xlu0 %834 }
 0x1af   :  { %874 = vst.msk [vmem:[%s1520_s8 + $0x20] sm:$0xff] %vm869_vm3, %v835_v51 }
 0x1b2   :  { %v838_v30 = vpop.xlane.xlu1 %837 }
 0x1b3   :  { %875 = vst.msk [vmem:[%s1520_s8 + $0x28] sm:$0xff] %vm869_vm3, %v838_v30 }
 0x1b8   :  { %v853_v52 = vpop.xlane.xlu0 %852 }
 0x1b9   :  { %880 = vst.msk [vmem:[%s1520_s8 + $0x50] sm:$0xff] %vm869_vm3, %v853_v52  ;;  %v856_v53 = vpop.xlane.xlu1 %855 }
 0x1ba   :  { %881 = vst.msk [vmem:[%s1520_s8 + $0x58] sm:$0xff] %vm869_vm3, %v856_v53 }
 0x1be   :  { %v847_v50 = vpop.xlane.xlu0 %846 }
 0x1bf   :  { %878 = vst.msk [vmem:[%s1520_s8 + $0x40] sm:$0xff] %vm869_vm3, %v847_v50 }
 0x1c2   :  { %v850_v54 = vpop.xlane.xlu1 %849 }
 0x1c3   :  { %879 = vst.msk [vmem:[%s1520_s8 + $0x48] sm:$0xff] %vm869_vm3, %v850_v54 }
 0x1c5   :  { %v859_v56 = vpop.xlane.xlu0 %858 }
 0x1c6   :  { %882 = vst.msk [vmem:[%s1520_s8 + $0x60] sm:$0xff] %vm869_vm3, %v859_v56 }
 0x1ca   :  { %v862_v57 = vpop.xlane.xlu1 %861 }
 0x1cb   :  { %883 = vst.msk [vmem:[%s1520_s8 + $0x68] sm:$0xff] %vm869_vm3, %v862_v57 }
 0x1cc   :  { %v865_v59 = vpop.xlane.xlu0 %864 }
 0x1cd   :  { %884 = vst.msk [vmem:[%s1520_s8 + $0x70] sm:$0xff] %vm869_vm3, %v865_v59 }
 0x1d0   :  { %v868_v61 = vpop.xlane.xlu1 %867 }
 0x1d1   :  { %885 = vst.msk [vmem:[%s1520_s8 + $0x78] sm:$0xff] %vm869_vm3, %v868_v61 }

// kernel: _lambda_.45
= control target key start
LH: loop header
LB: loop body
LE: loop exit
PB: predicated region body
PF: predicated region fallthrough
CT: control target
= control target key end

     0   :  { %vm47_vm0 = vcmask 261120   ;;  %s268_s3 = inlined_call_operand.vmem [shape: f32[32,32], index: 3, kind: input, shape index: {}]   ;;  %s269_s0 = inlined_call_operand.vmem [shape: f32[32,32], index: 0, kind: input, shape index: {}]   ;;  %s270_s1 = inlined_call_operand.vmem [shape: f32[1,32], index: 1, kind: input, shape index: {}]   ;;  %s271_s2 = inlined_call_operand.vmem [shape: f32[1,32], index: 2, kind: input, shape index: {}]   ;;  %s272_s4 = inlined_call_operand.vmem [shape: f32[32,32], index: 4, kind: output, shape index: {}]  }
   0x1   :  { %v43_v0 = vld [vmem:[%s268_s3] sm:$0xff]  ;;  %v44_v1 = vld [vmem:[%s268_s3 + $0x8] sm:$0xff]  ;;  %v45_v2 = vld [vmem:[%s268_s3 + $0x10] sm:$0xff] }
   0x2   :  { %v181_v3 = vpack.c.bf16 %v44_v1, %v43_v0  ;;  %v46_v4 = vld [vmem:[%s268_s3 + $0x18] sm:$0xff]  ;;  %v17_v5 = vld [vmem:[%s269_s0] sm:$0xff]  ;;  %v19_v10 = vld [vmem:[%s269_s0 + $0x10] sm:$0xff] }
   0x3   :  { %v153_v6 = vld [vmem:[%s270_s1] ss:$0 sm:$0xff]  ;;  %v185_v7 = vpack.c.bf16 %v46_v4, %v45_v2  ;;  %v18_v11 = vld [vmem:[%s269_s0 + $0x8] sm:$0xff]  ;;  %v20_v14 = vld [vmem:[%s269_s0 + $0x18] sm:$0xff] }
   0x4   :  { %v28_v8 = vadd.f32 %v153_v6, %v17_v5  ;;  %v154_v9 = vld [vmem:[%s271_s2] ss:$0 sm:$0xff]  ;;  %182 = vmatprep.subr.bf16.mxu0 %v181_v3  ;;  %189 = vmatprep.subr.bf16.mxu1 %v181_v3  ;;  %v30_v12 = vadd.f32 %v153_v6, %v19_v10  ;;  %v29_v13 = vadd.f32 %v153_v6, %v18_v11 }
   0x5   :  { %184 = vmatpush3.bf16.msra.mxu0 %v181_v3  ;;  %191 = vmatpush3.bf16.msra.mxu1 %v181_v3  ;;  %v31_v16 = vadd.f32 %v153_v6, %v20_v14 }
   0x6   :  { %v39_v15 = vmul.f32 %v154_v9, %v28_v8  ;;  %186 = vmatprep.subr.bf16.mxu0 %v185_v7  ;;  %190 = vmatprep.subr.bf16.mxu1 %v185_v7  ;;  %v41_v17 = vmul.f32 %v154_v9, %v30_v12  ;;  %v40_v18 = vmul.f32 %v154_v9, %v29_v13 }
   0x7   :  { %v42_v19 = vmul.f32 %v154_v9, %v31_v16 }
   0x8   :  { %175 = vmatprep.mubr.msk.f32.mxu0 %vm47_vm0, %v39_v15  ;;  %178 = vmatprep.mubr.msk.f32.mxu1 %vm47_vm0, %v41_v17 }
   0x9   :  { %188 = vmatpush3.bf16.msra.mxu0 %v185_v7  ;;  %192 = vmatpush3.bf16.msra.mxu1 %v185_v7 }
   0xc   :  { %176 = vmatmul.mubr.msk.f32.vlgmr.msra.gmra.mrb[0].mxu0 %vm47_vm0, %v40_v18  ;;  %179 = vmatmul.mubr.msk.f32.vlgmr.msra.gmra.mrb[0].mxu1 %vm47_vm0, %v42_v19 }
  0xdf   :  { %v177_v20 = vpop.f32.mrb[0].mxu0  ;;  %v180_v21 = vpop.f32.mrb[0].mxu1 }
  0xe0   :  { %146 = vst.msk [vmem:[%s272_s4 + $0x8] sm:$0xff] %vm47_vm0, %v177_v20  ;;  %148 = vst.msk [vmem:[%s272_s4 + $0x18] sm:$0xff] %vm47_vm0, %v180_v21  ;;  %v126_v22 = vpop.f32.mrb[1].mxu0  ;;  %v136_v23 = vpop.f32.mrb[1].mxu1 }
  0xe1   :  { %145 = vst.msk [vmem:[%s272_s4] sm:$0xff] %vm47_vm0, %v126_v22  ;;  %147 = vst.msk [vmem:[%s272_s4 + $0x10] sm:$0xff] %vm47_vm0, %v136_v23 }

// kernel: _lambda_.44
= control target key start
LH: loop header
LB: loop body
LE: loop exit
PB: predicated region body
PF: predicated region fallthrough
CT: control target
= control target key end

     0   :  { %9 = vsyncpa [#allocation6], 0  ;;  %s529_s12 = smov 0   ;;  %s531_s13 = smov 0   ;;  %s628_s0 = inlined_call_operand.vmem [shape: f32[32,32], index: 0, kind: input, shape index: {}]   ;;  %s629_s1 = inlined_call_operand.vmem [shape: f32[1,32], index: 1, kind: output, shape index: {0}]   ;;  %s630_s2 = inlined_call_operand.vmem [shape: f32[1,32], index: 2, kind: output, shape index: {1}]   ;;  %s631_s3 = inlined_call_operand.hbm [shape: f32[1,1], index: 3, kind: output, shape index: {2}]  }
   0x1   :  { %s533_s14 = smov 0  }
   0x2 LB: > { %s394_s15 = sadd.s32 4294967295, %s504_s14   ;;  %s27_s16 = sadd.s32 1, %s500_s13  ;;  %s504_s14 = sphi %s533_s14, %s15_s14   ;;  %s500_s13 = sphi %s531_s13, %s634_s13   ;;  %s496_s12 = sphi %s529_s12, %s633_s12  }
   0x3   : > { %p29_p0 = scmp.ge.s32.totalorder %s27_s16, 2  ;;  %p397_p1 = scmp.ge.s32.totalorder %s504_s14, 1 }
   0x4   : > { %p141_p2 = scmp.lt.s32.totalorder %s504_s14, 3 }
   0x5   : > { %s636_s16 = smov (%p29_p0, %s27_s16), 0 }
   0x6   : > { %p142_p3 = pnand %p397_p1, %p141_p2 }
   0x7   : > { %p181_p4 = scmp.eq.s32.totalorder (!%p142_p3), %s496_s12, 0 }
   0x8   : > { %145 = sbr.rel (%p142_p3) target bundleno = 371 (0x173), region = 24 }
   0xf   : > { %186 = sbr.rel (!%p181_p4) target bundleno = 22 (0x16), region = 28  ;;  %vm187_vm0 = vcmask (%p181_p4), 253952   ;;  %v506_v0 = vmov (%p181_p4), 0.0  }
  0x10   : > { %188 = vst.msk [vmem:[#allocation2] sm:$0x1] (%p181_p4), %vm187_vm0, %v506_v0 }
  0x16 PF: > { %p399_p5 = scmp.ne.s32.totalorder %s496_s12, 0 }
  0x17   : > { %v192_v1 = vld [vmem:[%s628_s0] sm:$0xff] (!%p399_p5)  ;;  %v193_v2 = vld [vmem:[%s628_s0 + $0x8] sm:$0xff] (!%p399_p5)  ;;  %v194_v3 = vld [vmem:[%s628_s0 + $0x10] sm:$0xff] (!%p399_p5)  ;;  %vm209_vm1 = vcmask (!%p399_p5), 261120   ;;  %vm224_vm2 = vcmask (!%p399_p5), 253952  }
  0x18   : > { %191 = sbr.rel (%p399_p5) target bundleno = 46 (0x2e), region = 32  ;;  %v195_v4 = vld [vmem:[%s628_s0 + $0x18] sm:$0xff] (!%p399_p5)  ;;  %v210_v5 = vsel (!%p399_p5), %vm209_vm1, %v192_v1, 0.0  ;;  %v211_v6 = vsel (!%p399_p5), %vm209_vm1, %v193_v2, 0.0  ;;  %v213_v7 = vsel (!%p399_p5), %vm209_vm1, %v194_v3, 0.0 }
  0x19   : > { %v212_v8 = vadd.f32 (!%p399_p5), %v211_v6, %v210_v5  ;;  %v215_v9 = vsel (!%p399_p5), %vm209_vm1, %v195_v4, 0.0  ;;  %v208_v17 = vld [vmem:[#allocation2] sm:$0x1] (!%p399_p5) }
  0x1b   : > { %v214_v10 = vadd.f32 (!%p399_p5), %v213_v7, %v212_v8 }
  0x1d   : > { %v216_v11 = vadd.f32 (!%p399_p5), %v215_v9, %v214_v10 }
  0x1f   : > { %v217_v12 = vrot.slane %v216_v11, 4 }
  0x21   : > { %v218_v13 = vadd.f32 %v217_v12, %v216_v11 }
  0x23   : > { %v219_v14 = vrot.slane %v218_v13, 2 }
  0x25   : > { %v220_v15 = vadd.f32 %v219_v14, %v218_v13 }
  0x27   : > { %v221_v16 = vrot.slane %v220_v15, 1 }
  0x29   : > { %v222_v18 = vadd.f32 %v221_v16, %v220_v15 }
  0x2b   : > { %v223_v19 = vadd.f32 %v222_v18, %v208_v17 }
  0x2d   : > { %225 = vst.msk [vmem:[#allocation2] sm:$0x1] %vm224_vm2, %v223_v19 }
  0x2e PF: > { %p226_p6 = scmp.eq.s32.totalorder %s496_s12, 1 }
  0x2f   : > { %vm233_vm3 = vcmask (%p226_p6), 253952   ;;  %v507_v22 = vmov (%p226_p6), 0.0  }
  0x30   : > { %230 = sbr.rel (!%p226_p6) target bundleno = 56 (0x38), region = 36  ;;  %235 = vst.msk [vmem:[#allocation4] sm:$0x1] (%p226_p6), %vm233_vm3, %v507_v22 }
  0x34   : > { %v231_v20 = vld [vmem:[#allocation2] sm:$0x1] (%p226_p6) }
  0x35   : > { %v232_v21 = vmul.f32 (%p226_p6), 0.03125, %v231_v20 }
  0x37   : > { %234 = vst.msk [vmem:[#allocation3] sm:$0x1] %vm233_vm3, %v232_v21 }
  0x38 PF: > { %p401_p7 = scmp.ne.s32.totalorder %s496_s12, 1 }
  0x39   : > { %v239_v23 = vld [vmem:[%s628_s0] sm:$0xff] (!%p401_p7)  ;;  %v240_v24 = vld [vmem:[%s628_s0 + $0x8] sm:$0xff] (!%p401_p7)  ;;  %v241_v25 = vld [vmem:[%s628_s0 + $0x10] sm:$0xff] (!%p401_p7)  ;;  %vm271_vm4 = vcmask (!%p401_p7), 261120   ;;  %vm286_vm5 = vcmask (!%p401_p7), 253952  }
  0x3a   : > { %238 = sbr.rel (%p401_p7) target bundleno = 89 (0x59), region = 40  ;;  %v242_v26 = vld [vmem:[%s628_s0 + $0x18] sm:$0xff] (!%p401_p7)  ;;  %v266_v48 = vld [vmem:[#allocation4] sm:$0x1] (!%p401_p7) }
  0x3e   : > { %v402_v27 = vld [vmem:[#allocation3] ss:$0 sm:$0xff] (!%p401_p7) }
  0x3f   : > { %v250_v28 = vsub.f32 (!%p401_p7), %v239_v23, %v402_v27  ;;  %v251_v29 = vsub.f32 (!%p401_p7), %v240_v24, %v402_v27  ;;  %v252_v30 = vsub.f32 (!%p401_p7), %v241_v25, %v402_v27  ;;  %v253_v31 = vsub.f32 (!%p401_p7), %v242_v26, %v402_v27 }
  0x41   : > { %v267_v32 = vmul.f32 %v250_v28, %v250_v28  ;;  %v268_v33 = vmul.f32 %v251_v29, %v251_v29  ;;  %v269_v34 = vmul.f32 %v252_v30, %v252_v30  ;;  %v270_v35 = vmul.f32 %v253_v31, %v253_v31 }
  0x43   : > { %v272_v36 = vsel %vm271_vm4, %v267_v32, 0.0  ;;  %v273_v37 = vsel %vm271_vm4, %v268_v33, 0.0  ;;  %v275_v38 = vsel %vm271_vm4, %v269_v34, 0.0  ;;  %v277_v40 = vsel %vm271_vm4, %v270_v35, 0.0 }
  0x44   : > { %v274_v39 = vadd.f32 %v273_v37, %v272_v36 }
  0x46   : > { %v276_v41 = vadd.f32 %v275_v38, %v274_v39 }
  0x48   : > { %v278_v42 = vadd.f32 %v277_v40, %v276_v41 }
  0x4a   : > { %v279_v43 = vrot.slane %v278_v42, 4 }
  0x4c   : > { %v280_v44 = vadd.f32 %v279_v43, %v278_v42 }
  0x4e   : > { %v281_v45 = vrot.slane %v280_v44, 2 }
  0x50   : > { %v282_v46 = vadd.f32 %v281_v45, %v280_v44 }
  0x52   : > { %v283_v47 = vrot.slane %v282_v46, 1 }
  0x54   : > { %v284_v49 = vadd.f32 %v283_v47, %v282_v46 }
  0x56   : > { %v285_v50 = vadd.f32 %v284_v49, %v266_v48 }
  0x58   : > { %287 = vst.msk [vmem:[#allocation4] sm:$0x1] %vm286_vm5, %v285_v50 }
  0x59 PF: > { %289 = sbr.rel (!%p226_p6) target bundleno = 346 (0x15a), region = 44  ;;  %v304_v52 = vld [vmem:[#allocation3] sm:$0x1] (%p226_p6)  ;;  %vm306_vm6 = vcmask (%p226_p6), 253952   ;;  %vm322_vm9 = vcmask (%p226_p6), 0  }
  0x5a   : > { %v305_v54 = vsub.f32 (%p226_p6), 0.0, %v304_v52 }
  0x5c   : > { %307 = vst.msk [vmem:[%s629_s1] sm:$0x1] (%p226_p6), %vm306_vm6, %v305_v54 }
  0x5f   : > { %v290_v51 = vld [vmem:[#allocation4] sm:$0x1] (%p226_p6) }
  0x60   : > { %v291_v53 = vmul.f32 0.03125, %v290_v51 }
  0x62   : > { %444 = vrsqrt.f32 %v291_v53  ;;  %vm294_vm7 = vcmp.eq.f32.partialorder %v291_v53, inf  ;;  %v297_v56 = vand.u32 2147483648, %v291_v53  ;;  %vm296_vm8 = vcmp.eq.f32.partialorder %v291_v53, 0.0 }
  0x6c   : > { %v445_v55 = vpop.eup %444 }
  0x6d   : > { %v293_v57 = vmul.f32 %v445_v55, %v291_v53 }
  0x6f   : > { %v295_v58 = vsel %vm294_vm7, %v291_v53, %v293_v57 }
  0x70   : > { %v298_v59 = vsel %vm296_vm8, %v297_v56, %v295_v58 }
  0x71   : > { %v299_v60 = vadd.f32 1e-06, %v298_v59 }
  0x73   : > { %446 = vrcp.f32 %v299_v60 }
  0x7d   : > { %v447_v61 = vpop.eup %446 }
  0x7e   : > { %448 = vlog2.f32 %v447_v61 }
  0x88   : > { %v449_v62 = vpop.eup %448 }
  0x89   : > { %v303_v63 = vmul.f32 0.6931472, %v449_v62 }
  0x8b   : > { %v308_v0 = vmul.f32 1.442695, %v303_v63  ;;  %v311_v1 = vsel %vm306_vm6, %v303_v63, 0.0 }
  0x8c   : > { %312 = vadd.xlane.f32.xlu0 %v311_v1 }
  0x8d   : > { %450 = vpow2.f32 %v308_v0 }
  0x97   : > { %v451_v2 = vpop.eup %450 }
  0x98   : > { %310 = vst.msk [vmem:[%s630_s2] sm:$0x1] %vm306_vm6, %v451_v2 }
 0x119   : > { %v313_v3 = vpop.xlane.xlu0 %312 }
 0x11a   : > { %v314_v4 = vrot.slane %v313_v3, 4 }
 0x11c   : > { %v315_v5 = vadd.f32 %v314_v4, %v313_v3 }
 0x11e   : > { %v316_v6 = vrot.slane %v315_v5, 2 }
 0x120   : > { %v317_v7 = vadd.f32 %v316_v6, %v315_v5 }
 0x122   : > { %v318_v8 = vrot.slane %v317_v7, 1 }
 0x124   : > { %v319_v9 = vadd.f32 %v318_v8, %v317_v7 }
 0x126   : > { %409 = vpush %v319_v9 }
 0x157   : > { %s410_s10 = spop %409 }
 0x158   : > { %v321_v10 = vstv %s410_s10 }
 0x159   : > { %323 = vst.msk [vmem:[#allocation5] sm:$0x1] %vm322_vm9, %v321_v10 }
 0x15a PF: > { %p593_p8 = scmp.eq.s32.totalorder %s394_s15, 1  ;;  %s508_s12 = smov [#allocation5]  }
 0x15b   : > { %s337_s17 = sshll.u32 %s508_s12, 4  ;;  %s338_s17 = int_to_ptr.vmem [resolvable:$true] %s337_s17 }
 0x15c   : > { %s452_s18 = scalar_lea.vmem %s338_s17, 16  ;;  %s458_s19 = scalar_lea.vmem %s338_s17, 32 }
 0x15d   : > { %p453_p9 = scmp.ne.s32.totalorder %s338_s17, %s452_s18  ;;  %p459_p12 = scmp.lt.s32.totalorder %s338_s17, %s338_s17 }
 0x15e   : > { %p460_p13 = scmp.lt.s32.totalorder %s458_s19, %s452_s18 }
 0x15f   : > { %p454_p10 = pnand %p453_p9, %p593_p8 }
 0x160   : > { %p461_p0 = por %p460_p13, %p459_p12 }
 0x161   : > { %p455_p11 = pneg %p454_p10 }
 0x163   : > { %p462_p1 = pnand %p461_p0, %p455_p11 }
 0x165   : > { %465 = shalt.err (!%p462_p1)
}
 0x166   : > { %s466_s21 = scalar_lea.hbm %s631_s3, 16 }
 0x167   : > { %p467_p2 = scmp.ne.s32.totalorder %s631_s3, %s466_s21  ;;  %p472_p5 = scmp.lt.u32.totalorder %s466_s21, %s631_s3 }
 0x169   : > { %p468_p3 = pnand %p467_p2, %p593_p8 }
 0x16b   : > { %p469_p4 = pneg %p468_p3 }
 0x16d   : > { %p474_p6 = pnand %p472_p5, %p469_p4 }
 0x16f   : > { %477 = shalt.err (!%p474_p6)
}
 0x170   : > { %412 = dma.vmem_to_hbm [thread:$0]  (%p593_p8), %s338_s17, 16, %s631_s3, [#allocation6]  }
 0x171   : > { %491 = dma.done.wait (%p593_p8), [#allocation6], 16  }
 0x172   : > { %493 = vsyncadd (%p593_p8), [#allocation6], 4294967280 }
 0x173 PF: > { %s15_s14 = sadd.s32 1, %s504_s14   ;;  %s633_s12 = smov %s500_s13 }
 0x174   : > { %p12_p7 = scmp.ge.s32.totalorder %s15_s14, 4   ;;  %s634_s13 = smov %s636_s16 }
 0x176   :  { %14 = sbr.rel (!%p12_p7) target bundleno = 2 (0x2), region = 87 }
 0x17d   :  { %356 = vsyncpa [#allocation6], 1 }
 0x17e   :  { %358 = vsyncpa [#allocation6 + $0x1], 1 }

// kernel: _lambda_.46
= control target key start
LH: loop header
LB: loop body
LE: loop exit
PB: predicated region body
PF: predicated region fallthrough
CT: control target
= control target key end

     0   :  { %vm16_vm0 = vcmask 261120   ;;  %v238_v0 = vmov 0   ;;  %v239_v2 = vmov 0.0   ;;  %vm119_vm1 = vcmask 130048   ;;  %s338_s1 = inlined_call_operand.vmem [shape: bf16[144,32], index: 1, kind: input, shape index: {}]   ;;  %s339_s2 = inlined_call_operand.vmem [shape: f32[32,32], index: 2, kind: output, shape index: {}]   ;;  %s340_s0 = inlined_call_operand.vmem [shape: bf16[32,144], index: 0, kind: input, shape index: {}]  }
   0x1   :  { %126 = vmatprep.subr.bf16.mxu0 %v238_v0  ;;  %203 = vmatprep.subr.bf16.mxu1 %v238_v0  ;;  %v223_v1 = vld [vmem:[%s338_s1] sm:$0xff]   ;;  %17 = vst.msk [vmem:[%s339_s2] sm:$0xff] %vm16_vm0, %v239_v2  ;;  %18 = vst.msk [vmem:[%s339_s2 + $0x8] sm:$0xff] %vm16_vm0, %v239_v2  ;;  %v224_v3 = vld [vmem:[%s338_s1 + $0x8] sm:$0xff]  }
   0x2   :  { %19 = vst.msk [vmem:[%s339_s2 + $0x10] sm:$0xff] %vm16_vm0, %v239_v2  ;;  %20 = vst.msk [vmem:[%s339_s2 + $0x18] sm:$0xff] %vm16_vm0, %v239_v2  ;;  %127 = vmatpush1.bf16.msra.mxu0 %v223_v1  ;;  %212 = vmatpush1.bf16.msra.mxu1 %v223_v1  ;;  %v225_v4 = vld [vmem:[%s338_s1 + $0x10] sm:$0xff]   ;;  %v226_v5 = vld [vmem:[%s338_s1 + $0x18] sm:$0xff]  }
   0x3   :  { %128 = vmatprep.subr.bf16.mxu0 %v238_v0  ;;  %204 = vmatprep.subr.bf16.mxu1 %v238_v0  ;;  %v234_v6 = vld [vmem:[%s340_s0 + $0x4] ss:$8 sps:$4 sm:$0xff]   ;;  %v237_v7 = vld [vmem:[%s340_s0 + $0x14] ss:$8 sps:$4 sm:$0xff]   ;;  %v232_v13 = vld [vmem:[%s340_s0] ss:$8 sps:$4 sm:$0xff]  }
   0x4   :  { %201 = vmatprep.mubr.msk.bf16.mxu0 %vm119_vm1, %v234_v6  ;;  %202 = vmatprep.mubr.msk.bf16.mxu1 %vm119_vm1, %v237_v7  ;;  %v227_v8 = vld [vmem:[%s338_s1 + $0x20] sm:$0xff]   ;;  %v228_v9 = vld [vmem:[%s338_s1 + $0x28] sm:$0xff]   ;;  %v229_v10 = vld [vmem:[%s338_s1 + $0x30] sm:$0xff]  }
   0x5   :  { %v230_v11 = vld [vmem:[%s338_s1 + $0x38] sm:$0xff]   ;;  %v231_v12 = vld [vmem:[%s338_s1 + $0x40] sm:$0xff]  }
   0x6   :  { %129 = vmatpush1.bf16.msra.mxu0 %v224_v3  ;;  %213 = vmatpush1.bf16.msra.mxu1 %v224_v3  ;;  %v235_v14 = vld [vmem:[%s340_s0 + $0x10] ss:$8 sps:$4 sm:$0xff]  }
   0x7   :  { %130 = vmatprep.subr.bf16.mxu0 %v238_v0  ;;  %205 = vmatprep.subr.bf16.mxu1 %v238_v0 }
   0x8   :  { %v21_v15 = vld [vmem:[%s339_s2] sm:$0xff]  ;;  %v22_v19 = vld [vmem:[%s339_s2 + $0x8] sm:$0xff] }
   0x9   :  { %v23_v16 = vld [vmem:[%s339_s2 + $0x10] sm:$0xff]  ;;  %v24_v20 = vld [vmem:[%s339_s2 + $0x18] sm:$0xff] }
   0xa   :  { %131 = vmatpush1.bf16.msra.mxu0 %v225_v4  ;;  %214 = vmatpush1.bf16.msra.mxu1 %v225_v4 }
   0xb   :  { %132 = vmatprep.subr.bf16.mxu0 %v238_v0  ;;  %206 = vmatprep.subr.bf16.mxu1 %v238_v0 }
   0xe   :  { %133 = vmatpush1.bf16.msra.mxu0 %v226_v5  ;;  %215 = vmatpush1.bf16.msra.mxu1 %v226_v5 }
   0xf   :  { %134 = vmatprep.subr.bf16.mxu0 %v238_v0  ;;  %207 = vmatprep.subr.bf16.mxu1 %v238_v0 }
  0x12   :  { %135 = vmatpush1.bf16.msra.mxu0 %v227_v8  ;;  %216 = vmatpush1.bf16.msra.mxu1 %v227_v8 }
  0x13   :  { %136 = vmatprep.subr.bf16.mxu0 %v238_v0  ;;  %208 = vmatprep.subr.bf16.mxu1 %v238_v0 }
  0x16   :  { %137 = vmatpush1.bf16.msra.mxu0 %v228_v9  ;;  %217 = vmatpush1.bf16.msra.mxu1 %v228_v9 }
  0x17   :  { %138 = vmatprep.subr.bf16.mxu0 %v238_v0  ;;  %209 = vmatprep.subr.bf16.mxu1 %v238_v0 }
  0x1a   :  { %139 = vmatpush1.bf16.msra.mxu0 %v229_v10  ;;  %218 = vmatpush1.bf16.msra.mxu1 %v229_v10 }
  0x1b   :  { %140 = vmatprep.subr.bf16.mxu0 %v238_v0  ;;  %210 = vmatprep.subr.bf16.mxu1 %v238_v0 }
  0x1e   :  { %141 = vmatpush1.bf16.msra.mxu0 %v230_v11  ;;  %219 = vmatpush1.bf16.msra.mxu1 %v230_v11 }
  0x1f   :  { %142 = vmatprep.subr.bf16.mxu0 %v238_v0  ;;  %211 = vmatprep.subr.bf16.mxu1 %v238_v0 }
  0x22   :  { %143 = vmatpush1.bf16.msra.mxu0 %v231_v12  ;;  %220 = vmatpush1.bf16.msra.mxu1 %v231_v12 }
  0x25   :  { %159 = vmatmul.mubr.bf16.vlgmr.msra.gmra.mrb[0].mxu0 %v232_v13  ;;  %167 = vmatmul.mubr.bf16.vlgmr.msra.gmra.mrb[0].mxu1 %v235_v14 }
  0xf8   :  { %v160_v17 = vpop.f32.mrb[0].mxu0  ;;  %v168_v18 = vpop.f32.mrb[0].mxu1 }
  0xf9   :  { %v175_v21 = vadd.f32 %v160_v17, %v21_v15  ;;  %v177_v22 = vadd.f32 %v168_v18, %v23_v16  ;;  %v162_v23 = vpop.f32.mrb[1].mxu0  ;;  %v170_v24 = vpop.f32.mrb[1].mxu1 }
  0xfa   :  { %v163_v25 = vpop.f32.mrb[2].mxu0  ;;  %v171_v26 = vpop.f32.mrb[2].mxu1 }
  0xfb   :  { %180 = vst.msk [vmem:[%s339_s2] sm:$0xff] %vm16_vm0, %v175_v21  ;;  %182 = vst.msk [vmem:[%s339_s2 + $0x10] sm:$0xff] %vm16_vm0, %v177_v22  ;;  %v176_v27 = vadd.f32 %v163_v25, %v22_v19  ;;  %v178_v28 = vadd.f32 %v171_v26, %v24_v20  ;;  %v165_v29 = vpop.f32.mrb[3].mxu0  ;;  %v173_v30 = vpop.f32.mrb[3].mxu1 }
  0xfd   :  { %181 = vst.msk [vmem:[%s339_s2 + $0x8] sm:$0xff] %vm16_vm0, %v176_v27  ;;  %183 = vst.msk [vmem:[%s339_s2 + $0x18] sm:$0xff] %vm16_vm0, %v178_v28 }

// kernel: _lambda_.48
= control target key start
LH: loop header
LB: loop body
LE: loop exit
PB: predicated region body
PF: predicated region fallthrough
CT: control target
= control target key end

     0   :  { %vm66_vm0 = vcmask 261120   ;;  %s211_s3 = inlined_call_operand.vmem [shape: bf16[32,32], index: 3, kind: input, shape index: {}]   ;;  %s212_s0 = inlined_call_operand.vmem [shape: f32[32,32], index: 0, kind: input, shape index: {}]   ;;  %s213_s1 = inlined_call_operand.vmem [shape: f32[1,32], index: 1, kind: input, shape index: {}]   ;;  %s214_s2 = inlined_call_operand.vmem [shape: f32[1,32], index: 2, kind: input, shape index: {}]   ;;  %s215_s4 = inlined_call_operand.vmem [shape: f32[32,32], index: 4, kind: output, shape index: {}]  }
   0x1   :  { %v148_v0 = vld [vmem:[%s211_s3] sm:$0xff]   ;;  %v149_v1 = vld [vmem:[%s211_s3 + $0x8] sm:$0xff]   ;;  %v20_v8 = vld [vmem:[%s212_s0 + $0x10] sm:$0xff] }
   0x2   :  { %140 = vmatprep.subr.bf16.mxu0 %v148_v0  ;;  %v18_v2 = vld [vmem:[%s212_s0] sm:$0xff]  ;;  %v19_v3 = vld [vmem:[%s212_s0 + $0x8] sm:$0xff]  ;;  %v21_v9 = vld [vmem:[%s212_s0 + $0x18] sm:$0xff] }
   0x3   :  { %v130_v4 = vld [vmem:[%s213_s1] ss:$0 sm:$0xff]  ;;  %141 = vmatpush3.bf16.msra.mxu0 %v148_v0 }
   0x4   :  { %v29_v5 = vadd.f32 %v130_v4, %v18_v2  ;;  %v30_v6 = vadd.f32 %v130_v4, %v19_v3  ;;  %v131_v7 = vld [vmem:[%s214_s2] ss:$0 sm:$0xff]  ;;  %142 = vmatprep.subr.bf16.mxu0 %v149_v1  ;;  %v31_v10 = vadd.f32 %v130_v4, %v20_v8  ;;  %v32_v11 = vadd.f32 %v130_v4, %v21_v9 }
   0x6   :  { %v40_v12 = vmul.f32 %v131_v7, %v29_v5  ;;  %v41_v13 = vmul.f32 %v131_v7, %v30_v6  ;;  %v42_v14 = vmul.f32 %v131_v7, %v31_v10  ;;  %v43_v15 = vmul.f32 %v131_v7, %v32_v11 }
   0x7   :  { %143 = vmatpush3.bf16.msra.mxu0 %v149_v1 }
   0x8   :  { %v44_v16 = vmax.f32 %v40_v12, 0.0  ;;  %v45_v17 = vmax.f32 %v41_v13, 0.0  ;;  %v46_v18 = vmax.f32 %v42_v14, 0.0  ;;  %v47_v19 = vmax.f32 %v43_v15, 0.0 }
   0xa   :  { %v48_v20 = vpack.c.bf16 %v45_v17, %v44_v16  ;;  %v49_v21 = vpack.c.bf16 %v47_v19, %v46_v18 }
   0xc   :  { %144 = vmatprep.mubr.msk.bf16.mxu0 %vm66_vm0, %v48_v20 }
   0xd   :  { %145 = vmatmul.mubr.msk.bf16.vlgmr.msra.gmra.mrb[0].mxu0 %vm66_vm0, %v49_v21 }
  0xe0   :  { %v146_v22 = vpop.f32.mrb[0].mxu0 }
  0xe1   :  { %124 = vst.msk [vmem:[%s215_s4 + $0x10] sm:$0xff] %vm66_vm0, %v146_v22  ;;  %v107_v23 = vpop.f32.mrb[1].mxu0 }
  0xe2   :  { %122 = vst.msk [vmem:[%s215_s4] sm:$0xff] %vm66_vm0, %v107_v23  ;;  %v147_v24 = vpop.f32.mrb[2].mxu0 }
  0xe3   :  { %125 = vst.msk [vmem:[%s215_s4 + $0x18] sm:$0xff] %vm66_vm0, %v147_v24  ;;  %v110_v25 = vpop.f32.mrb[3].mxu0 }
  0xe4   :  { %123 = vst.msk [vmem:[%s215_s4 + $0x8] sm:$0xff] %vm66_vm0, %v110_v25 }

// kernel: _lambda_.50
= control target key start
LH: loop header
LB: loop body
LE: loop exit
PB: predicated region body
PF: predicated region fallthrough
CT: control target
= control target key end

     0   :  { %vm60_vm0 = vcmask 257024   ;;  %s129_s0 = inlined_call_operand.vmem [shape: f32[32,32], index: 0, kind: input, shape index: {}]   ;;  %s130_s1 = inlined_call_operand.vmem [shape: f32[1,32], index: 1, kind: input, shape index: {}]   ;;  %s131_s2 = inlined_call_operand.vmem [shape: f32[1,32], index: 2, kind: input, shape index: {}]   ;;  %s132_s3 = inlined_call_operand.vmem [shape: bf16[32,32], index: 3, kind: output, shape index: {}]  }
   0x1   :  { %v14_v0 = vld [vmem:[%s129_s0] sm:$0xff]  ;;  %v15_v4 = vld [vmem:[%s129_s0 + $0x8] sm:$0xff]  ;;  %v16_v5 = vld [vmem:[%s129_s0 + $0x10] sm:$0xff] }
   0x2   :  { %v69_v1 = vld [vmem:[%s130_s1] ss:$0 sm:$0xff]  ;;  %v17_v6 = vld [vmem:[%s129_s0 + $0x18] sm:$0xff] }
   0x3   :  { %v70_v2 = vld [vmem:[%s131_s2] ss:$0 sm:$0xff]  ;;  %v25_v3 = vadd.f32 %v69_v1, %v14_v0  ;;  %v26_v7 = vadd.f32 %v69_v1, %v15_v4  ;;  %v27_v8 = vadd.f32 %v69_v1, %v16_v5  ;;  %v28_v9 = vadd.f32 %v69_v1, %v17_v6 }
   0x5   :  { %v36_v10 = vmul.f32 %v70_v2, %v25_v3  ;;  %v37_v11 = vmul.f32 %v70_v2, %v26_v7  ;;  %v38_v12 = vmul.f32 %v70_v2, %v27_v8  ;;  %v39_v13 = vmul.f32 %v70_v2, %v28_v9 }
   0x7   :  { %v40_v14 = vmax.f32 %v36_v10, 0.0  ;;  %v41_v15 = vmax.f32 %v37_v11, 0.0  ;;  %v42_v16 = vmax.f32 %v38_v12, 0.0  ;;  %v43_v17 = vmax.f32 %v39_v13, 0.0 }
   0x9   :  { %v75_v18 = vpack.c.bf16 %v40_v14, %v40_v14  ;;  %v76_v19 = vpack.c.bf16 %v41_v15, %v41_v15  ;;  %v77_v20 = vpack.c.bf16 %v42_v16, %v42_v16  ;;  %v78_v21 = vpack.c.bf16 %v43_v17, %v43_v17 }
   0xb   :  { %61 = vst.msk [vmem:[%s132_s3] sm:$0xf] %vm60_vm0, %v75_v18  ;;  %62 = vst.msk [vmem:[%s132_s3 + $0x4] sm:$0xf] %vm60_vm0, %v76_v19 }
   0xc   :  { %63 = vst.msk [vmem:[%s132_s3 + $0x8] sm:$0xf] %vm60_vm0, %v77_v20  ;;  %64 = vst.msk [vmem:[%s132_s3 + $0xc] sm:$0xf] %vm60_vm0, %v78_v21 }

// kernel: _lambda_.51
= control target key start
LH: loop header
LB: loop body
LE: loop exit
PB: predicated region body
PF: predicated region fallthrough
CT: control target
= control target key end

     0   :  { %vm231_vm0 = vcmask 261120   ;;  %vm36_vm1 = vcmask 130048   ;;  %v934_v42 = vmov 0.0   ;;  %vm718_vm2 = vcmask 7168   ;;  %s1195_s1 = inlined_call_operand.vmem [shape: bf16[288,16], index: 1, kind: input, shape index: {}, may-alias: {1,2}]   ;;  %s1196_s0 = inlined_call_operand.vmem [shape: bf16[32,288], index: 0, kind: input, shape index: {}]   ;;  %s1197_s2 = inlined_call_operand.vmem [shape: bf16[288,16], index: 2, kind: input, shape index: {}, may-alias: {1,2}]   ;;  %s1198_s4 = inlined_call_operand.vmem [shape: f32[1,16], index: 4, kind: input, shape index: {}, may-alias: {3,4}]   ;;  %s1199_s6 = inlined_call_operand.vmem [shape: f32[1,16], index: 6, kind: input, shape index: {}, may-alias: {5,6}]   ;;  %s1200_s3 = inlined_call_operand.vmem [shape: f32[1,16], index: 3, kind: input, shape index: {}, may-alias: {3,4}]   ;;  %s1201_s5 = inlined_call_operand.vmem [shape: f32[1,16], index: 5, kind: input, shape index: {}, may-alias: {5,6}]   ;;  %s1202_s7 = inlined_call_operand.vmem [shape: f32[32,16], index: 7, kind: input, shape index: {}]   ;;  %s1203_s8 = inlined_call_operand.vmem [shape: f32[32,16], index: 8, kind: output, shape index: {0}]   ;;  %s1204_s9 = inlined_call_operand.vmem [shape: f32[32,1], index: 9, kind: output, shape index: {1}]  }
   0x1   :  { %v866_v0 = vld [vmem:[%s1195_s1 + $0x40] sm:$0xff]   ;;  %v869_v3 = vld [vmem:[%s1195_s1 + $0x48] sm:$0xff]   ;;  %v873_v7 = vld [vmem:[%s1195_s1 + $0x50] sm:$0xff]   ;;  %37 = vst.msk [vmem:[#allocation2] sm:$0xff] %vm36_vm1, %v934_v42 }
   0x2   :  { %v867_v1 = vld [vmem:[%s1195_s1 + $0x80] sm:$0xff]   ;;  %785 = vmatprep.subr.bf16.mxu0 %v866_v0  ;;  %v870_v4 = vld [vmem:[%s1195_s1 + $0x88] sm:$0xff]   ;;  %v876_v10 = vld [vmem:[%s1195_s1 + $0x10] sm:$0xff]   ;;  %38 = vst.msk [vmem:[#allocation2 + $0x8] sm:$0xff] %vm36_vm1, %v934_v42 }
   0x3   :  { %v868_v2 = vld [vmem:[%s1195_s1] sm:$0xff]   ;;  %849 = vmatprep.subr.bf16.mxu1 %v867_v1  ;;  %v871_v5 = vld [vmem:[%s1195_s1 + $0x8] sm:$0xff]   ;;  %v878_v12 = vld [vmem:[%s1195_s1 + $0x58] sm:$0xff]   ;;  %39 = vst.msk [vmem:[#allocation2 + $0x10] sm:$0xff] %vm36_vm1, %v934_v42 }
   0x4   :  { %786 = vmatpush3.bf16.msra.mxu0 %v868_v2  ;;  %850 = vmatpush3.bf16.msra.mxu1 %v867_v1  ;;  %v1006_v6 = vld [vmem:[%s1196_s0 + $0x8] ss:$12 sps:$4 sm:$0xff]   ;;  %v1014_v8 = vld [vmem:[%s1196_s0 + $0x20] ss:$12 sps:$4 sm:$0xff]   ;;  %v880_v14 = vld [vmem:[%s1195_s1 + $0x18] sm:$0xff]   ;;  %40 = vst.msk [vmem:[#allocation2 + $0x18] sm:$0xff] %vm36_vm1, %v934_v42 }
   0x5   :  { %787 = vmatprep.subr.bf16.mxu0 %v869_v3  ;;  %851 = vmatprep.subr.bf16.mxu1 %v870_v4  ;;  %v875_v9 = vld [vmem:[%s1197_s2 + $0x40] sm:$0xff]   ;;  %v879_v13 = vld [vmem:[%s1197_s2 + $0x48] sm:$0xff]   ;;  %v883_v17 = vld [vmem:[%s1197_s2 + $0x50] sm:$0xff]   ;;  %41 = vst.msk [vmem:[#allocation3] sm:$0xff] %vm36_vm1, %v934_v42 }
   0x6   :  { %853 = vmatprep.mubr.msk.bf16.mxu1 %vm231_vm0, %v1006_v6  ;;  %v877_v11 = vld [vmem:[%s1197_s2] sm:$0xff]   ;;  %v881_v15 = vld [vmem:[%s1197_s2 + $0x8] sm:$0xff]   ;;  %v885_v19 = vld [vmem:[%s1197_s2 + $0x10] sm:$0xff]   ;;  %42 = vst.msk [vmem:[#allocation3 + $0x8] sm:$0xff] %vm36_vm1, %v934_v42 }
   0x7   :  { %v882_v16 = vld [vmem:[%s1195_s1 + $0x60] sm:$0xff]   ;;  %v886_v20 = vld [vmem:[%s1195_s1 + $0x68] sm:$0xff]   ;;  %v887_v21 = vld [vmem:[%s1197_s2 + $0x58] sm:$0xff]   ;;  %43 = vst.msk [vmem:[#allocation3 + $0x10] sm:$0xff] %vm36_vm1, %v934_v42 }
   0x8   :  { %788 = vmatpush3.bf16.msra.mxu0 %v871_v5  ;;  %852 = vmatpush3.bf16.msra.mxu1 %v870_v4  ;;  %v884_v18 = vld [vmem:[%s1195_s1 + $0x20] sm:$0xff]   ;;  %v888_v22 = vld [vmem:[%s1195_s1 + $0x28] sm:$0xff]   ;;  %v889_v23 = vld [vmem:[%s1197_s2 + $0x18] sm:$0xff]   ;;  %44 = vst.msk [vmem:[#allocation3 + $0x18] sm:$0xff] %vm36_vm1, %v934_v42 }
   0x9   :  { %789 = vmatprep.subr.bf16.mxu0 %v873_v7  ;;  %817 = vmatprep.subr.bf16.mxu1 %v875_v9  ;;  %v890_v24 = vld [vmem:[%s1195_s1 + $0x70] sm:$0xff]   ;;  %v891_v25 = vld [vmem:[%s1197_s2 + $0x60] sm:$0xff]   ;;  %v894_v28 = vld [vmem:[%s1195_s1 + $0x78] sm:$0xff]  }
   0xa   :  { %v892_v26 = vld [vmem:[%s1195_s1 + $0x30] sm:$0xff]   ;;  %v893_v27 = vld [vmem:[%s1197_s2 + $0x20] sm:$0xff]   ;;  %v895_v29 = vld [vmem:[%s1197_s2 + $0x68] sm:$0xff]  }
   0xb   :  { %854 = vmatmul.mubr.msk.bf16.vlgmr.msra.gmra.mrb[0].mxu1 %vm231_vm0, %v1014_v8  ;;  %v896_v30 = vld [vmem:[%s1195_s1 + $0x38] sm:$0xff]   ;;  %v897_v31 = vld [vmem:[%s1197_s2 + $0x28] sm:$0xff]   ;;  %v900_v33 = vld [vmem:[%s1196_s0 + $0x4] ss:$12 sps:$4 sm:$0xff]  }
   0xc   :  { %790 = vmatpush3.bf16.msra.mxu0 %v876_v10  ;;  %818 = vmatpush3.bf16.msra.mxu1 %v877_v11  ;;  %v898_v32 = vld [vmem:[%s1196_s0] ss:$12 sps:$4 sm:$0xff]   ;;  %v901_v34 = vld [vmem:[%s1197_s2 + $0x70] sm:$0xff]   ;;  %v904_v37 = vld [vmem:[%s1197_s2 + $0x78] sm:$0xff]  }
   0xd   :  { %791 = vmatprep.subr.bf16.mxu0 %v878_v12  ;;  %819 = vmatprep.subr.bf16.mxu1 %v879_v13  ;;  %v902_v35 = vld [vmem:[%s1197_s2 + $0x30] sm:$0xff]   ;;  %v903_v36 = vld [vmem:[%s1197_s2 + $0x80] sm:$0xff]   ;;  %v905_v38 = vld [vmem:[%s1197_s2 + $0x38] sm:$0xff]  }
   0xe   :  { %270 = vmatprep.mubr.bf16.mxu0 %v900_v33  ;;  %525 = vmatprep.mubr.bf16.mxu1 %v900_v33  ;;  %v906_v39 = vld [vmem:[%s1196_s0 + $0x1c] ss:$12 sps:$4 sm:$0xff]   ;;  %v908_v40 = vld [vmem:[%s1196_s0 + $0x18] ss:$12 sps:$4 sm:$0xff]   ;;  %v55_v3 = vld [vmem:[#allocation2 + $0x10] sm:$0xff] }
   0xf   :  { %v909_v41 = vld [vmem:[%s1197_s2 + $0x88] sm:$0xff]   ;;  %v53_v51 = vld [vmem:[#allocation2] sm:$0xff]  ;;  %v56_v9 = vld [vmem:[#allocation2 + $0x18] sm:$0xff] }
  0x10   :  { %792 = vmatpush3.bf16.msra.mxu0 %v880_v14  ;;  %820 = vmatpush3.bf16.msra.mxu1 %v881_v15  ;;  %v54_v55 = vld [vmem:[#allocation2 + $0x8] sm:$0xff] }
  0x11   :  { %793 = vmatprep.subr.bf16.mxu0 %v882_v16  ;;  %821 = vmatprep.subr.bf16.mxu1 %v883_v17  ;;  %v345_v16 = vld [vmem:[#allocation3] sm:$0xff] }
  0x14   :  { %794 = vmatpush3.bf16.msra.mxu0 %v884_v18  ;;  %822 = vmatpush3.bf16.msra.mxu1 %v885_v19 }
  0x15   :  { %795 = vmatprep.subr.bf16.mxu0 %v886_v20  ;;  %823 = vmatprep.subr.bf16.mxu1 %v887_v21 }
  0x18   :  { %796 = vmatpush3.bf16.msra.mxu0 %v888_v22  ;;  %824 = vmatpush3.bf16.msra.mxu1 %v889_v23  ;;  %v347_v22 = vld [vmem:[#allocation3 + $0x10] sm:$0xff] }
  0x19   :  { %797 = vmatprep.subr.bf16.mxu0 %v890_v24  ;;  %825 = vmatprep.subr.bf16.mxu1 %v891_v25  ;;  %v346_v24 = vld [vmem:[#allocation3 + $0x8] sm:$0xff] }
  0x1c   :  { %798 = vmatpush3.bf16.msra.mxu0 %v892_v26  ;;  %826 = vmatpush3.bf16.msra.mxu1 %v893_v27 }
  0x1d   :  { %799 = vmatprep.subr.bf16.mxu0 %v894_v28  ;;  %827 = vmatprep.subr.bf16.mxu1 %v895_v29 }
  0x20   :  { %800 = vmatpush3.bf16.msra.mxu0 %v896_v30  ;;  %828 = vmatpush3.bf16.msra.mxu1 %v897_v31  ;;  %v348_v30 = vld [vmem:[#allocation3 + $0x18] sm:$0xff] }
  0x21   :  { %829 = vmatprep.subr.bf16.mxu1 %v901_v34  ;;  %857 = vmatprep.subr.bf16.mxu0 %v903_v36 }
  0x23   :  { %271 = vmatmul.mubr.bf16.vlgmr.msra.gmra.mrb[0].mxu0 %v898_v32 }
  0x24   :  { %830 = vmatpush3.bf16.msra.mxu1 %v902_v35  ;;  %858 = vmatpush3.bf16.msra.mxu0 %v903_v36  ;;  %v779_v35 = vld [vmem:[%s1198_s4] ss:$0 sm:$0xff] }
  0x25   :  { %831 = vmatprep.subr.bf16.mxu1 %v904_v37  ;;  %278 = vmatprep.mubr.bf16.mxu0 %v906_v39  ;;  %v780_v37 = vld [vmem:[%s1199_s6] ss:$0 sm:$0xff] }
  0x26   :  { %859 = vmatprep.subr.bf16.mxu0 %v909_v41 }
  0x28   :  { %832 = vmatpush3.bf16.msra.mxu1 %v905_v38  ;;  %860 = vmatpush3.bf16.msra.mxu0 %v909_v41 }
  0x2b   :  { %279 = vmatmul.mubr.bf16.gmra.mrb[4].mxu0 %v908_v40  ;;  %526 = vmatmul.mubr.bf16.vlgmr.msra.gmra.mrb[4].mxu1 %v898_v32 }
  0x2c   :  { %533 = vmatprep.mubr.bf16.mxu1 %v906_v39  ;;  %861 = vmatprep.mubr.msk.bf16.mxu0 %vm231_vm0, %v1006_v6 }
  0x33   :  { %534 = vmatmul.mubr.bf16.gmra.mrb[8].mxu1 %v908_v40  ;;  %862 = vmatmul.mubr.msk.bf16.vlgmr.msra.gmra.mrb[8].mxu0 %vm231_vm0, %v1014_v8 }
  0xde   :  { %v855_v43 = vpop.f32.mrb[0].mxu1 }
  0xdf   :  { %v321_v44 = vpop.f32.mrb[1].mxu1 }
  0xe0   :  { %v856_v45 = vpop.f32.mrb[2].mxu1 }
  0xe1   :  { %v324_v46 = vpop.f32.mrb[3].mxu1 }
  0xf6   :  { %v801_v47 = vpop.f32.mrb[0].mxu0 }
  0xf7   :  { %v802_v48 = vpop.f32.mrb[1].mxu0 }
  0xf8   :  { %v803_v49 = vadd.f32 %v802_v48, %v801_v47  ;;  %v804_v50 = vpop.f32.mrb[2].mxu0 }
  0xf9   :  { %v805_v52 = vpop.f32.mrb[3].mxu0 }
  0xfa   :  { %v322_v53 = vadd.f32 %v803_v49, %v321_v44  ;;  %v806_v54 = vadd.f32 %v805_v52, %v804_v50 }
  0xfc   :  { %v336_v56 = vadd.f32 %v322_v53, %v53_v51  ;;  %v325_v57 = vadd.f32 %v806_v54, %v324_v46 }
  0xfe   :  { %341 = vst.msk [vmem:[#allocation2] sm:$0xff] %vm36_vm1, %v336_v56  ;;  %v337_v58 = vadd.f32 %v325_v57, %v54_v55  ;;  %v807_v59 = vpop.f32.mrb[4].mxu0  ;;  %v833_v60 = vpop.f32.mrb[4].mxu1 }
  0xff   :  { %v808_v61 = vpop.f32.mrb[5].mxu0  ;;  %v834_v62 = vpop.f32.mrb[5].mxu1 }
 0x100   :  { %342 = vst.msk [vmem:[#allocation2 + $0x8] sm:$0xff] %vm36_vm1, %v337_v58  ;;  %v809_v63 = vadd.f32 %v808_v61, %v807_v59  ;;  %v835_v0 = vadd.f32 %v834_v62, %v833_v60  ;;  %v810_v1 = vpop.f32.mrb[6].mxu0  ;;  %v836_v2 = vpop.f32.mrb[6].mxu1  ;;  %v777_v58 = vld [vmem:[%s1200_s3] ss:$0 sm:$0xff] }
 0x101   :  { %v811_v4 = vpop.f32.mrb[7].mxu0  ;;  %v837_v5 = vpop.f32.mrb[7].mxu1 }
 0x102   :  { %v330_v6 = vadd.f32 %v855_v43, %v809_v63  ;;  %v812_v7 = vadd.f32 %v811_v4, %v810_v1  ;;  %v838_v8 = vadd.f32 %v837_v5, %v836_v2  ;;  %v778_v5 = vld [vmem:[%s1201_s5] ss:$0 sm:$0xff] }
 0x104   :  { %v338_v10 = vadd.f32 %v330_v6, %v55_v3  ;;  %v333_v11 = vadd.f32 %v856_v45, %v812_v7 }
 0x105   :  { %v602_v60 = vld [vmem:[#allocation2] sm:$0xff] }
 0x106   :  { %343 = vst.msk [vmem:[#allocation2 + $0x10] sm:$0xff] %vm36_vm1, %v338_v10  ;;  %v339_v12 = vadd.f32 %v333_v11, %v56_v9  ;;  %v839_v13 = vpop.f32.mrb[8].mxu1  ;;  %v863_v14 = vpop.f32.mrb[8].mxu0  ;;  %v613_v2 = vadd.f32 %v777_v58, %v602_v60 }
 0x107   :  { %v840_v15 = vpop.f32.mrb[9].mxu1  ;;  %v576_v17 = vpop.f32.mrb[9].mxu0  ;;  %v603_v4 = vld [vmem:[#allocation2 + $0x8] sm:$0xff] }
 0x108   :  { %344 = vst.msk [vmem:[#allocation2 + $0x18] sm:$0xff] %vm36_vm1, %v339_v12  ;;  %v841_v18 = vadd.f32 %v840_v15, %v839_v13  ;;  %v577_v19 = vadd.f32 %v835_v0, %v576_v17  ;;  %v842_v20 = vpop.f32.mrb[10].mxu1  ;;  %v864_v21 = vpop.f32.mrb[10].mxu0  ;;  %v614_v9 = vadd.f32 %v777_v58, %v603_v4  ;;  %v624_v10 = vmul.f32 %v778_v5, %v613_v2  ;;  %v654_v12 = vld [vmem:[%s1202_s7] sm:$0xff]  ;;  %v655_v17 = vld [vmem:[%s1202_s7 + $0x8] sm:$0xff] }
 0x109   :  { %v843_v23 = vpop.f32.mrb[11].mxu1  ;;  %v579_v25 = vpop.f32.mrb[11].mxu0 }
 0x10a   :  { %v585_v26 = vadd.f32 %v863_v14, %v841_v18  ;;  %v591_v27 = vadd.f32 %v577_v19, %v345_v16  ;;  %v844_v28 = vadd.f32 %v843_v23, %v842_v20  ;;  %v580_v29 = vadd.f32 %v838_v8, %v579_v25  ;;  %v656_v14 = vld [vmem:[%s1202_s7 + $0x10] sm:$0xff]  ;;  %v657_v20 = vld [vmem:[%s1202_s7 + $0x18] sm:$0xff] }
 0x10b   :  { %v625_v15 = vmul.f32 %v778_v5, %v614_v9  ;;  %v686_v16 = vadd.f32 %v654_v12, %v624_v10 }
 0x10c   :  { %v593_v31 = vadd.f32 %v585_v26, %v347_v22  ;;  %595 = vst.msk [vmem:[#allocation3] sm:$0xff] %vm36_vm1, %v591_v27  ;;  %v588_v32 = vadd.f32 %v864_v21, %v844_v28  ;;  %v592_v33 = vadd.f32 %v580_v29, %v346_v24 }
 0x10d   :  { %v604_v0 = vld [vmem:[#allocation2 + $0x10] sm:$0xff]  ;;  %v687_v24 = vadd.f32 %v655_v17, %v625_v15 }
 0x10e   :  { %597 = vst.msk [vmem:[#allocation3 + $0x10] sm:$0xff] %vm36_vm1, %v593_v31  ;;  %v594_v34 = vadd.f32 %v588_v32, %v348_v30  ;;  %596 = vst.msk [vmem:[#allocation3 + $0x8] sm:$0xff] %vm36_vm1, %v592_v33  ;;  %v615_v8 = vadd.f32 %v777_v58, %v604_v0 }
 0x10f   :  { %v605_v7 = vld [vmem:[#allocation2 + $0x18] sm:$0xff] }
 0x110   :  { %598 = vst.msk [vmem:[#allocation3 + $0x18] sm:$0xff] %vm36_vm1, %v594_v34  ;;  %v616_v11 = vadd.f32 %v777_v58, %v605_v7  ;;  %v626_v13 = vmul.f32 %v778_v5, %v615_v8 }
 0x112   :  { %v627_v18 = vmul.f32 %v778_v5, %v616_v11  ;;  %v688_v22 = vadd.f32 %v656_v14, %v626_v13 }
 0x113   :  { %v628_v36 = vld [vmem:[#allocation3] sm:$0xff] }
 0x114   :  { %v639_v38 = vadd.f32 %v779_v35, %v628_v36  ;;  %v689_v27 = vadd.f32 %v657_v20, %v627_v18 }
 0x115   :  { %v630_v39 = vld [vmem:[#allocation3 + $0x10] sm:$0xff]  ;;  %v629_v40 = vld [vmem:[#allocation3 + $0x8] sm:$0xff] }
 0x116   :  { %v650_v41 = vmul.f32 %v780_v37, %v639_v38  ;;  %v641_v42 = vadd.f32 %v779_v35, %v630_v39  ;;  %v640_v43 = vadd.f32 %v779_v35, %v629_v40 }
 0x117   :  { %v631_v44 = vld [vmem:[#allocation3 + $0x18] sm:$0xff] }
 0x118   :  { %v658_v45 = vadd.f32 2.0, %v650_v41  ;;  %v652_v46 = vmul.f32 %v780_v37, %v641_v42  ;;  %v651_v47 = vmul.f32 %v780_v37, %v640_v43  ;;  %v642_v48 = vadd.f32 %v779_v35, %v631_v44 }
 0x11a   :  { %v781_v49 = vmul.f32 -1.442695, %v658_v45  ;;  %v660_v50 = vadd.f32 2.0, %v652_v46  ;;  %v659_v51 = vadd.f32 2.0, %v651_v47  ;;  %v653_v52 = vmul.f32 %v780_v37, %v642_v48 }
 0x11c   :  { %910 = vpow2.f32 %v781_v49  ;;  %v783_v53 = vmul.f32 -1.442695, %v660_v50  ;;  %v782_v54 = vmul.f32 -1.442695, %v659_v51  ;;  %v661_v55 = vadd.f32 2.0, %v653_v52 }
 0x11e   :  { %912 = vpow2.f32 %v783_v53  ;;  %v784_v56 = vmul.f32 -1.442695, %v661_v55 }
 0x11f   :  { %914 = vpow2.f32 %v782_v54 }
 0x120   :  { %916 = vpow2.f32 %v784_v56 }
 0x126   :  { %v911_v57 = vpop.eup %910 }
 0x127   :  { %v674_v59 = vadd.f32 1.0, %v911_v57 }
 0x128   :  { %v913_v61 = vpop.eup %912 }
 0x129   :  { %v915_v62 = vpop.eup %914  ;;  %918 = vrcp.f32 %v674_v59  ;;  %v676_v63 = vadd.f32 1.0, %v913_v61 }
 0x12a   :  { %v917_v1 = vpop.eup %916  ;;  %v675_v3 = vadd.f32 1.0, %v915_v62 }
 0x12b   :  { %920 = vrcp.f32 %v676_v63  ;;  %v677_v6 = vadd.f32 1.0, %v917_v1 }
 0x12c   :  { %922 = vrcp.f32 %v675_v3 }
 0x12d   :  { %924 = vrcp.f32 %v677_v6 }
 0x133   :  { %v919_v19 = vpop.eup %918 }
 0x134   :  { %926 = vlog2.f32 %v919_v19  ;;  %v690_v21 = vmul.f32 %v919_v19, %v686_v16 }
 0x135   :  { %v921_v23 = vpop.eup %920 }
 0x136   :  { %v923_v25 = vpop.eup %922  ;;  %694 = vst.msk [vmem:[%s1203_s8] sm:$0xff] %vm36_vm1, %v690_v21  ;;  %928 = vlog2.f32 %v921_v23  ;;  %v692_v26 = vmul.f32 %v921_v23, %v688_v22 }
 0x137   :  { %v925_v28 = vpop.eup %924  ;;  %930 = vlog2.f32 %v923_v25  ;;  %v691_v29 = vmul.f32 %v923_v25, %v687_v24 }
 0x138   :  { %696 = vst.msk [vmem:[%s1203_s8 + $0x10] sm:$0xff] %vm36_vm1, %v692_v26  ;;  %932 = vlog2.f32 %v925_v28  ;;  %v693_v30 = vmul.f32 %v925_v28, %v689_v27 }
 0x139   :  { %695 = vst.msk [vmem:[%s1203_s8 + $0x8] sm:$0xff] %vm36_vm1, %v691_v29 }
 0x13a   :  { %697 = vst.msk [vmem:[%s1203_s8 + $0x18] sm:$0xff] %vm36_vm1, %v693_v30 }
 0x13e   :  { %v927_v31 = vpop.eup %926 }
 0x13f   :  { %v699_v32 = vmul.f32 0.6931472, %v927_v31 }
 0x140   :  { %v929_v33 = vpop.eup %928 }
 0x141   :  { %v931_v34 = vpop.eup %930  ;;  %v706_v35 = vsel %vm36_vm1, %v699_v32, 0.0  ;;  %v703_v36 = vmul.f32 0.6931472, %v929_v33 }
 0x142   :  { %v933_v37 = vpop.eup %932  ;;  %707 = vadd.xlane.f32.xlu0 %v706_v35  ;;  %v701_v38 = vmul.f32 0.6931472, %v931_v34 }
 0x143   :  { %v712_v39 = vsel %vm36_vm1, %v703_v36, 0.0  ;;  %v705_v40 = vmul.f32 0.6931472, %v933_v37 }
 0x144   :  { %713 = vadd.xlane.f32.xlu1 %v712_v39  ;;  %v709_v41 = vsel %vm36_vm1, %v701_v38, 0.0 }
 0x145   :  { %v715_v42 = vsel %vm36_vm1, %v705_v40, 0.0 }
 0x146   :  { %710 = vadd.xlane.f32.xlu0 %v709_v41 }
 0x148   :  { %716 = vadd.xlane.f32.xlu1 %v715_v42 }
 0x1cf   :  { %v708_v43 = vpop.xlane.xlu0 %707 }
 0x1d0   :  { %719 = vst.msk [vmem:[%s1204_s9] sm:$0xff] %vm718_vm2, %v708_v43 }
 0x1d1   :  { %v714_v44 = vpop.xlane.xlu1 %713 }
 0x1d2   :  { %721 = vst.msk [vmem:[%s1204_s9 + $0x10] sm:$0xff] %vm718_vm2, %v714_v44 }
 0x1d3   :  { %v711_v45 = vpop.xlane.xlu0 %710 }
 0x1d4   :  { %720 = vst.msk [vmem:[%s1204_s9 + $0x8] sm:$0xff] %vm718_vm2, %v711_v45 }
 0x1d5   :  { %v717_v46 = vpop.xlane.xlu1 %716 }
 0x1d6   :  { %722 = vst.msk [vmem:[%s1204_s9 + $0x18] sm:$0xff] %vm718_vm2, %v717_v46 }

// kernel: _lambda_.67
= control target key start
LH: loop header
LB: loop body
LE: loop exit
PB: predicated region body
PF: predicated region fallthrough
CT: control target
= control target key end

     0   :  { %v26_v0 = vlaneseq  ;;  %vm12_vm0 = vcmask 1024   ;;  %v62_v2 = vmov 1983009808   ;;  %v63_v5 = vmov 0.0   ;;  %s88_s0 = inlined_call_operand.vmem [shape: f32[2,512], index: 0, kind: input, shape index: {}]   ;;  %s89_s1 = inlined_call_operand.vmem [shape: f32[2,1], index: 1, kind: output, shape index: {}]  }
   0x1   :  { %v14_v1 = vld [vmem:[%s88_s0] sm:$0xff]  ;;  %v24_v3 = vunpack.c.l.s4 %v62_v2  ;;  %13 = vst.msk [vmem:[%s89_s1] sm:$0x3] %vm12_vm0, %v63_v5  ;;  %vm43_vm1 = vcmask 1041408  }
   0x2   :  { %v15_v4 = vmul.f32 %v14_v1, %v14_v1  ;;  %v27_v8 = vshrl.u32 %v26_v0, 7 }
   0x3   :  { %v25_v7 = vunpack.c.0.s8 %v24_v3 }
   0x4   :  { %v16_v6 = vmul.f32 0.13533528, %v15_v4 }
   0x5   :  { %v28_v11 = vsub.s32 %v25_v7, %v27_v8 }
   0x6   :  { %v17_v9 = vadd.f32 2.0, %v16_v6 }
   0x8   :  { %v18_v10 = vadd.f32 1.837877, %v17_v9  ;;  %v20_v25 = vld [vmem:[%s89_s1] sm:$0x3] }
   0xa   :  { %v19_v12 = vmul.f32 -0.5, %v18_v10 }
   0xc   :  { %v22_v13 = vcombine.high %v19_v12, %v19_v12  ;;  %v29_v14 = vrot.slane %v19_v12, %v28_v11 }
   0xe   :  { %v36_v15 = vrot.slane %v22_v13, %v28_v11  ;;  %v37_v16 = vcombine.high %v29_v14, %v29_v14  ;;  %v44_v17 = vsel %vm43_vm1, %v29_v14, 0.0 }
  0x10   :  { %v38_v18 = vcombine.high %v36_v15, %v36_v15  ;;  %v45_v19 = vsel %vm43_vm1, %v37_v16, 0.0  ;;  %v47_v20 = vsel %vm43_vm1, %v36_v15, 0.0 }
  0x11   :  { %v46_v21 = vadd.f32 %v45_v19, %v44_v17 }
  0x12   :  { %v49_v22 = vsel %vm43_vm1, %v38_v18, 0.0 }
  0x13   :  { %v48_v23 = vadd.f32 %v47_v20, %v46_v21 }
  0x15   :  { %v50_v24 = vadd.f32 %v49_v22, %v48_v23 }
  0x17   :  { %51 = vadd.xlane.f32.xlu0 %v50_v24 }
  0xa4   :  { %v52_v26 = vpop.xlane.xlu0 %51 }
  0xa5   :  { %v53_v27 = vadd.f32 %v52_v26, %v20_v25 }
  0xa7   :  { %55 = vst.msk [vmem:[%s89_s1] sm:$0x3] %vm12_vm0, %v53_v27 }

</bundles_post_ra>
